<compile_context>
chip_gen: v6e
topology: v6e:2x2x1
jax: 0.10.0
libtpu: 0.0.40
codegen_flags: <defaults>
</compile_context>

<pallas_src>
import jax
import jax.numpy as jnp
from jax.experimental import pallas as pl
from jax.experimental.pallas import tpu as pltpu

BN_EPS = 1e-5


# ----------------------------------------------------------------------------
# Fused whole-network kernel
# ----------------------------------------------------------------------------
def _make_fused_kernel(B, bx, by, C, A, HPAD):
    oh3, ow3 = bx - 2, by - 2      # spatial dims after conv3 ('valid')
    oh4, ow4 = bx - 4, by - 4      # spatial dims after conv4 ('valid')

    def kernel(x_ref, w1_ref, w2_ref, w3_ref, w4_ref, csc_ref, csh_ref,
               wfc1_ref, fs1_ref, ft1_ref, wfc2_ref, fs2_ref, ft2_ref,
               wh_ref, bh_ref, out_ref, pad_ref):
        f32 = jnp.float32
        bf16 = jnp.bfloat16

        # ---- conv1 ('same', Cin=1): 9 VPU broadcast-MACs, BN+ReLU folded ----
        xp = x_ref[...]                                    # (B, bx+2, by+2, 1)
        acc = jnp.zeros((B, bx, by, C), f32)
        for t in range(9):
            kh, kw = divmod(t, 3)
            acc = acc + xp[:, kh:kh + bx, kw:kw + by, :] * w1_ref[t]
        a = jnp.maximum(acc * csc_ref[0] + csh_ref[0], 0.0)        # (B,bx,by,C)

        # ---- conv2 ('same'): zero-pad in VMEM scratch, im2col, one matmul ----
        pad_ref[...] = jnp.zeros_like(pad_ref)
        pad_ref[:, 1:1 + bx, 1:1 + by, :] = a
        xp2 = pad_ref[...]                                 # (B, bx+2, by+2, C)
        cols = [xp2[:, kh:kh + bx, kw:kw + by, :].reshape(B * bx * by, C)
                for kh in range(3) for kw in range(3)]
        y = jnp.dot(jnp.concatenate(cols, axis=-1), w2_ref[...],
                    preferred_element_type=f32)            # (B*bx*by, C)
        a = jnp.maximum(y * csc_ref[1] + csh_ref[1], 0.0).reshape(B, bx, by, C)

        # ---- conv3 ('valid'): im2col, one matmul ----
        cols = [a[:, kh:kh + oh3, kw:kw + ow3, :].reshape(B * oh3 * ow3, C)
                for kh in range(3) for kw in range(3)]
        y = jnp.dot(jnp.concatenate(cols, axis=-1), w3_ref[...],
                    preferred_element_type=f32)
        a = jnp.maximum(y * csc_ref[2] + csh_ref[2], 0.0).reshape(B, oh3, ow3, C)

        # ---- conv4 ('valid'): im2col, one matmul ----
        cols = [a[:, kh:kh + oh4, kw:kw + ow4, :].reshape(B * oh4 * ow4, C)
                for kh in range(3) for kw in range(3)]
        y = jnp.dot(jnp.concatenate(cols, axis=-1), w4_ref[...],
                    preferred_element_type=f32)
        a = jnp.maximum(y * csc_ref[3] + csh_ref[3], 0.0)  # (B*oh4*ow4, C)

        # ---- NHWC flatten (wfc1 rows pre-permuted at init -> no transpose) ----
        a3 = a.reshape(B, oh4 * ow4, C)
        xflat = jnp.concatenate([a3[:, i, :] for i in range(oh4 * ow4)],
                                axis=-1)                   # (B, oh4*ow4*C)

        # ---- fc1 + folded BN + ReLU (bf16 weights, f32 accumulation) ----
        h = jnp.dot(xflat.astype(bf16), wfc1_ref[...], preferred_element_type=f32)
        h = jnp.maximum(h * fs1_ref[...] + ft1_ref[...], 0.0)
        # TODO(synk): nn.Dropout is identity in eval mode; training-mode RNG dropout not implemented.

        # ---- fc2 + folded BN + ReLU ----
        h = jnp.dot(h.astype(bf16), wfc2_ref[...], preferred_element_type=f32)
        h = jnp.maximum(h * fs2_ref[...] + ft2_ref[...], 0.0)

        # ---- heads: policy + value fused into one lane-dense (B, HPAD) slab ----
        logits = jnp.dot(h.astype(bf16), wh_ref[...], preferred_element_type=f32)
        logits = logits + bh_ref[...]                      # (B, HPAD)
        col = jax.lax.broadcasted_iota(jnp.int32, (B, HPAD), 1)
        is_pi = col < A
        masked = jnp.where(is_pi, logits, -1e30)
        m = jnp.max(masked, axis=-1, keepdims=True)
        e = jnp.where(is_pi, jnp.exp(masked - m), 0.0)
        denom = jnp.sum(e, axis=-1, keepdims=True)
        pi = e / denom                                     # softmax over cols < A
        out_ref[...] = jnp.where(col == A, jnp.tanh(logits), pi).astype(out_ref.dtype)

    return kernel


def _full_spec(shape):
    n = len(shape)
    return pl.BlockSpec(shape, lambda i, _n=n: (0,) * _n)


def gobang_forward(s, params, bx, by, num_channels, action_size):
    # s: (B, bx, by)  ->  pi: (B, action_size), v: (B, 1)
    B = s.shape[0]
    C = num_channels
    A = action_size
    HPAD = params["wh"].shape[1]

    x = s.reshape(B, bx, by, 1).astype(jnp.float32)
    # Pad only the raw board here (tiny, read-once input); conv2's 'same' pad
    # of the intermediate activation happens in VMEM inside the fused kernel.
    x = jnp.pad(x, ((0, 0), (1, 1), (1, 1), (0, 0)))

    args = (x, params["w1"], params["w2"], params["w3"], params["w4"],
            params["csc"], params["csh"],
            params["wfc1"], params["fs1"], params["ft1"],
            params["wfc2"], params["fs2"], params["ft2"],
            params["wh"], params["bh"])

    kernel = _make_fused_kernel(B, bx, by, C, A, HPAD)

    out = pl.pallas_call(
        kernel,
        out_shape=jax.ShapeDtypeStruct((B, HPAD), jnp.float32),
        grid=(1,),
        in_specs=[_full_spec(a.shape) for a in args],
        out_specs=pl.BlockSpec((B, HPAD), lambda i: (0, 0)),
        scratch_shapes=[pltpu.VMEM((B, bx + 2, by + 2, C), jnp.float32)],
        compiler_params=pltpu.CompilerParams(
            dimension_semantics=("arbitrary",),
            vmem_limit_bytes=32 * 1024 * 1024),
    )(*args)

    return out[:, :A], out[:, A:A + 1]


# ----------------------------------------------------------------------------
# Parameter setup (random init, inference-mode BN folded, biases folded)
# ----------------------------------------------------------------------------
def init_params(key, num_channels, bx, by, action_size):
    C = num_channels
    hh, ww = bx - 4, by - 4
    fc_in = C * hh * ww
    HPAD = ((action_size + 1 + 127) // 128) * 128   # pi cols + value col, lane-dense

    ks = iter(jax.random.split(key, 64))

    def nrm(shape, scale=0.05):
        return (scale * jax.random.normal(next(ks), shape)).astype(jnp.float32)

    def bn(c):
        gamma = 1.0 + 0.1 * jax.random.normal(next(ks), (c,))
        beta = 0.1 * jax.random.normal(next(ks), (c,))
        mean = 0.1 * jax.random.normal(next(ks), (c,))
        var = 1.0 + 0.1 * jnp.abs(jax.random.normal(next(ks), (c,)))
        scale = gamma / jnp.sqrt(var + BN_EPS)
        shift = beta - mean * scale
        return scale.astype(jnp.float32), shift.astype(jnp.float32)

    p = {}
    # conv1 weights: (9, C), tap index = kh*3 + kw (Cin == 1).
    w1, b1 = nrm((9, C)), nrm((C,))
    s1, t1 = bn(C)
    # conv2..4 im2col weights: (9*C, C), row = (kh*3+kw)*C + cin.
    # (From a PyTorch checkpoint: w.permute(2, 3, 1, 0).reshape(9*Cin, Cout).)
    w2, b2 = nrm((9 * C, C)), nrm((C,)); s2, t2 = bn(C)
    w3, b3 = nrm((9 * C, C)), nrm((C,)); s3, t3 = bn(C)
    w4, b4 = nrm((9 * C, C)), nrm((C,)); s4, t4 = bn(C)
    p["w1"], p["w2"], p["w3"], p["w4"] = w1, w2, w3, w4
    # Fold conv bias into the BN shift:  (z + b)*s + t == z*s + (t + b*s).
    p["csc"] = jnp.stack([s1, s2, s3, s4])                                   # (4, C)
    p["csh"] = jnp.stack([t1 + b1 * s1, t2 + b2 * s2, t3 + b3 * s3, t4 + b4 * s4])

    # fc1: emulate a PyTorch-ordered weight (rows indexed by the NCHW flatten
    # c*hh*ww + h*ww + w) and permute the rows ONCE to NHWC order so the fused
    # kernel can flatten the conv output directly (zero runtime cost).
    wfc1_nchw, bfc1 = nrm((fc_in, 1024)), nrm((1024,))
    perm = jnp.arange(fc_in).reshape(C, hh, ww).transpose(1, 2, 0).reshape(-1)
    wfc1 = wfc1_nchw[perm]
    fs1, ft1 = bn(1024)
    p["wfc1"] = wfc1.astype(jnp.bfloat16)
    p["fs1"] = fs1.reshape(1, -1)
    p["ft1"] = (ft1 + bfc1 * fs1).reshape(1, -1)

    wfc2, bfc2 = nrm((1024, 512)), nrm((512,))
    fs2, ft2 = bn(512)
    p["wfc2"] = wfc2.astype(jnp.bfloat16)
    p["fs2"] = fs2.reshape(1, -1)
    p["ft2"] = (ft2 + bfc2 * fs2).reshape(1, -1)

    # Heads: pack policy and value into one lane-dense (512, HPAD) matmul;
    # column `action_size` is the value head, columns beyond it are zero.
    wpi, bpi = nrm((512, action_size)), nrm((action_size,))
    wv, bv = nrm((512, 1)), nrm((1,))
    wh = jnp.zeros((512, HPAD), jnp.float32)
    wh = wh.at[:, :action_size].set(wpi).at[:, action_size].set(wv[:, 0])
    bh = jnp.zeros((HPAD,), jnp.float32)
    bh = bh.at[:action_size].set(bpi).at[action_size].set(bv[0])
    p["wh"] = wh.astype(jnp.bfloat16)
    p["bh"] = bh.reshape(1, -1)
    return p


if __name__ == "__main__":
    key = jax.random.PRNGKey(0)
    k_param, k_input = jax.random.split(key)

    B, BX, BY, C = 2, 8, 8, 32
    ACTION_SIZE = BX * BY + 1  # gobang action space: board cells + pass

    params = init_params(k_param, C, BX, BY, ACTION_SIZE)
    # board values in {-1, 0, 1}
    s = jax.random.randint(k_input, (B, BX, BY), -1, 2).astype(jnp.float32)

    fwd = jax.jit(lambda s_: gobang_forward(s_, params, BX, BY, C, ACTION_SIZE))
    pi, v = fwd(s)
    jax.block_until_ready((pi, v))

    assert pi.shape == (B, ACTION_SIZE) and v.shape == (B, 1)
    assert bool(jnp.all(jnp.isfinite(pi))) and bool(jnp.all(jnp.isfinite(v)))
    assert bool(jnp.allclose(jnp.sum(pi, axis=1), 1.0, atol=1e-5))   # softmax rows
    assert bool(jnp.all(jnp.abs(v) <= 1.0))                          # tanh range
    print("KERNEL_OK")
</pallas_src>

<mosaic_0001>
module attributes {stable_mosaic.version = 11 : i64} {
  func.func @kernel(%arg0: i32, %arg1: memref<2x10x10x1xf32, #tpu.memory_space<vmem>>, %arg2: memref<9x32xf32, #tpu.memory_space<vmem>>, %arg3: memref<288x32xf32, #tpu.memory_space<vmem>>, %arg4: memref<288x32xf32, #tpu.memory_space<vmem>>, %arg5: memref<288x32xf32, #tpu.memory_space<vmem>>, %arg6: memref<4x32xf32, #tpu.memory_space<vmem>>, %arg7: memref<4x32xf32, #tpu.memory_space<vmem>>, %arg8: memref<512x1024xbf16, #tpu.memory_space<vmem>>, %arg9: memref<1x1024xf32, #tpu.memory_space<vmem>>, %arg10: memref<1x1024xf32, #tpu.memory_space<vmem>>, %arg11: memref<1024x512xbf16, #tpu.memory_space<vmem>>, %arg12: memref<1x512xf32, #tpu.memory_space<vmem>>, %arg13: memref<1x512xf32, #tpu.memory_space<vmem>>, %arg14: memref<512x128xbf16, #tpu.memory_space<vmem>>, %arg15: memref<1x128xf32, #tpu.memory_space<vmem>>, %arg16: memref<2x128xf32, #tpu.memory_space<vmem>>, %arg17: memref<2x10x10x32xf32, #tpu.memory_space<vmem>>) attributes {dimension_semantics = [#tpu.dimension_semantics<arbitrary>], iteration_bounds = array<i64: 1>, scalar_prefetch = 0 : i64, scratch_operands = 1 : i64, tpu.core_type = #tpu.core_type<tc>, window_params = [{pipeline_mode = #tpu.pipeline_mode<synchronous>, transform_indices = @transform_0, window_bounds = array<i64: 2, 10, 10, 1>}, {pipeline_mode = #tpu.pipeline_mode<synchronous>, transform_indices = @transform_1, window_bounds = array<i64: 9, 32>}, {pipeline_mode = #tpu.pipeline_mode<synchronous>, transform_indices = @transform_2, window_bounds = array<i64: 288, 32>}, {pipeline_mode = #tpu.pipeline_mode<synchronous>, transform_indices = @transform_3, window_bounds = array<i64: 288, 32>}, {pipeline_mode = #tpu.pipeline_mode<synchronous>, transform_indices = @transform_4, window_bounds = array<i64: 288, 32>}, {pipeline_mode = #tpu.pipeline_mode<synchronous>, transform_indices = @transform_5, window_bounds = array<i64: 4, 32>}, {pipeline_mode = #tpu.pipeline_mode<synchronous>, transform_indices = @transform_6, window_bounds = array<i64: 4, 32>}, {pipeline_mode = #tpu.pipeline_mode<synchronous>, transform_indices = @transform_7, window_bounds = array<i64: 512, 1024>}, {pipeline_mode = #tpu.pipeline_mode<synchronous>, transform_indices = @transform_8, window_bounds = array<i64: 1, 1024>}, {pipeline_mode = #tpu.pipeline_mode<synchronous>, transform_indices = @transform_9, window_bounds = array<i64: 1, 1024>}, {pipeline_mode = #tpu.pipeline_mode<synchronous>, transform_indices = @transform_10, window_bounds = array<i64: 1024, 512>}, {pipeline_mode = #tpu.pipeline_mode<synchronous>, transform_indices = @transform_11, window_bounds = array<i64: 1, 512>}, {pipeline_mode = #tpu.pipeline_mode<synchronous>, transform_indices = @transform_12, window_bounds = array<i64: 1, 512>}, {pipeline_mode = #tpu.pipeline_mode<synchronous>, transform_indices = @transform_13, window_bounds = array<i64: 512, 128>}, {pipeline_mode = #tpu.pipeline_mode<synchronous>, transform_indices = @transform_14, window_bounds = array<i64: 1, 128>}, {pipeline_mode = #tpu.pipeline_mode<synchronous>, transform_indices = @transform_15, window_bounds = array<i64: 2, 128>}]} {
    %c0 = arith.constant 0 : index
    %c0_0 = arith.constant 0 : index
    %c0_1 = arith.constant 0 : index
    %c0_2 = arith.constant 0 : index
    %0 = vector.load %arg1[%c0, %c0_0, %c0_1, %c0_2] : memref<2x10x10x1xf32, #tpu.memory_space<vmem>>, vector<2x10x10x1xf32>
    %cst = arith.constant 0.000000e+00 : f32
    %1 = vector.broadcast %cst : f32 to vector<2x8x8x32xf32>
    %2 = vector.extract_strided_slice %0 {offsets = [0, 0, 0, 0], sizes = [2, 8, 8, 1], strides = [1, 1, 1, 1]} : vector<2x10x10x1xf32> to vector<2x8x8x1xf32>
    %c0_3 = arith.constant 0 : index
    %c0_4 = arith.constant 0 : index
    %3 = vector.load %arg2[%c0_3, %c0_4] : memref<9x32xf32, #tpu.memory_space<vmem>>, vector<1x32xf32>
    %4 = vector.shape_cast %3 : vector<1x32xf32> to vector<32xf32>
    %5 = vector.shape_cast %4 : vector<32xf32> to vector<1x1x1x32xf32>
    %6 = vector.broadcast %2 : vector<2x8x8x1xf32> to vector<2x8x8x32xf32>
    %7 = vector.broadcast %5 : vector<1x1x1x32xf32> to vector<2x8x8x32xf32>
    %8 = arith.mulf %6, %7 : vector<2x8x8x32xf32>
    %9 = arith.addf %1, %8 : vector<2x8x8x32xf32>
    %10 = vector.extract_strided_slice %0 {offsets = [0, 0, 1, 0], sizes = [2, 8, 8, 1], strides = [1, 1, 1, 1]} : vector<2x10x10x1xf32> to vector<2x8x8x1xf32>
    %c1 = arith.constant 1 : index
    %c0_5 = arith.constant 0 : index
    %11 = vector.load %arg2[%c1, %c0_5] : memref<9x32xf32, #tpu.memory_space<vmem>>, vector<1x32xf32>
    %12 = vector.shape_cast %11 : vector<1x32xf32> to vector<32xf32>
    %13 = vector.shape_cast %12 : vector<32xf32> to vector<1x1x1x32xf32>
    %14 = vector.broadcast %10 : vector<2x8x8x1xf32> to vector<2x8x8x32xf32>
    %15 = vector.broadcast %13 : vector<1x1x1x32xf32> to vector<2x8x8x32xf32>
    %16 = arith.mulf %14, %15 : vector<2x8x8x32xf32>
    %17 = arith.addf %9, %16 : vector<2x8x8x32xf32>
    %18 = vector.extract_strided_slice %0 {offsets = [0, 0, 2, 0], sizes = [2, 8, 8, 1], strides = [1, 1, 1, 1]} : vector<2x10x10x1xf32> to vector<2x8x8x1xf32>
    %c2 = arith.constant 2 : index
    %c0_6 = arith.constant 0 : index
    %19 = vector.load %arg2[%c2, %c0_6] : memref<9x32xf32, #tpu.memory_space<vmem>>, vector<1x32xf32>
    %20 = vector.shape_cast %19 : vector<1x32xf32> to vector<32xf32>
    %21 = vector.shape_cast %20 : vector<32xf32> to vector<1x1x1x32xf32>
    %22 = vector.broadcast %18 : vector<2x8x8x1xf32> to vector<2x8x8x32xf32>
    %23 = vector.broadcast %21 : vector<1x1x1x32xf32> to vector<2x8x8x32xf32>
    %24 = arith.mulf %22, %23 : vector<2x8x8x32xf32>
    %25 = arith.addf %17, %24 : vector<2x8x8x32xf32>
    %26 = vector.extract_strided_slice %0 {offsets = [0, 1, 0, 0], sizes = [2, 8, 8, 1], strides = [1, 1, 1, 1]} : vector<2x10x10x1xf32> to vector<2x8x8x1xf32>
    %c3 = arith.constant 3 : index
    %c0_7 = arith.constant 0 : index
    %27 = vector.load %arg2[%c3, %c0_7] : memref<9x32xf32, #tpu.memory_space<vmem>>, vector<1x32xf32>
    %28 = vector.shape_cast %27 : vector<1x32xf32> to vector<32xf32>
    %29 = vector.shape_cast %28 : vector<32xf32> to vector<1x1x1x32xf32>
    %30 = vector.broadcast %26 : vector<2x8x8x1xf32> to vector<2x8x8x32xf32>
    %31 = vector.broadcast %29 : vector<1x1x1x32xf32> to vector<2x8x8x32xf32>
    %32 = arith.mulf %30, %31 : vector<2x8x8x32xf32>
    %33 = arith.addf %25, %32 : vector<2x8x8x32xf32>
    %34 = vector.extract_strided_slice %0 {offsets = [0, 1, 1, 0], sizes = [2, 8, 8, 1], strides = [1, 1, 1, 1]} : vector<2x10x10x1xf32> to vector<2x8x8x1xf32>
    %c4 = arith.constant 4 : index
    %c0_8 = arith.constant 0 : index
    %35 = vector.load %arg2[%c4, %c0_8] : memref<9x32xf32, #tpu.memory_space<vmem>>, vector<1x32xf32>
    %36 = vector.shape_cast %35 : vector<1x32xf32> to vector<32xf32>
    %37 = vector.shape_cast %36 : vector<32xf32> to vector<1x1x1x32xf32>
    %38 = vector.broadcast %34 : vector<2x8x8x1xf32> to vector<2x8x8x32xf32>
    %39 = vector.broadcast %37 : vector<1x1x1x32xf32> to vector<2x8x8x32xf32>
    %40 = arith.mulf %38, %39 : vector<2x8x8x32xf32>
    %41 = arith.addf %33, %40 : vector<2x8x8x32xf32>
    %42 = vector.extract_strided_slice %0 {offsets = [0, 1, 2, 0], sizes = [2, 8, 8, 1], strides = [1, 1, 1, 1]} : vector<2x10x10x1xf32> to vector<2x8x8x1xf32>
    %c5 = arith.constant 5 : index
    %c0_9 = arith.constant 0 : index
    %43 = vector.load %arg2[%c5, %c0_9] : memref<9x32xf32, #tpu.memory_space<vmem>>, vector<1x32xf32>
    %44 = vector.shape_cast %43 : vector<1x32xf32> to vector<32xf32>
    %45 = vector.shape_cast %44 : vector<32xf32> to vector<1x1x1x32xf32>
    %46 = vector.broadcast %42 : vector<2x8x8x1xf32> to vector<2x8x8x32xf32>
    %47 = vector.broadcast %45 : vector<1x1x1x32xf32> to vector<2x8x8x32xf32>
    %48 = arith.mulf %46, %47 : vector<2x8x8x32xf32>
    %49 = arith.addf %41, %48 : vector<2x8x8x32xf32>
    %50 = vector.extract_strided_slice %0 {offsets = [0, 2, 0, 0], sizes = [2, 8, 8, 1], strides = [1, 1, 1, 1]} : vector<2x10x10x1xf32> to vector<2x8x8x1xf32>
    %c6 = arith.constant 6 : index
    %c0_10 = arith.constant 0 : index
    %51 = vector.load %arg2[%c6, %c0_10] : memref<9x32xf32, #tpu.memory_space<vmem>>, vector<1x32xf32>
    %52 = vector.shape_cast %51 : vector<1x32xf32> to vector<32xf32>
    %53 = vector.shape_cast %52 : vector<32xf32> to vector<1x1x1x32xf32>
    %54 = vector.broadcast %50 : vector<2x8x8x1xf32> to vector<2x8x8x32xf32>
    %55 = vector.broadcast %53 : vector<1x1x1x32xf32> to vector<2x8x8x32xf32>
    %56 = arith.mulf %54, %55 : vector<2x8x8x32xf32>
    %57 = arith.addf %49, %56 : vector<2x8x8x32xf32>
    %58 = vector.extract_strided_slice %0 {offsets = [0, 2, 1, 0], sizes = [2, 8, 8, 1], strides = [1, 1, 1, 1]} : vector<2x10x10x1xf32> to vector<2x8x8x1xf32>
    %c7 = arith.constant 7 : index
    %c0_11 = arith.constant 0 : index
    %59 = vector.load %arg2[%c7, %c0_11] : memref<9x32xf32, #tpu.memory_space<vmem>>, vector<1x32xf32>
    %60 = vector.shape_cast %59 : vector<1x32xf32> to vector<32xf32>
    %61 = vector.shape_cast %60 : vector<32xf32> to vector<1x1x1x32xf32>
    %62 = vector.broadcast %58 : vector<2x8x8x1xf32> to vector<2x8x8x32xf32>
    %63 = vector.broadcast %61 : vector<1x1x1x32xf32> to vector<2x8x8x32xf32>
    %64 = arith.mulf %62, %63 : vector<2x8x8x32xf32>
    %65 = arith.addf %57, %64 : vector<2x8x8x32xf32>
    %66 = vector.extract_strided_slice %0 {offsets = [0, 2, 2, 0], sizes = [2, 8, 8, 1], strides = [1, 1, 1, 1]} : vector<2x10x10x1xf32> to vector<2x8x8x1xf32>
    %c8 = arith.constant 8 : index
    %c0_12 = arith.constant 0 : index
    %67 = vector.load %arg2[%c8, %c0_12] : memref<9x32xf32, #tpu.memory_space<vmem>>, vector<1x32xf32>
    %68 = vector.shape_cast %67 : vector<1x32xf32> to vector<32xf32>
    %69 = vector.shape_cast %68 : vector<32xf32> to vector<1x1x1x32xf32>
    %70 = vector.broadcast %66 : vector<2x8x8x1xf32> to vector<2x8x8x32xf32>
    %71 = vector.broadcast %69 : vector<1x1x1x32xf32> to vector<2x8x8x32xf32>
    %72 = arith.mulf %70, %71 : vector<2x8x8x32xf32>
    %73 = arith.addf %65, %72 : vector<2x8x8x32xf32>
    %c0_13 = arith.constant 0 : index
    %c0_14 = arith.constant 0 : index
    %74 = vector.load %arg6[%c0_13, %c0_14] : memref<4x32xf32, #tpu.memory_space<vmem>>, vector<1x32xf32>
    %75 = vector.shape_cast %74 : vector<1x32xf32> to vector<32xf32>
    %76 = vector.shape_cast %75 : vector<32xf32> to vector<1x1x1x32xf32>
    %77 = vector.broadcast %76 : vector<1x1x1x32xf32> to vector<2x8x8x32xf32>
    %78 = arith.mulf %73, %77 : vector<2x8x8x32xf32>
    %c0_15 = arith.constant 0 : index
    %c0_16 = arith.constant 0 : index
    %79 = vector.load %arg7[%c0_15, %c0_16] : memref<4x32xf32, #tpu.memory_space<vmem>>, vector<1x32xf32>
    %80 = vector.shape_cast %79 : vector<1x32xf32> to vector<32xf32>
    %81 = vector.shape_cast %80 : vector<32xf32> to vector<1x1x1x32xf32>
    %82 = vector.broadcast %81 : vector<1x1x1x32xf32> to vector<2x8x8x32xf32>
    %83 = arith.addf %78, %82 : vector<2x8x8x32xf32>
    %cst_17 = arith.constant 0.000000e+00 : f32
    %84 = vector.broadcast %cst_17 : f32 to vector<2x8x8x32xf32>
    %85 = arith.maximumf %83, %84 : vector<2x8x8x32xf32>
    %cst_18 = arith.constant 0.000000e+00 : f32
    %86 = vector.broadcast %cst_18 : f32 to vector<2x10x10x32xf32>
    %c0_19 = arith.constant 0 : index
    %c0_20 = arith.constant 0 : index
    %c0_21 = arith.constant 0 : index
    %c0_22 = arith.constant 0 : index
    %87 = vector.load %arg17[%c0_19, %c0_20, %c0_21, %c0_22] : memref<2x10x10x32xf32, #tpu.memory_space<vmem>>, vector<2x10x10x32xf32>
    tpu.vector_store %arg17[%c0_19, %c0_20, %c0_21, %c0_22], %86 {strides = array<i32>} : memref<2x10x10x32xf32, #tpu.memory_space<vmem>>, vector<2x10x10x32xf32>,
    %c0_23 = arith.constant 0 : index
    %c1_24 = arith.constant 1 : index
    %c1_25 = arith.constant 1 : index
    %c0_26 = arith.constant 0 : index
    %88 = vector.load %arg17[%c0_23, %c1_24, %c1_25, %c0_26] : memref<2x10x10x32xf32, #tpu.memory_space<vmem>>, vector<2x8x8x32xf32>
    tpu.vector_store %arg17[%c0_23, %c1_24, %c1_25, %c0_26], %85 {strides = array<i32>} : memref<2x10x10x32xf32, #tpu.memory_space<vmem>>, vector<2x8x8x32xf32>,
    %c0_27 = arith.constant 0 : index
    %c0_28 = arith.constant 0 : index
    %c0_29 = arith.constant 0 : index
    %c0_30 = arith.constant 0 : index
    %89 = vector.load %arg17[%c0_27, %c0_28, %c0_29, %c0_30] : memref<2x10x10x32xf32, #tpu.memory_space<vmem>>, vector<2x10x10x32xf32>
    %90 = vector.extract_strided_slice %89 {offsets = [0, 0, 0, 0], sizes = [2, 8, 8, 32], strides = [1, 1, 1, 1]} : vector<2x10x10x32xf32> to vector<2x8x8x32xf32>
    %91 = vector.shape_cast %90 : vector<2x8x8x32xf32> to vector<128x32xf32>
    %92 = vector.extract_strided_slice %89 {offsets = [0, 0, 1, 0], sizes = [2, 8, 8, 32], strides = [1, 1, 1, 1]} : vector<2x10x10x32xf32> to vector<2x8x8x32xf32>
    %93 = vector.shape_cast %92 : vector<2x8x8x32xf32> to vector<128x32xf32>
    %94 = vector.extract_strided_slice %89 {offsets = [0, 0, 2, 0], sizes = [2, 8, 8, 32], strides = [1, 1, 1, 1]} : vector<2x10x10x32xf32> to vector<2x8x8x32xf32>
    %95 = vector.shape_cast %94 : vector<2x8x8x32xf32> to vector<128x32xf32>
    %96 = vector.extract_strided_slice %89 {offsets = [0, 1, 0, 0], sizes = [2, 8, 8, 32], strides = [1, 1, 1, 1]} : vector<2x10x10x32xf32> to vector<2x8x8x32xf32>
    %97 = vector.shape_cast %96 : vector<2x8x8x32xf32> to vector<128x32xf32>
    %98 = vector.extract_strided_slice %89 {offsets = [0, 1, 1, 0], sizes = [2, 8, 8, 32], strides = [1, 1, 1, 1]} : vector<2x10x10x32xf32> to vector<2x8x8x32xf32>
    %99 = vector.shape_cast %98 : vector<2x8x8x32xf32> to vector<128x32xf32>
    %100 = vector.extract_strided_slice %89 {offsets = [0, 1, 2, 0], sizes = [2, 8, 8, 32], strides = [1, 1, 1, 1]} : vector<2x10x10x32xf32> to vector<2x8x8x32xf32>
    %101 = vector.shape_cast %100 : vector<2x8x8x32xf32> to vector<128x32xf32>
    %102 = vector.extract_strided_slice %89 {offsets = [0, 2, 0, 0], sizes = [2, 8, 8, 32], strides = [1, 1, 1, 1]} : vector<2x10x10x32xf32> to vector<2x8x8x32xf32>
    %103 = vector.shape_cast %102 : vector<2x8x8x32xf32> to vector<128x32xf32>
    %104 = vector.extract_strided_slice %89 {offsets = [0, 2, 1, 0], sizes = [2, 8, 8, 32], strides = [1, 1, 1, 1]} : vector<2x10x10x32xf32> to vector<2x8x8x32xf32>
    %105 = vector.shape_cast %104 : vector<2x8x8x32xf32> to vector<128x32xf32>
    %106 = vector.extract_strided_slice %89 {offsets = [0, 2, 2, 0], sizes = [2, 8, 8, 32], strides = [1, 1, 1, 1]} : vector<2x10x10x32xf32> to vector<2x8x8x32xf32>
    %107 = vector.shape_cast %106 : vector<2x8x8x32xf32> to vector<128x32xf32>
    %108 = tpu.concatenate %91, %93, %95, %97, %99, %101, %103, %105, %107 in 1 : vector<128x32xf32>, vector<128x32xf32>, vector<128x32xf32>, vector<128x32xf32>, vector<128x32xf32>, vector<128x32xf32>, vector<128x32xf32>, vector<128x32xf32>, vector<128x32xf32> -> vector<128x288xf32>
    %c0_31 = arith.constant 0 : index
    %c0_32 = arith.constant 0 : index
    %109 = vector.load %arg3[%c0_31, %c0_32] : memref<288x32xf32, #tpu.memory_space<vmem>>, vector<288x32xf32>
    %cst_33 = arith.constant dense<0.000000e+00> : vector<128x32xf32>
    %110 = tpu.matmul %108, %109, %cst_33 {dimension_numbers = #tpu.dot_dimension_numbers<[1], [0], [0], [1], [0, 0, 1, 1], [], []>} : vector<128x288xf32>, vector<288x32xf32>, vector<128x32xf32> -> vector<128x32xf32>
    %c1_34 = arith.constant 1 : index
    %c0_35 = arith.constant 0 : index
    %111 = vector.load %arg6[%c1_34, %c0_35] : memref<4x32xf32, #tpu.memory_space<vmem>>, vector<1x32xf32>
    %112 = vector.shape_cast %111 : vector<1x32xf32> to vector<32xf32>
    %113 = vector.shape_cast %112 : vector<32xf32> to vector<1x32xf32>
    %114 = vector.broadcast %113 : vector<1x32xf32> to vector<128x32xf32>
    %115 = arith.mulf %110, %114 : vector<128x32xf32>
    %c1_36 = arith.constant 1 : index
    %c0_37 = arith.constant 0 : index
    %116 = vector.load %arg7[%c1_36, %c0_37] : memref<4x32xf32, #tpu.memory_space<vmem>>, vector<1x32xf32>
    %117 = vector.shape_cast %116 : vector<1x32xf32> to vector<32xf32>
    %118 = vector.shape_cast %117 : vector<32xf32> to vector<1x32xf32>
    %119 = vector.broadcast %118 : vector<1x32xf32> to vector<128x32xf32>
    %120 = arith.addf %115, %119 : vector<128x32xf32>
    %cst_38 = arith.constant 0.000000e+00 : f32
    %121 = vector.broadcast %cst_38 : f32 to vector<128x32xf32>
    %122 = arith.maximumf %120, %121 : vector<128x32xf32>
    %123 = vector.shape_cast %122 : vector<128x32xf32> to vector<2x8x8x32xf32>
    %124 = vector.extract_strided_slice %123 {offsets = [0, 0, 0, 0], sizes = [2, 6, 6, 32], strides = [1, 1, 1, 1]} : vector<2x8x8x32xf32> to vector<2x6x6x32xf32>
    %125 = vector.shape_cast %124 : vector<2x6x6x32xf32> to vector<72x32xf32>
    %126 = vector.extract_strided_slice %123 {offsets = [0, 0, 1, 0], sizes = [2, 6, 6, 32], strides = [1, 1, 1, 1]} : vector<2x8x8x32xf32> to vector<2x6x6x32xf32>
    %127 = vector.shape_cast %126 : vector<2x6x6x32xf32> to vector<72x32xf32>
    %128 = vector.extract_strided_slice %123 {offsets = [0, 0, 2, 0], sizes = [2, 6, 6, 32], strides = [1, 1, 1, 1]} : vector<2x8x8x32xf32> to vector<2x6x6x32xf32>
    %129 = vector.shape_cast %128 : vector<2x6x6x32xf32> to vector<72x32xf32>
    %130 = vector.extract_strided_slice %123 {offsets = [0, 1, 0, 0], sizes = [2, 6, 6, 32], strides = [1, 1, 1, 1]} : vector<2x8x8x32xf32> to vector<2x6x6x32xf32>
    %131 = vector.shape_cast %130 : vector<2x6x6x32xf32> to vector<72x32xf32>
    %132 = vector.extract_strided_slice %123 {offsets = [0, 1, 1, 0], sizes = [2, 6, 6, 32], strides = [1, 1, 1, 1]} : vector<2x8x8x32xf32> to vector<2x6x6x32xf32>
    %133 = vector.shape_cast %132 : vector<2x6x6x32xf32> to vector<72x32xf32>
    %134 = vector.extract_strided_slice %123 {offsets = [0, 1, 2, 0], sizes = [2, 6, 6, 32], strides = [1, 1, 1, 1]} : vector<2x8x8x32xf32> to vector<2x6x6x32xf32>
    %135 = vector.shape_cast %134 : vector<2x6x6x32xf32> to vector<72x32xf32>
    %136 = vector.extract_strided_slice %123 {offsets = [0, 2, 0, 0], sizes = [2, 6, 6, 32], strides = [1, 1, 1, 1]} : vector<2x8x8x32xf32> to vector<2x6x6x32xf32>
    %137 = vector.shape_cast %136 : vector<2x6x6x32xf32> to vector<72x32xf32>
    %138 = vector.extract_strided_slice %123 {offsets = [0, 2, 1, 0], sizes = [2, 6, 6, 32], strides = [1, 1, 1, 1]} : vector<2x8x8x32xf32> to vector<2x6x6x32xf32>
    %139 = vector.shape_cast %138 : vector<2x6x6x32xf32> to vector<72x32xf32>
    %140 = vector.extract_strided_slice %123 {offsets = [0, 2, 2, 0], sizes = [2, 6, 6, 32], strides = [1, 1, 1, 1]} : vector<2x8x8x32xf32> to vector<2x6x6x32xf32>
    %141 = vector.shape_cast %140 : vector<2x6x6x32xf32> to vector<72x32xf32>
    %142 = tpu.concatenate %125, %127, %129, %131, %133, %135, %137, %139, %141 in 1 : vector<72x32xf32>, vector<72x32xf32>, vector<72x32xf32>, vector<72x32xf32>, vector<72x32xf32>, vector<72x32xf32>, vector<72x32xf32>, vector<72x32xf32>, vector<72x32xf32> -> vector<72x288xf32>
    %c0_39 = arith.constant 0 : index
    %c0_40 = arith.constant 0 : index
    %143 = vector.load %arg4[%c0_39, %c0_40] : memref<288x32xf32, #tpu.memory_space<vmem>>, vector<288x32xf32>
    %cst_41 = arith.constant dense<0.000000e+00> : vector<72x32xf32>
    %144 = tpu.matmul %142, %143, %cst_41 {dimension_numbers = #tpu.dot_dimension_numbers<[1], [0], [0], [1], [0, 0, 1, 1], [], []>} : vector<72x288xf32>, vector<288x32xf32>, vector<72x32xf32> -> vector<72x32xf32>
    %c2_42 = arith.constant 2 : index
    %c0_43 = arith.constant 0 : index
    %145 = vector.load %arg6[%c2_42, %c0_43] : memref<4x32xf32, #tpu.memory_space<vmem>>, vector<1x32xf32>
    %146 = vector.shape_cast %145 : vector<1x32xf32> to vector<32xf32>
    %147 = vector.shape_cast %146 : vector<32xf32> to vector<1x32xf32>
    %148 = vector.broadcast %147 : vector<1x32xf32> to vector<72x32xf32>
    %149 = arith.mulf %144, %148 : vector<72x32xf32>
    %c2_44 = arith.constant 2 : index
    %c0_45 = arith.constant 0 : index
    %150 = vector.load %arg7[%c2_44, %c0_45] : memref<4x32xf32, #tpu.memory_space<vmem>>, vector<1x32xf32>
    %151 = vector.shape_cast %150 : vector<1x32xf32> to vector<32xf32>
    %152 = vector.shape_cast %151 : vector<32xf32> to vector<1x32xf32>
    %153 = vector.broadcast %152 : vector<1x32xf32> to vector<72x32xf32>
    %154 = arith.addf %149, %153 : vector<72x32xf32>
    %cst_46 = arith.constant 0.000000e+00 : f32
    %155 = vector.broadcast %cst_46 : f32 to vector<72x32xf32>
    %156 = arith.maximumf %154, %155 : vector<72x32xf32>
    %157 = vector.shape_cast %156 : vector<72x32xf32> to vector<2x6x6x32xf32>
    %158 = vector.extract_strided_slice %157 {offsets = [0, 0, 0, 0], sizes = [2, 4, 4, 32], strides = [1, 1, 1, 1]} : vector<2x6x6x32xf32> to vector<2x4x4x32xf32>
    %159 = vector.shape_cast %158 : vector<2x4x4x32xf32> to vector<32x32xf32>
    %160 = vector.extract_strided_slice %157 {offsets = [0, 0, 1, 0], sizes = [2, 4, 4, 32], strides = [1, 1, 1, 1]} : vector<2x6x6x32xf32> to vector<2x4x4x32xf32>
    %161 = vector.shape_cast %160 : vector<2x4x4x32xf32> to vector<32x32xf32>
    %162 = vector.extract_strided_slice %157 {offsets = [0, 0, 2, 0], sizes = [2, 4, 4, 32], strides = [1, 1, 1, 1]} : vector<2x6x6x32xf32> to vector<2x4x4x32xf32>
    %163 = vector.shape_cast %162 : vector<2x4x4x32xf32> to vector<32x32xf32>
    %164 = vector.extract_strided_slice %157 {offsets = [0, 1, 0, 0], sizes = [2, 4, 4, 32], strides = [1, 1, 1, 1]} : vector<2x6x6x32xf32> to vector<2x4x4x32xf32>
    %165 = vector.shape_cast %164 : vector<2x4x4x32xf32> to vector<32x32xf32>
    %166 = vector.extract_strided_slice %157 {offsets = [0, 1, 1, 0], sizes = [2, 4, 4, 32], strides = [1, 1, 1, 1]} : vector<2x6x6x32xf32> to vector<2x4x4x32xf32>
    %167 = vector.shape_cast %166 : vector<2x4x4x32xf32> to vector<32x32xf32>
    %168 = vector.extract_strided_slice %157 {offsets = [0, 1, 2, 0], sizes = [2, 4, 4, 32], strides = [1, 1, 1, 1]} : vector<2x6x6x32xf32> to vector<2x4x4x32xf32>
    %169 = vector.shape_cast %168 : vector<2x4x4x32xf32> to vector<32x32xf32>
    %170 = vector.extract_strided_slice %157 {offsets = [0, 2, 0, 0], sizes = [2, 4, 4, 32], strides = [1, 1, 1, 1]} : vector<2x6x6x32xf32> to vector<2x4x4x32xf32>
    %171 = vector.shape_cast %170 : vector<2x4x4x32xf32> to vector<32x32xf32>
    %172 = vector.extract_strided_slice %157 {offsets = [0, 2, 1, 0], sizes = [2, 4, 4, 32], strides = [1, 1, 1, 1]} : vector<2x6x6x32xf32> to vector<2x4x4x32xf32>
    %173 = vector.shape_cast %172 : vector<2x4x4x32xf32> to vector<32x32xf32>
    %174 = vector.extract_strided_slice %157 {offsets = [0, 2, 2, 0], sizes = [2, 4, 4, 32], strides = [1, 1, 1, 1]} : vector<2x6x6x32xf32> to vector<2x4x4x32xf32>
    %175 = vector.shape_cast %174 : vector<2x4x4x32xf32> to vector<32x32xf32>
    %176 = tpu.concatenate %159, %161, %163, %165, %167, %169, %171, %173, %175 in 1 : vector<32x32xf32>, vector<32x32xf32>, vector<32x32xf32>, vector<32x32xf32>, vector<32x32xf32>, vector<32x32xf32>, vector<32x32xf32>, vector<32x32xf32>, vector<32x32xf32> -> vector<32x288xf32>
    %c0_47 = arith.constant 0 : index
    %c0_48 = arith.constant 0 : index
    %177 = vector.load %arg5[%c0_47, %c0_48] : memref<288x32xf32, #tpu.memory_space<vmem>>, vector<288x32xf32>
    %cst_49 = arith.constant dense<0.000000e+00> : vector<32x32xf32>
    %178 = tpu.matmul %176, %177, %cst_49 {dimension_numbers = #tpu.dot_dimension_numbers<[1], [0], [0], [1], [0, 0, 1, 1], [], []>} : vector<32x288xf32>, vector<288x32xf32>, vector<32x32xf32> -> vector<32x32xf32>
    %c3_50 = arith.constant 3 : index
    %c0_51 = arith.constant 0 : index
    %179 = vector.load %arg6[%c3_50, %c0_51] : memref<4x32xf32, #tpu.memory_space<vmem>>, vector<1x32xf32>
    %180 = vector.shape_cast %179 : vector<1x32xf32> to vector<32xf32>
    %181 = vector.shape_cast %180 : vector<32xf32> to vector<1x32xf32>
    %182 = vector.broadcast %181 : vector<1x32xf32> to vector<32x32xf32>
    %183 = arith.mulf %178, %182 : vector<32x32xf32>
    %c3_52 = arith.constant 3 : index
    %c0_53 = arith.constant 0 : index
    %184 = vector.load %arg7[%c3_52, %c0_53] : memref<4x32xf32, #tpu.memory_space<vmem>>, vector<1x32xf32>
    %185 = vector.shape_cast %184 : vector<1x32xf32> to vector<32xf32>
    %186 = vector.shape_cast %185 : vector<32xf32> to vector<1x32xf32>
    %187 = vector.broadcast %186 : vector<1x32xf32> to vector<32x32xf32>
    %188 = arith.addf %183, %187 : vector<32x32xf32>
    %cst_54 = arith.constant 0.000000e+00 : f32
    %189 = vector.broadcast %cst_54 : f32 to vector<32x32xf32>
    %190 = arith.maximumf %188, %189 : vector<32x32xf32>
    %191 = vector.shape_cast %190 : vector<32x32xf32> to vector<2x16x32xf32>
    %192 = vector.extract_strided_slice %191 {offsets = [0, 0, 0], sizes = [2, 1, 32], strides = [1, 1, 1]} : vector<2x16x32xf32> to vector<2x1x32xf32>
    %193 = vector.shape_cast %192 : vector<2x1x32xf32> to vector<2x32xf32>
    %194 = vector.extract_strided_slice %191 {offsets = [0, 1, 0], sizes = [2, 1, 32], strides = [1, 1, 1]} : vector<2x16x32xf32> to vector<2x1x32xf32>
    %195 = vector.shape_cast %194 : vector<2x1x32xf32> to vector<2x32xf32>
    %196 = vector.extract_strided_slice %191 {offsets = [0, 2, 0], sizes = [2, 1, 32], strides = [1, 1, 1]} : vector<2x16x32xf32> to vector<2x1x32xf32>
    %197 = vector.shape_cast %196 : vector<2x1x32xf32> to vector<2x32xf32>
    %198 = vector.extract_strided_slice %191 {offsets = [0, 3, 0], sizes = [2, 1, 32], strides = [1, 1, 1]} : vector<2x16x32xf32> to vector<2x1x32xf32>
    %199 = vector.shape_cast %198 : vector<2x1x32xf32> to vector<2x32xf32>
    %200 = vector.extract_strided_slice %191 {offsets = [0, 4, 0], sizes = [2, 1, 32], strides = [1, 1, 1]} : vector<2x16x32xf32> to vector<2x1x32xf32>
    %201 = vector.shape_cast %200 : vector<2x1x32xf32> to vector<2x32xf32>
    %202 = vector.extract_strided_slice %191 {offsets = [0, 5, 0], sizes = [2, 1, 32], strides = [1, 1, 1]} : vector<2x16x32xf32> to vector<2x1x32xf32>
    %203 = vector.shape_cast %202 : vector<2x1x32xf32> to vector<2x32xf32>
    %204 = vector.extract_strided_slice %191 {offsets = [0, 6, 0], sizes = [2, 1, 32], strides = [1, 1, 1]} : vector<2x16x32xf32> to vector<2x1x32xf32>
    %205 = vector.shape_cast %204 : vector<2x1x32xf32> to vector<2x32xf32>
    %206 = vector.extract_strided_slice %191 {offsets = [0, 7, 0], sizes = [2, 1, 32], strides = [1, 1, 1]} : vector<2x16x32xf32> to vector<2x1x32xf32>
    %207 = vector.shape_cast %206 : vector<2x1x32xf32> to vector<2x32xf32>
    %208 = vector.extract_strided_slice %191 {offsets = [0, 8, 0], sizes = [2, 1, 32], strides = [1, 1, 1]} : vector<2x16x32xf32> to vector<2x1x32xf32>
    %209 = vector.shape_cast %208 : vector<2x1x32xf32> to vector<2x32xf32>
    %210 = vector.extract_strided_slice %191 {offsets = [0, 9, 0], sizes = [2, 1, 32], strides = [1, 1, 1]} : vector<2x16x32xf32> to vector<2x1x32xf32>
    %211 = vector.shape_cast %210 : vector<2x1x32xf32> to vector<2x32xf32>
    %212 = vector.extract_strided_slice %191 {offsets = [0, 10, 0], sizes = [2, 1, 32], strides = [1, 1, 1]} : vector<2x16x32xf32> to vector<2x1x32xf32>
    %213 = vector.shape_cast %212 : vector<2x1x32xf32> to vector<2x32xf32>
    %214 = vector.extract_strided_slice %191 {offsets = [0, 11, 0], sizes = [2, 1, 32], strides = [1, 1, 1]} : vector<2x16x32xf32> to vector<2x1x32xf32>
    %215 = vector.shape_cast %214 : vector<2x1x32xf32> to vector<2x32xf32>
    %216 = vector.extract_strided_slice %191 {offsets = [0, 12, 0], sizes = [2, 1, 32], strides = [1, 1, 1]} : vector<2x16x32xf32> to vector<2x1x32xf32>
    %217 = vector.shape_cast %216 : vector<2x1x32xf32> to vector<2x32xf32>
    %218 = vector.extract_strided_slice %191 {offsets = [0, 13, 0], sizes = [2, 1, 32], strides = [1, 1, 1]} : vector<2x16x32xf32> to vector<2x1x32xf32>
    %219 = vector.shape_cast %218 : vector<2x1x32xf32> to vector<2x32xf32>
    %220 = vector.extract_strided_slice %191 {offsets = [0, 14, 0], sizes = [2, 1, 32], strides = [1, 1, 1]} : vector<2x16x32xf32> to vector<2x1x32xf32>
    %221 = vector.shape_cast %220 : vector<2x1x32xf32> to vector<2x32xf32>
    %222 = vector.extract_strided_slice %191 {offsets = [0, 15, 0], sizes = [2, 1, 32], strides = [1, 1, 1]} : vector<2x16x32xf32> to vector<2x1x32xf32>
    %223 = vector.shape_cast %222 : vector<2x1x32xf32> to vector<2x32xf32>
    %224 = tpu.concatenate %193, %195, %197, %199, %201, %203, %205, %207, %209, %211, %213, %215, %217, %219, %221, %223 in 1 : vector<2x32xf32>, vector<2x32xf32>, vector<2x32xf32>, vector<2x32xf32>, vector<2x32xf32>, vector<2x32xf32>, vector<2x32xf32>, vector<2x32xf32>, vector<2x32xf32>, vector<2x32xf32>, vector<2x32xf32>, vector<2x32xf32>, vector<2x32xf32>, vector<2x32xf32>, vector<2x32xf32>, vector<2x32xf32> -> vector<2x512xf32>
    %225 = arith.truncf %224 : vector<2x512xf32> to vector<2x512xbf16>
    %c0_55 = arith.constant 0 : index
    %c0_56 = arith.constant 0 : index
    %226 = vector.load %arg8[%c0_55, %c0_56] : memref<512x1024xbf16, #tpu.memory_space<vmem>>, vector<512x1024xbf16>
    %cst_57 = arith.constant dense<0.000000e+00> : vector<2x1024xf32>
    %227 = tpu.matmul %225, %226, %cst_57 {dimension_numbers = #tpu.dot_dimension_numbers<[1], [0], [0], [1], [0, 0, 1, 1], [], []>} : vector<2x512xbf16>, vector<512x1024xbf16>, vector<2x1024xf32> -> vector<2x1024xf32>
    %c0_58 = arith.constant 0 : index
    %c0_59 = arith.constant 0 : index
    %228 = vector.load %arg9[%c0_58, %c0_59] : memref<1x1024xf32, #tpu.memory_space<vmem>>, vector<1x1024xf32>
    %229 = vector.broadcast %228 : vector<1x1024xf32> to vector<2x1024xf32>
    %230 = arith.mulf %227, %229 : vector<2x1024xf32>
    %c0_60 = arith.constant 0 : index
    %c0_61 = arith.constant 0 : index
    %231 = vector.load %arg10[%c0_60, %c0_61] : memref<1x1024xf32, #tpu.memory_space<vmem>>, vector<1x1024xf32>
    %232 = vector.broadcast %231 : vector<1x1024xf32> to vector<2x1024xf32>
    %233 = arith.addf %230, %232 : vector<2x1024xf32>
    %cst_62 = arith.constant 0.000000e+00 : f32
    %234 = vector.broadcast %cst_62 : f32 to vector<2x1024xf32>
    %235 = arith.maximumf %233, %234 : vector<2x1024xf32>
    %236 = arith.truncf %235 : vector<2x1024xf32> to vector<2x1024xbf16>
    %c0_63 = arith.constant 0 : index
    %c0_64 = arith.constant 0 : index
    %237 = vector.load %arg11[%c0_63, %c0_64] : memref<1024x512xbf16, #tpu.memory_space<vmem>>, vector<1024x512xbf16>
    %cst_65 = arith.constant dense<0.000000e+00> : vector<2x512xf32>
    %238 = tpu.matmul %236, %237, %cst_65 {dimension_numbers = #tpu.dot_dimension_numbers<[1], [0], [0], [1], [0, 0, 1, 1], [], []>} : vector<2x1024xbf16>, vector<1024x512xbf16>, vector<2x512xf32> -> vector<2x512xf32>
    %c0_66 = arith.constant 0 : index
    %c0_67 = arith.constant 0 : index
    %239 = vector.load %arg12[%c0_66, %c0_67] : memref<1x512xf32, #tpu.memory_space<vmem>>, vector<1x512xf32>
    %240 = vector.broadcast %239 : vector<1x512xf32> to vector<2x512xf32>
    %241 = arith.mulf %238, %240 : vector<2x512xf32>
    %c0_68 = arith.constant 0 : index
    %c0_69 = arith.constant 0 : index
    %242 = vector.load %arg13[%c0_68, %c0_69] : memref<1x512xf32, #tpu.memory_space<vmem>>, vector<1x512xf32>
    %243 = vector.broadcast %242 : vector<1x512xf32> to vector<2x512xf32>
    %244 = arith.addf %241, %243 : vector<2x512xf32>
    %cst_70 = arith.constant 0.000000e+00 : f32
    %245 = vector.broadcast %cst_70 : f32 to vector<2x512xf32>
    %246 = arith.maximumf %244, %245 : vector<2x512xf32>
    %247 = arith.truncf %246 : vector<2x512xf32> to vector<2x512xbf16>
    %c0_71 = arith.constant 0 : index
    %c0_72 = arith.constant 0 : index
    %248 = vector.load %arg14[%c0_71, %c0_72] : memref<512x128xbf16, #tpu.memory_space<vmem>>, vector<512x128xbf16>
    %cst_73 = arith.constant dense<0.000000e+00> : vector<2x128xf32>
    %249 = tpu.matmul %247, %248, %cst_73 {dimension_numbers = #tpu.dot_dimension_numbers<[1], [0], [0], [1], [0, 0, 1, 1], [], []>} : vector<2x512xbf16>, vector<512x128xbf16>, vector<2x128xf32> -> vector<2x128xf32>
    %c0_74 = arith.constant 0 : index
    %c0_75 = arith.constant 0 : index
    %250 = vector.load %arg15[%c0_74, %c0_75] : memref<1x128xf32, #tpu.memory_space<vmem>>, vector<1x128xf32>
    %251 = vector.broadcast %250 : vector<1x128xf32> to vector<2x128xf32>
    %252 = arith.addf %249, %251 : vector<2x128xf32>
    %253 = tpu.iota {dimensions = array<i32: 1>} : vector<2x128xi32>
    %c65_i32 = arith.constant 65 : i32
    %254 = vector.broadcast %c65_i32 : i32 to vector<2x128xi32>
    %255 = arith.cmpi slt, %253, %254 : vector<2x128xi32>
    %cst_76 = arith.constant -1.000000e+30 : f32
    %256 = vector.broadcast %cst_76 : f32 to vector<2x128xf32>
    %257 = arith.select %255, %252, %256 : vector<2x128xi1>, vector<2x128xf32>
    %cst_77 = arith.constant dense<0xFF800000> : vector<2xf32>
    %258 = vector.multi_reduction <maximumf>, %257, %cst_77 [1] : vector<2x128xf32> to vector<2xf32>
    %259 = vector.shape_cast %258 : vector<2xf32> to vector<2x1xf32>
    %260 = vector.broadcast %259 : vector<2x1xf32> to vector<2x128xf32>
    %261 = arith.subf %257, %260 : vector<2x128xf32>
    %262 = math.exp %261 : vector<2x128xf32>
    %cst_78 = arith.constant 0.000000e+00 : f32
    %263 = vector.broadcast %cst_78 : f32 to vector<2x128xf32>
    %264 = arith.select %255, %262, %263 : vector<2x128xi1>, vector<2x128xf32>
    %cst_79 = arith.constant dense<0.000000e+00> : vector<2xf32>
    %265 = vector.multi_reduction <add>, %264, %cst_79 [1] : vector<2x128xf32> to vector<2xf32>
    %266 = vector.shape_cast %265 : vector<2xf32> to vector<2x1xf32>
    %267 = vector.broadcast %266 : vector<2x1xf32> to vector<2x128xf32>
    %268 = arith.divf %264, %267 : vector<2x128xf32>
    %c65_i32_80 = arith.constant 65 : i32
    %269 = vector.broadcast %c65_i32_80 : i32 to vector<2x128xi32>
    %270 = arith.cmpi eq, %253, %269 : vector<2x128xi32>
    %271 = math.tanh %252 : vector<2x128xf32>
    %272 = arith.select %270, %271, %268 : vector<2x128xi1>, vector<2x128xf32>
    %c0_81 = arith.constant 0 : index
    %c0_82 = arith.constant 0 : index
    %273 = vector.load %arg16[%c0_81, %c0_82] : memref<2x128xf32, #tpu.memory_space<vmem>>, vector<2x128xf32>
    tpu.vector_store %arg16[%c0_81, %c0_82], %272 {strides = array<i32>} : memref<2x128xf32, #tpu.memory_space<vmem>>, vector<2x128xf32>,
    return
  }
  func.func @transform_0(%arg0: i32) -> (i32, i32, i32, i32) {
    %c0_i32 = arith.constant 0 : i32
    %c0_i32_0 = arith.constant 0 : i32
    %c0_i32_1 = arith.constant 0 : i32
    %c0_i32_2 = arith.constant 0 : i32
    %c0_i32_3 = arith.constant 0 : i32
    return %c0_i32, %c0_i32_0, %c0_i32_1, %c0_i32_2 : i32, i32, i32, i32
  }
  func.func @transform_1(%arg0: i32) -> (i32, i32) {
    %c0_i32 = arith.constant 0 : i32
    %c0_i32_0 = arith.constant 0 : i32
    %c0_i32_1 = arith.constant 0 : i32
    return %c0_i32, %c0_i32_0 : i32, i32
  }
  func.func @transform_2(%arg0: i32) -> (i32, i32) {
    %c0_i32 = arith.constant 0 : i32
    %c0_i32_0 = arith.constant 0 : i32
    %c0_i32_1 = arith.constant 0 : i32
    return %c0_i32, %c0_i32_0 : i32, i32
  }
  func.func @transform_3(%arg0: i32) -> (i32, i32) {
    %c0_i32 = arith.constant 0 : i32
    %c0_i32_0 = arith.constant 0 : i32
    %c0_i32_1 = arith.constant 0 : i32
    return %c0_i32, %c0_i32_0 : i32, i32
  }
  func.func @transform_4(%arg0: i32) -> (i32, i32) {
    %c0_i32 = arith.constant 0 : i32
    %c0_i32_0 = arith.constant 0 : i32
    %c0_i32_1 = arith.constant 0 : i32
    return %c0_i32, %c0_i32_0 : i32, i32
  }
  func.func @transform_5(%arg0: i32) -> (i32, i32) {
    %c0_i32 = arith.constant 0 : i32
    %c0_i32_0 = arith.constant 0 : i32
    %c0_i32_1 = arith.constant 0 : i32
    return %c0_i32, %c0_i32_0 : i32, i32
  }
  func.func @transform_6(%arg0: i32) -> (i32, i32) {
    %c0_i32 = arith.constant 0 : i32
    %c0_i32_0 = arith.constant 0 : i32
    %c0_i32_1 = arith.constant 0 : i32
    return %c0_i32, %c0_i32_0 : i32, i32
  }
  func.func @transform_7(%arg0: i32) -> (i32, i32) {
    %c0_i32 = arith.constant 0 : i32
    %c0_i32_0 = arith.constant 0 : i32
    %c0_i32_1 = arith.constant 0 : i32
    return %c0_i32, %c0_i32_0 : i32, i32
  }
  func.func @transform_8(%arg0: i32) -> (i32, i32) {
    %c0_i32 = arith.constant 0 : i32
    %c0_i32_0 = arith.constant 0 : i32
    %c0_i32_1 = arith.constant 0 : i32
    return %c0_i32, %c0_i32_0 : i32, i32
  }
  func.func @transform_9(%arg0: i32) -> (i32, i32) {
    %c0_i32 = arith.constant 0 : i32
    %c0_i32_0 = arith.constant 0 : i32
    %c0_i32_1 = arith.constant 0 : i32
    return %c0_i32, %c0_i32_0 : i32, i32
  }
  func.func @transform_10(%arg0: i32) -> (i32, i32) {
    %c0_i32 = arith.constant 0 : i32
    %c0_i32_0 = arith.constant 0 : i32
    %c0_i32_1 = arith.constant 0 : i32
    return %c0_i32, %c0_i32_0 : i32, i32
  }
  func.func @transform_11(%arg0: i32) -> (i32, i32) {
    %c0_i32 = arith.constant 0 : i32
    %c0_i32_0 = arith.constant 0 : i32
    %c0_i32_1 = arith.constant 0 : i32
    return %c0_i32, %c0_i32_0 : i32, i32
  }
  func.func @transform_12(%arg0: i32) -> (i32, i32) {
    %c0_i32 = arith.constant 0 : i32
    %c0_i32_0 = arith.constant 0 : i32
    %c0_i32_1 = arith.constant 0 : i32
    return %c0_i32, %c0_i32_0 : i32, i32
  }
  func.func @transform_13(%arg0: i32) -> (i32, i32) {
    %c0_i32 = arith.constant 0 : i32
    %c0_i32_0 = arith.constant 0 : i32
    %c0_i32_1 = arith.constant 0 : i32
    return %c0_i32, %c0_i32_0 : i32, i32
  }
  func.func @transform_14(%arg0: i32) -> (i32, i32) {
    %c0_i32 = arith.constant 0 : i32
    %c0_i32_0 = arith.constant 0 : i32
    %c0_i32_1 = arith.constant 0 : i32
    return %c0_i32, %c0_i32_0 : i32, i32
  }
  func.func @transform_15(%arg0: i32) -> (i32, i32) {
    %c0_i32 = arith.constant 0 : i32
    %c0_i32_0 = arith.constant 0 : i32
    %c0_i32_1 = arith.constant 0 : i32
    return %c0_i32, %c0_i32_0 : i32, i32
  }
}

</mosaic_0001>

<bundles_post_ra>
// kernel: _lambda_.1
= control target key start
LH: loop header
LB: loop body
LE: loop exit
PB: predicated region body
PF: predicated region fallthrough
CT: control target
= control target key end

     0   :  { %20 = vsyncpa [#allocation4], 0  ;;  %s15759_s0 = inlined_call_operand.vmem [shape: f32[2,10,10,1], index: 0, kind: input, shape index: {}]   ;;  %s15760_s1 = inlined_call_operand.vmem [shape: f32[9,32], index: 1, kind: input, shape index: {}]   ;;  %s15761_s2 = inlined_call_operand.hbm [shape: f32[288,32], index: 2, kind: input, shape index: {}]   ;;  %s15762_s3 = inlined_call_operand.vmem [shape: f32[288,32], index: 3, kind: input, shape index: {}]   ;;  %s15763_s4 = inlined_call_operand.vmem [shape: f32[288,32], index: 4, kind: input, shape index: {}]   ;;  %s15764_s5 = inlined_call_operand.hbm [shape: f32[4,32], index: 5, kind: input, shape index: {}]   ;;  %s15765_s6 = inlined_call_operand.hbm [shape: f32[4,32], index: 6, kind: input, shape index: {}]   ;;  %s15766_s7 = inlined_call_operand.hbm [shape: bf16[512,1024], index: 7, kind: input, shape index: {}]   ;;  %s15767_s8 = inlined_call_operand.hbm [shape: f32[1,1024], index: 8, kind: input, shape index: {}]   ;;  %s15768_s9 = inlined_call_operand.vmem [shape: f32[1,1024], index: 9, kind: input, shape index: {}]   ;;  %s15769_s10 = inlined_call_operand.hbm [shape: bf16[1024,512], index: 10, kind: input, shape index: {}]   ;;  %s15770_s11 = inlined_call_operand.vmem [shape: f32[1,512], index: 11, kind: input, shape index: {}]   ;;  %s15771_s12 = inlined_call_operand.vmem [shape: f32[1,512], index: 12, kind: input, shape index: {}]   ;;  %s15772_s13 = inlined_call_operand.hbm [shape: bf16[512,128], index: 13, kind: input, shape index: {}]   ;;  %s15773_s14 = inlined_call_operand.vmem [shape: f32[1,128], index: 14, kind: input, shape index: {}]   ;;  %s15774_s15 = inlined_call_operand.vmem [shape: f32[2,128], index: 15, kind: output, shape index: {}]  }
   0x1   :  { %21 = vsyncpa [#allocation6], 0 }
   0x2   :  { %22 = vsyncpa [#allocation9], 0 }
   0x3   :  { %23 = vsyncpa [#allocation12], 0  ;;  %s11860_s18 = smov [#allocation5]   ;;  %s11861_s20 = smov [#allocation8]  }
   0x4   :  { %s50_s19 = sshll.u32 %s11860_s18, 4  ;;  %s69_s21 = sshll.u32 %s11861_s20, 4  ;;  %s51_s19 = int_to_ptr.vmem [resolvable:$true] %s50_s19  ;;  %s70_s21 = int_to_ptr.vmem [resolvable:$true] %s69_s21 }
   0x5   :  { %s11720_s22 = scalar_lea.vmem %s51_s19, 64  ;;  %p11725_p1 = scmp.lt.s32.totalorder %s51_s19, %s51_s19 }
   0x6   :  { %p11721_p0 = scmp.ne.s32.totalorder %s51_s19, %s11720_s22  ;;  %p11726_p2 = scmp.lt.s32.totalorder %s11720_s22, %s11720_s22 }
   0x8   :  { %p11727_p3 = por %p11726_p2, %p11725_p1 }
   0xa   :  { %p11728_p4 = pnand %p11727_p3, %p11721_p0 }
   0xc   :  { %11731 = shalt.err (!%p11728_p4)
}
   0xd   :  { %53 = dma.hbm_to_vmem [thread:$0]  %s15764_s5, 64, %s51_s19, [#allocation6]  }
   0xe   :  { %s11740_s25 = scalar_lea.vmem %s70_s21, 32768  ;;  %p11745_p6 = scmp.lt.s32.totalorder %s70_s21, %s70_s21 }
   0xf   :  { %p11741_p5 = scmp.ne.s32.totalorder %s70_s21, %s11740_s25  ;;  %p11746_p7 = scmp.lt.s32.totalorder %s11740_s25, %s11740_s25 }
  0x11   :  { %p11747_p8 = por %p11746_p7, %p11745_p6 }
  0x13   :  { %p11748_p9 = pnand %p11747_p8, %p11741_p5 }
  0x15   :  { %11751 = shalt.err (!%p11748_p9)
}
  0x16   :  { %s11862_s26 = smov 512   ;;  %s11863_s27 = smov 32  }
  0x17   :  { %75 = dma.hbm_to_vmem [thread:$0]  %s15766_s7, 32768, %s70_s21, [#allocation9], %s11862_s26, %s11862_s26, %s11863_s27  }
  0x18   :  { %s11864_s30 = smov [#allocation11]  }
  0x19   :  { %s93_s16 = sshll.u32 %s11864_s30, 4  ;;  %s94_s16 = int_to_ptr.vmem [resolvable:$true] %s93_s16 }
  0x1a   :  { %s11760_s17 = scalar_lea.vmem %s94_s16, 32768  ;;  %p11765_p11 = scmp.lt.s32.totalorder %s94_s16, %s94_s16 }
  0x1b   :  { %p11761_p10 = scmp.ne.s32.totalorder %s94_s16, %s11760_s17  ;;  %p11766_p12 = scmp.lt.s32.totalorder %s11760_s17, %s11760_s17 }
  0x1d   :  { %p11767_p13 = por %p11766_p12, %p11765_p11 }
  0x1f   :  { %p11768_p0 = pnand %p11767_p13, %p11761_p10 }
  0x21   :  { %11771 = shalt.err (!%p11768_p0)
}
  0x22   :  { %s11865_s5 = smov 256   ;;  %s11866_s18 = smov 16  }
  0x23   :  { %99 = dma.hbm_to_vmem [thread:$0]  %s15769_s10, 32768, %s94_s16, [#allocation12], %s11865_s5, %s11865_s5, %s11866_s18  }
  0x24   :  { %s11867_s22 = smov [#allocation3]  }
  0x25   :  { %s33_s23 = sshll.u32 %s11867_s22, 4  ;;  %s34_s23 = int_to_ptr.vmem [resolvable:$true] %s33_s23 }
  0x26   :  { %s11780_s7 = scalar_lea.vmem %s34_s23, 4608  ;;  %p11785_p2 = scmp.lt.s32.totalorder %s34_s23, %s34_s23 }
  0x27   :  { %p11781_p1 = scmp.ne.s32.totalorder %s34_s23, %s11780_s7  ;;  %p11786_p3 = scmp.lt.s32.totalorder %s11780_s7, %s11780_s7 }
  0x29   :  { %p11787_p4 = por %p11786_p3, %p11785_p2 }
  0x2b   :  { %p11788_p5 = pnand %p11787_p4, %p11781_p1 }
  0x2d   :  { %11791 = shalt.err (!%p11788_p5)
}
  0x2e   :  { %s11868_s21 = smov 128   ;;  %s11869_s24 = smov 8  }
  0x2f   :  { %39 = dma.hbm_to_vmem [thread:$0]  %s15761_s2, 4608, %s34_s23, [#allocation4], %s11868_s21, %s11868_s21, %s11869_s24  }
  0x30   :  { %s11870_s28 = smov [#allocation7]   ;;  %s11871_s30 = smov [#allocation10]  }
  0x31   :  { %s60_s29 = sshll.u32 %s11870_s28, 4  ;;  %s82_s10 = sshll.u32 %s11871_s30, 4  ;;  %s61_s29 = int_to_ptr.vmem [resolvable:$true] %s60_s29  ;;  %s83_s10 = int_to_ptr.vmem [resolvable:$true] %s82_s10 }
  0x32   :  { %s11800_s16 = scalar_lea.vmem %s61_s29, 64  ;;  %p11805_p7 = scmp.lt.s32.totalorder %s61_s29, %s61_s29 }
  0x33   :  { %p11801_p6 = scmp.ne.s32.totalorder %s61_s29, %s11800_s16  ;;  %p11806_p8 = scmp.lt.s32.totalorder %s11800_s16, %s11800_s16 }
  0x35   :  { %p11807_p9 = por %p11806_p8, %p11805_p7 }
  0x37   :  { %p11808_p10 = pnand %p11807_p9, %p11801_p6 }
  0x39   :  { %11811 = shalt.err (!%p11808_p10)
}
  0x3a   :  { %63 = dma.hbm_to_vmem [thread:$0]  %s15765_s6, 64, %s61_s29, [#allocation6]  }
  0x3b   :  { %s11820_s18 = scalar_lea.vmem %s83_s10, 128  ;;  %p11825_p12 = scmp.lt.s32.totalorder %s83_s10, %s83_s10 }
  0x3c   :  { %p11821_p11 = scmp.ne.s32.totalorder %s83_s10, %s11820_s18  ;;  %p11826_p13 = scmp.lt.s32.totalorder %s11820_s18, %s11820_s18 }
  0x3e   :  { %p11827_p0 = por %p11826_p13, %p11825_p12 }
  0x40   :  { %p11828_p1 = pnand %p11827_p0, %p11821_p11 }
  0x42   :  { %11831 = shalt.err (!%p11828_p1)
}
  0x43   :  { %85 = dma.hbm_to_vmem [thread:$0]  %s15767_s8, 128, %s83_s10, [#allocation9]  }
  0x44   :  { %s11872_s20 = smov [#allocation13]  }
  0x45   :  { %s109_s22 = sshll.u32 %s11872_s20, 4  ;;  %s110_s22 = int_to_ptr.vmem [resolvable:$true] %s109_s22 }
  0x46   :  { %s11840_s23 = scalar_lea.vmem %s110_s22, 4096  ;;  %p11845_p3 = scmp.lt.s32.totalorder %s110_s22, %s110_s22 }
  0x47   :  { %p11841_p2 = scmp.ne.s32.totalorder %s110_s22, %s11840_s23  ;;  %p11846_p4 = scmp.lt.s32.totalorder %s11840_s23, %s11840_s23 }
  0x49   :  { %p11847_p5 = por %p11846_p4, %p11845_p3 }
  0x4b   :  { %p11848_p6 = pnand %p11847_p5, %p11841_p2 }
  0x4d   :  { %11851 = shalt.err (!%p11848_p6)
}
  0x4e   :  { %s11873_s6 = smov 64   ;;  %s11874_s7 = smov 4  }
  0x4f   :  { %115 = dma.hbm_to_vmem [thread:$0]  %s15772_s13, 4096, %s110_s22, [#allocation12], %s11873_s6, %s11873_s6, %s11874_s7  }
  0x50   :  { %11852 = dma.done.wait [#allocation4], 4608  }
  0x51   :  { %11853 = vsyncadd [#allocation4], 4294962688 }
  0x52   :  { %11854 = dma.done.wait [#allocation6], 128  }
  0x53   :  { %11855 = vsyncadd [#allocation6], 4294967168 }
  0x54   :  { %11856 = dma.done.wait [#allocation9], 32896  }
  0x55   :  { %11857 = vsyncadd [#allocation9], 4294934400 }
  0x56   :  { %11858 = dma.done.wait [#allocation12], 36864  }
  0x57   :  { %11859 = vsyncadd [#allocation12], 4294930432  ;;  %v11875_v0 = vmov 0   ;;  %v142_v1 = vld [vmem:[%s15759_s0 + $0x10] sm:$0xff]  ;;  %v140_v2 = vld [vmem:[%s15759_s0] sm:$0xff]  ;;  %vm1445_vm0 = vcmask 261120  }
  0x58   :  { %10803 = vset.pattern.permute.xlu1 %v11875_v0  ;;  %10802 = vset.pattern.permute.xlu0 %v11875_v0  ;;  %v143_v3 = vld [vmem:[%s15759_s0 + $0x18] sm:$0x3]  ;;  %v141_v4 = vld [vmem:[%s15759_s0 + $0x8] sm:$0x3]  ;;  %v144_v6 = vld [vmem:[%s15759_s0 + $0x20] sm:$0xff]  ;;  %vm1447_vm1 = vcmask 254976  }
  0x59   :  { %188 = vperm.xlu1 %10803, %v142_v1   ;;  %183 = vperm.xlu0 %10802, %v140_v2   ;;  %v145_v5 = vld [vmem:[%s15759_s0 + $0x28] sm:$0x3]  ;;  %v147_v7 = vld [vmem:[%s15759_s0 + $0x38] sm:$0x3]  ;;  %v146_v8 = vld [vmem:[%s15759_s0 + $0x30] sm:$0xff]  ;;  %v15775_v41 = vmov 0.0  }
  0x5a   :  { %v149_v9 = vld [vmem:[%s15759_s0 + $0x48] sm:$0x3]  ;;  %v148_v10 = vld [vmem:[%s15759_s0 + $0x40] sm:$0xff]  ;;  %v151_v11 = vld [vmem:[%s15759_s0 + $0x58] sm:$0x3]  ;;  %1461 = vst.msk [vmem:[#allocation2 + $0x70] sm:$0xff] %vm1445_vm0, %v15775_v41 }
  0x5b   :  { %v150_v12 = vld [vmem:[%s15759_s0 + $0x50] sm:$0xff]  ;;  %v153_v13 = vld [vmem:[%s15759_s0 + $0x68] sm:$0x3]  ;;  %v152_v14 = vld [vmem:[%s15759_s0 + $0x60] sm:$0xff]  ;;  %1462 = vst.msk [vmem:[#allocation2 + $0x78] sm:$0x3] %vm1447_vm1, %v15775_v41 }
  0x5c   :  { %v155_v15 = vld [vmem:[%s15759_s0 + $0x78] sm:$0x3]  ;;  %v154_v16 = vld [vmem:[%s15759_s0 + $0x70] sm:$0xff]  ;;  %v161_v17 = vld [vmem:[%s15759_s0 + $0xa8] sm:$0x3]  ;;  %1446 = vst.msk [vmem:[#allocation2] sm:$0xff] %vm1445_vm0, %v15775_v41 }
  0x5d   :  { %305 = vperm.xlu1 %10803, %v143_v3   ;;  %300 = vperm.xlu0 %10802, %v141_v4   ;;  %v160_v18 = vld [vmem:[%s15759_s0 + $0xa0] sm:$0xff]  ;;  %v157_v19 = vld [vmem:[%s15759_s0 + $0x88] sm:$0x3]  ;;  %v163_v21 = vld [vmem:[%s15759_s0 + $0xb8] sm:$0x3]  ;;  %1449 = vst.msk [vmem:[#allocation2 + $0x10] sm:$0xff] %vm1445_vm0, %v15775_v41 }
  0x5e   :  { %v156_v20 = vld [vmem:[%s15759_s0 + $0x80] sm:$0xff]  ;;  %v162_v22 = vld [vmem:[%s15759_s0 + $0xb0] sm:$0xff]  ;;  %v165_v23 = vld [vmem:[%s15759_s0 + $0xc8] sm:$0x3]  ;;  %1448 = vst.msk [vmem:[#allocation2 + $0x8] sm:$0x3] %vm1447_vm1, %v15775_v41 }
  0x5f   :  { %v164_v24 = vld [vmem:[%s15759_s0 + $0xc0] sm:$0xff]  ;;  %v159_v25 = vld [vmem:[%s15759_s0 + $0x98] sm:$0x3]  ;;  %v158_v26 = vld [vmem:[%s15759_s0 + $0x90] sm:$0xff]  ;;  %1450 = vst.msk [vmem:[#allocation2 + $0x18] sm:$0x3] %vm1447_vm1, %v15775_v41 }
  0x60   :  { %v167_v27 = vld [vmem:[%s15759_s0 + $0xd8] sm:$0x3]  ;;  %v166_v28 = vld [vmem:[%s15759_s0 + $0xd0] sm:$0xff]  ;;  %v169_v29 = vld [vmem:[%s15759_s0 + $0xe8] sm:$0x3]  ;;  %1451 = vst.msk [vmem:[#allocation2 + $0x20] sm:$0xff] %vm1445_vm0, %v15775_v41 }
  0x61   :  { %310 = vperm.xlu1 %10803, %v145_v5   ;;  %193 = vperm.xlu0 %10802, %v144_v6   ;;  %v168_v30 = vld [vmem:[%s15759_s0 + $0xe0] sm:$0xff]  ;;  %v171_v31 = vld [vmem:[%s15759_s0 + $0xf8] sm:$0x3]  ;;  %v170_v32 = vld [vmem:[%s15759_s0 + $0xf0] sm:$0xff]  ;;  %1452 = vst.msk [vmem:[#allocation2 + $0x28] sm:$0x3] %vm1447_vm1, %v15775_v41 }
  0x62   :  { %v173_v33 = vld [vmem:[%s15759_s0 + $0x108] sm:$0x3]  ;;  %v172_v34 = vld [vmem:[%s15759_s0 + $0x100] sm:$0xff]  ;;  %v175_v35 = vld [vmem:[%s15759_s0 + $0x118] sm:$0x3]  ;;  %1453 = vst.msk [vmem:[#allocation2 + $0x30] sm:$0xff] %vm1445_vm0, %v15775_v41 }
  0x63   :  { %v174_v36 = vld [vmem:[%s15759_s0 + $0x110] sm:$0xff]  ;;  %v177_v37 = vld [vmem:[%s15759_s0 + $0x128] sm:$0x3]  ;;  %v176_v38 = vld [vmem:[%s15759_s0 + $0x120] sm:$0xff]  ;;  %1454 = vst.msk [vmem:[#allocation2 + $0x38] sm:$0x3] %vm1447_vm1, %v15775_v41 }
  0x64   :  { %v179_v39 = vld [vmem:[%s15759_s0 + $0x138] sm:$0x3]  ;;  %v178_v40 = vld [vmem:[%s15759_s0 + $0x130] sm:$0xff]  ;;  %1455 = vst.msk [vmem:[#allocation2 + $0x40] sm:$0xff] %vm1445_vm0, %v15775_v41  ;;  %1457 = vst.msk [vmem:[#allocation2 + $0x50] sm:$0xff] %vm1445_vm0, %v15775_v41  ;;  %vm446_vm2 = vcmask 1046528  }
  0x65   :  { %315 = vperm.xlu1 %10803, %v147_v7   ;;  %198 = vperm.xlu0 %10802, %v146_v8   ;;  %1456 = vst.msk [vmem:[#allocation2 + $0x48] sm:$0x3] %vm1447_vm1, %v15775_v41  ;;  %1458 = vst.msk [vmem:[#allocation2 + $0x58] sm:$0x3] %vm1447_vm1, %v15775_v41  ;;  %v2141_v42 = vld [vmem:[#allocation3 + $0x118] sm:$0xff]  ;;  %v2140_v43 = vld [vmem:[#allocation3 + $0x110] sm:$0xff] }
  0x66   :  { %1459 = vst.msk [vmem:[#allocation2 + $0x60] sm:$0xff] %vm1445_vm0, %v15775_v41  ;;  %1463 = vst.msk [vmem:[#allocation2 + $0x80] sm:$0xff] %vm1445_vm0, %v15775_v41  ;;  %10701 = vmatprep.subr.mxu1 %v2141_v42  ;;  %v2139_v44 = vld [vmem:[#allocation3 + $0x108] sm:$0xff]  ;;  %v2138_v45 = vld [vmem:[#allocation3 + $0x100] sm:$0xff]  ;;  %vm596_vm3 = vcmask 1045504   ;;  %s11877_s24 = smov 96  }
  0x67   :  { %1460 = vst.msk [vmem:[#allocation2 + $0x68] sm:$0x3] %vm1447_vm1, %v15775_v41  ;;  %1464 = vst.msk [vmem:[#allocation2 + $0x88] sm:$0x3] %vm1447_vm1, %v15775_v41  ;;  %10702 = vmatpush3.msra.mxu1 %v2141_v42  ;;  %v12187_v46 = vld [vmem:[%s15760_s1 + $0x1] ss:$0 sm:$0xff] }
  0x68   :  { %1465 = vst.msk [vmem:[#allocation2 + $0x90] sm:$0xff] %vm1445_vm0, %v15775_v41  ;;  %1467 = vst.msk [vmem:[#allocation2 + $0xa0] sm:$0xff] %vm1445_vm0, %v15775_v41  ;;  %10703 = vmatprep.subr.mxu1 %v2140_v43  ;;  %v12192_v47 = vld [vmem:[%s15760_s1 + $0x2] ss:$0 sm:$0xff]  ;;  %v12197_v48 = vld [vmem:[%s15760_s1 + $0x4] ss:$0 sm:$0xff] }
  0x69   :  { %320 = vperm.xlu1 %10803, %v149_v9   ;;  %203 = vperm.xlu0 %10802, %v148_v10   ;;  %1466 = vst.msk [vmem:[#allocation2 + $0x98] sm:$0x3] %vm1447_vm1, %v15775_v41  ;;  %1468 = vst.msk [vmem:[#allocation2 + $0xa8] sm:$0x3] %vm1447_vm1, %v15775_v41  ;;  %v12199_v49 = vld [vmem:[#allocation2] sm:$0xff]  ;;  %vm2024_vm4 = vcmask 523264  }
  0x6a   :  { %1469 = vst.msk [vmem:[#allocation2 + $0xb0] sm:$0xff] %vm1445_vm0, %v15775_v41  ;;  %1471 = vst.msk [vmem:[#allocation2 + $0xc0] sm:$0xff] %vm1445_vm0, %v15775_v41  ;;  %10704 = vmatpush3.msra.mxu1 %v2140_v43  ;;  %v12201_v50 = vld [vmem:[#allocation2 + $0x8] sm:$0x3]  ;;  %v12206_v51 = vld [vmem:[%s15760_s1] ss:$0 sm:$0xff] }
  0x6b   :  { %1470 = vst.msk [vmem:[#allocation2 + $0xb8] sm:$0x3] %vm1447_vm1, %v15775_v41  ;;  %1472 = vst.msk [vmem:[#allocation2 + $0xc8] sm:$0x3] %vm1447_vm1, %v15775_v41  ;;  %10705 = vmatprep.subr.mxu1 %v2139_v44  ;;  %v12211_v52 = vld [vmem:[%s15760_s1 + $0x5] ss:$0 sm:$0xff] }
  0x6c   :  { %1473 = vst.msk [vmem:[#allocation2 + $0xd0] sm:$0xff] %vm1445_vm0, %v15775_v41  ;;  %1475 = vst.msk [vmem:[#allocation2 + $0xe0] sm:$0xff] %vm1445_vm0, %v15775_v41  ;;  %10706 = vmatpush3.msra.mxu1 %v2139_v44  ;;  %v1624_v58 = vrot.slane %v12199_v49, 2  ;;  %v1625_v59 = vrot.slane %v12201_v50, 2  ;;  %v12224_v63 = vld [vmem:[%s15760_s1 + $0x3] ss:$0 sm:$0xff] }
  0x6d   :  { %325 = vperm.xlu1 %10803, %v151_v11   ;;  %208 = vperm.xlu0 %10802, %v150_v12   ;;  %1474 = vst.msk [vmem:[#allocation2 + $0xd8] sm:$0x3] %vm1447_vm1, %v15775_v41  ;;  %1476 = vst.msk [vmem:[#allocation2 + $0xe8] sm:$0x3] %vm1447_vm1, %v15775_v41  ;;  %v1576_v0 = vrot.slane %v12199_v49, 1  ;;  %vm2041_vm5 = vcmask 785408  }
  0x6e   :  { %1477 = vst.msk [vmem:[#allocation2 + $0xf0] sm:$0xff] %vm1445_vm0, %v15775_v41  ;;  %1479 = vst.msk [vmem:[#allocation2 + $0x100] sm:$0xff] %vm1445_vm0, %v15775_v41  ;;  %10707 = vmatprep.subr.mxu1 %v2138_v45  ;;  %vm2738_vm6 = vcmask 1040384   ;;  %vm2739_vm7 = vcmask 1042434   ;;  %vm2741_vm9 = vcmask 1044484   ;;  %vm2743_vm11 = vcmask 1046534  }
  0x6f   :  { %1478 = vst.msk [vmem:[#allocation2 + $0xf8] sm:$0x3] %vm1447_vm1, %v15775_v41  ;;  %1480 = vst.msk [vmem:[#allocation2 + $0x108] sm:$0x3] %vm1447_vm1, %v15775_v41  ;;  %10708 = vmatpush3.msra.mxu1 %v2138_v45  ;;  %vm11879_vm13 = vmmov 0   ;;  %vm5422_vm14 = vcmask 1041409  }
  0x70   :  { %1481 = vst.msk [vmem:[#allocation2 + $0x110] sm:$0xff] %vm1445_vm0, %v15775_v41  ;;  %1483 = vst.msk [vmem:[#allocation2 + $0x120] sm:$0xff] %vm1445_vm0, %v15775_v41 }
  0x71   :  { %330 = vperm.xlu1 %10803, %v153_v13   ;;  %213 = vperm.xlu0 %10802, %v152_v14   ;;  %1482 = vst.msk [vmem:[#allocation2 + $0x118] sm:$0x3] %vm1447_vm1, %v15775_v41  ;;  %1484 = vst.msk [vmem:[#allocation2 + $0x128] sm:$0x3] %vm1447_vm1, %v15775_v41 }
  0x72   :  { %1485 = vst.msk [vmem:[#allocation2 + $0x130] sm:$0xff] %vm1445_vm0, %v15775_v41  ;;  %vm2740_vm8 = vmor %vm2738_vm6, %vm2739_vm7 }
  0x73   :  { %1486 = vst.msk [vmem:[#allocation2 + $0x138] sm:$0x3] %vm1447_vm1, %v15775_v41  ;;  %vm2742_vm10 = vmor %vm2740_vm8, %vm2741_vm9 }
  0x74   :  { %vm13579_vm12 = vmor %vm2742_vm10, %vm2743_vm11 }
  0x75   :  { %335 = vperm.xlu1 %10803, %v155_v15   ;;  %218 = vperm.xlu0 %10802, %v154_v16  }
  0x79   :  { %340 = vperm.xlu1 %10803, %v161_v17   ;;  %223 = vperm.xlu0 %10802, %v160_v18  }
  0x7d   :  { %727 = vperm.xlu1 %10803, %v157_v19   ;;  %680 = vperm.xlu0 %10802, %v156_v20  }
  0x81   :  { %345 = vperm.xlu1 %10803, %v163_v21   ;;  %228 = vperm.xlu0 %10802, %v162_v22  }
  0x85   :  { %350 = vperm.xlu1 %10803, %v165_v23   ;;  %233 = vperm.xlu0 %10802, %v164_v24  }
  0x89   :  { %1082 = vperm.xlu1 %10803, %v159_v25   ;;  %1035 = vperm.xlu0 %10802, %v158_v26  }
  0x8d   :  { %355 = vperm.xlu1 %10803, %v167_v27   ;;  %238 = vperm.xlu0 %10802, %v166_v28   ;;  %v12242_v28 = vld [vmem:[%s15760_s1 + $0x7] ss:$0 sm:$0xff] }
  0x91   :  { %360 = vperm.xlu1 %10803, %v169_v29   ;;  %243 = vperm.xlu0 %10802, %v168_v30   ;;  %v12247_v29 = vld [vmem:[%s15760_s1 + $0x8] ss:$0 sm:$0xff] }
  0x95   :  { %365 = vperm.xlu1 %10803, %v171_v31   ;;  %248 = vperm.xlu0 %10802, %v170_v32  }
  0x99   :  { %370 = vperm.xlu1 %10803, %v173_v33   ;;  %253 = vperm.xlu0 %10802, %v172_v34  }
  0x9d   :  { %375 = vperm.xlu1 %10803, %v175_v35   ;;  %258 = vperm.xlu0 %10802, %v174_v36  }
  0xa1   :  { %732 = vperm.xlu1 %10803, %v177_v37   ;;  %685 = vperm.xlu0 %10802, %v176_v38  }
  0xa5   :  { %1087 = vperm.xlu1 %10803, %v179_v39   ;;  %1040 = vperm.xlu0 %10802, %v178_v40  }
  0xd4   :  { %v189_v53 = vpop.permute.xlu1 %188  ;;  %v184_v54 = vpop.permute.xlu0 %183 }
  0xd5   :  { %v384_v55 = vmul.f32 %v12187_v46, %v189_v53  ;;  %v534_v56 = vmul.f32 %v12192_v47, %v189_v53  ;;  %v739_v57 = vmul.f32 %v12197_v48, %v189_v53  ;;  %v266_v60 = vmul.f32 %v12206_v51, %v189_v53 }
  0xd6   :  { %v888_v61 = vmul.f32 %v12211_v52, %v189_v53  ;;  %v265_v62 = vmul.f32 %v12206_v51, %v184_v54  ;;  %v382_v3 = vmul.f32 %v12187_v46, %v184_v54  ;;  %v532_v4 = vmul.f32 %v12192_v47, %v184_v54 }
  0xd7   :  { %v450_v1 = vrot.slane %v384_v55, 1  ;;  %v600_v2 = vrot.slane %v534_v56, 2  ;;  %v803_v11 = vrot.slane %v739_v57, 1  ;;  %v692_v12 = vmul.f32 %v12224_v63, %v189_v53 }
  0xd8   :  { %v306_v5 = vpop.permute.xlu1 %305  ;;  %v301_v6 = vpop.permute.xlu0 %300  ;;  %v952_v19 = vrot.slane %v888_v61, 2  ;;  %v447_v20 = vrot.slane %v382_v3, 1  ;;  %v597_v24 = vrot.slane %v532_v4, 2 }
  0xd9   :  { %v385_v7 = vmul.f32 %v12187_v46, %v306_v5  ;;  %v535_v8 = vmul.f32 %v12192_v47, %v306_v5  ;;  %v740_v9 = vmul.f32 %v12197_v48, %v306_v5  ;;  %v889_v10 = vmul.f32 %v12211_v52, %v306_v5 }
  0xda   :  { %v383_v13 = vmul.f32 %v12187_v46, %v301_v6  ;;  %v533_v14 = vmul.f32 %v12192_v47, %v301_v6 }
  0xdb   :  { %v451_v15 = vrot.slane %v385_v7, 1  ;;  %v601_v16 = vrot.slane %v535_v8, 2  ;;  %v804_v17 = vrot.slane %v740_v9, 1  ;;  %v953_v18 = vrot.slane %v889_v10, 2 }
  0xdc   :  { %v448_v21 = vrot.slane %v383_v13, 1  ;;  %v598_v22 = vrot.slane %v533_v14, 2  ;;  %v311_v23 = vpop.permute.xlu1 %310  ;;  %v194_v38 = vpop.permute.xlu0 %193 }
  0xdd   :  { %v452_v25 = vsel %vm446_vm2, %v450_v1, %v451_v15  ;;  %v602_v26 = vsel %vm596_vm3, %v600_v2, %v601_v16  ;;  %v805_v27 = vsel %vm446_vm2, %v803_v11, %v804_v17  ;;  %v954_v31 = vsel %vm596_vm3, %v952_v19, %v953_v18 }
  0xde   :  { %v512_v30 = vadd.f32 %v452_v25, %v266_v60  ;;  %v449_v32 = vsel %vm446_vm2, %v447_v20, %v448_v21  ;;  %v387_v33 = vmul.f32 %v12187_v46, %v311_v23  ;;  %v537_v35 = vmul.f32 %v12192_v47, %v311_v23  ;;  %v12261_v60 = vld [vmem:[%s15760_s1 + $0x6] ss:$0 sm:$0xff] }
  0xdf   :  { %v511_v34 = vadd.f32 %v449_v32, %v265_v62  ;;  %v742_v36 = vmul.f32 %v12197_v48, %v311_v23  ;;  %v891_v37 = vmul.f32 %v12211_v52, %v311_v23  ;;  %v599_v40 = vsel %vm596_vm3, %v597_v24, %v598_v22 }
  0xe0   :  { %v662_v39 = vadd.f32 %v602_v26, %v512_v30  ;;  %v1095_v42 = vmul.f32 %v12242_v28, %v311_v23  ;;  %v1244_v43 = vmul.f32 %v12247_v29, %v311_v23  ;;  %v454_v45 = vrot.slane %v387_v33, 1  ;;  %v316_v8 = vpop.permute.xlu1 %315 }
  0xe1   :  { %v661_v44 = vadd.f32 %v599_v40, %v511_v34  ;;  %v604_v53 = vrot.slane %v537_v35, 2  ;;  %v807_v54 = vrot.slane %v742_v36, 1  ;;  %v956_v55 = vrot.slane %v891_v37, 2  ;;  %v199_v35 = vpop.permute.xlu0 %198  ;;  %v12288_v40 = vld [vmem:[#allocation5] ss:$0 sm:$0xff] }
  0xe2   :  { %v1159_v56 = vrot.slane %v1095_v42, 1  ;;  %v1308_v57 = vrot.slane %v1244_v43, 2  ;;  %v386_v61 = vmul.f32 %v12187_v46, %v194_v38  ;;  %v536_v1 = vmul.f32 %v12192_v47, %v194_v38 }
  0xe3   :  { %v708_v62 = vadd.f32 %v692_v12, %v661_v44  ;;  %v693_v2 = vmul.f32 %v12224_v63, %v194_v38  ;;  %v741_v3 = vmul.f32 %v12197_v48, %v194_v38  ;;  %v267_v4 = vmul.f32 %v12206_v51, %v194_v38 }
  0xe4   :  { %v453_v5 = vrot.slane %v386_v61, 1  ;;  %v890_v6 = vmul.f32 %v12211_v52, %v194_v38  ;;  %v1094_v7 = vmul.f32 %v12242_v28, %v194_v38  ;;  %v1047_v13 = vmul.f32 %v12261_v60, %v194_v38 }
  0xe5   :  { %v867_v9 = vadd.f32 %v805_v27, %v708_v62  ;;  %v709_v10 = vadd.f32 %v693_v2, %v662_v39  ;;  %v806_v11 = vrot.slane %v741_v3, 1  ;;  %v603_v14 = vrot.slane %v536_v1, 2  ;;  %v12293_v62 = vld [vmem:[#allocation7] ss:$0 sm:$0xff] }
  0xe6   :  { %v455_v12 = vsel %vm446_vm2, %v453_v5, %v454_v45  ;;  %v1158_v15 = vrot.slane %v1094_v7, 1  ;;  %v1243_v16 = vmul.f32 %v12247_v29, %v194_v38  ;;  %v955_v19 = vrot.slane %v890_v6, 2  ;;  %v321_v7 = vpop.permute.xlu1 %320 }
  0xe7   :  { %v1016_v17 = vadd.f32 %v954_v31, %v867_v9  ;;  %v808_v18 = vsel %vm446_vm2, %v806_v11, %v807_v54  ;;  %v389_v20 = vmul.f32 %v12187_v46, %v316_v8  ;;  %v513_v21 = vadd.f32 %v455_v12, %v267_v4 }
  0xe8   :  { %v868_v22 = vadd.f32 %v808_v18, %v709_v10  ;;  %v1307_v23 = vrot.slane %v1243_v16, 2  ;;  %v12276_v24 = vmul.f32 %v12192_v47, %v316_v8  ;;  %v1160_v26 = vsel %vm446_vm2, %v1158_v15, %v1159_v56 }
  0xe9   :  { %v1063_v25 = vadd.f32 %v1047_v13, %v1016_v17  ;;  %v744_v27 = vmul.f32 %v12197_v48, %v316_v8  ;;  %v12281_v30 = vmul.f32 %v12211_v52, %v316_v8  ;;  %v457_v32 = vrot.slane %v389_v20, 1 }
  0xea   :  { %v1309_v31 = vsel %vm596_vm3, %v1307_v23, %v1308_v57  ;;  %v1097_v33 = vmul.f32 %v12242_v28, %v316_v8  ;;  %v1246_v34 = vmul.f32 %v12247_v29, %v316_v8  ;;  %v607_v37 = vrot.slane %v12276_v24, 2 }
  0xeb   :  { %v1222_v36 = vadd.f32 %v1160_v26, %v1063_v25  ;;  %v810_v38 = vrot.slane %v744_v27, 1  ;;  %v605_v39 = vsel %vm596_vm3, %v603_v14, %v604_v53  ;;  %v959_v42 = vrot.slane %v12281_v30, 2 }
  0xec   :  { %v1162_v43 = vrot.slane %v1097_v33, 1  ;;  %v663_v44 = vadd.f32 %v605_v39, %v513_v21  ;;  %v957_v45 = vsel %vm596_vm3, %v955_v19, %v956_v55  ;;  %v1311_v56 = vrot.slane %v1246_v34, 2  ;;  %v204_v34 = vpop.permute.xlu0 %203 }
  0xed   :  { %v1371_v54 = vadd.f32 %v1309_v31, %v1222_v36  ;;  %v1017_v57 = vadd.f32 %v957_v45, %v868_v22  ;;  %v388_v61 = vmul.f32 %v12187_v46, %v199_v35  ;;  %v538_v1 = vmul.f32 %v12192_v47, %v199_v35 }
  0xee   :  { %v694_v2 = vmul.f32 %v12224_v63, %v199_v35  ;;  %v743_v53 = vmul.f32 %v12197_v48, %v199_v35  ;;  %v892_v3 = vmul.f32 %v12211_v52, %v199_v35  ;;  %v1048_v55 = vmul.f32 %v12261_v60, %v199_v35 }
  0xef   :  { %v1392_v4 = vmul.f32 %v12288_v40, %v1371_v54  ;;  %v456_v5 = vrot.slane %v388_v61, 1  ;;  %v1096_v6 = vmul.f32 %v12242_v28, %v199_v35  ;;  %v268_v8 = vmul.f32 %v12206_v51, %v199_v35 }
  0xf0   :  { %v606_v9 = vrot.slane %v538_v1, 2  ;;  %v710_v10 = vadd.f32 %v694_v2, %v663_v44  ;;  %v809_v11 = vrot.slane %v743_v53, 1  ;;  %v1064_v14 = vadd.f32 %v1048_v55, %v1017_v57 }
  0xf1   :  { %v1413_v13 = vadd.f32 %v12293_v62, %v1392_v4  ;;  %v458_v12 = vsel %vm446_vm2, %v456_v5, %v457_v32  ;;  %v1161_v15 = vrot.slane %v1096_v6, 1  ;;  %v958_v17 = vrot.slane %v892_v3, 2 }
  0xf2   :  { %v514_v16 = vadd.f32 %v458_v12, %v268_v8  ;;  %v1245_v18 = vmul.f32 %v12247_v29, %v199_v35  ;;  %v391_v19 = vmul.f32 %v12187_v46, %v321_v7  ;;  %v811_v21 = vsel %vm446_vm2, %v809_v11, %v810_v38 }
  0xf3   :  { %v1429_v20 = vmax.f32 %v1413_v13, 0.0  ;;  %v1163_v22 = vsel %vm446_vm2, %v1161_v15, %v1162_v43  ;;  %v12310_v23 = vmul.f32 %v12192_v47, %v321_v7  ;;  %v869_v24 = vadd.f32 %v811_v21, %v710_v10  ;;  %v326_v10 = vpop.permute.xlu1 %325 }
  0xf4   :  { %v1223_v25 = vadd.f32 %v1163_v22, %v1064_v14  ;;  %v1310_v26 = vrot.slane %v1245_v18, 2  ;;  %v746_v27 = vmul.f32 %v12197_v48, %v321_v7  ;;  %v460_v30 = vrot.slane %v391_v19, 1 }
  0xf5   :  { %v12314_v31 = vmul.f32 %v12211_v52, %v321_v7  ;;  %v1099_v32 = vmul.f32 %v12242_v28, %v321_v7  ;;  %v1248_v33 = vmul.f32 %v12247_v29, %v321_v7  ;;  %1488 = vst.msk [vmem:[#allocation2 + $0x11] sm:$0xff] %vm1445_vm0, %v1429_v20  ;;  %v610_v36 = vrot.slane %v12310_v23, 2 }
  0xf6   :  { %v1312_v35 = vsel %vm596_vm3, %v1310_v26, %v1311_v56  ;;  %v813_v38 = vrot.slane %v746_v27, 1  ;;  %v608_v39 = vsel %vm596_vm3, %v606_v9, %v607_v37  ;;  %v960_v54 = vsel %vm596_vm3, %v958_v17, %v959_v42 }
  0xf7   :  { %v1372_v43 = vadd.f32 %v1312_v35, %v1223_v25  ;;  %v962_v44 = vrot.slane %v12314_v31, 2  ;;  %v1165_v45 = vrot.slane %v1099_v32, 1  ;;  %v1314_v57 = vrot.slane %v1248_v33, 2  ;;  %v209_v32 = vpop.permute.xlu0 %208 }
  0xf8   :  { %v664_v61 = vadd.f32 %v608_v39, %v514_v16  ;;  %v1018_v1 = vadd.f32 %v960_v54, %v869_v24  ;;  %v390_v2 = vmul.f32 %v12187_v46, %v204_v34  ;;  %v540_v56 = vmul.f32 %v12192_v47, %v204_v34 }
  0xf9   :  { %v1393_v53 = vmul.f32 %v12288_v40, %v1372_v43  ;;  %v695_v3 = vmul.f32 %v12224_v63, %v204_v34  ;;  %v745_v4 = vmul.f32 %v12197_v48, %v204_v34  ;;  %v894_v5 = vmul.f32 %v12211_v52, %v204_v34 }
  0xfa   :  { %v459_v37 = vrot.slane %v390_v2, 1  ;;  %v1049_v55 = vmul.f32 %v12261_v60, %v204_v34  ;;  %v1098_v42 = vmul.f32 %v12242_v28, %v204_v34  ;;  %v269_v7 = vmul.f32 %v12206_v51, %v204_v34 }
  0xfb   :  { %v1414_v6 = vadd.f32 %v12293_v62, %v1393_v53  ;;  %v609_v8 = vrot.slane %v540_v56, 2  ;;  %v812_v9 = vrot.slane %v745_v4, 1  ;;  %v711_v13 = vadd.f32 %v695_v3, %v664_v61 }
  0xfc   :  { %v461_v11 = vsel %vm446_vm2, %v459_v37, %v460_v30  ;;  %v1065_v12 = vadd.f32 %v1049_v55, %v1018_v1  ;;  %v1164_v14 = vrot.slane %v1098_v42, 1  ;;  %v961_v17 = vrot.slane %v894_v5, 2 }
  0xfd   :  { %v1430_v15 = vmax.f32 %v1414_v6, 0.0  ;;  %v515_v16 = vadd.f32 %v461_v11, %v269_v7  ;;  %v1247_v18 = vmul.f32 %v12247_v29, %v204_v34  ;;  %v814_v19 = vsel %vm446_vm2, %v812_v9, %v813_v38 }
  0xfe   :  { %v1166_v20 = vsel %vm446_vm2, %v1164_v14, %v1165_v45  ;;  %v393_v21 = vmul.f32 %v12187_v46, %v326_v10  ;;  %v12340_v22 = vmul.f32 %v12192_v47, %v326_v10  ;;  %v748_v25 = vmul.f32 %v12197_v48, %v326_v10 }
  0xff   :  { %v1224_v23 = vadd.f32 %v1166_v20, %v1065_v12  ;;  %v1313_v24 = vrot.slane %v1247_v18, 2  ;;  %v12344_v26 = vmul.f32 %v12211_v52, %v326_v10  ;;  %1489 = vst.msk [vmem:[#allocation2 + $0x21] sm:$0xff] %vm1445_vm0, %v1430_v15  ;;  %v870_v27 = vadd.f32 %v814_v19, %v711_v13  ;;  %v331_v12 = vpop.permute.xlu1 %330 }
 0x100   :  { %v463_v30 = vrot.slane %v393_v21, 1  ;;  %v1101_v31 = vmul.f32 %v12242_v28, %v326_v10  ;;  %v1577_v33 = vrot.slane %v12201_v50, 1  ;;  %v613_v35 = vrot.slane %v12340_v22, 2 }
 0x101   :  { %v1315_v34 = vsel %vm596_vm3, %v1313_v24, %v1314_v57  ;;  %v1250_v38 = vmul.f32 %v12247_v29, %v326_v10  ;;  %v611_v39 = vsel %vm596_vm3, %v609_v8, %v610_v36  ;;  %v816_v45 = vrot.slane %v748_v25, 1 }
 0x102   :  { %v1373_v43 = vadd.f32 %v1315_v34, %v1224_v23  ;;  %v965_v54 = vrot.slane %v12344_v26, 2  ;;  %v665_v61 = vadd.f32 %v611_v39, %v515_v16  ;;  %v1168_v1 = vrot.slane %v1101_v31, 1 }
 0x103   :  { %v963_v2 = vsel %vm596_vm3, %v961_v17, %v962_v44  ;;  %v392_v53 = vmul.f32 %v12187_v46, %v209_v32  ;;  %v542_v56 = vmul.f32 %v12192_v47, %v209_v32  ;;  %v696_v4 = vmul.f32 %v12224_v63, %v209_v32 }
 0x104   :  { %v1394_v57 = vmul.f32 %v12288_v40, %v1373_v43  ;;  %v1019_v3 = vadd.f32 %v963_v2, %v870_v27  ;;  %v747_v37 = vmul.f32 %v12197_v48, %v209_v32  ;;  %v1317_v36 = vrot.slane %v1250_v38, 2 }
 0x105   :  { %v462_v5 = vrot.slane %v392_v53, 1  ;;  %v896_v55 = vmul.f32 %v12211_v52, %v209_v32  ;;  %v1050_v42 = vmul.f32 %v12261_v60, %v209_v32  ;;  %v712_v44 = vadd.f32 %v696_v4, %v665_v61 }
 0x106   :  { %v1415_v6 = vadd.f32 %v12293_v62, %v1394_v57  ;;  %v815_v7 = vrot.slane %v747_v37, 1  ;;  %v1100_v8 = vmul.f32 %v12242_v28, %v209_v32  ;;  %v270_v9 = vmul.f32 %v12206_v51, %v209_v32 }
 0x107   :  { %v464_v10 = vsel %vm446_vm2, %v462_v5, %v463_v30  ;;  %v1066_v11 = vadd.f32 %v1050_v42, %v1019_v3  ;;  %v1249_v13 = vmul.f32 %v12247_v29, %v209_v32  ;;  %v612_v15 = vrot.slane %v542_v56, 2  ;;  %v12376_v30 = vpop.permute.xlu0 %213 }
 0x108   :  { %v1431_v14 = vmax.f32 %v1415_v6, 0.0  ;;  %v817_v16 = vsel %vm446_vm2, %v815_v7, %v816_v45  ;;  %v1167_v17 = vrot.slane %v1100_v8, 1  ;;  %v516_v18 = vadd.f32 %v464_v10, %v270_v9 }
 0x109   :  { %v871_v19 = vadd.f32 %v817_v16, %v712_v44  ;;  %v964_v20 = vrot.slane %v896_v55, 2  ;;  %v1316_v21 = vrot.slane %v1249_v13, 2  ;;  %v750_v23 = vmul.f32 %v12197_v48, %v331_v12 }
 0x10a   :  { %v1169_v22 = vsel %vm446_vm2, %v1167_v17, %v1168_v1  ;;  %v899_v24 = vmul.f32 %v12211_v52, %v331_v12  ;;  %v1103_v25 = vmul.f32 %v12242_v28, %v331_v12  ;;  %1490 = vst.msk [vmem:[#allocation2 + $0x31] sm:$0xff] %vm1445_vm0, %v1431_v14  ;;  %v12374_v27 = vmul.f32 %v12187_v46, %v331_v12 }
 0x10b   :  { %v1225_v26 = vadd.f32 %v1169_v22, %v1066_v11  ;;  %v12383_v31 = vsel %vm596_vm3, %v1624_v58, %v1625_v59  ;;  %v12388_v32 = vsel %vm446_vm2, %v1576_v0, %v1577_v33  ;;  %v1318_v34 = vsel %vm596_vm3, %v1316_v21, %v1317_v36  ;;  %v336_v59 = vpop.permute.xlu1 %335  ;;  %v12419_v42 = vpop.permute.xlu0 %218 }
 0x10c   :  { %v12392_v38 = vmul.f32 %v12192_v47, %v331_v12  ;;  %v819_v39 = vrot.slane %v750_v23, 1  ;;  %v1252_v43 = vmul.f32 %v12247_v29, %v331_v12  ;;  %v968_v50 = vrot.slane %v899_v24, 2 }
 0x10d   :  { %v1374_v45 = vadd.f32 %v1318_v34, %v1225_v26  ;;  %v614_v61 = vsel %vm596_vm3, %v612_v15, %v613_v35  ;;  %v966_v58 = vsel %vm596_vm3, %v964_v20, %v965_v54  ;;  %v1171_v1 = vrot.slane %v1103_v25, 1 }
 0x10e   :  { %v666_v49 = vadd.f32 %v614_v61, %v516_v18  ;;  %v1020_v2 = vadd.f32 %v966_v58, %v871_v19  ;;  %v12399_v0 = vmul.f32 %v12187_v46, %v12376_v30  ;;  %v1320_v53 = vrot.slane %v1252_v43, 2 }
 0x10f   :  { %v1395_v33 = vmul.f32 %v12288_v40, %v1374_v45  ;;  %v697_v56 = vmul.f32 %v12224_v63, %v12376_v30  ;;  %v749_v57 = vmul.f32 %v12197_v48, %v12376_v30  ;;  %v12408_v35 = vmul.f32 %v12192_v47, %v12376_v30  ;;  %v341_v12 = vpop.permute.xlu1 %340  ;;  %v224_v43 = vpop.permute.xlu0 %223 }
 0x110   :  { %v898_v54 = vmul.f32 %v12211_v52, %v12376_v30  ;;  %v1051_v3 = vmul.f32 %v12261_v60, %v12376_v30  ;;  %v1102_v4 = vmul.f32 %v12242_v28, %v12376_v30  ;;  %v1251_v55 = vmul.f32 %v12247_v29, %v12376_v30 }
 0x111   :  { %v1416_v37 = vadd.f32 %v12293_v62, %v1395_v33  ;;  %v713_v36 = vadd.f32 %v697_v56, %v666_v49  ;;  %v818_v5 = vrot.slane %v749_v57, 1  ;;  %v12422_v8 = vmul.f32 %v12187_v46, %v336_v59 }
 0x112   :  { %v967_v6 = vrot.slane %v898_v54, 2  ;;  %v1067_v44 = vadd.f32 %v1051_v3, %v1020_v2  ;;  %v1170_v7 = vrot.slane %v1102_v4, 1  ;;  %v466_v10 = vrot.slane %v12374_v27, 1 }
 0x113   :  { %v1432_v9 = vmax.f32 %v1416_v37, 0.0  ;;  %v820_v11 = vsel %vm446_vm2, %v818_v5, %v819_v39  ;;  %v1319_v13 = vrot.slane %v1251_v55, 2  ;;  %v616_v14 = vrot.slane %v12392_v38, 2  ;;  %v728_v33 = vpop.permute.xlu1 %727 }
 0x114   :  { %v465_v15 = vrot.slane %v12399_v0, 1  ;;  %v872_v16 = vadd.f32 %v820_v11, %v713_v36  ;;  %v1172_v17 = vsel %vm446_vm2, %v1170_v7, %v1171_v1  ;;  %v615_v18 = vrot.slane %v12408_v35, 2 }
 0x115   :  { %v1226_v19 = vadd.f32 %v1172_v17, %v1067_v44  ;;  %v469_v20 = vrot.slane %v12422_v8, 1  ;;  %v12432_v21 = vmul.f32 %v12192_v47, %v336_v59  ;;  %1491 = vst.msk [vmem:[#allocation2 + $0x41] sm:$0xff] %vm1445_vm0, %v1432_v9  ;;  %v1321_v22 = vsel %vm596_vm3, %v1319_v13, %v1320_v53 }
 0x116   :  { %v1105_v23 = vmul.f32 %v12242_v28, %v336_v59  ;;  %v1254_v24 = vmul.f32 %v12247_v29, %v336_v59  ;;  %v969_v25 = vsel %vm596_vm3, %v967_v6, %v968_v50  ;;  %v12440_v27 = vmul.f32 %v12197_v48, %v336_v59 }
 0x117   :  { %v1375_v26 = vadd.f32 %v1321_v22, %v1226_v19  ;;  %v1021_v34 = vadd.f32 %v969_v25, %v872_v16  ;;  %v1052_v39 = vmul.f32 %v12261_v60, %v12419_v42  ;;  %v12445_v45 = vmul.f32 %v12211_v52, %v336_v59 }
 0x118   :  { %v1174_v61 = vrot.slane %v1105_v23, 1  ;;  %v1104_v58 = vmul.f32 %v12242_v28, %v12419_v42  ;;  %v1253_v1 = vmul.f32 %v12247_v29, %v12419_v42  ;;  %v399_v2 = vmul.f32 %v12187_v46, %v341_v12 }
 0x119   :  { %v1396_v50 = vmul.f32 %v12288_v40, %v1375_v26  ;;  %v1068_v49 = vadd.f32 %v1052_v39, %v1021_v34  ;;  %v549_v0 = vmul.f32 %v12192_v47, %v341_v12  ;;  %v1323_v53 = vrot.slane %v1254_v24, 2 }
 0x11a   :  { %v1173_v56 = vrot.slane %v1104_v58, 1  ;;  %v1322_v57 = vrot.slane %v1253_v1, 2  ;;  %v398_v59 = vmul.f32 %v12187_v46, %v224_v43  ;;  %v472_v3 = vrot.slane %v399_v2, 1 }
 0x11b   :  { %v1417_v54 = vadd.f32 %v12293_v62, %v1396_v50  ;;  %v273_v4 = vmul.f32 %v12206_v51, %v224_v43  ;;  %v548_v37 = vmul.f32 %v12192_v47, %v224_v43  ;;  %v622_v5 = vrot.slane %v549_v0, 2  ;;  %v681_v43 = vpop.permute.xlu0 %680 }
 0x11c   :  { %v1175_v36 = vsel %vm446_vm2, %v1173_v56, %v1174_v61  ;;  %v471_v55 = vrot.slane %v398_v59, 1  ;;  %v12460_v6 = vmul.f32 %v12197_v48, %v728_v33  ;;  %v12463_v11 = vmul.f32 %v12211_v52, %v728_v33 }
 0x11d   :  { %v1433_v44 = vmax.f32 %v1417_v54, 0.0  ;;  %v1227_v7 = vadd.f32 %v1175_v36, %v1068_v49  ;;  %v621_v9 = vrot.slane %v548_v37, 2  ;;  %v1324_v13 = vsel %vm596_vm3, %v1322_v57, %v1323_v53 }
 0x11e   :  { %v473_v12 = vsel %vm446_vm2, %v471_v55, %v472_v3  ;;  %v1107_v16 = vmul.f32 %v12242_v28, %v728_v33  ;;  %v12469_v17 = vmul.f32 %v12247_v29, %v728_v33  ;;  %v619_v19 = vrot.slane %v12432_v21, 2 }
 0x11f   :  { %v822_v22 = vrot.slane %v12440_v27, 1  ;;  %v1376_v23 = vadd.f32 %v1324_v13, %v1227_v7  ;;  %v519_v24 = vadd.f32 %v473_v12, %v273_v4  ;;  %1492 = vst.msk [vmem:[#allocation2 + $0x51] sm:$0xff] %vm1445_vm0, %v1433_v44  ;;  %v971_v25 = vrot.slane %v12445_v45, 2  ;;  %v229_v36 = vpop.permute.xlu0 %228 }
 0x120   :  { %v825_v26 = vrot.slane %v12460_v6, 1  ;;  %v271_v34 = vmul.f32 %v12206_v51, %v12376_v30  ;;  %v467_v39 = vsel %vm446_vm2, %v465_v15, %v466_v10  ;;  %v623_v58 = vsel %vm596_vm3, %v621_v9, %v622_v5  ;;  %v346_v30 = vpop.permute.xlu1 %345 }
 0x121   :  { %v1397_v61 = vmul.f32 %v12288_v40, %v1376_v23  ;;  %v974_v27 = vrot.slane %v12463_v11, 2  ;;  %v1177_v1 = vrot.slane %v1107_v16, 1  ;;  %v1326_v50 = vrot.slane %v12469_v17, 2  ;;  %v12514_v17 = vld [vmem:[#allocation2 + $0x20] sm:$0xff] }
 0x122   :  { %v517_v49 = vadd.f32 %v467_v39, %v271_v34  ;;  %v751_v45 = vmul.f32 %v12197_v48, %v12419_v42  ;;  %v900_v2 = vmul.f32 %v12211_v52, %v12419_v42  ;;  %v669_v15 = vadd.f32 %v623_v58, %v519_v24  ;;  %v12654_v11 = vld [vmem:[%s15760_s1 + $0x2] ss:$0 sm:$0xff] }
 0x123   :  { %v1418_v10 = vadd.f32 %v12293_v62, %v1397_v61  ;;  %v617_v0 = vsel %vm596_vm3, %v615_v18, %v616_v14  ;;  %v698_v33 = vmul.f32 %v12224_v63, %v12419_v42  ;;  %v1106_v59 = vmul.f32 %v12242_v28, %v681_v43 }
 0x124   :  { %v667_v53 = vadd.f32 %v617_v0, %v517_v49  ;;  %v821_v56 = vrot.slane %v751_v45, 1  ;;  %v970_v57 = vrot.slane %v900_v2, 2  ;;  %v12497_v3 = vmul.f32 %v12224_v63, %v681_v43 }
 0x125   :  { %v1434_v54 = vmax.f32 %v1418_v10, 0.0  ;;  %v1255_v4 = vmul.f32 %v12247_v29, %v681_v43  ;;  %v401_v38 = vmul.f32 %v12187_v46, %v346_v30  ;;  %v12502_v35 = vmul.f32 %v12197_v48, %v681_v43 }
 0x126   :  { %v714_v37 = vadd.f32 %v698_v33, %v667_v53  ;;  %v12505_v14 = vmul.f32 %v12211_v52, %v681_v43  ;;  %v1176_v18 = vrot.slane %v1106_v59, 1  ;;  %v823_v5 = vsel %vm446_vm2, %v821_v56, %v822_v22  ;;  %v351_v53 = vpop.permute.xlu1 %350 }
 0x127   :  { %v972_v55 = vsel %vm596_vm3, %v970_v57, %v971_v25  ;;  %v1053_v44 = vmul.f32 %v12261_v60, %v681_v43  ;;  %1493 = vst.msk [vmem:[#allocation2 + $0x61] sm:$0xff] %vm1445_vm0, %v1434_v54  ;;  %v756_v7 = vmul.f32 %v12197_v48, %v346_v30  ;;  %v1325_v13 = vrot.slane %v1255_v4, 2 }
 0x128   :  { %v873_v9 = vadd.f32 %v823_v5, %v714_v37  ;;  %v551_v12 = vmul.f32 %v12192_v47, %v346_v30  ;;  %v905_v16 = vmul.f32 %v12211_v52, %v346_v30  ;;  %v1178_v23 = vsel %vm446_vm2, %v1176_v18, %v1177_v1  ;;  %v12525_v1 = vld [vmem:[#allocation2 + $0x28] sm:$0x3] }
 0x129   :  { %v475_v24 = vrot.slane %v401_v38, 1  ;;  %v274_v22 = vmul.f32 %v12206_v51, %v229_v36  ;;  %v400_v25 = vmul.f32 %v12187_v46, %v229_v36  ;;  %v828_v39 = vrot.slane %v756_v7, 1 }
 0x12a   :  { %v1022_v34 = vadd.f32 %v972_v55, %v873_v9  ;;  %v550_v43 = vmul.f32 %v12192_v47, %v229_v36  ;;  %v700_v61 = vmul.f32 %v12224_v63, %v229_v36  ;;  %v755_v49 = vmul.f32 %v12197_v48, %v229_v36 }
 0x12b   :  { %v474_v58 = vrot.slane %v400_v25, 1  ;;  %v904_v45 = vmul.f32 %v12211_v52, %v229_v36  ;;  %v10804_v2 = vpack.i.bf16 %v12383_v31, %v12514_v17  ;;  %v625_v10 = vrot.slane %v551_v12, 2  ;;  %v234_v12 = vpop.permute.xlu0 %233 }
 0x12c   :  { %v1069_v30 = vadd.f32 %v1053_v44, %v1022_v34  ;;  %v977_v0 = vrot.slane %v905_v16, 2  ;;  %v716_v33 = vadd.f32 %v700_v61, %v669_v15  ;;  %v624_v57 = vrot.slane %v550_v43, 2 }
 0x12d   :  { %v476_v56 = vsel %vm446_vm2, %v474_v58, %v475_v24  ;;  %v827_v59 = vrot.slane %v755_v49, 1  ;;  %10805 = vrot.lane.b32.xlu1 %v10804_v2, %s11873_s6  ;;  %v1630_v54 = vrot.slane %v12514_v17, 2  ;;  %v976_v37 = vrot.slane %v904_v45, 2 }
 0x12e   :  { %v1228_v4 = vadd.f32 %v1178_v23, %v1069_v30  ;;  %v520_v38 = vadd.f32 %v476_v56, %v274_v22  ;;  %v1631_v31 = vrot.slane %v12525_v1, 2  ;;  %v1327_v18 = vsel %vm596_vm3, %v1325_v13, %v1326_v50 }
 0x12f   :  { %v829_v36 = vsel %vm446_vm2, %v827_v59, %v828_v39  ;;  %v403_v15 = vmul.f32 %v12187_v46, %v351_v53  ;;  %v12535_v5 = vmul.f32 %v12192_v47, %v351_v53  ;;  %v824_v55 = vrot.slane %v12502_v35, 1 }
 0x130   :  { %v1377_v44 = vadd.f32 %v1327_v18, %v1228_v4  ;;  %v875_v7 = vadd.f32 %v829_v36, %v716_v33  ;;  %v12539_v9 = vsel %vm596_vm3, %v1630_v54, %v1631_v31  ;;  %v626_v16 = vsel %vm596_vm3, %v624_v57, %v625_v10  ;;  %v12566_v4 = vld [vmem:[#allocation2 + $0x10] sm:$0xff] }
 0x131   :  { %v1583_v23 = vrot.slane %v12525_v1, 1  ;;  %10709 = vmatprep.mubr.msk.f32.mxu1 %vm1445_vm0, %v12539_v9  ;;  %v758_v50 = vmul.f32 %v12197_v48, %v351_v53  ;;  %v12547_v13 = vmul.f32 %v12211_v52, %v351_v53  ;;  %v670_v22 = vadd.f32 %v626_v16, %v520_v38  ;;  %v12568_v38 = vld [vmem:[#allocation2 + $0x18] sm:$0x3] }
 0x132   :  { %v1398_v24 = vmul.f32 %v12288_v40, %v1377_v44  ;;  %v978_v25 = vsel %vm596_vm3, %v976_v37, %v977_v0  ;;  %v1111_v34 = vmul.f32 %v12242_v28, %v351_v53  ;;  %v478_v39 = vrot.slane %v403_v15, 1  ;;  %v12578_v16 = vld [vmem:[#allocation2 + $0x38] sm:$0x3] }
 0x133   :  { %v628_v43 = vrot.slane %v12535_v5, 2  ;;  %v1260_v61 = vmul.f32 %v12247_v29, %v351_v53  ;;  %v402_v58 = vmul.f32 %v12187_v46, %v234_v12  ;;  %v1024_v45 = vadd.f32 %v978_v25, %v875_v7  ;;  %v12703_v5 = vld [vmem:[%s15760_s1 + $0x3] ss:$0 sm:$0xff] }
 0x134   :  { %v1419_v49 = vadd.f32 %v12293_v62, %v1398_v24  ;;  %v831_v2 = vrot.slane %v758_v50, 1  ;;  %v12557_v30 = vmul.f32 %v12192_v47, %v234_v12  ;;  %v980_v10 = vrot.slane %v12547_v13, 2  ;;  %v1083_v50 = vpop.permute.xlu1 %1082 }
 0x135   :  { %v1183_v33 = vrot.slane %v1111_v34, 1  ;;  %v477_v0 = vrot.slane %v402_v58, 1  ;;  %v757_v56 = vmul.f32 %v12197_v48, %v234_v12  ;;  %v12562_v59 = vmul.f32 %v12211_v52, %v234_v12  ;;  %v12573_v48 = vld [vmem:[#allocation2 + $0x30] sm:$0xff] }
 0x136   :  { %v1435_v57 = vmax.f32 %v1419_v49, 0.0  ;;  %v1055_v53 = vmul.f32 %v12261_v60, %v234_v12  ;;  %v1110_v54 = vmul.f32 %v12242_v28, %v234_v12  ;;  %v1332_v37 = vrot.slane %v1260_v61, 2 }
 0x137   :  { %v275_v31 = vmul.f32 %v12206_v51, %v234_v12  ;;  %v627_v18 = vrot.slane %v12557_v30, 2  ;;  %v701_v36 = vmul.f32 %v12224_v63, %v234_v12  ;;  %v479_v52 = vsel %vm446_vm2, %v477_v0, %v478_v39 }
 0x138   :  { %1494 = vst.msk [vmem:[#allocation2 + $0x71] sm:$0xff] %vm1445_vm0, %v1435_v57  ;;  %v1071_v15 = vadd.f32 %v1055_v53, %v1024_v45  ;;  %v1182_v44 = vrot.slane %v1110_v54, 1  ;;  %v1259_v7 = vmul.f32 %v12247_v29, %v234_v12  ;;  %v830_v25 = vrot.slane %v757_v56, 1  ;;  %v1036_v54 = vpop.permute.xlu0 %1035 }
 0x139   :  { %v717_v24 = vadd.f32 %v701_v36, %v670_v22  ;;  %v1627_v34 = vrot.slane %v12566_v4, 2  ;;  %v1628_v61 = vrot.slane %v12568_v38, 2  ;;  %v979_v63 = vrot.slane %v12562_v59, 2 }
 0x13a   :  { %v1184_v58 = vsel %vm446_vm2, %v1182_v44, %v1183_v33  ;;  %v1331_v49 = vrot.slane %v1259_v7, 2  ;;  %v1633_v39 = vrot.slane %v12573_v48, 2  ;;  %v1634_v12 = vrot.slane %v12578_v16, 2 }
 0x13b   :  { %v1230_v45 = vadd.f32 %v1184_v58, %v1071_v15  ;;  %v12586_v0 = vsel %vm596_vm3, %v1627_v34, %v1628_v61  ;;  %v1109_v22 = vmul.f32 %v12242_v28, %v1083_v50  ;;  %v12590_v56 = vadd.f32 %v479_v52, %v275_v31 }
 0x13c   :  { %v1333_v57 = vsel %vm596_vm3, %v1331_v49, %v1332_v37  ;;  %v10819_v53 = vpack.i.bf16 %v12388_v32, %v12586_v0  ;;  %v1258_v33 = vmul.f32 %v12247_v29, %v1083_v50  ;;  %v832_v36 = vsel %vm446_vm2, %v830_v25, %v831_v2  ;;  %v12614_v49 = vld [vmem:[#allocation2 + $0x40] sm:$0xff] }
 0x13d   :  { %v1379_v15 = vadd.f32 %v1333_v57, %v1230_v45  ;;  %v12598_v44 = vsel %vm596_vm3, %v1633_v39, %v1634_v12  ;;  %v396_v7 = vmul.f32 %v12187_v46, %v12419_v42  ;;  %v876_v34 = vadd.f32 %v832_v36, %v717_v24  ;;  %v12626_v39 = vld [vmem:[#allocation2 + $0x48] sm:$0x3]  ;;  %v356_v45 = vpop.permute.xlu1 %355 }
 0x13e   :  { %10820 = vrot.lane.b32.xlu0 %v10819_v53, %s11863_s27  ;;  %10710 = vmatmul.mubr.msk.f32.vlgmr.msra.gmra.mxu1 %vm1445_vm0, %v12598_v44  ;;  %v1180_v37 = vrot.slane %v1109_v22, 1  ;;  %v272_v32 = vmul.f32 %v12206_v51, %v12419_v42  ;;  %v546_v2 = vmul.f32 %v12192_v47, %v12419_v42  ;;  %v1329_v52 = vrot.slane %v1258_v33, 2  ;;  %v12668_v33 = vld [vmem:[%s15760_s1 + $0x5] ss:$0 sm:$0xff] }
 0x13f   :  { %v1400_v31 = vmul.f32 %v12288_v40, %v1379_v15  ;;  %v468_v50 = vrot.slane %v396_v7, 1  ;;  %v1108_v25 = vmul.f32 %v12242_v28, %v1036_v54  ;;  %v973_v24 = vrot.slane %v12505_v14, 2 }
 0x140   :  { %v618_v46 = vrot.slane %v546_v2, 2  ;;  %v1257_v61 = vmul.f32 %v12247_v29, %v1036_v54  ;;  %v1582_v58 = vrot.slane %v12514_v17, 1  ;;  %v826_v42 = vsel %vm446_vm2, %v824_v55, %v825_v26 }
 0x141   :  { %v1421_v51 = vadd.f32 %v12293_v62, %v1400_v31  ;;  %v470_v47 = vsel %vm446_vm2, %v468_v50, %v469_v20  ;;  %v1054_v14 = vmul.f32 %v12261_v60, %v1036_v54  ;;  %v1179_v12 = vrot.slane %v1108_v25, 1  ;;  %v239_v31 = vpop.permute.xlu0 %238 }
 0x142   :  { %v518_v17 = vadd.f32 %v470_v47, %v272_v32  ;;  %v1328_v22 = vrot.slane %v1257_v61, 2  ;;  %v12631_v8 = vsel %vm446_vm2, %v1582_v58, %v1583_v23  ;;  %v620_v6 = vsel %vm596_vm3, %v618_v46, %v619_v19  ;;  %v12646_v23 = vld [vmem:[%s15760_s1 + $0x1] ss:$0 sm:$0xff] }
 0x143   :  { %v1437_v20 = vmax.f32 %v1421_v51, 0.0  ;;  %v10824_v26 = vpack.i.bf16 %v12566_v4, %v12631_v8  ;;  %v1636_v35 = vrot.slane %v12614_v49, 2  ;;  %v975_v57 = vsel %vm596_vm3, %v973_v24, %v974_v27  ;;  %v12662_v27 = vld [vmem:[%s15760_s1 + $0x4] ss:$0 sm:$0xff] }
 0x144   :  { %v668_v55 = vadd.f32 %v620_v6, %v518_v17  ;;  %v1637_v1 = vrot.slane %v12626_v39, 2  ;;  %v405_v21 = vmul.f32 %v12646_v23, %v356_v45  ;;  %v12657_v19 = vmul.f32 %v12654_v11, %v356_v45 }
 0x145   :  { %1496 = vst.msk [vmem:[#allocation2 + $0xb1] sm:$0xff] %vm1445_vm0, %v1437_v20  ;;  %10825 = vrot.lane.b32.xlu0 %v10824_v26, %s11877_s24  ;;  %v760_v53 = vmul.f32 %v12662_v27, %v356_v45  ;;  %v12671_v54 = vmul.f32 %v12668_v33, %v356_v45  ;;  %v1113_v36 = vmul.f32 %v12242_v28, %v356_v45 }
 0x146   :  { %v715_v15 = vadd.f32 %v12497_v3, %v668_v55  ;;  %v1181_v7 = vsel %vm446_vm2, %v1179_v12, %v1180_v37  ;;  %v1330_v32 = vsel %vm596_vm3, %v1328_v22, %v1329_v52  ;;  %v12678_v2 = vsel %vm596_vm3, %v1636_v35, %v1637_v1  ;;  %v12720_v55 = vld [vmem:[#allocation2 + $0x50] sm:$0xff] }
 0x147   :  { %10712 = vmatprep.mubr.msk.f32.mxu1 %vm1445_vm0, %v12678_v2  ;;  %v481_v50 = vrot.slane %v405_v21, 1  ;;  %v631_v25 = vrot.slane %v12657_v19, 2  ;;  %v834_v46 = vrot.slane %v760_v53, 1  ;;  %v1262_v24 = vmul.f32 %v12247_v29, %v356_v45  ;;  %v12724_v53 = vld [vmem:[#allocation2 + $0x58] sm:$0x3] }
 0x148   :  { %v874_v61 = vadd.f32 %v826_v42, %v715_v15  ;;  %v983_v3 = vrot.slane %v12671_v54, 2  ;;  %v629_v37 = vsel %vm596_vm3, %v627_v18, %v628_v43  ;;  %v981_v52 = vsel %vm596_vm3, %v979_v63, %v980_v10  ;;  %v2136_v15 = vld [vmem:[#allocation3 + $0xf0] sm:$0xff] }
 0x149   :  { %v1186_v58 = vrot.slane %v1113_v36, 1  ;;  %v671_v51 = vadd.f32 %v629_v37, %v12590_v56  ;;  %v1025_v47 = vadd.f32 %v981_v52, %v876_v34  ;;  %v404_v42 = vmul.f32 %v12646_v23, %v239_v31  ;;  %v12715_v34 = vld [vmem:[%s15760_s1] ss:$0 sm:$0xff]  ;;  %v361_v36 = vpop.permute.xlu1 %360 }
 0x14a   :  { %v1023_v45 = vadd.f32 %v975_v57, %v874_v61  ;;  %v12698_v17 = vmul.f32 %v12654_v11, %v239_v31  ;;  %v702_v13 = vmul.f32 %v12703_v5, %v239_v31  ;;  %v759_v43 = vmul.f32 %v12662_v27, %v239_v31 }
 0x14b   :  { %v480_v30 = vrot.slane %v404_v42, 1  ;;  %v12708_v10 = vmul.f32 %v12668_v33, %v239_v31  ;;  %v1056_v59 = vmul.f32 %v12261_v60, %v239_v31  ;;  %v1112_v18 = vmul.f32 %v12242_v28, %v239_v31  ;;  %v2137_v60 = vld [vmem:[#allocation3 + $0xf8] sm:$0xff]  ;;  %v2119_v42 = vld [vmem:[#allocation3 + $0x68] sm:$0xff] }
 0x14c   :  { %v1070_v63 = vadd.f32 %v1054_v14, %v1023_v45  ;;  %v1335_v56 = vrot.slane %v1262_v24, 2  ;;  %v276_v12 = vmul.f32 %v12715_v34, %v239_v31  ;;  %v833_v22 = vrot.slane %v759_v43, 1  ;;  %v2121_v28 = vld [vmem:[#allocation3 + $0x78] sm:$0xff]  ;;  %10433 = vmatprep.subr.mxu0 %v2137_v60 }
 0x14d   :  { %v482_v20 = vsel %vm446_vm2, %v480_v30, %v481_v50  ;;  %v630_v6 = vrot.slane %v12698_v17, 2  ;;  %v1072_v26 = vadd.f32 %v1056_v59, %v1025_v47  ;;  %v1185_v35 = vrot.slane %v1112_v18, 1  ;;  %10434 = vmatpush3.msra.mxu0 %v2121_v28  ;;  %v2134_v30 = vld [vmem:[#allocation3 + $0xe0] sm:$0xff] }
 0x14e   :  { %v1229_v14 = vadd.f32 %v1181_v7, %v1070_v63  ;;  %v718_v57 = vadd.f32 %v702_v13, %v671_v51  ;;  %v982_v1 = vrot.slane %v12708_v10, 2  ;;  %v1261_v21 = vmul.f32 %v12247_v29, %v239_v31  ;;  %10435 = vmatprep.subr.mxu0 %v2136_v15  ;;  %v12753_v18 = vld [vmem:[%s15760_s1 + $0x7] ss:$0 sm:$0xff]  ;;  %v2117_v15 = vld [vmem:[#allocation3 + $0x58] sm:$0xff] }
 0x14f   :  { %v522_v50 = vadd.f32 %v482_v20, %v276_v12  ;;  %v835_v24 = vsel %vm446_vm2, %v833_v22, %v834_v46  ;;  %v1187_v61 = vsel %vm446_vm2, %v1185_v35, %v1186_v58  ;;  %v10834_v37 = vpack.i.bf16 %v12586_v0, %v12573_v48  ;;  %v2120_v0 = vld [vmem:[#allocation3 + $0x70] sm:$0xff] }
 0x150   :  { %v1378_v7 = vadd.f32 %v1330_v32, %v1229_v14  ;;  %v1231_v52 = vadd.f32 %v1187_v61, %v1072_v26  ;;  %v1334_v51 = vrot.slane %v1261_v21, 2  ;;  %v1639_v47 = vrot.slane %v12720_v55, 2  ;;  %v2135_v32 = vld [vmem:[#allocation3 + $0xe8] sm:$0xff]  ;;  %10436 = vmatpush3.msra.mxu0 %v2120_v0  ;;  %v244_v26 = vpop.permute.xlu0 %243  ;;  %v2133_v21 = vld [vmem:[#allocation3 + $0xd8] sm:$0xff]  ;;  %v2116_v0 = vld [vmem:[#allocation3 + $0x50] sm:$0xff] }
 0x151   :  { %10835 = vrot.lane.b32.xlu0 %v10834_v37, %s11873_s6  ;;  %v1640_v29 = vrot.slane %v12724_v53, 2  ;;  %v12734_v31 = vmul.f32 %v12646_v23, %v361_v36  ;;  %v12737_v46 = vmul.f32 %v12654_v11, %v361_v36  ;;  %v12740_v58 = vmul.f32 %v12662_v27, %v361_v36  ;;  %10437 = vmatprep.subr.mxu0 %v2135_v32  ;;  %v12775_v61 = vld [vmem:[%s15760_s1 + $0x8] ss:$0 sm:$0xff] }
 0x152   :  { %v1399_v45 = vmul.f32 %v12288_v40, %v1378_v7  ;;  %v877_v17 = vadd.f32 %v835_v24, %v718_v57  ;;  %v1336_v13 = vsel %vm596_vm3, %v1334_v51, %v1335_v56  ;;  %v12745_v43 = vmul.f32 %v12668_v33, %v361_v36  ;;  %10438 = vmatpush3.msra.mxu0 %v2119_v42  ;;  %v2118_v57 = vld [vmem:[#allocation3 + $0x60] sm:$0xff]  ;;  %v2131_v32 = vld [vmem:[#allocation3 + $0xc8] sm:$0xff] }
 0x153   :  { %v1380_v10 = vadd.f32 %v1336_v13, %v1231_v52  ;;  %v12748_v59 = vsel %vm596_vm3, %v1639_v47, %v1640_v29  ;;  %v12756_v63 = vmul.f32 %v12753_v18, %v361_v36  ;;  %v484_v12 = vrot.slane %v12734_v31, 1  ;;  %10439 = vmatprep.subr.mxu0 %v2134_v30  ;;  %v12798_v51 = vld [vmem:[#allocation2 + $0x60] sm:$0xff]  ;;  %v2115_v42 = vld [vmem:[#allocation3 + $0x48] sm:$0xff] }
 0x154   :  { %v1420_v56 = vadd.f32 %v12293_v62, %v1399_v45  ;;  %10713 = vmatmul.mubr.msk.f32.gmra.mxu1 %vm1445_vm0, %v12748_v59  ;;  %v634_v22 = vrot.slane %v12737_v46, 2  ;;  %v837_v20 = vrot.slane %v12740_v58, 1  ;;  %v986_v60 = vrot.slane %v12745_v43, 2  ;;  %10440 = vmatpush3.msra.mxu0 %v2118_v57  ;;  %v366_v57 = vpop.permute.xlu1 %365 }
 0x155   :  { %v1401_v35 = vmul.f32 %v12288_v40, %v1380_v10  ;;  %v632_v28 = vsel %vm596_vm3, %v630_v6, %v631_v25  ;;  %v984_v14 = vsel %vm596_vm3, %v982_v1, %v983_v3  ;;  %v12778_v40 = vmul.f32 %v12775_v61, %v361_v36  ;;  %v2132_v25 = vld [vmem:[#allocation3 + $0xd0] sm:$0xff]  ;;  %10441 = vmatprep.subr.mxu0 %v2133_v21  ;;  %v12803_v10 = vld [vmem:[#allocation2 + $0x68] sm:$0x3] }
 0x156   :  { %v1436_v24 = vmax.f32 %v1420_v56, 0.0  ;;  %v672_v19 = vadd.f32 %v632_v28, %v522_v50  ;;  %v1026_v37 = vadd.f32 %v984_v14, %v877_v17  ;;  %v1189_v3 = vrot.slane %v12756_v63, 1  ;;  %10442 = vmatpush3.msra.mxu0 %v2117_v15  ;;  %v2130_v63 = vld [vmem:[#allocation3 + $0xc0] sm:$0xff] }
 0x157   :  { %v1422_v54 = vadd.f32 %v12293_v62, %v1401_v35  ;;  %v406_v6 = vmul.f32 %v12646_v23, %v244_v26  ;;  %v12784_v1 = vmul.f32 %v12654_v11, %v244_v26  ;;  %v703_v7 = vmul.f32 %v12703_v5, %v244_v26  ;;  %v12795_v62 = vld [vmem:[%s15760_s1 + $0x6] ss:$0 sm:$0xff]  ;;  %10443 = vmatprep.subr.mxu0 %v2132_v25 }
 0x158   :  { %1495 = vst.msk [vmem:[#allocation2 + $0x81] sm:$0xff] %vm1445_vm0, %v1436_v24  ;;  %v761_v36 = vmul.f32 %v12662_v27, %v244_v26  ;;  %v12790_v50 = vmul.f32 %v12668_v33, %v244_v26  ;;  %v1057_v52 = vmul.f32 %v12795_v62, %v244_v26  ;;  %v277_v29 = vmul.f32 %v12715_v34, %v244_v26  ;;  %v2114_v25 = vld [vmem:[#allocation3 + $0x40] sm:$0xff] }
 0x159   :  { %v1438_v47 = vmax.f32 %v1422_v54, 0.0  ;;  %v483_v31 = vrot.slane %v406_v6, 1  ;;  %v1114_v58 = vmul.f32 %v12753_v18, %v244_v26  ;;  %v1338_v45 = vrot.slane %v12778_v40, 2  ;;  %10444 = vmatpush3.msra.mxu0 %v2116_v0  ;;  %v2129_v54 = vld [vmem:[#allocation3 + $0xb8] sm:$0xff] }
 0x15a   :  { %v719_v17 = vadd.f32 %v703_v7, %v672_v19  ;;  %v836_v13 = vrot.slane %v761_v36, 1  ;;  %v1073_v30 = vadd.f32 %v1057_v52, %v1026_v37  ;;  %v1263_v28 = vmul.f32 %v12775_v61, %v244_v26  ;;  %10445 = vmatprep.subr.mxu0 %v2131_v32  ;;  %v2113_v6 = vld [vmem:[#allocation3 + $0x38] sm:$0xff]  ;;  %v249_v32 = vpop.permute.xlu0 %248 }
 0x15b   :  { %1497 = vst.msk [vmem:[#allocation2 + $0xc1] sm:$0xff] %vm1445_vm0, %v1438_v47  ;;  %v485_v56 = vsel %vm446_vm2, %v483_v31, %v484_v12  ;;  %v1188_v35 = vrot.slane %v1114_v58, 1  ;;  %v10844_v14 = vpack.i.bf16 %v12631_v8, %v12598_v44  ;;  %v633_v15 = vrot.slane %v12784_v1, 2  ;;  %10446 = vmatpush3.msra.mxu0 %v2115_v42 }
 0x15c   :  { %v523_v21 = vadd.f32 %v485_v56, %v277_v29  ;;  %v985_v24 = vrot.slane %v12790_v50, 2  ;;  %v1642_v40 = vrot.slane %v12798_v51, 2  ;;  %v838_v19 = vsel %vm446_vm2, %v836_v13, %v837_v20  ;;  %10447 = vmatprep.subr.mxu0 %v2130_v63  ;;  %v2128_v20 = vld [vmem:[#allocation3 + $0xb0] sm:$0xff]  ;;  %v2127_v63 = vld [vmem:[#allocation3 + $0xa8] sm:$0xff] }
 0x15d   :  { %v1190_v12 = vsel %vm446_vm2, %v1188_v35, %v1189_v3  ;;  %v1337_v37 = vrot.slane %v1263_v28, 2  ;;  %10845 = vrot.lane.b32.xlu0 %v10844_v14, %s11863_s27  ;;  %v1643_v26 = vrot.slane %v12803_v10, 2  ;;  %v409_v1 = vmul.f32 %v12646_v23, %v366_v57  ;;  %10448 = vmatpush3.msra.mxu0 %v2114_v25  ;;  %v2111_v56 = vld [vmem:[#allocation3 + $0x28] sm:$0xff]  ;;  %v12842_v35 = vld [vmem:[#allocation5] ss:$0 sm:$0xff] }
 0x15e   :  { %v1232_v7 = vadd.f32 %v1190_v12, %v1073_v30  ;;  %v12819_v36 = vmul.f32 %v12654_v11, %v366_v57  ;;  %v12822_v50 = vmul.f32 %v12662_v27, %v366_v57  ;;  %v878_v3 = vadd.f32 %v838_v19, %v719_v17  ;;  %10449 = vmatprep.subr.mxu0 %v2129_v54  ;;  %v2112_v30 = vld [vmem:[#allocation3 + $0x30] sm:$0xff]  ;;  %v2126_v12 = vld [vmem:[#allocation3 + $0xa0] sm:$0xff] }
 0x15f   :  { %v1339_v52 = vsel %vm596_vm3, %v1337_v37, %v1338_v45  ;;  %v12826_v47 = vsel %vm596_vm3, %v1642_v40, %v1643_v26  ;;  %v12829_v29 = vmul.f32 %v12753_v18, %v366_v57  ;;  %v1589_v31 = vrot.slane %v12626_v39, 1  ;;  %10450 = vmatpush3.msra.mxu0 %v2113_v6  ;;  %v12854_v26 = vld [vmem:[#allocation7] ss:$0 sm:$0xff] }
 0x160   :  { %v1381_v58 = vadd.f32 %v1339_v52, %v1232_v7  ;;  %10715 = vmatprep.mubr.msk.f32.mxu1 %vm1445_vm0, %v12826_v47  ;;  %v12835_v0 = vmul.f32 %v12668_v33, %v366_v57  ;;  %v487_v42 = vrot.slane %v409_v1, 1  ;;  %v637_v45 = vrot.slane %v12819_v36, 2  ;;  %10451 = vmatprep.subr.mxu0 %v2128_v20  ;;  %v2110_v7 = vld [vmem:[#allocation3 + $0x20] sm:$0xff]  ;;  %v2125_v1 = vld [vmem:[#allocation3 + $0x98] sm:$0xff] }
 0x161   :  { %v840_v17 = vrot.slane %v12822_v50, 1  ;;  %v635_v13 = vsel %vm596_vm3, %v633_v15, %v634_v22  ;;  %v1266_v14 = vmul.f32 %v12775_v61, %v366_v57  ;;  %v987_v19 = vsel %vm596_vm3, %v985_v24, %v986_v60  ;;  %10452 = vmatpush3.msra.mxu0 %v2112_v30  ;;  %v2109_v50 = vld [vmem:[#allocation3 + $0x18] sm:$0xff] }
 0x162   :  { %v1402_v28 = vmul.f32 %v12842_v35, %v1381_v58  ;;  %v673_v40 = vadd.f32 %v635_v13, %v523_v21  ;;  %v1192_v46 = vrot.slane %v12829_v29, 1  ;;  %v1027_v22 = vadd.f32 %v987_v19, %v878_v3  ;;  %10453 = vmatprep.subr.mxu0 %v2127_v63  ;;  %v12865_v58 = vld [vmem:[#allocation2 + $0x70] sm:$0xff]  ;;  %v12869_v19 = vld [vmem:[#allocation2 + $0x78] sm:$0x3] }
 0x163   :  { %v408_v15 = vmul.f32 %v12646_v23, %v249_v32  ;;  %v12852_v37 = vmul.f32 %v12654_v11, %v249_v32  ;;  %v704_v21 = vmul.f32 %v12703_v5, %v249_v32  ;;  %v763_v43 = vmul.f32 %v12662_v27, %v249_v32  ;;  %10454 = vmatpush3.msra.mxu0 %v2111_v56  ;;  %v2124_v13 = vld [vmem:[#allocation3 + $0x90] sm:$0xff] }
 0x164   :  { %v1423_v57 = vadd.f32 %v12854_v26, %v1402_v28  ;;  %v12860_v60 = vmul.f32 %v12668_v33, %v249_v32  ;;  %v278_v24 = vmul.f32 %v12715_v34, %v249_v32  ;;  %v1058_v54 = vmul.f32 %v12795_v62, %v249_v32  ;;  %10455 = vmatprep.subr.mxu0 %v2126_v12 }
 0x165   :  { %v486_v25 = vrot.slane %v408_v15, 1  ;;  %v1116_v6 = vmul.f32 %v12753_v18, %v249_v32  ;;  %v1341_v3 = vrot.slane %v1266_v14, 2  ;;  %v720_v52 = vadd.f32 %v704_v21, %v673_v40  ;;  %10456 = vmatpush3.msra.mxu0 %v2110_v7 }
 0x166   :  { %v1439_v20 = vmax.f32 %v1423_v57, 0.0  ;;  %v839_v29 = vrot.slane %v763_v43, 1  ;;  %v1074_v63 = vadd.f32 %v1058_v54, %v1027_v22  ;;  %v1265_v28 = vmul.f32 %v12775_v61, %v249_v32  ;;  %10457 = vmatprep.subr.mxu0 %v2125_v1  ;;  %v371_v57 = vpop.permute.xlu1 %370  ;;  %v2108_v43 = vld [vmem:[#allocation3 + $0x10] sm:$0xff]  ;;  %v2107_v54 = vld [vmem:[#allocation3 + $0x8] sm:$0xff] }
 0x167   :  { %v488_v30 = vsel %vm446_vm2, %v486_v25, %v487_v42  ;;  %v1191_v56 = vrot.slane %v1116_v6, 1  ;;  %v989_v12 = vrot.slane %v12835_v0, 2  ;;  %v636_v14 = vrot.slane %v12852_v37, 2  ;;  %10458 = vmatpush3.msra.mxu0 %v2109_v50  ;;  %v2123_v25 = vld [vmem:[#allocation3 + $0x88] sm:$0xff]  ;;  %v2122_v50 = vld [vmem:[#allocation3 + $0x80] sm:$0xff] }
 0x168   :  { %1498 = vst.msk [vmem:[#allocation2 + $0xd1] sm:$0xff] %vm1445_vm0, %v1439_v20  ;;  %v988_v40 = vrot.slane %v12860_v60, 2  ;;  %v1588_v15 = vrot.slane %v12614_v49, 1  ;;  %v524_v42 = vadd.f32 %v488_v30, %v278_v24  ;;  %v1340_v21 = vrot.slane %v1265_v28, 2  ;;  %10459 = vmatprep.subr.mxu0 %v2124_v13 }
 0x169   :  { %v1193_v22 = vsel %vm446_vm2, %v1191_v56, %v1192_v46  ;;  %v1645_v32 = vrot.slane %v12865_v58, 2  ;;  %v841_v0 = vsel %vm446_vm2, %v839_v29, %v840_v17  ;;  %v1646_v60 = vrot.slane %v12869_v19, 2  ;;  %10460 = vmatpush3.msra.mxu0 %v2108_v43 }
 0x16a   :  { %v1233_v6 = vadd.f32 %v1193_v22, %v1074_v63  ;;  %v12882_v37 = vsel %vm446_vm2, %v1588_v15, %v1589_v31  ;;  %v879_v24 = vadd.f32 %v841_v0, %v720_v52  ;;  %v1342_v46 = vsel %vm596_vm3, %v1340_v21, %v1341_v3  ;;  %10461 = vmatprep.subr.mxu0 %v2123_v25  ;;  %v2106_v52 = vld [vmem:[#allocation3] sm:$0xff]  ;;  %v12905_v63 = vpop.permute.xlu0 %253 }
 0x16b   :  { %v10854_v7 = vpack.i.bf16 %v12573_v48, %v12882_v37  ;;  %v766_v1 = vmul.f32 %v12662_v27, %v371_v57  ;;  %v12891_v39 = vsel %vm596_vm3, %v1645_v32, %v1646_v60  ;;  %v12894_v31 = vmul.f32 %v12646_v23, %v371_v57  ;;  %10462 = vmatpush3.msra.mxu0 %v2107_v54 }
 0x16c   :  { %v1382_v20 = vadd.f32 %v1342_v46, %v1233_v6  ;;  %v1595_v3 = vrot.slane %v12803_v10, 1  ;;  %10716 = vmatmul.mubr.msk.f32.gmra.mxu1 %vm1445_vm0, %v12891_v39  ;;  %v12901_v29 = vmul.f32 %v12654_v11, %v371_v57  ;;  %v915_v13 = vmul.f32 %v12668_v33, %v371_v57  ;;  %10463 = vmatprep.subr.mxu0 %v2122_v50 }
 0x16d   :  { %10855 = vrot.lane.b32.xlu0 %v10854_v7, %s11877_s24  ;;  %v1119_v30 = vmul.f32 %v12753_v18, %v371_v57  ;;  %v843_v28 = vrot.slane %v766_v1, 1  ;;  %v638_v15 = vsel %vm596_vm3, %v636_v14, %v637_v45  ;;  %v990_v22 = vsel %vm596_vm3, %v988_v40, %v989_v12  ;;  %10464 = vmatpush3.msra.mxu0 %v2106_v52 }
 0x16e   :  { %v1403_v56 = vmul.f32 %v12842_v35, %v1382_v20  ;;  %v1268_v32 = vmul.f32 %v12775_v61, %v371_v57  ;;  %v674_v43 = vadd.f32 %v638_v15, %v524_v42  ;;  %v1028_v25 = vadd.f32 %v990_v22, %v879_v24  ;;  %v376_v42 = vpop.permute.xlu1 %375 }
 0x16f   :  { %v1195_v21 = vrot.slane %v1119_v30, 1  ;;  %v12916_v0 = vmul.f32 %v12646_v23, %v12905_v63  ;;  %v12920_v36 = vmul.f32 %v12654_v11, %v12905_v63  ;;  %v705_v45 = vmul.f32 %v12703_v5, %v12905_v63 }
 0x170   :  { %v1424_v54 = vadd.f32 %v12854_v26, %v1403_v56  ;;  %v765_v12 = vmul.f32 %v12662_v27, %v12905_v63  ;;  %v914_v14 = vmul.f32 %v12668_v33, %v12905_v63  ;;  %v1059_v40 = vmul.f32 %v12795_v62, %v12905_v63 }
 0x171   :  { %v1118_v57 = vmul.f32 %v12753_v18, %v12905_v63  ;;  %v490_v60 = vrot.slane %v12894_v31, 1  ;;  %v640_v24 = vrot.slane %v12901_v29, 2  ;;  %v721_v46 = vadd.f32 %v705_v45, %v674_v43  ;;  %v13012_v29 = vld [vmem:[#allocation2 + $0x98] sm:$0x3] }
 0x172   :  { %v1440_v6 = vmax.f32 %v1424_v54, 0.0  ;;  %v992_v7 = vrot.slane %v915_v13, 2  ;;  %v842_v1 = vrot.slane %v765_v12, 1  ;;  %v1075_v50 = vadd.f32 %v1059_v40, %v1028_v25  ;;  %v12943_v25 = vpop.permute.xlu0 %258 }
 0x173   :  { %v1194_v20 = vrot.slane %v1118_v57, 1  ;;  %v1344_v52 = vrot.slane %v1268_v32, 2  ;;  %v991_v30 = vrot.slane %v914_v14, 2  ;;  %v1267_v56 = vmul.f32 %v12775_v61, %v12905_v63 }
 0x174   :  { %1499 = vst.msk [vmem:[#allocation2 + $0xe1] sm:$0xff] %vm1445_vm0, %v1440_v6  ;;  %v10864_v15 = vpack.i.bf16 %v12598_v44, %v12720_v55  ;;  %v489_v22 = vrot.slane %v12916_v0, 1  ;;  %v639_v31 = vrot.slane %v12920_v36, 2  ;;  %v844_v43 = vsel %vm446_vm2, %v842_v1, %v843_v28  ;;  %v733_v36 = vpop.permute.xlu1 %732 }
 0x175   :  { %v1196_v13 = vsel %vm446_vm2, %v1194_v20, %v1195_v21  ;;  %v880_v54 = vadd.f32 %v844_v43, %v721_v46  ;;  %v1343_v32 = vrot.slane %v1267_v56, 2  ;;  %v12947_v12 = vmul.f32 %v12646_v23, %v376_v42 }
 0x176   :  { %v1234_v45 = vadd.f32 %v1196_v13, %v1075_v50  ;;  %10865 = vrot.lane.b32.xlu0 %v10864_v15, %s11873_s6  ;;  %v12950_v44 = vmul.f32 %v12654_v11, %v376_v42  ;;  %v12953_v0 = vmul.f32 %v12662_v27, %v376_v42  ;;  %v12956_v28 = vmul.f32 %v12668_v33, %v376_v42 }
 0x177   :  { %v1121_v21 = vmul.f32 %v12753_v18, %v376_v42  ;;  %v1345_v14 = vsel %vm596_vm3, %v1343_v32, %v1344_v52  ;;  %v1270_v40 = vmul.f32 %v12775_v61, %v376_v42  ;;  %v993_v57 = vsel %vm596_vm3, %v991_v30, %v992_v7 }
 0x178   :  { %v1060_v6 = vmul.f32 %v12795_v62, %v12943_v25  ;;  %v1383_v46 = vadd.f32 %v1345_v14, %v1234_v45  ;;  %v1029_v50 = vadd.f32 %v993_v57, %v880_v54  ;;  %v1120_v20 = vmul.f32 %v12753_v18, %v12943_v25 }
 0x179   :  { %v1198_v1 = vrot.slane %v1121_v21, 1  ;;  %v1347_v56 = vrot.slane %v1270_v40, 2  ;;  %v1269_v15 = vmul.f32 %v12775_v61, %v12943_v25  ;;  %v10874_v52 = vpack.i.bf16 %v12882_v37, %v12748_v59 }
 0x17a   :  { %v12971_v42 = vmul.f32 %v12662_v27, %v733_v36  ;;  %v1404_v7 = vmul.f32 %v12842_v35, %v1383_v46  ;;  %v1076_v30 = vadd.f32 %v1060_v6, %v1029_v50  ;;  %v1197_v43 = vrot.slane %v1120_v20, 1 }
 0x17b   :  { %v12975_v13 = vmul.f32 %v12668_v33, %v733_v36  ;;  %v846_v32 = vrot.slane %v12953_v0, 1  ;;  %v1346_v21 = vrot.slane %v1269_v15, 2  ;;  %10875 = vrot.lane.b32.xlu0 %v10874_v52, %s11863_s27  ;;  %v995_v40 = vrot.slane %v12956_v28, 2  ;;  %v12989_v0 = vpop.permute.xlu0 %685 }
 0x17c   :  { %v1425_v14 = vadd.f32 %v12854_v26, %v1404_v7  ;;  %v1199_v57 = vsel %vm446_vm2, %v1197_v43, %v1198_v1  ;;  %v1123_v50 = vmul.f32 %v12753_v18, %v733_v36  ;;  %v1272_v20 = vmul.f32 %v12775_v61, %v733_v36  ;;  %v1088_v7 = vpop.permute.xlu1 %1087 }
 0x17d   :  { %v1235_v46 = vadd.f32 %v1199_v57, %v1076_v30  ;;  %v279_v41 = vmul.f32 %v12715_v34, %v12905_v63  ;;  %v1348_v52 = vsel %vm596_vm3, %v1346_v21, %v1347_v56  ;;  %v491_v28 = vsel %vm446_vm2, %v489_v22, %v490_v60 }
 0x17e   :  { %v1441_v15 = vmax.f32 %v1425_v14, 0.0  ;;  %v767_v30 = vmul.f32 %v12662_v27, %v12943_v25  ;;  %v916_v36 = vmul.f32 %v12668_v33, %v12943_v25  ;;  %v641_v63 = vsel %vm596_vm3, %v639_v31, %v640_v24 }
 0x17f   :  { %v1384_v1 = vadd.f32 %v1348_v52, %v1235_v46  ;;  %v525_v43 = vadd.f32 %v491_v28, %v279_v41  ;;  %v1122_v56 = vmul.f32 %v12753_v18, %v12989_v0  ;;  %v1271_v60 = vmul.f32 %v12775_v61, %v12989_v0  ;;  %v13010_v46 = vld [vmem:[#allocation2 + $0x90] sm:$0xff]  ;;  %v13019_v52 = vld [vmem:[#allocation2 + $0x80] sm:$0xff] }
 0x180   :  { %1500 = vst.msk [vmem:[#allocation2 + $0xf1] sm:$0xff] %vm1445_vm0, %v1441_v15  ;;  %v1594_v41 = vrot.slane %v12798_v51, 1  ;;  %v706_v14 = vmul.f32 %v12703_v5, %v12943_v25  ;;  %v845_v57 = vrot.slane %v767_v30, 1  ;;  %v1201_v24 = vrot.slane %v1123_v50, 1 }
 0x181   :  { %v1405_v22 = vmul.f32 %v12842_v35, %v1384_v1  ;;  %v675_v21 = vadd.f32 %v641_v63, %v525_v43  ;;  %v994_v31 = vrot.slane %v916_v36, 2  ;;  %v1708_v28 = vrot.slane %v13010_v46, 1  ;;  %v13022_v1 = vld [vmem:[#allocation2 + $0x88] sm:$0x3] }
 0x182   :  { %v13017_v15 = vsel %vm446_vm2, %v1594_v41, %v1595_v3  ;;  %v1350_v30 = vrot.slane %v1272_v20, 2  ;;  %v1200_v17 = vrot.slane %v1122_v56, 1  ;;  %v847_v50 = vsel %vm446_vm2, %v845_v57, %v846_v32  ;;  %v1041_v57 = vpop.permute.xlu0 %1040 }
 0x183   :  { %v1426_v43 = vadd.f32 %v12854_v26, %v1405_v22  ;;  %v722_v63 = vadd.f32 %v706_v14, %v675_v21  ;;  %v1349_v36 = vrot.slane %v1271_v60, 2  ;;  %v10884_v10 = vpack.i.bf16 %v12720_v55, %v13017_v15 }
 0x184   :  { %v1709_v3 = vrot.slane %v13012_v29, 1  ;;  %v1698_v45 = vrot.slane %v13019_v52, 2  ;;  %v1699_v54 = vrot.slane %v13022_v1, 2  ;;  %v996_v22 = vsel %vm596_vm3, %v994_v31, %v995_v40 }
 0x185   :  { %v1442_v41 = vmax.f32 %v1426_v43, 0.0  ;;  %v881_v6 = vadd.f32 %v847_v50, %v722_v63  ;;  %v1061_v20 = vmul.f32 %v12795_v62, %v12989_v0  ;;  %10885 = vrot.lane.b32.xlu0 %v10884_v10, %s11877_s24  ;;  %v13037_v56 = vmul.f32 %v12753_v18, %v1088_v7 }
 0x186   :  { %v1710_v32 = vsel %vm446_vm2, %v1708_v28, %v1709_v3  ;;  %v13042_v14 = vsel %vm596_vm3, %v1698_v45, %v1699_v54  ;;  %v412_v40 = vmul.f32 %v12646_v23, %v12943_v25  ;;  %v1202_v31 = vsel %vm446_vm2, %v1200_v17, %v1201_v24 }
 0x187   :  { %1501 = vst.msk [vmem:[#allocation2 + $0x101] sm:$0xff] %vm1445_vm0, %v1442_v41  ;;  %v1030_v60 = vadd.f32 %v996_v22, %v881_v6  ;;  %v10809_v21 = vpack.i.bf16 %v13019_v52, %v1710_v32  ;;  %v1351_v43 = vsel %vm596_vm3, %v1349_v36, %v1350_v30  ;;  %10718 = vmatprep.mubr.msk.f32.mxu1 %vm1445_vm0, %v13042_v14  ;;  %v1204_v50 = vrot.slane %v13037_v56, 1  ;;  %v13083_v32 = vld [vmem:[#allocation2 + $0xc8] sm:$0x3] }
 0x188   :  { %v13051_v28 = vmul.f32 %v12775_v61, %v1088_v7  ;;  %v562_v6 = vmul.f32 %v12654_v11, %v12943_v25  ;;  %v492_v54 = vrot.slane %v412_v40, 1  ;;  %v769_v23 = vmul.f32 %v12662_v27, %v12989_v0  ;;  %v13090_v40 = vld [vmem:[#allocation2 + $0xa0] sm:$0xff] }
 0x189   :  { %v1077_v63 = vadd.f32 %v1061_v20, %v1030_v60  ;;  %10810 = vrot.lane.b32.xlu1 %v10809_v21, %s11877_s24  ;;  %v918_v17 = vmul.f32 %v12668_v33, %v12989_v0  ;;  %v280_v45 = vmul.f32 %v12715_v34, %v12943_v25  ;;  %v13063_v7 = vmul.f32 %v12753_v18, %v1041_v57  ;;  %v13081_v20 = vld [vmem:[#allocation2 + $0xc0] sm:$0xff] }
 0x18a   :  { %v642_v24 = vrot.slane %v562_v6, 2  ;;  %v13066_v30 = vmul.f32 %v12775_v61, %v1041_v57  ;;  %v15825_v36 = vrot.slane %v12947_v12, 1  ;;  %v848_v10 = vrot.slane %v769_v23, 1 }
 0x18b   :  { %v1236_v11 = vadd.f32 %v1202_v31, %v1077_v63  ;;  %v1353_v33 = vrot.slane %v13051_v28, 2  ;;  %v707_v34 = vmul.f32 %v12703_v5, %v12989_v0  ;;  %v997_v25 = vrot.slane %v918_v17, 2  ;;  %v13092_v31 = vld [vmem:[#allocation2 + $0xa8] sm:$0x3] }
 0x18c   :  { %v494_v27 = vsel %vm446_vm2, %v492_v54, %v15825_v36  ;;  %v15826_v41 = vrot.slane %v12950_v44, 2  ;;  %v1203_v22 = vrot.slane %v13063_v7, 1  ;;  %v10894_v12 = vpack.i.bf16 %v12748_v59, %v12865_v58 }
 0x18d   :  { %v526_v3 = vadd.f32 %v494_v27, %v280_v45  ;;  %v1385_v18 = vadd.f32 %v1351_v43, %v1236_v11  ;;  %v15827_v21 = vrot.slane %v12971_v42, 1  ;;  %v1352_v0 = vrot.slane %v13066_v30, 2  ;;  %v13109_v30 = vld [vmem:[#allocation2 + $0xd0] sm:$0xff]  ;;  %v13111_v11 = vld [vmem:[#allocation2 + $0xd8] sm:$0x3] }
 0x18e   :  { %v644_v61 = vsel %vm596_vm3, %v642_v24, %v15826_v41  ;;  %v1714_v44 = vrot.slane %v13010_v46, 2  ;;  %10895 = vrot.lane.b32.xlu0 %v10894_v12, %s11873_s6  ;;  %v1715_v59 = vrot.slane %v13012_v29, 2  ;;  %v1648_v28 = vrot.slane %v13090_v40, 2 }
 0x18f   :  { %v676_v60 = vadd.f32 %v644_v61, %v526_v3  ;;  %v850_v5 = vsel %vm446_vm2, %v848_v10, %v15827_v21  ;;  %v1406_v43 = vmul.f32 %v12842_v35, %v1385_v18  ;;  %v1649_v42 = vrot.slane %v13092_v31, 2 }
 0x190   :  { %v15828_v63 = vrot.slane %v12975_v13, 2  ;;  %v1654_v23 = vrot.slane %v13081_v20, 2  ;;  %v1655_v17 = vrot.slane %v13083_v32, 2  ;;  %v1716_v24 = vsel %vm596_vm3, %v1714_v44, %v1715_v59  ;;  %v13148_v59 = vld [vmem:[#allocation2 + $0xb0] sm:$0xff] }
 0x191   :  { %v723_v6 = vadd.f32 %v707_v34, %v676_v60  ;;  %v1427_v45 = vadd.f32 %v12854_v26, %v1406_v43  ;;  %v1650_v7 = vsel %vm596_vm3, %v1648_v28, %v1649_v42  ;;  %v10904_v29 = vpack.i.bf16 %v13017_v15, %v12891_v39  ;;  %10719 = vmatmul.mubr.msk.f32.gmra.mxu1 %vm1445_vm0, %v1716_v24  ;;  %v13129_v60 = vld [vmem:[#allocation2 + $0xe0] sm:$0xff]  ;;  %v13150_v28 = vld [vmem:[#allocation2 + $0xb8] sm:$0x3] }
 0x192   :  { %v999_v54 = vsel %vm596_vm3, %v997_v25, %v15828_v63  ;;  %v10814_v36 = vpack.i.bf16 %v1650_v7, %v13081_v20  ;;  %v13116_v27 = vsel %vm596_vm3, %v1654_v23, %v1655_v17  ;;  %v1579_v10 = vrot.slane %v12566_v4, 1  ;;  %v13164_v23 = vld [vmem:[#allocation2 + $0xf0] sm:$0xff]  ;;  %v13178_v7 = vld [vmem:[#allocation2 + $0x20] sm:$0xff] }
 0x193   :  { %v882_v13 = vadd.f32 %v850_v5, %v723_v6  ;;  %v1443_v3 = vmax.f32 %v1427_v45, 0.0  ;;  %10721 = vmatprep.mubr.msk.f32.mxu1 %vm1445_vm0, %v13116_v27  ;;  %10905 = vrot.lane.b32.xlu0 %v10904_v29, %s11863_s27  ;;  %v1580_v34 = vrot.slane %v12568_v38, 1  ;;  %v1676_v25 = vrot.slane %v13019_v52, 1  ;;  %v13139_v5 = vld [vmem:[#allocation2 + $0xe8] sm:$0x3] }
 0x194   :  { %v1677_v18 = vrot.slane %v13022_v1, 1  ;;  %v1062_v61 = vmul.f32 %v12795_v62, %v1041_v57  ;;  %10815 = vrot.lane.b32.xlu1 %v10814_v36, %s11873_s6  ;;  %v1657_v12 = vrot.slane %v13109_v30, 2  ;;  %v1658_v4 = vrot.slane %v13111_v11, 2 }
 0x195   :  { %v1031_v41 = vadd.f32 %v999_v54, %v882_v13  ;;  %1502 = vst.msk [vmem:[#allocation2 + $0x111] sm:$0xff] %vm1445_vm0, %v1443_v3  ;;  %v13133_v21 = vsel %vm446_vm2, %v1579_v10, %v1580_v34  ;;  %v1585_v1 = vrot.slane %v12573_v48, 1  ;;  %v1205_v48 = vsel %vm446_vm2, %v1203_v22, %v1204_v50  ;;  %v13186_v10 = vld [vmem:[#allocation2 + $0x100] sm:$0xff] }
 0x196   :  { %v13136_v38 = vsel %vm446_vm2, %v1676_v25, %v1677_v18  ;;  %v10829_v57 = vpack.i.bf16 %v13133_v21, %v12539_v9  ;;  %v13146_v43 = vsel %vm596_vm3, %v1657_v12, %v1658_v4  ;;  %v1354_v42 = vsel %vm596_vm3, %v1352_v0, %v1353_v33  ;;  %v13171_v33 = vld [vmem:[#allocation2 + $0xf8] sm:$0x3] }
 0x197   :  { %v1078_v62 = vadd.f32 %v1062_v61, %v1031_v41  ;;  %v10914_v44 = vpack.i.bf16 %v12865_v58, %v13136_v38  ;;  %10722 = vmatmul.mubr.msk.f32.gmra.mxu1 %vm1445_vm0, %v13146_v43  ;;  %v15829_v6 = vrot.slane %v12578_v16, 1  ;;  %v1660_v54 = vrot.slane %v13129_v60, 2 }
 0x198   :  { %v1607_v45 = vrot.slane %v13083_v32, 1  ;;  %10830 = vrot.lane.b32.xlu1 %v10829_v57, %s11863_s27  ;;  %v1661_v56 = vrot.slane %v13139_v5, 2  ;;  %v1600_v50 = vrot.slane %v13090_v40, 1  ;;  %v10924_v16 = vpack.i.bf16 %v12891_v39, %v13010_v46  ;;  %v13188_v39 = vld [vmem:[#allocation2 + $0x108] sm:$0x3] }
 0x199   :  { %v13161_v63 = vsel %vm446_vm2, %v1585_v1, %v15829_v6  ;;  %v1237_v17 = vadd.f32 %v1205_v48, %v1078_v62  ;;  %10915 = vrot.lane.b32.xlu0 %v10914_v44, %s11877_s24  ;;  %v1601_v22 = vrot.slane %v13092_v31, 1  ;;  %v1651_v0 = vrot.slane %v13148_v59, 2 }
 0x19a   :  { %v1652_v24 = vrot.slane %v13150_v28, 2  ;;  %v10839_v29 = vpack.i.bf16 %v13178_v7, %v13161_v63  ;;  %v13183_v13 = vsel %vm596_vm3, %v1660_v54, %v1661_v56  ;;  %v1663_v36 = vrot.slane %v13164_v23, 2 }
 0x19b   :  { %v1386_v32 = vadd.f32 %v1354_v42, %v1237_v17  ;;  %10724 = vmatprep.mubr.msk.f32.mxu1 %vm1445_vm0, %v13183_v13  ;;  %v1602_v46 = vsel %vm446_vm2, %v1600_v50, %v1601_v22  ;;  %v1664_v3 = vrot.slane %v13171_v33, 2  ;;  %v1606_v34 = vrot.slane %v13081_v20, 1  ;;  %v13242_v17 = vld [vmem:[#allocation2 + $0x40] sm:$0xff] }
 0x19c   :  { %v1653_v31 = vsel %vm596_vm3, %v1651_v0, %v1652_v24  ;;  %10840 = vrot.lane.b32.xlu1 %v10839_v29, %s11877_s24  ;;  %v1666_v41 = vrot.slane %v13186_v10, 2  ;;  %v1667_v61 = vrot.slane %v13188_v39, 2  ;;  %v13204_v12 = vld [vmem:[#allocation2 + $0x110] sm:$0xff]  ;;  %v13206_v4 = vld [vmem:[#allocation2 + $0x118] sm:$0x3]  ;;  %v1592_v57 = vrot.slane %v12724_v53, 1 }
 0x19d   :  { %v1407_v25 = vmul.f32 %v12842_v35, %v1386_v32  ;;  %10925 = vrot.lane.b32.xlu0 %v10924_v16, %s11873_s6  ;;  %v13200_v18 = vsel %vm596_vm3, %v1663_v36, %v1664_v3  ;;  %v10849_v35 = vpack.i.bf16 %v12539_v9, %v12614_v49  ;;  %v10929_v62 = vpack.i.bf16 %v1602_v46, %v1653_v31 }
 0x19e   :  { %10725 = vmatmul.mubr.msk.f32.gmra.mxu1 %vm1445_vm0, %v13200_v18  ;;  %v13215_v44 = vsel %vm446_vm2, %v1606_v34, %v1607_v45  ;;  %v1591_v48 = vrot.slane %v12720_v55, 1  ;;  %v13219_v42 = vsel %vm596_vm3, %v1666_v41, %v1667_v61  ;;  %v1669_v9 = vrot.slane %v13204_v12, 2 }
 0x19f   :  { %v1428_v1 = vadd.f32 %v12854_v26, %v1407_v25  ;;  %v1670_v49 = vrot.slane %v13206_v4, 2  ;;  %10727 = vmatprep.mubr.msk.f32.mxu1 %vm1445_vm0, %v13219_v42  ;;  %v10859_v55 = vpack.i.bf16 %v13161_v63, %v12678_v2  ;;  %v10934_v53 = vpack.i.bf16 %v13148_v59, %v13215_v44 }
 0x1a0   :  { %10850 = vrot.lane.b32.xlu1 %v10849_v35, %s11873_s6  ;;  %v13236_v54 = vsel %vm446_vm2, %v1591_v48, %v1592_v57  ;;  %v10944_v56 = vpack.i.bf16 %v1653_v31, %v13109_v30  ;;  %v1613_v50 = vrot.slane %v13139_v5, 1  ;;  %v1612_v16 = vrot.slane %v13129_v60, 1  ;;  %v10806_v57 = vpop.permute.xlu1 %10805 }
 0x1a1   :  { %v1444_v6 = vmax.f32 %v1428_v1, 0.0  ;;  %10930 = vrot.lane.b32.xlu0 %v10929_v62, %s11863_s27  ;;  %v13233_v26 = vsel %vm596_vm3, %v1669_v9, %v1670_v49  ;;  %v10869_v45 = vpack.i.bf16 %v13242_v17, %v13236_v54  ;;  %v10879_v24 = vpack.i.bf16 %v12678_v2, %v12798_v51 }
 0x1a2   :  { %10728 = vmatmul.mubr.msk.f32.gmra.mxu1 %vm1445_vm0, %v13233_v26  ;;  %v10954_v32 = vpack.i.bf16 %v13215_v44, %v13146_v43  ;;  %v1598_v36 = vrot.slane %v12869_v19, 1  ;;  %v13263_v46 = vsel %vm446_vm2, %v1612_v16, %v1613_v50  ;;  %v1597_v31 = vrot.slane %v12865_v58, 1 }
 0x1a3   :  { %1503 = vst.msk [vmem:[#allocation2 + $0x121] sm:$0xff] %vm1445_vm0, %v1444_v6  ;;  %v10889_v3 = vpack.i.bf16 %v13236_v54, %v12826_v47  ;;  %v10964_v19 = vpack.i.bf16 %v13109_v30, %v13263_v46  ;;  %v10974_v1 = vpack.i.bf16 %v13146_v43, %v13164_v23  ;;  %v1619_v35 = vrot.slane %v13188_v39, 1 }
 0x1a4   :  { %10860 = vrot.lane.b32.xlu1 %v10859_v55, %s11863_s27  ;;  %v13278_v34 = vsel %vm446_vm2, %v1597_v31, %v1598_v36  ;;  %v1618_v62 = vrot.slane %v13186_v10, 1  ;;  %v10909_v48 = vpack.i.bf16 %v12826_v47, %v13019_v52  ;;  %v10984_v43 = vpack.i.bf16 %v13263_v46, %v13200_v18 }
 0x1a5   :  { %10935 = vrot.lane.b32.xlu0 %v10934_v53, %s11877_s24  ;;  %v10899_v61 = vpack.i.bf16 %v12798_v51, %v13278_v34  ;;  %v11704_v51 = vld [vmem:[#allocation2] sm:$0xff]  ;;  %v10808_v39 = vunpack.i.h.bf16 %v10806_v57  ;;  %v10807_v49 = vunpack.i.l.bf16 %v10806_v57  ;;  %v1604_v50 = vrot.slane %v13150_v28, 1 }
 0x1a6   :  { %v13298_v53 = vsel %vm446_vm2, %v1618_v62, %v1619_v35  ;;  %v1609_v36 = vrot.slane %v13109_v30, 1  ;;  %v1542_v35 = vld [vmem:[#allocation2 + $0x130] sm:$0xff] }
 0x1a7   :  { %v11034_v57 = vpack.i.bf16 %v13233_v26, %v1542_v35 }
 0x1a8   :  { %10870 = vrot.lane.b32.xlu1 %v10869_v45, %s11877_s24 }
 0x1a9   :  { %10945 = vrot.lane.b32.xlu0 %v10944_v56, %s11873_s6 }
 0x1aa   :  { %v13251_v22 = vld [vmem:[#allocation2 + $0x120] sm:$0xff]  ;;  %v13253_v0 = vld [vmem:[#allocation2 + $0x128] sm:$0x3] }
 0x1ab   :  { %v1701_v29 = vrot.slane %v13251_v22, 2  ;;  %v1702_v5 = vrot.slane %v13253_v0, 2 }
 0x1ac   :  { %10880 = vrot.lane.b32.xlu1 %v10879_v24, %s11873_s6 }
 0x1ad   :  { %10955 = vrot.lane.b32.xlu0 %v10954_v32, %s11863_s27  ;;  %v13269_v2 = vsel %vm596_vm3, %v1701_v29, %v1702_v5  ;;  %v10919_v32 = vpack.i.bf16 %v13278_v34, %v13042_v14  ;;  %v10994_v29 = vpack.i.bf16 %v13164_v23, %v13298_v53  ;;  %v1610_v5 = vrot.slane %v13111_v11, 1 }
 0x1ae   :  { %10730 = vmatprep.mubr.msk.f32.mxu1 %vm1445_vm0, %v13269_v2  ;;  %v11004_v14 = vpack.i.bf16 %v13200_v18, %v13204_v12  ;;  %v1679_v11 = vrot.slane %v13251_v22, 1  ;;  %v10959_v18 = vpack.i.bf16 %v13116_v27, %v13129_v60 }
 0x1b0   :  { %v10821_v58 = vpop.permute.xlu0 %10820  ;;  %10890 = vrot.lane.b32.xlu1 %v10889_v3, %s11863_s27  ;;  %v13324_v3 = vsel %vm446_vm2, %v1609_v36, %v1610_v5 }
 0x1b1   :  { %10965 = vrot.lane.b32.xlu0 %v10964_v19, %s11877_s24  ;;  %v10823_v25 = vunpack.i.h.bf16 %v10821_v58  ;;  %v10822_v41 = vunpack.i.l.bf16 %v10821_v58  ;;  %v1680_v19 = vrot.slane %v13253_v0, 1  ;;  %v10949_v58 = vpack.i.bf16 %v13081_v20, %v13324_v3 }
 0x1b2   :  { %v10969_v62 = vpack.i.bf16 %v13324_v3, %v13183_v13 }
 0x1b3   :  { %v2058_v6 = vsel %vm1445_vm0, %v13133_v21, %v10822_v41  ;;  %v2008_v9 = vsel %vm1445_vm0, %v11704_v51, %v10823_v25  ;;  %v1603_v21 = vrot.slane %v13148_v59, 1  ;;  %v11014_v25 = vpack.i.bf16 %v13298_v53, %v13233_v26 }
 0x1b4   :  { %10900 = vrot.lane.b32.xlu1 %v10899_v61, %s11877_s24  ;;  %v2074_v47 = vsel %vm2024_vm4, %v2058_v6, %v10807_v49  ;;  %v2025_v52 = vsel %vm2024_vm4, %v2008_v9, %v10808_v39  ;;  %v13335_v41 = vsel %vm446_vm2, %v1679_v11, %v1680_v19  ;;  %v1616_v61 = vrot.slane %v13171_v33, 1  ;;  %v1543_v49 = vld [vmem:[#allocation2 + $0x138] sm:$0x3] }
 0x1b5   :  { %10975 = vrot.lane.b32.xlu0 %v10974_v1, %s11873_s6  ;;  %v13317_v28 = vsel %vm446_vm2, %v1603_v21, %v1604_v50  ;;  %v11024_v0 = vpack.i.bf16 %v13204_v12, %v13335_v41  ;;  %v1615_v1 = vrot.slane %v13164_v23, 1  ;;  %v10989_v33 = vpack.i.bf16 %v13183_v13, %v13186_v10 }
 0x1b6   :  { %v10939_v31 = vpack.i.bf16 %v13317_v28, %v13116_v27  ;;  %v1622_v6 = vrot.slane %v13206_v4, 1  ;;  %v1621_v51 = vrot.slane %v13204_v12, 1  ;;  %v1718_v13 = vrot.slane %v1543_v49, 2 }
 0x1b7   :  { %v10826_v55 = vpop.permute.xlu0 %10825 }
 0x1b8   :  { %v10828_v45 = vunpack.i.h.bf16 %v10826_v55  ;;  %v10827_v56 = vunpack.i.l.bf16 %v10826_v55  ;;  %10910 = vrot.lane.b32.xlu1 %v10909_v48, %s11873_s6  ;;  %v13351_v48 = vsel %vm446_vm2, %v1615_v1, %v1616_v61  ;;  %v13366_v9 = vsel %vm446_vm2, %v1621_v51, %v1622_v6 }
 0x1b9   :  { %10985 = vrot.lane.b32.xlu0 %v10984_v43, %s11863_s27  ;;  %v10979_v27 = vpack.i.bf16 %v13129_v60, %v13351_v48  ;;  %v10999_v26 = vpack.i.bf16 %v13351_v48, %v13219_v42  ;;  %v1717_v43 = vrot.slane %v1542_v35, 2  ;;  %v11009_v39 = vpack.i.bf16 %v13186_v10, %v13366_v9 }
 0x1ba   :  { %v2090_v16 = vsel %vm2041_vm5, %v2074_v47, %v10827_v56  ;;  %v2042_v24 = vsel %vm2041_vm5, %v2025_v52, %v10828_v45  ;;  %v11019_v45 = vpack.i.bf16 %v13219_v42, %v13251_v22  ;;  %v1711_v56 = vrot.slane %v1542_v35, 1 }
 0x1bb   :  { %2238 = vmatprep.mubr.f32.mxu0 %v2090_v16  ;;  %v1719_v55 = vsel %vm596_vm3, %v1717_v43, %v1718_v13  ;;  %v1712_v47 = vrot.slane %v1543_v49, 1  ;;  %v11029_v52 = vpack.i.bf16 %v13366_v9, %v13269_v2 }
 0x1bc   :  { %2239 = vmatmul.mubr.f32.vlgmr.msra.gmra.mxu0 %v2042_v24  ;;  %10920 = vrot.lane.b32.xlu1 %v10919_v32, %s11863_s27 }
 0x1bd   :  { %10995 = vrot.lane.b32.xlu0 %v10994_v29, %s11877_s24  ;;  %10731 = vmatmul.mubr.msk.f32.gmra.mxu1 %vm1445_vm0, %v1719_v55  ;;  %v1713_v21 = vsel %vm446_vm2, %v1711_v56, %v1712_v47 }
 0x1be   :  { %v11039_v16 = vpack.i.bf16 %v13251_v22, %v1713_v21 }
 0x1c0   :  { %10940 = vrot.lane.b32.xlu1 %v10939_v31, %s11863_s27 }
 0x1c1   :  { %11005 = vrot.lane.b32.xlu0 %v11004_v14, %s11873_s6 }
 0x1c3   :  { %v10836_v4 = vpop.permute.xlu0 %10835 }
 0x1c4   :  { %10950 = vrot.lane.b32.xlu1 %v10949_v58, %s11877_s24  ;;  %v10837_v61 = vunpack.i.l.bf16 %v10836_v4 }
 0x1c5   :  { %11015 = vrot.lane.b32.xlu0 %v11014_v25, %s11863_s27  ;;  %v11705_v25 = vld [vmem:[#allocation2 + $0x10] sm:$0xff] }
 0x1c8   :  { %10960 = vrot.lane.b32.xlu1 %v10959_v18, %s11873_s6 }
 0x1c9   :  { %11025 = vrot.lane.b32.xlu0 %v11024_v0, %s11877_s24  ;;  %v10838_v0 = vunpack.i.h.bf16 %v10836_v4 }
 0x1cc   :  { %10970 = vrot.lane.b32.xlu1 %v10969_v62, %s11863_s27 }
 0x1cd   :  { %11035 = vrot.lane.b32.xlu0 %v11034_v57, %s11873_s6 }
 0x1cf   :  { %v10846_v50 = vpop.permute.xlu0 %10845 }
 0x1d0   :  { %10980 = vrot.lane.b32.xlu1 %v10979_v27, %s11877_s24  ;;  %v10848_v27 = vunpack.i.h.bf16 %v10846_v50 }
 0x1d4   :  { %10990 = vrot.lane.b32.xlu1 %v10989_v33, %s11873_s6  ;;  %v10847_v33 = vunpack.i.l.bf16 %v10846_v50 }
 0x1d6   :  { %v2060_v55 = vsel %vm1445_vm0, %v13161_v63, %v10847_v33 }
 0x1d8   :  { %11000 = vrot.lane.b32.xlu1 %v10999_v26, %s11863_s27 }
 0x1dc   :  { %11010 = vrot.lane.b32.xlu1 %v11009_v39, %s11877_s24 }
 0x1df   :  { %v10856_v24 = vpop.permute.xlu0 %10855 }
 0x1e0   :  { %11020 = vrot.lane.b32.xlu1 %v11019_v45, %s11873_s6  ;;  %v10858_v13 = vunpack.i.h.bf16 %v10856_v24  ;;  %v10857_v4 = vunpack.i.l.bf16 %v10856_v24  ;;  %v2010_v45 = vsel %vm1445_vm0, %v13178_v7, %v10848_v27  ;;  %v11706_v24 = vld [vmem:[#allocation2 + $0x30] sm:$0xff] }
 0x1e4   :  { %11030 = vrot.lane.b32.xlu1 %v11029_v52, %s11863_s27 }
 0x1e8   :  { %11040 = vrot.lane.b32.xlu1 %v11039_v16, %s11877_s24  ;;  %v10866_v42 = vpop.permute.xlu0 %10865 }
 0x1ed   :  { %v13383_v32 = vpop.permute.xlu0 %10875 }
 0x1f7   :  { %v13385_v29 = vpop.permute.xlu0 %10885 }
 0x1fb   :  { %v13387_v5 = vpop.permute.xlu1 %10810 }
 0x200   :  { %v13389_v36 = vpop.permute.xlu0 %10895 }
 0x205   :  { %v13391_v2 = vpop.permute.xlu0 %10905 }
 0x206   :  { %v13393_v31 = vpop.permute.xlu1 %10815 }
 0x20a   :  { %v10831_v14 = vpop.permute.xlu1 %10830 }
 0x20b   :  { %v13395_v11 = vpop.permute.xlu0 %10915  ;;  %v10833_v22 = vunpack.i.h.bf16 %v10831_v14  ;;  %v10832_v19 = vunpack.i.l.bf16 %v10831_v14 }
 0x20d   :  { %v2059_v58 = vsel %vm1445_vm0, %v12631_v8, %v10832_v19  ;;  %v2009_v18 = vsel %vm1445_vm0, %v11705_v25, %v10833_v22  ;;  %v10868_v19 = vunpack.i.h.bf16 %v10866_v42 }
 0x20e   :  { %v10841_v1 = vpop.permute.xlu1 %10840  ;;  %v2075_v6 = vsel %vm2024_vm4, %v2059_v58, %v10837_v61  ;;  %v2026_v51 = vsel %vm2024_vm4, %v2009_v18, %v10838_v0  ;;  %v10867_v58 = vunpack.i.l.bf16 %v10866_v42 }
 0x20f   :  { %v10843_v35 = vunpack.i.h.bf16 %v10841_v1  ;;  %v10842_v62 = vunpack.i.l.bf16 %v10841_v1  ;;  %v13400_v57 = vpop.permute.xlu0 %10925  ;;  %v10878_v1 = vunpack.i.h.bf16 %v13383_v32 }
 0x211   :  { %v2091_v26 = vsel %vm2041_vm5, %v2075_v6, %v10842_v62  ;;  %v2043_v8 = vsel %vm2041_vm5, %v2026_v51, %v10843_v35  ;;  %v10877_v35 = vunpack.i.l.bf16 %v13383_v32 }
 0x212   :  { %v10851_v43 = vpop.permute.xlu1 %10850  ;;  %2243 = vmatprep.mubr.f32.mxu0 %v2091_v26  ;;  %v10888_v26 = vunpack.i.h.bf16 %v13385_v29 }
 0x213   :  { %v10853_v39 = vunpack.i.h.bf16 %v10851_v43  ;;  %v10852_v49 = vunpack.i.l.bf16 %v10851_v43  ;;  %2244 = vmatmul.mubr.f32.gmra.mxu0 %v2043_v8  ;;  %v13410_v56 = vpop.permute.xlu0 %10930  ;;  %v10887_v8 = vunpack.i.l.bf16 %v13385_v29  ;;  %v2062_v32 = vsel %vm1445_vm0, %v13236_v54, %v10877_v35  ;;  %v11707_v29 = vld [vmem:[#allocation2 + $0x50] sm:$0xff] }
 0x214   :  { %v2012_v43 = vsel %vm1445_vm0, %v13242_v17, %v10878_v1  ;;  %v10918_v1 = vunpack.i.h.bf16 %v13395_v11  ;;  %v10917_v35 = vunpack.i.l.bf16 %v13395_v11  ;;  %v10933_v11 = vunpack.i.h.bf16 %v13410_v56 }
 0x215   :  { %v2076_v47 = vsel %vm2024_vm4, %v2060_v55, %v10852_v49  ;;  %v2027_v52 = vsel %vm2024_vm4, %v2010_v45, %v10853_v39 }
 0x216   :  { %v10861_v21 = vpop.permute.xlu1 %10860  ;;  %v2092_v50 = vsel %vm2041_vm5, %v2076_v47, %v10857_v4  ;;  %v2044_v16 = vsel %vm2041_vm5, %v2027_v52, %v10858_v13 }
 0x217   :  { %v10863_v14 = vunpack.i.h.bf16 %v10861_v21  ;;  %v10862_v22 = vunpack.i.l.bf16 %v10861_v21  ;;  %2248 = vmatprep.mubr.f32.mxu0 %v2092_v50  ;;  %v13419_v18 = vpop.permute.xlu0 %10935  ;;  %v10898_v21 = vunpack.i.h.bf16 %v13389_v36  ;;  %v10897_v50 = vunpack.i.l.bf16 %v13389_v36 }
 0x218   :  { %2249 = vmatmul.mubr.f32.gmra.mxu0 %v2044_v16 }
 0x219   :  { %v2061_v63 = vsel %vm1445_vm0, %v12882_v37, %v10862_v22  ;;  %v2011_v7 = vsel %vm1445_vm0, %v11706_v24, %v10863_v14  ;;  %v10908_v24 = vunpack.i.h.bf16 %v13391_v2 }
 0x21a   :  { %v10871_v25 = vpop.permute.xlu1 %10870  ;;  %v2077_v62 = vsel %vm2024_vm4, %v2061_v63, %v10867_v58  ;;  %v2028_v27 = vsel %vm2024_vm4, %v2011_v7, %v10868_v19  ;;  %v10907_v7 = vunpack.i.l.bf16 %v13391_v2 }
 0x21b   :  { %v10873_v0 = vunpack.i.h.bf16 %v10871_v25  ;;  %v10872_v61 = vunpack.i.l.bf16 %v10871_v25  ;;  %v13433_v39 = vpop.permute.xlu0 %10945 }
 0x21c   :  { %v2064_v2 = vsel %vm1445_vm0, %v13278_v34, %v10907_v7 }
 0x21d   :  { %v2093_v37 = vsel %vm2041_vm5, %v2077_v62, %v10872_v61  ;;  %v2045_v33 = vsel %vm2041_vm5, %v2028_v27, %v10873_v0  ;;  %v11708_v62 = vld [vmem:[#allocation2 + $0x60] sm:$0xff] }
 0x21e   :  { %v10881_v6 = vpop.permute.xlu1 %10880  ;;  %2253 = vmatprep.mubr.f32.mxu0 %v2093_v37  ;;  %v2014_v27 = vsel %vm1445_vm0, %v11708_v62, %v10908_v24  ;;  %v10932_v37 = vunpack.i.l.bf16 %v13410_v56 }
 0x21f   :  { %v10883_v42 = vunpack.i.h.bf16 %v10881_v6  ;;  %v10882_v51 = vunpack.i.l.bf16 %v10881_v6  ;;  %2254 = vmatmul.mubr.f32.gmra.mxu0 %v2045_v33  ;;  %v13444_v14 = vpop.permute.xlu0 %10955 }
 0x220   :  { %v2066_v56 = vsel %vm1445_vm0, %v13317_v28, %v10932_v37  ;;  %v10818_v28 = vunpack.i.h.bf16 %v13393_v31 }
 0x221   :  { %v2078_v49 = vsel %vm2024_vm4, %v2062_v32, %v10882_v51  ;;  %v2029_v13 = vsel %vm2024_vm4, %v2012_v43, %v10883_v42  ;;  %v10812_v43 = vunpack.i.l.bf16 %v13387_v5 }
 0x222   :  { %v10891_v4 = vpop.permute.xlu1 %10890  ;;  %v2094_v55 = vsel %vm2041_vm5, %v2078_v49, %v10887_v8  ;;  %v2046_v45 = vsel %vm2041_vm5, %v2029_v13, %v10888_v26  ;;  %v10928_v49 = vunpack.i.h.bf16 %v13400_v57  ;;  %v10927_v13 = vunpack.i.l.bf16 %v13400_v57 }
 0x223   :  { %v10893_v47 = vunpack.i.h.bf16 %v10891_v4  ;;  %v10892_v52 = vunpack.i.l.bf16 %v10891_v4  ;;  %2258 = vmatprep.mubr.f32.mxu0 %v2094_v55  ;;  %v13458_v33 = vpop.permute.xlu0 %10965  ;;  %v10937_v4 = vunpack.i.l.bf16 %v13419_v18 }
 0x224   :  { %2259 = vmatmul.mubr.f32.gmra.mxu0 %v2046_v45  ;;  %v11709_v45 = vld [vmem:[#allocation2 + $0x70] sm:$0xff] }
 0x225   :  { %v2063_v54 = vsel %vm1445_vm0, %v13017_v15, %v10892_v52  ;;  %v2013_v17 = vsel %vm1445_vm0, %v11707_v29, %v10893_v47  ;;  %v10813_v52 = vunpack.i.h.bf16 %v13387_v5 }
 0x226   :  { %v10901_v16 = vpop.permute.xlu1 %10900  ;;  %v2079_v19 = vsel %vm2024_vm4, %v2063_v54, %v10897_v50  ;;  %v2030_v15 = vsel %vm2024_vm4, %v2013_v17, %v10898_v21  ;;  %v10817_v54 = vunpack.i.l.bf16 %v13393_v31  ;;  %v10938_v21 = vunpack.i.h.bf16 %v13419_v18 }
 0x227   :  { %v10903_v22 = vunpack.i.h.bf16 %v10901_v16  ;;  %v10902_v63 = vunpack.i.l.bf16 %v10901_v16  ;;  %v10976_v50 = vpop.permute.xlu0 %10975  ;;  %v10958_v31 = vunpack.i.h.bf16 %v13444_v14 }
 0x228   :  { %v2082_v24 = vsel %vm2024_vm4, %v2066_v56, %v10817_v54 }
 0x229   :  { %v2095_v58 = vsel %vm2041_vm5, %v2079_v19, %v10902_v63  ;;  %v2047_v25 = vsel %vm2041_vm5, %v2030_v15, %v10903_v22  ;;  %v2016_v22 = vsel %vm1445_vm0, %v13090_v40, %v10933_v11  ;;  %v2098_v7 = vsel %vm2041_vm5, %v2082_v24, %v10937_v4 }
 0x22a   :  { %v10911_v0 = vpop.permute.xlu1 %10910  ;;  %2263 = vmatprep.mubr.f32.mxu0 %v2095_v58  ;;  %v10947_v19 = vunpack.i.l.bf16 %v13433_v39  ;;  %v2033_v40 = vsel %vm2024_vm4, %v2016_v22, %v10818_v28  ;;  %v10978_v4 = vunpack.i.h.bf16 %v10976_v50 }
 0x22b   :  { %v10913_v36 = vunpack.i.h.bf16 %v10911_v0  ;;  %v10912_v61 = vunpack.i.l.bf16 %v10911_v0  ;;  %2264 = vmatmul.mubr.f32.gmra.mxu0 %v2047_v25  ;;  %v2050_v25 = vsel %vm2041_vm5, %v2033_v40, %v10938_v21  ;;  %v10957_v0 = vunpack.i.l.bf16 %v13444_v14 }
 0x22c   :  { %v10967_v14 = vunpack.i.l.bf16 %v13458_v33 }
 0x22d   :  { %v2080_v6 = vsel %vm2024_vm4, %v2064_v2, %v10912_v61  ;;  %v2031_v42 = vsel %vm2024_vm4, %v2014_v27, %v10913_v36 }
 0x22e   :  { %v10921_v51 = vpop.permute.xlu1 %10920  ;;  %v2096_v26 = vsel %vm2041_vm5, %v2080_v6, %v10917_v35  ;;  %v2048_v8 = vsel %vm2041_vm5, %v2031_v42, %v10918_v1  ;;  %v10986_v35 = vpop.permute.xlu0 %10985 }
 0x22f   :  { %v10923_v32 = vunpack.i.h.bf16 %v10921_v51  ;;  %v10922_v34 = vunpack.i.l.bf16 %v10921_v51  ;;  %2268 = vmatprep.mubr.f32.mxu0 %v2096_v26  ;;  %v2068_v51 = vsel %vm1445_vm0, %v13324_v3, %v10957_v0  ;;  %v10988_v56 = vunpack.i.h.bf16 %v10986_v35 }
 0x230   :  { %2269 = vmatmul.mubr.f32.gmra.mxu0 %v2048_v8  ;;  %v10968_v8 = vunpack.i.h.bf16 %v13458_v33 }
 0x231   :  { %v2065_v55 = vsel %vm1445_vm0, %v13136_v38, %v10922_v34  ;;  %v2015_v47 = vsel %vm1445_vm0, %v11709_v45, %v10923_v32  ;;  %v2020_v28 = vsel %vm1445_vm0, %v13129_v60, %v10988_v56  ;;  %v10711_v56 = vpop.f32.mrf.mxu1 }
 0x232   :  { %v10941_v29 = vpop.permute.xlu1 %10940  ;;  %v2081_v17 = vsel %vm2024_vm4, %v2065_v55, %v10927_v13  ;;  %v2032_v57 = vsel %vm2024_vm4, %v2015_v47, %v10928_v49  ;;  %v10996_v34 = vpop.permute.xlu0 %10995  ;;  %v10977_v55 = vunpack.i.l.bf16 %v10976_v50 }
 0x233   :  { %v10942_v16 = vunpack.i.l.bf16 %v10941_v29  ;;  %v2097_v38 = vsel %vm2041_vm5, %v2081_v17, %v10812_v43  ;;  %v10943_v63 = vunpack.i.h.bf16 %v10941_v29  ;;  %v2049_v5 = vsel %vm2041_vm5, %v2032_v57, %v10813_v52 }
 0x234   :  { %2273 = vmatprep.mubr.f32.mxu0 %v2097_v38  ;;  %v10987_v52 = vunpack.i.l.bf16 %v10986_v35  ;;  %v10998_v50 = vunpack.i.h.bf16 %v10996_v34  ;;  %v10997_v38 = vunpack.i.l.bf16 %v10996_v34 }
 0x235   :  { %2274 = vmatmul.mubr.f32.gmra.mxu0 %v2049_v5  ;;  %v2067_v18 = vsel %vm1445_vm0, %v13215_v44, %v10942_v16  ;;  %v2017_v1 = vsel %vm1445_vm0, %v13148_v59, %v10943_v63  ;;  %v10948_v44 = vunpack.i.h.bf16 %v13433_v39  ;;  %v2018_v59 = vsel %vm1445_vm0, %v13081_v20, %v10958_v31 }
 0x236   :  { %v10951_v15 = vpop.permute.xlu1 %10950  ;;  %2278 = vmatprep.mubr.f32.mxu0 %v2098_v7  ;;  %v2083_v61 = vsel %vm2024_vm4, %v2067_v18, %v10947_v19  ;;  %v11006_v17 = vpop.permute.xlu0 %11005  ;;  %v2070_v22 = vsel %vm1445_vm0, %v13351_v48, %v10987_v52  ;;  %v11878_v52 = vmov 1983009808  }
 0x237   :  { %v10952_v58 = vunpack.i.l.bf16 %v10951_v15  ;;  %v10953_v36 = vunpack.i.h.bf16 %v10951_v15  ;;  %v2034_v6 = vsel %vm2024_vm4, %v2017_v1, %v10948_v44  ;;  %v11008_v31 = vunpack.i.h.bf16 %v11006_v17 }
 0x239   :  { %2279 = vmatmul.mubr.f32.gmra.mxu0 %v2050_v25  ;;  %v2099_v2 = vsel %vm2041_vm5, %v2083_v61, %v10952_v58  ;;  %v2051_v42 = vsel %vm2041_vm5, %v2034_v6, %v10953_v36  ;;  %v11007_v58 = vunpack.i.l.bf16 %v11006_v17 }
 0x23a   :  { %v10961_v62 = vpop.permute.xlu1 %10960  ;;  %2283 = vmatprep.mubr.f32.mxu0 %v2099_v2  ;;  %v11016_v19 = vpop.permute.xlu0 %11015 }
 0x23b   :  { %v10963_v27 = vunpack.i.h.bf16 %v10961_v62  ;;  %v10962_v37 = vunpack.i.l.bf16 %v10961_v62  ;;  %v11018_v61 = vunpack.i.h.bf16 %v11016_v19  ;;  %v11017_v1 = vunpack.i.l.bf16 %v11016_v19 }
 0x23d   :  { %2284 = vmatmul.mubr.f32.gmra.mxu0 %v2051_v42  ;;  %v2084_v39 = vsel %vm2024_vm4, %v2068_v51, %v10962_v37  ;;  %v2035_v26 = vsel %vm2024_vm4, %v2018_v59, %v10963_v27  ;;  %v2072_v42 = vsel %vm1445_vm0, %v13366_v9, %v11017_v1  ;;  %v2022_v51 = vsel %vm1445_vm0, %v13186_v10, %v11018_v61 }
 0x23e   :  { %v10971_v11 = vpop.permute.xlu1 %10970  ;;  %v2100_v32 = vsel %vm2041_vm5, %v2084_v39, %v10967_v14  ;;  %v2052_v13 = vsel %vm2041_vm5, %v2035_v26, %v10968_v8  ;;  %v11026_v2 = vpop.permute.xlu0 %11025 }
 0x23f   :  { %v10973_v43 = vunpack.i.h.bf16 %v10971_v11  ;;  %v10972_v49 = vunpack.i.l.bf16 %v10971_v11  ;;  %2288 = vmatprep.mubr.f32.mxu0 %v2100_v32  ;;  %v11028_v6 = vunpack.i.h.bf16 %v11026_v2  ;;  %v11027_v14 = vunpack.i.l.bf16 %v11026_v2 }
 0x241   :  { %2289 = vmatmul.mubr.f32.gmra.mxu0 %v2052_v13  ;;  %v2069_v20 = vsel %vm1445_vm0, %v13263_v46, %v10972_v49  ;;  %v2019_v3 = vsel %vm1445_vm0, %v13109_v30, %v10973_v43 }
 0x242   :  { %v10981_v45 = vpop.permute.xlu1 %10980  ;;  %v2085_v54 = vsel %vm2024_vm4, %v2069_v20, %v10977_v55  ;;  %v2036_v29 = vsel %vm2024_vm4, %v2019_v3, %v10978_v4  ;;  %v11036_v32 = vpop.permute.xlu0 %11035 }
 0x243   :  { %v10983_v33 = vunpack.i.h.bf16 %v10981_v45  ;;  %v10982_v47 = vunpack.i.l.bf16 %v10981_v45  ;;  %v11038_v49 = vunpack.i.h.bf16 %v11036_v32  ;;  %v11037_v13 = vunpack.i.l.bf16 %v11036_v32 }
 0x245   :  { %v2101_v57 = vsel %vm2041_vm5, %v2085_v54, %v10982_v47  ;;  %v2053_v21 = vsel %vm2041_vm5, %v2036_v29, %v10983_v33  ;;  %v2536_v54 = vunpack.c.l.s4 %v11878_v52 }
 0x246   :  { %v10991_v46 = vpop.permute.xlu1 %10990  ;;  %2293 = vmatprep.mubr.f32.mxu0 %v2101_v57  ;;  %v2385_v57 = vpop.f32.mrf.mxu1 }
 0x247   :  { %v10993_v16 = vunpack.i.h.bf16 %v10991_v46  ;;  %v10992_v30 = vunpack.i.l.bf16 %v10991_v46  ;;  %2294 = vmatmul.mubr.f32.gmra.mxu0 %v2053_v21  ;;  %v13550_v21 = vld [vmem:[#allocation5 + $0x1] ss:$0 sm:$0xff] }
 0x249   :  { %v2086_v63 = vsel %vm2024_vm4, %v2070_v22, %v10992_v30  ;;  %v2037_v5 = vsel %vm2024_vm4, %v2020_v28, %v10993_v16  ;;  %v2537_v16 = vunpack.c.0.s8 %v2536_v54 }
 0x24a   :  { %v11001_v24 = vpop.permute.xlu1 %11000  ;;  %v2102_v7 = vsel %vm2041_vm5, %v2086_v63, %v10997_v38  ;;  %v2054_v18 = vsel %vm2041_vm5, %v2037_v5, %v10998_v50  ;;  %v13555_v50 = vld [vmem:[#allocation7 + $0x1] ss:$0 sm:$0xff] }
 0x24b   :  { %v11003_v15 = vunpack.i.h.bf16 %v11001_v24  ;;  %v11002_v40 = vunpack.i.l.bf16 %v11001_v24  ;;  %2298 = vmatprep.mubr.f32.mxu0 %v2102_v7 }
 0x24c   :  { %2299 = vmatmul.mubr.f32.gmra.mxu0 %v2054_v18 }
 0x24d   :  { %v2071_v48 = vsel %vm1445_vm0, %v13298_v53, %v11002_v40  ;;  %v2021_v60 = vsel %vm1445_vm0, %v13164_v23, %v11003_v15 }
 0x24e   :  { %v11011_v25 = vpop.permute.xlu1 %11010  ;;  %v2087_v44 = vsel %vm2024_vm4, %v2071_v48, %v11007_v58  ;;  %v2038_v35 = vsel %vm2024_vm4, %v2021_v60, %v11008_v31  ;;  %v10714_v31 = vpop.f32.mrf.mxu1 }
 0x24f   :  { %v11013_v0 = vunpack.i.h.bf16 %v11011_v25  ;;  %v11012_v36 = vunpack.i.l.bf16 %v11011_v25 }
 0x251   :  { %v2103_v62 = vsel %vm2041_vm5, %v2087_v44, %v11012_v36  ;;  %v2055_v27 = vsel %vm2041_vm5, %v2038_v35, %v11013_v0 }
 0x252   :  { %v11021_v53 = vpop.permute.xlu1 %11020  ;;  %2303 = vmatprep.mubr.f32.mxu0 %v2103_v62  ;;  %v2395_v62 = vpop.f32.mrf.mxu1 }
 0x253   :  { %v11023_v37 = vunpack.i.h.bf16 %v11021_v53  ;;  %v11022_v23 = vunpack.i.l.bf16 %v11021_v53  ;;  %2304 = vmatmul.mubr.f32.gmra.mxu0 %v2055_v27 }
 0x255   :  { %v2088_v59 = vsel %vm2024_vm4, %v2072_v42, %v11022_v23  ;;  %v2039_v39 = vsel %vm2024_vm4, %v2022_v51, %v11023_v37 }
 0x256   :  { %v11031_v26 = vpop.permute.xlu1 %11030  ;;  %v2104_v8 = vsel %vm2041_vm5, %v2088_v59, %v11027_v14  ;;  %v2056_v11 = vsel %vm2041_vm5, %v2039_v39, %v11028_v6 }
 0x257   :  { %v11033_v34 = vunpack.i.h.bf16 %v11031_v26  ;;  %v11032_v43 = vunpack.i.l.bf16 %v11031_v26  ;;  %2308 = vmatprep.mubr.f32.mxu0 %v2104_v8 }
 0x258   :  { %2309 = vmatmul.mubr.f32.gmra.mxu0 %v2056_v11 }
 0x259   :  { %v2073_v9 = vsel %vm1445_vm0, %v13335_v41, %v11032_v43  ;;  %v2023_v10 = vsel %vm1445_vm0, %v13204_v12, %v11033_v34  ;;  %v15777_v12 = vlaneseq }
 0x25a   :  { %v11041_v20 = vpop.permute.xlu1 %11040  ;;  %v2089_v55 = vsel %vm2024_vm4, %v2073_v9, %v11037_v13  ;;  %v2040_v45 = vsel %vm2024_vm4, %v2023_v10, %v11038_v49 }
 0x25b   :  { %v11043_v3 = vunpack.i.h.bf16 %v11041_v20  ;;  %v11042_v4 = vunpack.i.l.bf16 %v11041_v20  ;;  %v13553_v30 = vshrl.u32 %v15777_v12, 7 }
 0x25d   :  { %v2105_v33 = vsel %vm2041_vm5, %v2089_v55, %v11042_v4  ;;  %v2057_v47 = vsel %vm2041_vm5, %v2040_v45, %v11043_v3  ;;  %15830 = vst [vmem:[#allocation18_spill] sm:$0xff] %v13553_v30  ;;  %v13560_v28 = vsub.s32 %v2537_v16, %v13553_v30  ;;  %v10717_v45 = vpop.f32.mrf.mxu1 }
 0x25e   :  { %2313 = vmatprep.mubr.f32.mxu0 %v2105_v33 }
 0x25f   :  { %2314 = vmatmul.mubr.f32.gmra.mxu0 %v2057_v47 }
 0x27c   :  { %v10465_v41 = vpop.f32.mrf.mxu0 }
 0x27e   :  { %v10466_v29 = vpop.f32.mrf.mxu0 }
 0x27f   :  { %v10467_v17 = vadd.f32 %v10466_v29, %v10465_v41 }
 0x281   :  { %v2386_v46 = vadd.f32 %v10467_v17, %v2385_v57 }
 0x283   :  { %v2469_v38 = vmul.f32 %v13550_v21, %v2386_v46 }
 0x285   :  { %v2490_v22 = vadd.f32 %v13555_v50, %v2469_v38 }
 0x287   :  { %v2506_v63 = vmax.f32 %v2490_v22, 0.0 }
 0x289   :  { %v13563_v5 = vrot.slane %v2506_v63, %v13560_v28  ;;  %v2534_v18 = vcombine.high %v2506_v63, %v2506_v63 }
 0x28b   :  { %v13567_v24 = vcombine.high %v13563_v5, %v13563_v5  ;;  %v13573_v48 = vrot.slane %v2534_v18, %v13560_v28  ;;  %v9829_v53 = vrot.slane %v13563_v5, 9 }
 0x28d   :  { %v2747_v15 = vrot.slane %v13567_v24, 7  ;;  %v2750_v1 = vrot.slane %v13573_v48, 7  ;;  %v2726_v35 = vcombine.high %v13573_v48, %v13573_v48  ;;  %v3319_v42 = vcombine.low %v13567_v24, %v13573_v48 }
 0x28f   :  { %v2749_v0 = vrot.slane %v2747_v15, 2  ;;  %v2748_v14 = vsel %vm13579_vm12, %v9829_v53, %v2747_v15  ;;  %v2752_v39 = vrot.slane %v2750_v1, 2  ;;  %v2753_v26 = vrot.slane %v2726_v35, 7 }
 0x290   :  { %v13604_v13 = vrot.slane %v3319_v42, %v13560_v28 }
 0x291   :  { %v2751_v37 = vsel %vm13579_vm12, %v2749_v0, %v2750_v1  ;;  %v2754_v3 = vsel %vm13579_vm12, %v2752_v39, %v2753_v26 }
 0x292   :  { %v3139_v8 = vcombine.low %v2748_v14, %v2751_v37 }
 0x294   :  { %v3147_v55 = vrot.slane %v3139_v8, %v13560_v28 }
 0x2d3   :  { %v10468_v19 = vpop.f32.mrf.mxu0 }
 0x2d5   :  { %v10469_v40 = vpop.f32.mrf.mxu0 }
 0x2d6   :  { %v10470_v60 = vadd.f32 %v10469_v40, %v10468_v19 }
 0x2d8   :  { %v2391_v58 = vadd.f32 %v10711_v56, %v10470_v60  ;;  %v10471_v25 = vpop.f32.mrf.mxu0  ;;  %v2405_v60 = vpop.f32.mrf.mxu1 }
 0x2da   :  { %v2470_v36 = vmul.f32 %v13550_v21, %v2391_v58  ;;  %v10472_v61 = vpop.f32.mrf.mxu0 }
 0x2db   :  { %v10473_v44 = vadd.f32 %v10472_v61, %v10471_v25 }
 0x2dc   :  { %v2491_v27 = vadd.f32 %v13555_v50, %v2470_v36 }
 0x2dd   :  { %v2396_v23 = vadd.f32 %v10473_v44, %v2395_v62 }
 0x2de   :  { %v2507_v6 = vmax.f32 %v2491_v27, 0.0 }
 0x2df   :  { %v2471_v51 = vmul.f32 %v13550_v21, %v2396_v23  ;;  %v10474_v59 = vpop.f32.mrf.mxu0 }
 0x2e0   :  { %v2550_v11 = vcombine.high %v2507_v6, %v2507_v6  ;;  %v13593_v32 = vrot.slane %v2507_v6, %v13560_v28 }
 0x2e1   :  { %v2492_v34 = vadd.f32 %v13555_v50, %v2471_v51  ;;  %v10475_v43 = vpop.f32.mrf.mxu0 }
 0x2e2   :  { %v13597_v9 = vrot.slane %v2550_v11, %v13560_v28  ;;  %v10476_v10 = vadd.f32 %v10475_v43, %v10474_v59  ;;  %v13601_v49 = vcombine.high %v13593_v32, %v13593_v32  ;;  %v9830_v4 = vrot.slane %v13593_v32, 9 }
 0x2e3   :  { %v2508_v20 = vmax.f32 %v2492_v34, 0.0  ;;  %v9845_v52 = vcombine.high %v13573_v48, %v13593_v32 }
 0x2e4   :  { %v2401_v33 = vadd.f32 %v10714_v31, %v10476_v10  ;;  %v10477_v47 = vpop.f32.mrf.mxu0  ;;  %v2757_v56 = vrot.slane %v13601_v49, 7  ;;  %v2994_v41 = vcombine.low %v13601_v49, %v13597_v9  ;;  %v13620_v17 = vcombine.high %v13597_v9, %v13597_v9 }
 0x2e5   :  { %v2566_v54 = vcombine.high %v2508_v20, %v2508_v20  ;;  %v13616_v29 = vrot.slane %v2508_v20, %v13560_v28  ;;  %v2760_v63 = vrot.slane %v13597_v9, 7  ;;  %v3334_v0 = vrot.slane %v9845_v52, %v13560_v28  ;;  %v10720_v52 = vpop.f32.mrf.mxu1 }
 0x2e6   :  { %v2472_v46 = vmul.f32 %v13550_v21, %v2401_v33  ;;  %v10478_v16 = vpop.f32.mrf.mxu0  ;;  %v13627_v38 = vsel %vm13579_vm12, %v9830_v4, %v2757_v56  ;;  %v2759_v22 = vrot.slane %v2757_v56, 2  ;;  %v13638_v58 = vrot.slane %v2994_v41, %v13560_v28 }
 0x2e7   :  { %v13631_v18 = vrot.slane %v2566_v54, %v13560_v28  ;;  %v10479_v19 = vadd.f32 %v10478_v16, %v10477_v47  ;;  %v3140_v15 = vcombine.low %v2754_v3, %v13627_v38  ;;  %v9851_v40 = vcombine.high %v13597_v9, %v13616_v29 }
 0x2e8   :  { %v2493_v31 = vadd.f32 %v13555_v50, %v2472_v46  ;;  %15833 = vst [vmem:[#allocation19_spill] sm:$0xff] %v13638_v58  ;;  %v13642_v25 = vcombine.high %v13616_v29, %v13616_v29  ;;  %v13649_v44 = vsel %vm13579_vm12, %v2759_v22, %v2760_v63  ;;  %v2762_v53 = vrot.slane %v2760_v63, 2 }
 0x2e9   :  { %v2406_v36 = vadd.f32 %v10479_v19, %v2405_v60  ;;  %v3154_v61 = vrot.slane %v3140_v15, %v13560_v28  ;;  %v3816_v1 = vrot.slane %v9851_v40, %v13560_v28  ;;  %v13655_v27 = vcombine.high %v13631_v18, %v13631_v18 }
 0x2ea   :  { %v2509_v35 = vmax.f32 %v2493_v31, 0.0  ;;  %v2995_v62 = vcombine.low %v13616_v29, %v13642_v25  ;;  %v2763_v42 = vrot.slane %v13620_v17, 7  ;;  %v9831_v26 = vrot.slane %v13616_v29, 9 }
 0x2eb   :  { %v2473_v37 = vmul.f32 %v13550_v21, %v2406_v36  ;;  %v10480_v23 = vpop.f32.mrf.mxu0  ;;  %v3155_v6 = vcombine.low %v3147_v55, %v3154_v61  ;;  %v3817_v14 = vcombine.low %v13638_v58, %v3816_v1  ;;  %v2767_v43 = vrot.slane %v13642_v25, 7 }
 0x2ec   :  { %v2582_v51 = vcombine.high %v2509_v35, %v2509_v35  ;;  %v13661_v59 = vrot.slane %v2509_v35, %v13560_v28  ;;  %v13664_v39 = vrot.slane %v2995_v62, %v13560_v28  ;;  %v2770_v10 = vrot.slane %v13631_v18, 7 }
 0x2ed   :  { %v2494_v8 = vadd.f32 %v13555_v50, %v2473_v37  ;;  %v10481_v11 = vpop.f32.mrf.mxu0  ;;  %v11044_v34 = vpack.i.bf16 %v3155_v6, %v3817_v14  ;;  %v2764_v56 = vsel %vm13579_vm12, %v2762_v53, %v2763_v42  ;;  %v2769_v41 = vrot.slane %v2767_v43, 2  ;;  %v2415_v53 = vpop.f32.mrf.mxu1  ;;  %v4235_v42 = vld [vmem:[%s15762_s3 + $0xf8] sm:$0xff] }
 0x2ee   :  { %15834 = vst [vmem:[#allocation20_spill] sm:$0xff] %v13664_v39  ;;  %v13671_v20 = vrot.slane %v2582_v51, %v13560_v28  ;;  %v10482_v3 = vadd.f32 %v10481_v11, %v10480_v23  ;;  %v13675_v4 = vcombine.high %v13661_v59, %v13661_v59  ;;  %v3011_v47 = vcombine.low %v13631_v18, %v13661_v59  ;;  %v4219_v51 = vld [vmem:[%s15762_s3 + $0x78] sm:$0xff] }
 0x2ef   :  { %v2510_v33 = vmax.f32 %v2494_v8, 0.0  ;;  %11045 = vrot.lane.b32.xlu0 %v11044_v34, %s11863_s27  ;;  %v2772_v22 = vrot.slane %v2770_v10, 2  ;;  %v2773_v63 = vrot.slane %v13655_v27, 7  ;;  %v3335_v15 = vcombine.low %v13604_v13, %v3334_v0  ;;  %10533 = vmatprep.subr.mxu1 %v4235_v42 }
 0x2f0   :  { %v2411_v54 = vadd.f32 %v10717_v45, %v10482_v3  ;;  %v10483_v46 = vpop.f32.mrf.mxu0  ;;  %v3012_v16 = vcombine.low %v13675_v4, %v13671_v20  ;;  %v13688_v19 = vrot.slane %v3011_v47, %v13560_v28  ;;  %v2768_v40 = vsel %vm13579_vm12, %v9831_v26, %v2767_v43  ;;  %v4234_v26 = vld [vmem:[%s15762_s3 + $0xf0] sm:$0xff]  ;;  %10534 = vmatpush3.msra.mxu1 %v4219_v51 }
 0x2f1   :  { %v13695_v60 = vsel %vm13579_vm12, %v2769_v41, %v2770_v10  ;;  %v2598_v45 = vcombine.high %v2510_v33, %v2510_v33  ;;  %v3156_v1 = vcombine.low %v13649_v44, %v2764_v56  ;;  %v13706_v0 = vsel %vm13579_vm12, %v2772_v22, %v2773_v63  ;;  %v4218_v3 = vld [vmem:[%s15762_s3 + $0x70] sm:$0xff]  ;;  %10535 = vmatprep.subr.mxu1 %v4234_v26 }
 0x2f2   :  { %15835 = vst [vmem:[#allocation21_spill] sm:$0xff] %v13688_v19  ;;  %v2474_v31 = vmul.f32 %v13550_v21, %v2411_v54  ;;  %v10484_v36 = vpop.f32.mrf.mxu0  ;;  %v13699_v61 = vrot.slane %v3012_v16, %v13560_v28  ;;  %v3941_v13 = vcombine.low %v13664_v39, %v13688_v19  ;;  %v3157_v62 = vcombine.low %v2768_v40, %v13695_v60 }
 0x2f3   :  { %v10485_v35 = vadd.f32 %v10484_v36, %v10483_v46  ;;  %v3164_v6 = vrot.slane %v3156_v1, %v13560_v28  ;;  %v3648_v10 = vcombine.low %v2764_v56, %v2768_v40  ;;  %v13731_v47 = vrot.slane %v2510_v33, %v13560_v28  ;;  %v4233_v56 = vld [vmem:[%s15762_s3 + $0xe8] sm:$0xff]  ;;  %10536 = vmatpush3.msra.mxu1 %v4218_v3  ;;  %v4232_v36 = vld [vmem:[%s15762_s3 + $0xe0] sm:$0xff]  ;;  %v13756_v1 = vpop.f32.mrf.mxu1  ;;  %v4215_v3 = vld [vmem:[%s15762_s3 + $0x58] sm:$0xff] }
 0x2f4   :  { %15836 = vst [vmem:[#allocation22_spill] sm:$0xff] %v13699_v61  ;;  %v2495_v37 = vadd.f32 %v13555_v50, %v2474_v31  ;;  %v11049_v34 = vpack.i.bf16 %v3335_v15, %v3941_v13  ;;  %v13725_v43 = vrot.slane %v3157_v62, %v13560_v28  ;;  %v3818_v46 = vcombine.low %v13631_v18, %v13655_v27  ;;  %v4217_v27 = vld [vmem:[%s15762_s3 + $0x68] sm:$0xff] }
 0x2f5   :  { %v2416_v8 = vadd.f32 %v10485_v35, %v2415_v53  ;;  %v10486_v11 = vpop.f32.mrf.mxu0  ;;  %v13741_v16 = vrot.slane %v2598_v45, %v13560_v28  ;;  %v13750_v31 = vrot.slane %v3648_v10, %v13560_v28  ;;  %v9832_v45 = vrot.slane %v13661_v59, 9  ;;  %10537 = vmatprep.subr.mxu1 %v4233_v56 }
 0x2f6   :  { %v2511_v41 = vmax.f32 %v2495_v37, 0.0  ;;  %11050 = vrot.lane.b32.xlu1 %v11049_v34, %s11873_s6  ;;  %v3172_v63 = vcombine.low %v3164_v6, %v13725_v43  ;;  %v3825_v62 = vrot.slane %v3818_v46, %v13560_v28  ;;  %v2777_v53 = vrot.slane %v13675_v4, 7  ;;  %v4216_v6 = vld [vmem:[%s15762_s3 + $0x60] sm:$0xff]  ;;  %10538 = vmatpush3.msra.mxu1 %v4217_v27 }
 0x2f7   :  { %v2475_v22 = vmul.f32 %v13550_v21, %v2416_v8  ;;  %v10487_v33 = vpop.f32.mrf.mxu0  ;;  %v3499_v37 = vcombine.low %v13593_v32, %v13601_v49  ;;  %v3500_v26 = vcombine.low %v13597_v9, %v13616_v29  ;;  %v13773_v8 = vcombine.high %v13731_v47, %v13731_v47  ;;  %v4231_v49 = vld [vmem:[%s15762_s3 + $0xd8] sm:$0xff]  ;;  %10539 = vmatprep.subr.mxu1 %v4232_v36 }
 0x2f8   :  { %v2614_v15 = vcombine.high %v2511_v41, %v2511_v41  ;;  %v10488_v40 = vadd.f32 %v10487_v33, %v10486_v11  ;;  %v13767_v42 = vrot.slane %v2511_v41, %v13560_v28  ;;  %v3826_v34 = vcombine.low %v3825_v62, %v13699_v61  ;;  %10540 = vmatpush3.msra.mxu1 %v4216_v6  ;;  %v2425_v33 = vpop.f32.mrf.mxu1 }
 0x2f9   :  { %v2496_v35 = vadd.f32 %v13555_v50, %v2475_v22  ;;  %v10489_v13 = vpop.f32.mrf.mxu0  ;;  %v3507_v29 = vrot.slane %v3499_v37, %v13560_v28  ;;  %v3514_v22 = vrot.slane %v3500_v26, %v13560_v28  ;;  %10541 = vmatprep.subr.mxu1 %v4231_v49 }
 0x2fa   :  { %v2421_v51 = vadd.f32 %v10720_v52, %v10488_v40  ;;  %v13783_v52 = vsel %vm13579_vm12, %v9832_v45, %v2777_v53  ;;  %v11054_v45 = vpack.i.bf16 %v3172_v63, %v3826_v34  ;;  %v13802_v62 = vrot.slane %v2614_v15, %v13560_v28  ;;  %10542 = vmatpush3.msra.mxu1 %v4215_v3  ;;  %v4214_v63 = vld [vmem:[%s15762_s3 + $0x50] sm:$0xff] }
 0x2fb   :  { %v2512_v11 = vmax.f32 %v2496_v35, 0.0  ;;  %v10490_v10 = vpop.f32.mrf.mxu0  ;;  %v3173_v56 = vcombine.low %v13706_v0, %v13783_v52  ;;  %v3028_v35 = vcombine.low %v13731_v47, %v13773_v8  ;;  %v3515_v49 = vcombine.low %v3507_v29, %v3514_v22  ;;  %v4213_v29 = vld [vmem:[%s15762_s3 + $0x48] sm:$0xff] }
 0x2fc   :  { %v2476_v41 = vmul.f32 %v13550_v21, %v2421_v51  ;;  %v10491_v46 = vadd.f32 %v10490_v10, %v10489_v13  ;;  %v4230_v13 = vld [vmem:[%s15762_s3 + $0xd0] sm:$0xff]  ;;  %11055 = vrot.lane.b32.xlu1 %v11054_v45, %s11863_s27  ;;  %v3336_v34 = vcombine.low %v13597_v9, %v13620_v17  ;;  %v4229_v10 = vld [vmem:[%s15762_s3 + $0xc8] sm:$0xff]  ;;  %v3337_v9 = vcombine.low %v13642_v25, %v13631_v18  ;;  %v13843_v45 = vpop.f32.mrf.mxu1 }
 0x2fd   :  { %v2867_v27 = vcombine.high %v2512_v11, %v2512_v11  ;;  %v13794_v40 = vrot.slane %v2512_v11, %v13560_v28  ;;  %v10492_v36 = vpop.f32.mrf.mxu0  ;;  %v13806_v51 = vrot.slane %v3173_v56, %v13560_v28  ;;  %v13816_v15 = vrot.slane %v3028_v35, %v13560_v28  ;;  %10543 = vmatprep.subr.mxu1 %v4230_v13 }
 0x2fe   :  { %v2497_v37 = vadd.f32 %v13555_v50, %v2476_v41  ;;  %v2426_v6 = vadd.f32 %v10491_v46, %v2425_v33  ;;  %v3344_v17 = vrot.slane %v3336_v34, %v13560_v28  ;;  %10544 = vmatpush3.msra.mxu1 %v4214_v63  ;;  %v13854_v63 = vrot.slane %v3337_v9, %v13560_v28 }
 0x2ff   :  { %v13812_v26 = vrot.slane %v2867_v27, %v13560_v28  ;;  %v10493_v11 = vpop.f32.mrf.mxu0  ;;  %15838 = vst [vmem:[#allocation24_spill] sm:$0xff] %v13816_v15  ;;  %v4025_v46 = vcombine.low %v13725_v43, %v13806_v51  ;;  %v13831_v22 = vcombine.high %v13794_v40, %v13794_v40  ;;  %v13838_v27 = vcombine.high %v13671_v20, %v13671_v20  ;;  %v4228_v43 = vld [vmem:[%s15762_s3 + $0xc0] sm:$0xff] }
 0x300   :  { %v2513_v3 = vmax.f32 %v2497_v37, 0.0  ;;  %v2477_v41 = vmul.f32 %v13550_v21, %v2426_v6  ;;  %v10494_v56 = vadd.f32 %v10493_v11, %v10492_v36  ;;  %10545 = vmatprep.subr.mxu1 %v4229_v10  ;;  %v4212_v37 = vld [vmem:[%s15762_s3 + $0x40] sm:$0xff]  ;;  %15840 = vst [vmem:[#allocation26_spill] sm:$0xff] %v13854_v63  ;;  %v3942_v11 = vcombine.low %v13699_v61, %v13816_v15 }
 0x301   :  { %15837 = vst [vmem:[#allocation23_spill] sm:$0xff] %v13812_v26  ;;  %v10495_v33 = vpop.f32.mrf.mxu0  ;;  %v11059_v13 = vpack.i.bf16 %v3515_v49, %v4025_v46  ;;  %10546 = vmatpush3.msra.mxu1 %v4213_v29  ;;  %v4227_v49 = vld [vmem:[%s15762_s3 + $0xb8] sm:$0xff]  ;;  %v13873_v46 = vcombine.high %v13741_v16, %v13741_v16  ;;  %v3352_v29 = vcombine.low %v3344_v17, %v13854_v63  ;;  %v2783_v55 = vrot.slane %v13838_v27, 7  ;;  %v4210_v17 = vld [vmem:[%s15762_s3 + $0x30] sm:$0xff] }
 0x302   :  { %v2923_v36 = vcombine.high %v2513_v3, %v2513_v3  ;;  %v13846_v35 = vrot.slane %v2513_v3, %v13560_v28  ;;  %v2498_v25 = vadd.f32 %v13555_v50, %v2477_v41  ;;  %v2431_v6 = vadd.f32 %v13756_v1, %v10494_v56  ;;  %10547 = vmatprep.subr.mxu1 %v4228_v43 }
 0x303   :  { %v10496_v34 = vpop.f32.mrf.mxu0  ;;  %v2779_v3 = vrot.slane %v2777_v53, 2  ;;  %11060 = vrot.lane.b32.xlu0 %v11059_v13, %s11877_s24  ;;  %v4211_v53 = vld [vmem:[%s15762_s3 + $0x38] sm:$0xff]  ;;  %10548 = vmatpush3.msra.mxu1 %v4212_v37  ;;  %v2435_v13 = vpop.f32.mrf.mxu1  ;;  %v11064_v37 = vpack.i.bf16 %v3352_v29, %v3942_v11  ;;  %v3029_v12 = vcombine.low %v13741_v16, %v13767_v42 }
 0x304   :  { %15839 = vst [vmem:[#allocation25_spill] sm:$0xff] %v13846_v35  ;;  %v13864_v10 = vrot.slane %v2923_v36, %v13560_v28  ;;  %v13868_v1 = vcombine.high %v13846_v35, %v13846_v35  ;;  %v2514_v41 = vmax.f32 %v2498_v25, 0.0  ;;  %v2478_v56 = vmul.f32 %v13550_v21, %v2431_v6  ;;  %v4226_v25 = vld [vmem:[%s15762_s3 + $0xb0] sm:$0xff]  ;;  %10549 = vmatprep.subr.mxu1 %v4227_v49 }
 0x305   :  { %v10497_v9 = vadd.f32 %v10496_v34, %v10495_v33  ;;  %v2780_v36 = vrot.slane %v13671_v20, 7  ;;  %10550 = vmatpush3.msra.mxu1 %v4211_v53  ;;  %v13986_v61 = vrot.slane %v3029_v12, %v13560_v28 }
 0x306   :  { %v2630_v43 = vcombine.high %v2514_v41, %v2514_v41  ;;  %v13886_v23 = vrot.slane %v2514_v41, %v13560_v28  ;;  %v2499_v33 = vadd.f32 %v13555_v50, %v2478_v56  ;;  %v4225_v41 = vld [vmem:[%s15762_s3 + $0xa8] sm:$0xff]  ;;  %v13900_v54 = vcombine.high %v13864_v10, %v13864_v10  ;;  %10551 = vmatprep.subr.mxu1 %v4226_v25 }
 0x307   :  { %v2436_v6 = vadd.f32 %v10497_v9, %v2435_v13  ;;  %v2781_v34 = vsel %vm13579_vm12, %v2779_v3, %v2780_v36  ;;  %v2782_v11 = vrot.slane %v2780_v36, 2  ;;  %v4209_v3 = vld [vmem:[%s15762_s3 + $0x28] sm:$0xff]  ;;  %11065 = vrot.lane.b32.xlu0 %v11064_v37, %s11873_s6  ;;  %v9833_v9 = vrot.slane %v13731_v47, 9  ;;  %10552 = vmatpush3.msra.mxu1 %v4210_v17  ;;  %v4208_v17 = vld [vmem:[%s15762_s3 + $0x20] sm:$0xff]  ;;  %15844 = vst [vmem:[#allocation30_spill] sm:$0xff] %v13986_v61 }
 0x308   :  { %15841 = vst [vmem:[#allocation27_spill] sm:$0xff] %v13886_v23  ;;  %v13903_v49 = vrot.slane %v2630_v43, %v13560_v28  ;;  %v13907_v56 = vcombine.high %v13886_v23, %v13886_v23  ;;  %v2515_v53 = vmax.f32 %v2499_v33, 0.0  ;;  %v2787_v13 = vrot.slane %v13773_v8, 7  ;;  %v4224_v43 = vld [vmem:[%s15762_s3 + $0xa0] sm:$0xff]  ;;  %10553 = vmatprep.subr.mxu1 %v4225_v41 }
 0x309   :  { %v2479_v29 = vmul.f32 %v13550_v21, %v2436_v6  ;;  %v13924_v33 = vsel %vm13579_vm12, %v2782_v11, %v2783_v55  ;;  %v3665_v37 = vcombine.low %v13783_v52, %v2781_v34  ;;  %10554 = vmatpush3.msra.mxu1 %v4209_v3  ;;  %v4223_v55 = vld [vmem:[%s15762_s3 + $0x98] sm:$0xff] }
 0x30a   :  { %15842 = vst [vmem:[#allocation28_spill] sm:$0xff] %v13907_v56  ;;  %v2646_v6 = vcombine.high %v2515_v53, %v2515_v53  ;;  %v13933_v7 = vsel %vm13579_vm12, %v9833_v9, %v2787_v13  ;;  %v13940_v52 = vrot.slane %v2515_v53, %v13560_v28  ;;  %v3174_v41 = vcombine.low %v2781_v34, %v13924_v33  ;;  %v10498_v9 = vpop.f32.mrf.mxu0  ;;  %v4207_v3 = vld [vmem:[%s15762_s3 + $0x18] sm:$0xff] }
 0x30b   :  { %v2500_v57 = vadd.f32 %v13555_v50, %v2479_v29  ;;  %v9852_v29 = vcombine.high %v13671_v20, %v13731_v47  ;;  %10555 = vmatprep.subr.mxu1 %v4224_v43  ;;  %v13951_v36 = vrot.slane %v3665_v37, %v13560_v28  ;;  %v3828_v53 = vcombine.low %v13741_v16, %v13873_v46  ;;  %v4222_v43 = vld [vmem:[%s15762_s3 + $0x90] sm:$0xff] }
 0x30c   :  { %v13957_v34 = vcombine.high %v13767_v42, %v13767_v42  ;;  %10556 = vmatpush3.msra.mxu1 %v4208_v17  ;;  %v13963_v11 = vrot.slane %v2646_v6, %v13560_v28  ;;  %v4206_v17 = vld [vmem:[%s15762_s3 + $0x10] sm:$0xff]  ;;  %v10499_v19 = vpop.f32.mrf.mxu0  ;;  %v2789_v12 = vrot.slane %v2787_v13, 2  ;;  %v4204_v13 = vld [vmem:[%s15762_s3] sm:$0xff] }
 0x30d   :  { %v2516_v14 = vmax.f32 %v2500_v57, 0.0  ;;  %15843 = vst [vmem:[#allocation29_spill] sm:$0xff] %v13951_v36  ;;  %v13966_v57 = vrot.slane %v3174_v41, %v13560_v28  ;;  %v3835_v37 = vrot.slane %v9852_v29, %v13560_v28  ;;  %10557 = vmatprep.subr.mxu1 %v4223_v55  ;;  %v3842_v6 = vrot.slane %v3828_v53, %v13560_v28  ;;  %v4221_v29 = vld [vmem:[%s15762_s3 + $0x88] sm:$0xff] }
 0x30e   :  { %v3045_v41 = vcombine.low %v13957_v34, %v13802_v62  ;;  %10558 = vmatpush3.msra.mxu1 %v4207_v3  ;;  %v3354_v53 = vcombine.low %v13671_v20, %v13838_v27  ;;  %v4205_v3 = vld [vmem:[%s15762_s3 + $0x8] sm:$0xff]  ;;  %v15849_v27 = vmov 0.0  }
 0x30f   :  { %v2662_v25 = vcombine.high %v2516_v14, %v2516_v14  ;;  %v13975_v30 = vrot.slane %v2516_v14, %v13560_v28  ;;  %v3189_v55 = vcombine.low %v13806_v51, %v13966_v57  ;;  %v9846_v14 = vcombine.high %v13631_v18, %v13661_v59  ;;  %10559 = vmatprep.subr.mxu1 %v4222_v43  ;;  %v4220_v18 = vld [vmem:[%s15762_s3 + $0x80] sm:$0xff] }
 0x310   :  { %v3843_v58 = vcombine.low %v3835_v37, %v3842_v6  ;;  %v13999_v51 = vrot.slane %v3045_v41, %v13560_v28  ;;  %10560 = vmatpush3.msra.mxu1 %v4206_v17  ;;  %v14010_v36 = vrot.slane %v3354_v53, %v13560_v28  ;;  %v3516_v6 = vcombine.low %v13661_v59, %v13675_v4 }
 0x311   :  { %v13996_v39 = vrot.slane %v2662_v25, %v13560_v28  ;;  %v14007_v43 = vrot.slane %v9846_v14, %v13560_v28  ;;  %v2790_v25 = vrot.slane %v13741_v16, 7  ;;  %10561 = vmatprep.subr.mxu1 %v4221_v29  ;;  %v10500_v41 = vadd.f32 %v10499_v19, %v10498_v9 }
 0x312   :  { %15845 = vst [vmem:[#allocation31_spill] sm:$0xff] %v13999_v51  ;;  %15847 = vst [vmem:[#allocation33_spill] sm:$0xff] %v14010_v36  ;;  %v11069_v37 = vpack.i.bf16 %v3189_v55, %v3843_v58  ;;  %v3943_v17 = vcombine.low %v13986_v61, %v13999_v51  ;;  %10562 = vmatpush3.msra.mxu1 %v4205_v3  ;;  %v14030_v58 = vcombine.high %v13802_v62, %v13802_v62 }
 0x313   :  { %15846 = vst [vmem:[#allocation32_spill] sm:$0xff] %v14007_v43  ;;  %v3369_v14 = vcombine.low %v14007_v43, %v14010_v36  ;;  %v14026_v29 = vsel %vm13579_vm12, %v2789_v12, %v2790_v25  ;;  %10563 = vmatprep.subr.mxu1 %v4220_v18  ;;  %v3523_v4 = vrot.slane %v3516_v6, %v13560_v28  ;;  %v2792_v9 = vrot.slane %v2790_v25, 2  ;;  %v10501_v25 = vpop.f32.mrf.mxu0 }
 0x314   :  { %15848 = vst [vmem:[#allocation34_spill] sm:$0xff] %v14026_v29  ;;  %11070 = vrot.lane.b32.xlu0 %v11069_v37, %s11863_s27  ;;  %v3190_v59 = vcombine.low %v13933_v7, %v14026_v29  ;;  %v2441_v19 = vadd.f32 %v13843_v45, %v10500_v41  ;;  %10564 = vmatpush3.msra.mxu1 %v4204_v13  ;;  %v9834_v3 = vrot.slane %v13767_v42, 9  ;;  %v2797_v12 = vrot.slane %v13957_v34, 7 }
 0x315   :  { %v11074_v55 = vpack.i.bf16 %v3369_v14, %v3943_v17  ;;  %v2800_v53 = vrot.slane %v13802_v62, 7  ;;  %10733 = vmatprep.subr.mxu1 %v15849_v27  ;;  %v3524_v37 = vcombine.low %v13854_v63, %v3523_v4  ;;  %v15850_v6 = vrot.slane %v13873_v46, 7 }
 0x316   :  { %v3198_v18 = vrot.slane %v3190_v59, %v13560_v28  ;;  %v2480_v36 = vmul.f32 %v13550_v21, %v2441_v19  ;;  %v14053_v13 = vsel %vm13579_vm12, %v9834_v3, %v2797_v12  ;;  %v2799_v17 = vrot.slane %v2797_v12, 2 }
 0x317   :  { %v14048_v45 = vsel %vm13579_vm12, %v2792_v9, %v15850_v6  ;;  %11075 = vrot.lane.b32.xlu1 %v11074_v55, %s11873_s6  ;;  %15852 = vst [vmem:[#allocation36_spill] sm:$0xff] %v14053_v13  ;;  %v2802_v41 = vrot.slane %v2800_v53, 2  ;;  %v2803_v14 = vrot.slane %v14030_v58, 7  ;;  %v9841_v46 = vrot.slane %v13794_v40, 9 }
 0x318   :  { %15851 = vst [vmem:[#allocation35_spill] sm:$0xff] %v14048_v45  ;;  %v4026_v59 = vcombine.low %v13966_v57, %v3198_v18  ;;  %v2501_v4 = vadd.f32 %v13555_v50, %v2480_v36  ;;  %v2903_v19 = vrot.slane %v13831_v22, 7  ;;  %v14062_v9 = vsel %vm13579_vm12, %v2799_v17, %v2800_v53  ;;  %v10502_v17 = vpop.f32.mrf.mxu0 }
 0x319   :  { %15853 = vst [vmem:[#allocation37_spill] sm:$0xff] %v14062_v9  ;;  %v14066_v55 = vsel %vm13579_vm12, %v2802_v41, %v2803_v14  ;;  %v3191_v3 = vcombine.low %v14048_v45, %v14053_v13  ;;  %v3370_v57 = vcombine.low %v13773_v8, %v13741_v16  ;;  %v3525_v14 = vcombine.low %v13671_v20, %v13731_v47 }
 0x31a   :  { %15854 = vst [vmem:[#allocation38_spill] sm:$0xff] %v14066_v55  ;;  %v11079_v12 = vpack.i.bf16 %v3524_v37, %v4026_v59  ;;  %v2517_v36 = vmax.f32 %v2501_v4, 0.0  ;;  %v14074_v6 = vsel %vm13579_vm12, %v9841_v46, %v2903_v19  ;;  %v3207_v53 = vcombine.low %v14062_v9, %v14066_v55  ;;  %v10729_v37 = vpop.f32.mrf.mxu1 }
 0x31b   :  { %v3205_v43 = vrot.slane %v3191_v3, %v13560_v28  ;;  %v14080_v41 = vrot.slane %v3370_v57, %v13560_v28  ;;  %v10504_v57 = vpop.f32.mrf.mxu0  ;;  %v3532_v63 = vrot.slane %v3525_v14, %v13560_v28  ;;  %v3944_v3 = vcombine.low %v13794_v40, %v13831_v22 }
 0x31c   :  { %11080 = vrot.lane.b32.xlu1 %v11079_v12, %s11877_s24  ;;  %v2678_v59 = vcombine.high %v2517_v36, %v2517_v36  ;;  %v14088_v4 = vrot.slane %v2517_v36, %v13560_v28  ;;  %v14091_v46 = vrot.slane %v3207_v53, %v13560_v28  ;;  %v9853_v12 = vcombine.high %v13802_v62, %v13794_v40  ;;  %v2445_v15 = vpop.f32.mrf.mxu1 }
 0x31d   :  { %15855 = vst [vmem:[#allocation39_spill] sm:$0xff] %v14080_v41  ;;  %v3206_v47 = vcombine.low %v3198_v18, %v3205_v43  ;;  %v9847_v53 = vcombine.high %v13741_v16, %v13767_v42  ;;  %v3533_v14 = vcombine.low %v3532_v63, %v14080_v41  ;;  %v3945_v18 = vcombine.low %v13812_v26, %v13846_v35  ;;  %v10505_v55 = vpop.f32.mrf.mxu0 }
 0x31e   :  { %v14101_v8 = vrot.slane %v2678_v59, %v13560_v28  ;;  %v4027_v36 = vcombine.low %v3205_v43, %v14091_v46  ;;  %v3851_v61 = vrot.slane %v9853_v12, %v13560_v28  ;;  %v10503_v20 = vadd.f32 %v10502_v17, %v10501_v25 }
 0x31f   :  { %v14113_v59 = vrot.slane %v9847_v53, %v13560_v28  ;;  %v3952_v43 = vrot.slane %v3944_v3, %v13560_v28  ;;  %v2899_v16 = vcombine.high %v13812_v26, %v13812_v26  ;;  %v2905_v27 = vrot.slane %v2903_v19, 2 }
 0x320   :  { %v11089_v9 = vpack.i.bf16 %v3533_v14, %v4027_v36  ;;  %v3852_v63 = vcombine.low %v13999_v51, %v3851_v61  ;;  %v3959_v12 = vrot.slane %v3945_v18, %v13560_v28  ;;  %v2446_v13 = vadd.f32 %v10503_v20, %v2445_v15 }
 0x321   :  { %15856 = vst [vmem:[#allocation40_spill] sm:$0xff] %v14113_v59  ;;  %v3386_v25 = vcombine.low %v14080_v41, %v14113_v59  ;;  %v2906_v17 = vrot.slane %v13812_v26, 7  ;;  %v2909_v53 = vrot.slane %v2899_v16, 7  ;;  %v15795_v45 = vrot.slane %v13868_v1, 7 }
 0x322   :  { %11090 = vrot.lane.b32.xlu0 %v11089_v9, %s11877_s24  ;;  %v11084_v3 = vpack.i.bf16 %v3206_v47, %v3852_v63  ;;  %v3960_v29 = vcombine.low %v3952_v43, %v3959_v12  ;;  %v2481_v19 = vmul.f32 %v13550_v21, %v2446_v13  ;;  %v3534_v61 = vcombine.low %v13767_v42, %v13957_v34  ;;  %v10507_v47 = vpop.f32.mrf.mxu0 }
 0x323   :  { %v14130_v15 = vsel %vm13579_vm12, %v2905_v27, %v2906_v17  ;;  %v2908_v20 = vrot.slane %v2906_v17, 2  ;;  %v15858_v36 = vrot.slane %v13846_v35, 9  ;;  %v3535_v9 = vcombine.low %v13802_v62, %v13794_v40 }
 0x324   :  { %15857 = vst [vmem:[#allocation41_spill] sm:$0xff] %v14130_v15  ;;  %11085 = vrot.lane.b32.xlu1 %v11084_v3, %s11863_s27  ;;  %v11094_v13 = vpack.i.bf16 %v3386_v25, %v3960_v29  ;;  %v2502_v42 = vadd.f32 %v13555_v50, %v2481_v19  ;;  %v3542_v34 = vrot.slane %v3534_v61, %v13560_v28  ;;  %v2807_v17 = vrot.slane %v13907_v56, 7 }
 0x325   :  { %v2960_v14 = vsel %vm13579_vm12, %v15858_v36, %v15795_v45  ;;  %v4028_v27 = vcombine.low %v14074_v6, %v14130_v15  ;;  %v14147_v18 = vsel %vm13579_vm12, %v2908_v20, %v2909_v53  ;;  %v3549_v43 = vrot.slane %v3535_v9, %v13560_v28 }
 0x326   :  { %15859 = vst [vmem:[#allocation42_spill] sm:$0xff] %v14147_v18  ;;  %v10506_v63 = vadd.f32 %v10505_v55, %v10504_v57  ;;  %v14152_v40 = vcombine.high %v13940_v52, %v13940_v52  ;;  %11095 = vrot.lane.b32.xlu0 %v11094_v13, %s11873_s6  ;;  %v2518_v29 = vmax.f32 %v2502_v42, 0.0  ;;  %v4029_v12 = vcombine.low %v14147_v18, %v2960_v14  ;;  %v10508_v57 = vpop.f32.mrf.mxu0 }
 0x327   :  { %v4036_v25 = vrot.slane %v4028_v27, %v13560_v28  ;;  %v3550_v3 = vcombine.low %v3542_v34, %v3549_v43  ;;  %v2810_v53 = vrot.slane %v13903_v49, 7  ;;  %v3062_v55 = vcombine.low %v13903_v49, %v13940_v52  ;;  %v14175_v27 = vpop.f32.mrf.mxu1 }
 0x328   :  { %v2451_v19 = vadd.f32 %v10729_v37, %v10506_v63  ;;  %v2694_v61 = vcombine.high %v2518_v29, %v2518_v29  ;;  %v14162_v20 = vrot.slane %v2518_v29, %v13560_v28  ;;  %v4043_v36 = vrot.slane %v4029_v12, %v13560_v28 }
 0x329   :  { %v15860_v14 = vrot.slane %v13886_v23, 9  ;;  %v2809_v37 = vrot.slane %v2807_v17, 2  ;;  %v3063_v42 = vcombine.low %v14152_v40, %v13963_v11  ;;  %v14173_v34 = vrot.slane %v3062_v55, %v13560_v28 }
 0x32a   :  { %v2482_v13 = vmul.f32 %v13550_v21, %v2451_v19  ;;  %v14178_v43 = vrot.slane %v2694_v61, %v13560_v28  ;;  %v4044_v63 = vcombine.low %v4036_v25, %v4043_v36  ;;  %v3853_v29 = vcombine.low %v13812_v26, %v2899_v16 }
 0x32b   :  { %v2808_v9 = vsel %vm13579_vm12, %v15860_v14, %v2807_v17  ;;  %15861 = vst [vmem:[#allocation43_spill] sm:$0xff] %v14173_v34  ;;  %v10509_v12 = vadd.f32 %v10508_v57, %v10507_v47  ;;  %v2811_v17 = vsel %vm13579_vm12, %v2809_v37, %v2810_v53  ;;  %v14185_v19 = vrot.slane %v3063_v42, %v13560_v28 }
 0x32c   :  { %v2503_v14 = vadd.f32 %v13555_v50, %v2482_v13  ;;  %v14189_v55 = vcombine.high %v13975_v30, %v13975_v30  ;;  %v11099_v45 = vpack.i.bf16 %v3550_v3, %v4044_v63  ;;  %v3208_v59 = vcombine.low %v2808_v9, %v2811_v17  ;;  %v2455_v13 = vpop.f32.mrf.mxu1 }
 0x32d   :  { %15862 = vst [vmem:[#allocation44_spill] sm:$0xff] %v14185_v19  ;;  %v3860_v61 = vrot.slane %v3853_v29, %v13560_v28  ;;  %v3387_v16 = vcombine.low %v13802_v62, %v14030_v58  ;;  %v3388_v36 = vcombine.low %v13907_v56, %v13903_v49  ;;  %v3961_v62 = vcombine.low %v13868_v1, %v13864_v10 }
 0x32e   :  { %v2519_v47 = vmax.f32 %v2503_v14, 0.0  ;;  %v3079_v57 = vcombine.low %v13975_v30, %v14189_v55  ;;  %11100 = vrot.lane.b32.xlu1 %v11099_v45, %s11877_s24  ;;  %v3222_v3 = vrot.slane %v3208_v59, %v13560_v28  ;;  %v2456_v14 = vadd.f32 %v10509_v12, %v2455_v13 }
 0x32f   :  { %v3861_v9 = vcombine.low %v3860_v61, %v14185_v19  ;;  %v14204_v37 = vrot.slane %v3387_v16, %v13560_v28  ;;  %v3402_v29 = vrot.slane %v3388_v36, %v13560_v28  ;;  %v3968_v59 = vrot.slane %v3961_v62, %v13560_v28 }
 0x330   :  { %v2710_v58 = vcombine.high %v2519_v47, %v2519_v47  ;;  %v14209_v42 = vrot.slane %v2519_v47, %v13560_v28  ;;  %v14212_v63 = vrot.slane %v3079_v57, %v13560_v28  ;;  %v3223_v45 = vcombine.low %v14091_v46, %v3222_v3 }
 0x331   :  { %15863 = vst [vmem:[#allocation45_spill] sm:$0xff] %v14204_v37  ;;  %v2732_v17 = vcombine.high %v13903_v49, %v13903_v49  ;;  %v3403_v16 = vcombine.low %v14204_v37, %v3402_v29  ;;  %v2733_v47 = vcombine.high %v13963_v11, %v13963_v11  ;;  %v14227_v57 = vcombine.high %v13996_v39, %v13996_v39 }
 0x332   :  { %15864 = vst [vmem:[#allocation46_spill] sm:$0xff] %v14212_v63  ;;  %v14220_v61 = vrot.slane %v2710_v58, %v13560_v28  ;;  %v11104_v36 = vpack.i.bf16 %v3223_v45, %v3861_v9  ;;  %v3969_v46 = vcombine.low %v3968_v59, %v14212_v63  ;;  %v2483_v12 = vmul.f32 %v13550_v21, %v2456_v14  ;;  %v10510_v45 = vpop.f32.mrf.mxu0 }
 0x333   :  { %v2812_v13 = vrot.slane %v2810_v53, 2  ;;  %v2813_v3 = vrot.slane %v2732_v17, 7  ;;  %v9836_v62 = vrot.slane %v13940_v52, 9  ;;  %v2817_v58 = vrot.slane %v14152_v40, 7 }
 0x334   :  { %v2820_v29 = vrot.slane %v13963_v11, 7  ;;  %11105 = vrot.lane.b32.xlu0 %v11104_v36, %s11863_s27  ;;  %v11109_v25 = vpack.i.bf16 %v3403_v16, %v3969_v46  ;;  %v2504_v37 = vadd.f32 %v13555_v50, %v2483_v12  ;;  %v2823_v35 = vrot.slane %v2733_v47, 7 }
 0x335   :  { %v9837_v9 = vrot.slane %v13975_v30, 9  ;;  %v2814_v21 = vsel %vm13579_vm12, %v2812_v13, %v2813_v3  ;;  %v14241_v53 = vsel %vm13579_vm12, %v9836_v62, %v2817_v58  ;;  %v2819_v59 = vrot.slane %v2817_v58, 2 }
 0x336   :  { %15865 = vst [vmem:[#allocation47_spill] sm:$0xff] %v14241_v53  ;;  %v2822_v14 = vrot.slane %v2820_v29, 2  ;;  %11110 = vrot.lane.b32.xlu1 %v11109_v25, %s11873_s6  ;;  %v2520_v17 = vmax.f32 %v2504_v37, 0.0  ;;  %v2827_v16 = vrot.slane %v14189_v55, 7  ;;  %v3224_v36 = vcombine.low %v2814_v21, %v14241_v53 }
 0x337   :  { %v14249_v46 = vsel %vm13579_vm12, %v2819_v59, %v2820_v29  ;;  %v9854_v13 = vcombine.high %v13963_v11, %v13975_v30  ;;  %v3863_v25 = vcombine.low %v13996_v39, %v14227_v57  ;;  %v10511_v29 = vpop.f32.mrf.mxu0  ;;  %v14281_v41 = vcombine.high %v14088_v4, %v14088_v4 }
 0x338   :  { %15866 = vst [vmem:[#allocation48_spill] sm:$0xff] %v14249_v46  ;;  %v14253_v12 = vsel %vm13579_vm12, %v2822_v14, %v2823_v35  ;;  %v2883_v37 = vcombine.high %v2520_v17, %v2520_v17  ;;  %v14260_v3 = vrot.slane %v2520_v17, %v13560_v28  ;;  %v14264_v62 = vsel %vm13579_vm12, %v9837_v9, %v2827_v16 }
 0x339   :  { %v3225_v58 = vcombine.low %v14249_v46, %v14253_v12  ;;  %v3232_v35 = vrot.slane %v3224_v36, %v13560_v28  ;;  %v3870_v14 = vrot.slane %v9854_v13, %v13560_v28  ;;  %v3877_v50 = vrot.slane %v3863_v25, %v13560_v28 }
 0x33a   :  { %v14275_v17 = vrot.slane %v2883_v37, %v13560_v28  ;;  %v3080_v36 = vcombine.low %v13996_v39, %v14088_v4  ;;  %v9848_v21 = vcombine.high %v13903_v49, %v13940_v52  ;;  %v3405_v59 = vcombine.low %v13963_v11, %v2733_v47 }
 0x33b   :  { %v3239_v9 = vrot.slane %v3225_v58, %v13560_v28  ;;  %v10512_v13 = vadd.f32 %v10511_v29, %v10510_v45  ;;  %v3878_v37 = vcombine.low %v3870_v14, %v3877_v50  ;;  %v3096_v58 = vcombine.low %v14281_v41, %v14101_v8 }
 0x33c   :  { %v2829_v34 = vrot.slane %v2827_v16, 2  ;;  %v14291_v25 = vrot.slane %v3080_v36, %v13560_v28  ;;  %v3412_v51 = vrot.slane %v9848_v21, %v13560_v28  ;;  %v3419_v56 = vrot.slane %v3405_v59, %v13560_v28 }
 0x33d   :  { %v3240_v19 = vcombine.low %v3232_v35, %v3239_v9  ;;  %v2461_v23 = vadd.f32 %v14175_v27, %v10512_v13  ;;  %v14297_v49 = vrot.slane %v3096_v58, %v13560_v28  ;;  %v2830_v47 = vrot.slane %v13996_v39, 7  ;;  %v11710_v35 = vld [vmem:[#allocation5 + $0x1] ss:$0 sm:$0xff]  ;;  %v11711_v9 = vld [vmem:[#allocation7 + $0x1] ss:$0 sm:$0xff] }
 0x33e   :  { %15867 = vst [vmem:[#allocation49_spill] sm:$0xff] %v14291_v25  ;;  %v15869_v45 = vrot.slane %v13868_v1, 7  ;;  %v3420_v29 = vcombine.low %v3412_v51, %v3419_v56  ;;  %v2962_v21 = vrot.slane %v13864_v10, 7  ;;  %v2965_v1 = vrot.slane %v13900_v54, 7 }
 0x33f   :  { %v11114_v46 = vpack.i.bf16 %v3240_v19, %v3878_v37  ;;  %15868 = vst [vmem:[#allocation50_spill] sm:$0xff] %v14297_v49  ;;  %v2484_v14 = vmul.f32 %v11710_v35, %v2461_v23  ;;  %v3970_v27 = vcombine.low %v14291_v25, %v14297_v49  ;;  %v14310_v19 = vsel %vm13579_vm12, %v2829_v34, %v2830_v47 }
 0x340   :  { %v2961_v50 = vrot.slane %v15869_v45, 2  ;;  %v3551_v59 = vcombine.low %v13831_v22, %v13812_v26  ;;  %v2964_v51 = vrot.slane %v2962_v21, 2  ;;  %v3552_v13 = vcombine.low %v13940_v52, %v14152_v40 }
 0x341   :  { %11115 = vrot.lane.b32.xlu1 %v11114_v46, %s11863_s27  ;;  %v2505_v56 = vadd.f32 %v11711_v9, %v2484_v14  ;;  %v3241_v46 = vcombine.low %v14264_v62, %v14310_v19  ;;  %v11119_v36 = vpack.i.bf16 %v3420_v29, %v3970_v27  ;;  %v14326_v37 = vcombine.high %v14101_v8, %v14101_v8 }
 0x342   :  { %v2963_v23 = vsel %vm13579_vm12, %v2961_v50, %v2962_v21  ;;  %v14322_v34 = vrot.slane %v3551_v59, %v13560_v28  ;;  %v2966_v58 = vsel %vm13579_vm12, %v2964_v51, %v2965_v1  ;;  %v2832_v50 = vrot.slane %v2830_v47, 2 }
 0x343   :  { %v2521_v22 = vmax.f32 %v2505_v56, 0.0  ;;  %v3249_v45 = vrot.slane %v3241_v46, %v13560_v28  ;;  %11120 = vrot.lane.b32.xlu0 %v11119_v36, %s11873_s6  ;;  %v3566_v29 = vrot.slane %v3552_v13, %v13560_v28  ;;  %v4045_v35 = vcombine.low %v2963_v23, %v2966_v58 }
 0x344   :  { %15870 = vst [vmem:[#allocation51_spill] sm:$0xff] %v14322_v34  ;;  %v9838_v52 = vrot.slane %v14088_v4, 9  ;;  %v2837_v40 = vrot.slane %v14281_v41, 7  ;;  %v15871_v27 = vrot.slane %v14227_v57, 7  ;;  %v2840_v47 = vrot.slane %v14101_v8, 7 }
 0x345   :  { %v2939_v14 = vcombine.high %v2521_v22, %v2521_v22  ;;  %v14336_v21 = vrot.slane %v2521_v22, %v13560_v28  ;;  %v3567_v59 = vcombine.low %v14322_v34, %v3566_v29  ;;  %v4052_v9 = vrot.slane %v4045_v35, %v13560_v28 }
 0x346   :  { %v14342_v1 = vsel %vm13579_vm12, %v2832_v50, %v15871_v27  ;;  %v14349_v56 = vsel %vm13579_vm12, %v9838_v52, %v2837_v40  ;;  %v2839_v23 = vrot.slane %v2837_v40, 2  ;;  %v2842_v46 = vrot.slane %v2840_v47, 2 }
 0x347   :  { %v14352_v51 = vrot.slane %v2939_v14, %v13560_v28  ;;  %v2843_v36 = vrot.slane %v14326_v37, 7  ;;  %v4053_v13 = vcombine.low %v4052_v9, %v3249_v45  ;;  %v3242_v58 = vcombine.low %v14342_v1, %v14349_v56 }
 0x348   :  { %v14358_v22 = vsel %vm13579_vm12, %v2839_v23, %v2840_v47  ;;  %v3421_v50 = vcombine.low %v14189_v55, %v13996_v39  ;;  %v3568_v52 = vcombine.low %v13963_v11, %v13975_v30  ;;  %v9855_v40 = vcombine.high %v14101_v8, %v14162_v20 }
 0x349   :  { %v14366_v29 = vcombine.high %v14352_v51, %v14352_v51  ;;  %v14370_v35 = vsel %vm13579_vm12, %v2842_v46, %v2843_v36  ;;  %v11124_v14 = vpack.i.bf16 %v3567_v59, %v4053_v13  ;;  %v3256_v27 = vrot.slane %v3242_v58, %v13560_v28 }
 0x34a   :  { %v3258_v55 = vcombine.low %v14358_v22, %v14370_v35  ;;  %v14380_v47 = vrot.slane %v3421_v50, %v13560_v28  ;;  %v3575_v9 = vrot.slane %v3568_v52, %v13560_v28  ;;  %v3886_v23 = vrot.slane %v9855_v40, %v13560_v28 }
 0x34b   :  { %v2709_v46 = vcombine.high %v14162_v20, %v14162_v20  ;;  %v14388_v30 = vcombine.high %v14209_v42, %v14209_v42  ;;  %11125 = vrot.lane.b32.xlu0 %v11124_v14, %s11877_s24  ;;  %v3257_v59 = vcombine.low %v3249_v45, %v3256_v27  ;;  %v3113_v36 = vcombine.low %v14178_v43, %v14209_v42 }
 0x34c   :  { %15872 = vst [vmem:[#allocation52_spill] sm:$0xff] %v14380_v47  ;;  %v14392_v11 = vrot.slane %v3258_v55, %v13560_v28  ;;  %v9849_v13 = vcombine.high %v13996_v39, %v14088_v4  ;;  %v3576_v58 = vcombine.low %v3575_v9, %v14380_v47  ;;  %v3887_v50 = vcombine.low %v14297_v49, %v3886_v23 }
 0x34d   :  { %v3097_v52 = vcombine.low %v14162_v20, %v2709_v46  ;;  %v3114_v40 = vcombine.low %v14388_v30, %v14220_v61  ;;  %v14405_v55 = vrot.slane %v3113_v36, %v13560_v28  ;;  %v2736_v39 = vcombine.high %v14178_v43, %v14178_v43 }
 0x34e   :  { %v4054_v14 = vcombine.low %v3256_v27, %v14392_v11  ;;  %v14408_v45 = vrot.slane %v9849_v13, %v13560_v28  ;;  %v11129_v16 = vpack.i.bf16 %v3257_v59, %v3887_v50  ;;  %v9839_v57 = vrot.slane %v14162_v20, 9 }
 0x34f   :  { %15873 = vst [vmem:[#allocation53_spill] sm:$0xff] %v14405_v55  ;;  %v14413_v9 = vrot.slane %v3097_v52, %v13560_v28  ;;  %v14416_v23 = vrot.slane %v3114_v40, %v13560_v28  ;;  %v2847_v36 = vrot.slane %v2709_v46, 7  ;;  %v2850_v13 = vrot.slane %v14178_v43, 7 }
 0x350   :  { %15874 = vst [vmem:[#allocation54_spill] sm:$0xff] %v14408_v45  ;;  %v11134_v34 = vpack.i.bf16 %v3576_v58, %v4054_v14  ;;  %v3437_v27 = vcombine.low %v14380_v47, %v14408_v45  ;;  %11130 = vrot.lane.b32.xlu0 %v11129_v16, %s11863_s27  ;;  %v2853_v40 = vrot.slane %v2736_v39, 7  ;;  %v3888_v16 = vcombine.low %v14178_v43, %v2736_v39 }
 0x351   :  { %15875 = vst [vmem:[#allocation55_spill] sm:$0xff] %v14413_v9  ;;  %15876 = vst [vmem:[#allocation56_spill] sm:$0xff] %v14416_v23  ;;  %v3971_v52 = vcombine.low %v14413_v9, %v14405_v55  ;;  %v14432_v58 = vsel %vm13579_vm12, %v9839_v57, %v2847_v36  ;;  %v2849_v14 = vrot.slane %v2847_v36, 2  ;;  %v2852_v26 = vrot.slane %v2850_v13, 2 }
 0x352   :  { %11135 = vrot.lane.b32.xlu1 %v11134_v34, %s11877_s24  ;;  %v9840_v50 = vrot.slane %v14209_v42, 9  ;;  %v2857_v49 = vrot.slane %v14388_v30, 7  ;;  %v3895_v57 = vrot.slane %v3888_v16, %v13560_v28  ;;  %v3577_v39 = vcombine.low %v14088_v4, %v14281_v41 }
 0x353   :  { %v11139_v25 = vpack.i.bf16 %v3437_v27, %v3971_v52  ;;  %v14441_v55 = vsel %vm13579_vm12, %v2849_v14, %v2850_v13  ;;  %v14445_v34 = vsel %vm13579_vm12, %v2852_v26, %v2853_v40  ;;  %v3578_v13 = vcombine.low %v14101_v8, %v14162_v20 }
 0x354   :  { %v3259_v27 = vcombine.low %v14432_v58, %v14441_v55  ;;  %v14456_v52 = vsel %vm13579_vm12, %v9840_v50, %v2857_v49  ;;  %v3896_v26 = vcombine.low %v3895_v57, %v14416_v23  ;;  %v3585_v4 = vrot.slane %v3577_v39, %v13560_v28 }
 0x355   :  { %v3275_v41 = vcombine.low %v14445_v34, %v14456_v52  ;;  %v14467_v40 = vcombine.high %v14260_v3, %v14260_v3  ;;  %v3592_v50 = vrot.slane %v3578_v13, %v13560_v28  ;;  %v3438_v20 = vcombine.low %v14101_v8, %v14326_v37 }
 0x356   :  { %11140 = vrot.lane.b32.xlu1 %v11139_v25, %s11873_s6  ;;  %v3273_v14 = vrot.slane %v3259_v27, %v13560_v28  ;;  %v3439_v25 = vcombine.low %v2709_v46, %v14178_v43  ;;  %v2737_v39 = vcombine.high %v14220_v61, %v14220_v61  ;;  %v2859_v36 = vrot.slane %v2857_v49, 2 }
 0x357   :  { %v3283_v16 = vrot.slane %v3275_v41, %v13560_v28  ;;  %v3972_v57 = vcombine.low %v14260_v3, %v14467_v40  ;;  %v3593_v9 = vcombine.low %v3585_v4, %v3592_v50  ;;  %v14481_v27 = vrot.slane %v3438_v20, %v13560_v28 }
 0x358   :  { %v3274_v59 = vcombine.low %v14392_v11, %v3273_v14  ;;  %v14484_v13 = vrot.slane %v3439_v25, %v13560_v28  ;;  %v2860_v46 = vrot.slane %v14220_v61, 7  ;;  %v2863_v41 = vrot.slane %v2737_v39, 7 }
 0x359   :  { %15877 = vst [vmem:[#allocation57_spill] sm:$0xff] %v14481_v27  ;;  %v4055_v8 = vcombine.low %v3273_v14, %v3283_v16  ;;  %v3979_v37 = vrot.slane %v3972_v57, %v13560_v28  ;;  %v9842_v49 = vrot.slane %v14260_v3, 9  ;;  %v2913_v11 = vrot.slane %v14467_v40, 7 }
 0x35a   :  { %15878 = vst [vmem:[#allocation58_spill] sm:$0xff] %v14484_v13  ;;  %v11144_v63 = vpack.i.bf16 %v3274_v59, %v3896_v26  ;;  %v3454_v53 = vcombine.low %v14481_v27, %v14484_v13  ;;  %v14495_v20 = vsel %vm13579_vm12, %v2859_v36, %v2860_v46  ;;  %v2862_v14 = vrot.slane %v2860_v46, 2 }
 0x35b   :  { %v11149_v4 = vpack.i.bf16 %v3593_v9, %v4055_v8  ;;  %v3980_v50 = vcombine.low %v14416_v23, %v3979_v37  ;;  %v14500_v59 = vsel %vm13579_vm12, %v9842_v49, %v2913_v11  ;;  %v2915_v26 = vrot.slane %v2913_v11, 2 }
 0x35c   :  { %11145 = vrot.lane.b32.xlu1 %v11144_v63, %s11863_s27  ;;  %v2916_v25 = vrot.slane %v14275_v17, 7  ;;  %v3594_v57 = vcombine.low %v14209_v42, %v14388_v30  ;;  %v14508_v36 = vsel %vm13579_vm12, %v2862_v14, %v2863_v41  ;;  %v2900_v63 = vcombine.high %v14275_v17, %v14275_v17 }
 0x35d   :  { %11150 = vrot.lane.b32.xlu0 %v11149_v4, %s11877_s24  ;;  %v11154_v9 = vpack.i.bf16 %v3454_v53, %v3980_v50  ;;  %v9856_v8 = vcombine.high %v14220_v61, %v14260_v3  ;;  %v3276_v30 = vcombine.low %v14495_v20, %v14508_v36  ;;  %v2954_v53 = vcombine.high %v14336_v21, %v14336_v21 }
 0x35e   :  { %v14516_v37 = vsel %vm13579_vm12, %v2915_v26, %v2916_v25  ;;  %v3601_v46 = vrot.slane %v3594_v57, %v13560_v28  ;;  %v2919_v49 = vrot.slane %v2900_v63, 7  ;;  %v3898_v11 = vcombine.low %v14275_v17, %v2900_v63 }
 0x35f   :  { %v4056_v41 = vcombine.low %v14500_v59, %v14516_v37  ;;  %v3905_v4 = vrot.slane %v9856_v8, %v13560_v28  ;;  %v3290_v50 = vrot.slane %v3276_v30, %v13560_v28  ;;  %v2969_v26 = vrot.slane %v2954_v53, 7 }
 0x360   :  { %v3602_v14 = vcombine.low %v14484_v13, %v3601_v46  ;;  %v9850_v23 = vcombine.high %v14178_v43, %v14209_v42  ;;  %v3912_v15 = vrot.slane %v3898_v11, %v13560_v28  ;;  %v3456_v18 = vcombine.low %v14220_v61, %v2737_v39 }
 0x361   :  { %11155 = vrot.lane.b32.xlu0 %v11154_v9, %s11873_s6  ;;  %v4063_v57 = vrot.slane %v4056_v41, %v13560_v28  ;;  %v3981_v63 = vcombine.low %v14275_v17, %v14336_v21  ;;  %v3291_v8 = vcombine.low %v3283_v16, %v3290_v50  ;;  %v2971_v47 = vrot.slane %v2969_v26, 2 }
 0x362   :  { %v14538_v30 = vrot.slane %v9850_v23, %v13560_v28  ;;  %v3982_v46 = vcombine.low %v2954_v53, %v14352_v51  ;;  %v3913_v43 = vcombine.low %v3905_v4, %v3912_v15  ;;  %v14542_v42 = vrot.slane %v3456_v18, %v13560_v28 }
 0x363   :  { %v4064_v13 = vcombine.low %v3290_v50, %v4063_v57  ;;  %v3989_v9 = vrot.slane %v3981_v63, %v13560_v28  ;;  %v2918_v39 = vrot.slane %v2916_v25, 2  ;;  %v15879_v11 = vrot.slane %v14336_v21, 9 }
 0x364   :  { %v3996_v41 = vrot.slane %v3982_v46, %v13560_v28  ;;  %v2972_v23 = vrot.slane %v14352_v51, 7  ;;  %v11159_v27 = vpack.i.bf16 %v3291_v8, %v3913_v43  ;;  %v3471_v15 = vcombine.low %v14538_v30, %v14542_v42  ;;  %v11046_v43 = vpop.permute.xlu0 %11045 }
 0x365   :  { %v2970_v16 = vsel %vm13579_vm12, %v15879_v11, %v2969_v26  ;;  %v11164_v45 = vpack.i.bf16 %v3602_v14, %v4064_v13  ;;  %v2975_v18 = vrot.slane %v14366_v29, 7  ;;  %v2920_v4 = vsel %vm13579_vm12, %v2918_v39, %v2919_v49  ;;  %v15886_v39 = vld [vmem:[#allocation34_spill] sm:$0xff] }
 0x366   :  { %v3997_v53 = vcombine.low %v3989_v9, %v3996_v41  ;;  %v2973_v25 = vsel %vm13579_vm12, %v2971_v47, %v2972_v23  ;;  %v2974_v50 = vrot.slane %v2972_v23, 2  ;;  %11160 = vrot.lane.b32.xlu0 %v11159_v27, %s11863_s27  ;;  %v3603_v13 = vcombine.low %v14220_v61, %v14260_v3  ;;  %v15885_v9 = vld [vmem:[#allocation29_spill] sm:$0xff] }
 0x367   :  { %11165 = vrot.lane.b32.xlu1 %v11164_v45, %s11877_s24  ;;  %v3604_v14 = vcombine.low %v14467_v40, %v14275_v17  ;;  %v4065_v26 = vcombine.low %v2920_v4, %v2970_v16  ;;  %v15880_v57 = vcombine.low %v13627_v38, %v13649_v44  ;;  %v15881_v45 = vcombine.low %v13563_v5, %v13567_v24  ;;  %v15889_v16 = vld [vmem:[#allocation36_spill] sm:$0xff]  ;;  %v15890_v23 = vld [vmem:[#allocation37_spill] sm:$0xff] }
 0x368   :  { %v2976_v47 = vsel %vm13579_vm12, %v2974_v50, %v2975_v18  ;;  %v15882_v61 = vcombine.low %v13573_v48, %v13593_v32  ;;  %v15883_v40 = vcombine.low %v13695_v60, %v13706_v0  ;;  %v11169_v38 = vpack.i.bf16 %v3471_v15, %v3997_v53  ;;  %v15892_v18 = vld [vmem:[#allocation38_spill] sm:$0xff] }
 0x369   :  { %v3655_v49 = vrot.slane %v15880_v57, %v13560_v28  ;;  %v2985_v27 = vrot.slane %v15881_v45, %v13560_v28  ;;  %v14585_v44 = vrot.slane %v3604_v14, %v13560_v28  ;;  %v4066_v8 = vcombine.low %v2973_v25, %v2976_v47  ;;  %v11051_v14 = vpop.permute.xlu1 %11050 }
 0x36a   :  { %v2992_v3 = vrot.slane %v15882_v61, %v13560_v28  ;;  %v14582_v63 = vrot.slane %v15883_v40, %v13560_v28  ;;  %v15884_v5 = vcombine.low %v13924_v33, %v13933_v7  ;;  %v3611_v48 = vrot.slane %v3603_v13, %v13560_v28  ;;  %v15887_v7 = vld [vmem:[#allocation35_spill] sm:$0xff] }
 0x36b   :  { %v3663_v46 = vcombine.low %v3655_v49, %v13750_v31  ;;  %11170 = vrot.lane.b32.xlu1 %v11169_v38, %s11873_s6  ;;  %v4073_v60 = vrot.slane %v4065_v26, %v13560_v28  ;;  %v4080_v0 = vrot.slane %v4066_v8, %v13560_v28  ;;  %v15888_v33 = vcombine.low %v15886_v39, %v15887_v7 }
 0x36c   :  { %v14591_v24 = vrot.slane %v15884_v5, %v13560_v28  ;;  %v2993_v32 = vcombine.low %v2985_v27, %v2992_v3  ;;  %v3680_v41 = vcombine.low %v14582_v63, %v15885_v9  ;;  %v15891_v31 = vcombine.low %v15889_v16, %v15890_v23  ;;  %v15897_v16 = vld [vmem:[#allocation57_spill] sm:$0xff]  ;;  %v15898_v23 = vld [vmem:[#allocation54_spill] sm:$0xff] }
 0x36d   :  { %v14604_v11 = vrot.slane %v15888_v33, %v13560_v28  ;;  %v15893_v53 = vcombine.low %v15892_v18, %v14074_v6  ;;  %v3619_v50 = vcombine.low %v3611_v48, %v14585_v44  ;;  %v4081_v13 = vcombine.low %v4073_v60, %v4080_v0  ;;  %v15899_v18 = vld [vmem:[#allocation58_spill] sm:$0xff] }
 0x36e   :  { %v14610_v15 = vrot.slane %v15891_v31, %v13560_v28  ;;  %v11048_v57 = vunpack.i.h.bf16 %v11046_v43  ;;  %v11047_v49 = vunpack.i.l.bf16 %v11046_v43  ;;  %v3733_v27 = vcombine.low %v14310_v19, %v14342_v1 }
 0x36f   :  { %v14616_v25 = vrot.slane %v15893_v53, %v13560_v28  ;;  %v3697_v26 = vcombine.low %v14591_v24, %v14604_v11  ;;  %v11174_v45 = vpack.i.bf16 %v3619_v50, %v4081_v13  ;;  %v11053_v61 = vunpack.i.h.bf16 %v11051_v14  ;;  %v4238_v50 = vld [vmem:[%s15762_s3 + $0x110] sm:$0xff] }
 0x370   :  { %v3749_v6 = vcombine.low %v14349_v56, %v14358_v22  ;;  %v11052_v3 = vunpack.i.l.bf16 %v11051_v14  ;;  %v15894_v40 = vcombine.low %v14253_v12, %v14264_v62  ;;  %v14635_v8 = vrot.slane %v3733_v27, %v13560_v28 }
 0x371   :  { %v3714_v47 = vcombine.low %v14610_v15, %v14616_v25  ;;  %11175 = vrot.lane.b32.xlu0 %v11174_v45, %s11877_s24  ;;  %v15895_v19 = vcombine.low %v14370_v35, %v14432_v58  ;;  %v4150_v56 = vsel %vm1445_vm0, %v2993_v32, %v11048_v57  ;;  %v4177_v22 = vsel %vm1445_vm0, %v3663_v46, %v11047_v49  ;;  %v4237_v49 = vld [vmem:[%s15762_s3 + $0x108] sm:$0xff] }
 0x372   :  { %v14632_v38 = vrot.slane %v15894_v40, %v13560_v28  ;;  %v14646_v5 = vrot.slane %v3749_v6, %v13560_v28  ;;  %v3767_v12 = vcombine.low %v14456_v52, %v14495_v20  ;;  %v15896_v35 = vcombine.low %v14441_v55, %v14445_v34 }
 0x373   :  { %v14641_v1 = vrot.slane %v15895_v19, %v13560_v28  ;;  %v3783_v32 = vcombine.low %v14508_v36, %v14500_v59  ;;  %v3784_v46 = vcombine.low %v14516_v37, %v2920_v4  ;;  %v4159_v43 = vsel %vm2024_vm4, %v4150_v56, %v11053_v61  ;;  %v4239_v37 = vld [vmem:[%s15762_s3 + $0x118] sm:$0xff]  ;;  %v11056_v61 = vpop.permute.xlu1 %11055 }
 0x374   :  { %v3748_v48 = vcombine.low %v14632_v38, %v14635_v8  ;;  %v14656_v58 = vrot.slane %v15896_v35, %v13560_v28  ;;  %v14664_v20 = vrot.slane %v3767_v12, %v13560_v28  ;;  %v4186_v39 = vsel %vm2024_vm4, %v4177_v22, %v11052_v3 }
 0x375   :  { %v11061_v62 = vpop.permute.xlu0 %11060  ;;  %v3765_v52 = vcombine.low %v14646_v5, %v14641_v1  ;;  %v14669_v55 = vrot.slane %v3783_v32, %v13560_v28  ;;  %v14672_v34 = vrot.slane %v3784_v46, %v13560_v28  ;;  %v4121_v33 = vcombine.low %v13864_v10, %v13900_v54 }
 0x376   :  { %v11063_v60 = vunpack.i.h.bf16 %v11061_v62  ;;  %v11062_v0 = vunpack.i.l.bf16 %v11061_v62  ;;  %v3782_v4 = vcombine.low %v14656_v58, %v14664_v20  ;;  %v4130_v31 = vcombine.low %v15898_v23, %v15897_v16 }
 0x377   :  { %v3799_v7 = vcombine.low %v14669_v55, %v14672_v34  ;;  %v4131_v53 = vcombine.low %v15899_v18, %v14538_v30  ;;  %v4132_v13 = vcombine.low %v14542_v42, %v14585_v44  ;;  %v9858_v14 = vcombine.high %v14275_v17, %v14336_v21  ;;  %v15901_v17 = vld [vmem:[#allocation52_spill] sm:$0xff]  ;;  %v15932_v55 = vld [vmem:[#allocation26_spill] sm:$0xff]  ;;  %v5214_v42 = vld [vmem:[%s15763_s4 + $0xf8] sm:$0xff] }
 0x378   :  { %v4195_v59 = vsel %vm2041_vm5, %v4186_v39, %v11062_v0  ;;  %v4168_v36 = vsel %vm2041_vm5, %v4159_v43, %v11063_v60  ;;  %v4134_v54 = vcombine.low %v14352_v51, %v14366_v29  ;;  %v14699_v10 = vrot.slane %v4121_v33, %v13560_v28  ;;  %v4236_v51 = vld [vmem:[%s15762_s3 + $0x100] sm:$0xff]  ;;  %v15902_v60 = vld [vmem:[#allocation19_spill] sm:$0xff]  ;;  %v5213_v18 = vld [vmem:[%s15763_s4 + $0xf0] sm:$0xff]  ;;  %10605 = vmatprep.subr.mxu0 %v5214_v42 }
 0x379   :  { %4322 = vmatprep.mubr.f32.mxu1 %v4195_v59  ;;  %v15900_v57 = vmov 0.0   ;;  %v14706_v45 = vrot.slane %v9858_v14, %v13560_v28  ;;  %v11066_v6 = vpop.permute.xlu0 %11065  ;;  %v11058_v40 = vunpack.i.h.bf16 %v11056_v61  ;;  %v11057_v19 = vunpack.i.l.bf16 %v11056_v61  ;;  %v15903_v0 = vld [vmem:[#allocation20_spill] sm:$0xff]  ;;  %v5198_v44 = vld [vmem:[%s15763_s4 + $0x78] sm:$0xff] }
 0x37a   :  { %4323 = vmatmul.mubr.f32.vlgmr.msra.gmra.mxu1 %v4168_v36  ;;  %v14709_v27 = vrot.slane %v4134_v54, %v13560_v28  ;;  %v4129_v21 = vcombine.low %v14699_v10, %v15901_v17  ;;  %v11068_v56 = vunpack.i.h.bf16 %v11066_v6  ;;  %v11067_v22 = vunpack.i.l.bf16 %v11066_v6  ;;  %v15933_v34 = vld [vmem:[#allocation32_spill] sm:$0xff]  ;;  %10606 = vmatpush3.msra.mxu0 %v5198_v44  ;;  %v5212_v10 = vld [vmem:[%s15763_s4 + $0xe8] sm:$0xff] }
 0x37b   :  { %10734 = vmatpush3.msra.mxu1 %v4239_v37  ;;  %v4178_v46 = vsel %vm1445_vm0, %v3680_v41, %v11057_v19  ;;  %v15904_v43 = vcombine.low %v15902_v60, %v15903_v0  ;;  %v15908_v60 = vld [vmem:[#allocation24_spill] sm:$0xff]  ;;  %v15909_v0 = vld [vmem:[#allocation30_spill] sm:$0xff]  ;;  %10607 = vmatprep.subr.mxu0 %v5213_v18 }
 0x37c   :  { %10735 = vmatprep.subr.mxu1 %v15900_v57  ;;  %v4149_v29 = vcombine.low %v14706_v45, %v14709_v27  ;;  %v4187_v36 = vsel %vm2024_vm4, %v4178_v46, %v11067_v22  ;;  %v5211_v45 = vld [vmem:[%s15763_s4 + $0xe0] sm:$0xff] }
 0x37d   :  { %10736 = vmatpush3.msra.mxu1 %v4238_v50  ;;  %v4151_v39 = vsel %vm1445_vm0, %v15904_v43, %v11058_v40  ;;  %v15910_v43 = vcombine.low %v15908_v60, %v15909_v0  ;;  %v5195_v27 = vld [vmem:[%s15763_s4 + $0x60] sm:$0xff] }
 0x37e   :  { %10737 = vmatprep.subr.mxu1 %v15900_v57  ;;  %v4160_v37 = vsel %vm2024_vm4, %v4151_v39, %v11068_v56 }
 0x37f   :  { %10738 = vmatpush3.msra.mxu1 %v4237_v49  ;;  %v15905_v49 = vld [vmem:[#allocation21_spill] sm:$0xff] }
 0x380   :  { %10739 = vmatprep.subr.mxu1 %v15900_v57 }
 0x381   :  { %10740 = vmatpush3.msra.mxu1 %v4236_v51  ;;  %v15906_v51 = vld [vmem:[#allocation22_spill] sm:$0xff] }
 0x382   :  { %v15907_v61 = vcombine.low %v15905_v49, %v15906_v51  ;;  %v15913_v49 = vld [vmem:[#allocation47_spill] sm:$0xff]  ;;  %v15914_v51 = vld [vmem:[#allocation48_spill] sm:$0xff] }
 0x386   :  { %v11071_v12 = vpop.permute.xlu0 %11070 }
 0x387   :  { %v11072_v59 = vunpack.i.l.bf16 %v11071_v12  ;;  %v11073_v33 = vunpack.i.h.bf16 %v11071_v12 }
 0x389   :  { %v11076_v3 = vpop.permute.xlu1 %11075  ;;  %v4179_v9 = vsel %vm1445_vm0, %v3697_v26, %v11072_v59  ;;  %v4152_v6 = vsel %vm1445_vm0, %v15907_v61, %v11073_v33  ;;  %v15915_v61 = vcombine.low %v15913_v49, %v15914_v51  ;;  %v15921_v49 = vld [vmem:[#allocation44_spill] sm:$0xff] }
 0x38a   :  { %v11077_v54 = vunpack.i.l.bf16 %v11076_v3  ;;  %v11078_v63 = vunpack.i.h.bf16 %v11076_v3 }
 0x38c   :  { %v4188_v56 = vsel %vm2024_vm4, %v4179_v9, %v11077_v54  ;;  %v4161_v12 = vsel %vm2024_vm4, %v4152_v6, %v11078_v63  ;;  %v15912_v63 = vld [vmem:[#allocation41_spill] sm:$0xff]  ;;  %v3730_v6 = vrot.slane %v15915_v61, %v13560_v28 }
 0x38e   :  { %v11081_v62 = vpop.permute.xlu1 %11080 }
 0x38f   :  { %v11083_v35 = vunpack.i.h.bf16 %v11081_v62  ;;  %v11082_v32 = vunpack.i.l.bf16 %v11081_v62 }
 0x391   :  { %v4196_v50 = vsel %vm2041_vm5, %v4187_v36, %v11082_v32  ;;  %v4169_v14 = vsel %vm2041_vm5, %v4160_v37, %v11083_v35 }
 0x392   :  { %4327 = vmatprep.mubr.f32.mxu1 %v4196_v50 }
 0x393   :  { %4328 = vmatmul.mubr.f32.gmra.mxu1 %v4169_v14 }
 0x394   :  { %v11091_v41 = vpop.permute.xlu0 %11090 }
 0x395   :  { %v11093_v40 = vunpack.i.h.bf16 %v11091_v41  ;;  %v11092_v19 = vunpack.i.l.bf16 %v11091_v41 }
 0x396   :  { %v11086_v3 = vpop.permute.xlu1 %11085 }
 0x397   :  { %v4197_v22 = vsel %vm2041_vm5, %v4188_v56, %v11092_v19  ;;  %v4170_v24 = vsel %vm2041_vm5, %v4161_v12, %v11093_v40  ;;  %v11088_v11 = vunpack.i.h.bf16 %v11086_v3  ;;  %v11087_v26 = vunpack.i.l.bf16 %v11086_v3  ;;  %v15916_v40 = vld [vmem:[#allocation27_spill] sm:$0xff]  ;;  %v15917_v19 = vld [vmem:[#allocation28_spill] sm:$0xff] }
 0x398   :  { %4332 = vmatprep.mubr.f32.mxu1 %v4197_v22  ;;  %v11096_v62 = vpop.permute.xlu0 %11095  ;;  %v15918_v56 = vcombine.low %v15916_v40, %v15917_v19 }
 0x399   :  { %4333 = vmatmul.mubr.f32.gmra.mxu1 %v4170_v24  ;;  %v11098_v35 = vunpack.i.h.bf16 %v11096_v62  ;;  %v11097_v32 = vunpack.i.l.bf16 %v11096_v62  ;;  %v4180_v46 = vsel %vm1445_vm0, %v3714_v47, %v11087_v26  ;;  %v4153_v39 = vsel %vm1445_vm0, %v15910_v43, %v11088_v11  ;;  %v15911_v47 = vld [vmem:[#allocation42_spill] sm:$0xff] }
 0x39a   :  { %v3715_v9 = vcombine.low %v15912_v63, %v15911_v47  ;;  %v3060_v22 = vrot.slane %v15918_v56, %v13560_v28 }
 0x39b   :  { %v4189_v33 = vsel %vm2024_vm4, %v4180_v46, %v11097_v32  ;;  %v4162_v50 = vsel %vm2024_vm4, %v4153_v39, %v11098_v35  ;;  %v15919_v32 = vld [vmem:[#allocation31_spill] sm:$0xff] }
 0x39c   :  { %v3723_v3 = vrot.slane %v3715_v9, %v13560_v28  ;;  %v3061_v46 = vcombine.low %v15919_v32, %v3060_v22  ;;  %v15920_v9 = vld [vmem:[#allocation43_spill] sm:$0xff] }
 0x39d   :  { %v15922_v51 = vcombine.low %v15920_v9, %v15921_v49 }
 0x39e   :  { %v3731_v35 = vcombine.low %v3723_v3, %v3730_v6 }
 0x3a0   :  { %v11101_v59 = vpop.permute.xlu1 %11100 }
 0x3a1   :  { %v11103_v36 = vunpack.i.h.bf16 %v11101_v59  ;;  %v11102_v37 = vunpack.i.l.bf16 %v11101_v59 }
 0x3a3   :  { %v4198_v14 = vsel %vm2041_vm5, %v4189_v33, %v11102_v37  ;;  %v4171_v54 = vsel %vm2041_vm5, %v4162_v50, %v11103_v36 }
 0x3a4   :  { %4337 = vmatprep.mubr.f32.mxu1 %v4198_v14 }
 0x3a5   :  { %4338 = vmatmul.mubr.f32.gmra.mxu1 %v4171_v54 }
 0x3a6   :  { %v11106_v15 = vpop.permute.xlu0 %11105 }
 0x3a7   :  { %v11107_v12 = vunpack.i.l.bf16 %v11106_v15  ;;  %v11108_v24 = vunpack.i.h.bf16 %v11106_v15 }
 0x3a8   :  { %v11111_v25 = vpop.permute.xlu1 %11110 }
 0x3a9   :  { %v11113_v11 = vunpack.i.h.bf16 %v11111_v25  ;;  %v11112_v26 = vunpack.i.l.bf16 %v11111_v25  ;;  %v4181_v0 = vsel %vm1445_vm0, %v3731_v35, %v11107_v12  ;;  %v4154_v36 = vsel %vm1445_vm0, %v3061_v46, %v11108_v24 }
 0x3ab   :  { %v4190_v33 = vsel %vm2024_vm4, %v4181_v0, %v11112_v26  ;;  %v4163_v50 = vsel %vm2024_vm4, %v4154_v36, %v11113_v11  ;;  %v15923_v26 = vld [vmem:[#allocation46_spill] sm:$0xff] }
 0x3b3   :  { %v11116_v62 = vpop.permute.xlu1 %11115 }
 0x3b4   :  { %v11117_v43 = vunpack.i.l.bf16 %v11116_v62  ;;  %v11118_v37 = vunpack.i.h.bf16 %v11116_v62  ;;  %v15924_v62 = vld [vmem:[#allocation49_spill] sm:$0xff] }
 0x3b5   :  { %v11121_v41 = vpop.permute.xlu0 %11120  ;;  %v15925_v35 = vcombine.low %v15923_v26, %v15924_v62 }
 0x3b6   :  { %v11122_v15 = vunpack.i.l.bf16 %v11121_v41  ;;  %v11123_v25 = vunpack.i.h.bf16 %v11121_v41  ;;  %v4182_v47 = vsel %vm1445_vm0, %v3748_v48, %v11117_v43  ;;  %v4155_v61 = vsel %vm1445_vm0, %v15922_v51, %v11118_v37 }
 0x3b8   :  { %v4191_v19 = vsel %vm2024_vm4, %v4182_v47, %v11122_v15  ;;  %v4164_v41 = vsel %vm2024_vm4, %v4155_v61, %v11123_v25  ;;  %v15926_v47 = vld [vmem:[#allocation50_spill] sm:$0xff] }
 0x3bd   :  { %v11126_v60 = vpop.permute.xlu0 %11125 }
 0x3be   :  { %v11128_v39 = vunpack.i.h.bf16 %v11126_v60  ;;  %v11127_v59 = vunpack.i.l.bf16 %v11126_v60 }
 0x3c0   :  { %v4199_v14 = vsel %vm2041_vm5, %v4190_v33, %v11127_v59  ;;  %v4172_v54 = vsel %vm2041_vm5, %v4163_v50, %v11128_v39 }
 0x3c1   :  { %4342 = vmatprep.mubr.f32.mxu1 %v4199_v14 }
 0x3c2   :  { %4343 = vmatmul.mubr.f32.gmra.mxu1 %v4172_v54  ;;  %v11131_v22 = vpop.permute.xlu0 %11130 }
 0x3c3   :  { %v11133_v8 = vunpack.i.h.bf16 %v11131_v22  ;;  %v11132_v48 = vunpack.i.l.bf16 %v11131_v22 }
 0x3c4   :  { %v11136_v63 = vpop.permute.xlu1 %11135 }
 0x3c5   :  { %v11138_v6 = vunpack.i.h.bf16 %v11136_v63  ;;  %v11137_v40 = vunpack.i.l.bf16 %v11136_v63  ;;  %v4183_v11 = vsel %vm1445_vm0, %v3765_v52, %v11132_v48  ;;  %v4156_v32 = vsel %vm1445_vm0, %v15925_v35, %v11133_v8  ;;  %v15927_v63 = vld [vmem:[#allocation55_spill] sm:$0xff] }
 0x3c6   :  { %v15928_v9 = vcombine.low %v15926_v47, %v15927_v63  ;;  %v5207_v47 = vld [vmem:[%s15763_s4 + $0xc0] sm:$0xff] }
 0x3c7   :  { %v4200_v56 = vsel %vm2041_vm5, %v4191_v19, %v11137_v40  ;;  %v4173_v38 = vsel %vm2041_vm5, %v4164_v41, %v11138_v6  ;;  %v5191_v63 = vld [vmem:[%s15763_s4 + $0x40] sm:$0xff] }
 0x3c8   :  { %4347 = vmatprep.mubr.f32.mxu1 %v4200_v56  ;;  %v11141_v12 = vpop.permute.xlu1 %11140 }
 0x3c9   :  { %4348 = vmatmul.mubr.f32.gmra.mxu1 %v4173_v38  ;;  %v11143_v3 = vunpack.i.h.bf16 %v11141_v12  ;;  %v11142_v24 = vunpack.i.l.bf16 %v11141_v12  ;;  %v15929_v12 = vld [vmem:[#allocation53_spill] sm:$0xff] }
 0x3cb   :  { %v4192_v43 = vsel %vm2024_vm4, %v4183_v11, %v11142_v24  ;;  %v4165_v39 = vsel %vm2024_vm4, %v4156_v32, %v11143_v3  ;;  %v15930_v3 = vld [vmem:[#allocation56_spill] sm:$0xff] }
 0x3cc   :  { %v15931_v24 = vcombine.low %v15929_v12, %v15930_v3 }
 0x3ce   :  { %v11146_v37 = vpop.permute.xlu1 %11145 }
 0x3cf   :  { %v11151_v46 = vpop.permute.xlu0 %11150  ;;  %v11148_v5 = vunpack.i.h.bf16 %v11146_v37  ;;  %v11147_v52 = vunpack.i.l.bf16 %v11146_v37  ;;  %v15940_v37 = vld [vmem:[#allocation40_spill] sm:$0xff] }
 0x3d0   :  { %v11153_v60 = vunpack.i.h.bf16 %v11151_v46  ;;  %v11152_v0 = vunpack.i.l.bf16 %v11151_v46  ;;  %v15935_v46 = vld [vmem:[#allocation39_spill] sm:$0xff] }
 0x3d1   :  { %v4184_v25 = vsel %vm1445_vm0, %v3782_v4, %v11147_v52  ;;  %v4157_v49 = vsel %vm1445_vm0, %v15928_v9, %v11148_v5  ;;  %v15941_v52 = vld [vmem:[#allocation51_spill] sm:$0xff] }
 0x3d2   :  { %v4201_v59 = vsel %vm2041_vm5, %v4192_v43, %v11152_v0  ;;  %v4174_v36 = vsel %vm2041_vm5, %v4165_v39, %v11153_v60  ;;  %v15936_v60 = vld [vmem:[#allocation33_spill] sm:$0xff]  ;;  %v15938_v39 = vld [vmem:[#allocation23_spill] sm:$0xff] }
 0x3d3   :  { %4352 = vmatprep.mubr.f32.mxu1 %v4201_v59  ;;  %v11156_v1 = vpop.permute.xlu0 %11155  ;;  %v4110_v0 = vcombine.low %v15936_v60, %v15935_v46  ;;  %v15937_v43 = vld [vmem:[#allocation25_spill] sm:$0xff] }
 0x3d4   :  { %4353 = vmatmul.mubr.f32.gmra.mxu1 %v4174_v36  ;;  %v11158_v33 = vunpack.i.h.bf16 %v11156_v1  ;;  %v11157_v50 = vunpack.i.l.bf16 %v11156_v1  ;;  %v9857_v59 = vcombine.high %v15938_v39, %v15937_v43  ;;  %v15939_v36 = vld [vmem:[#allocation45_spill] sm:$0xff] }
 0x3d5   :  { %v4111_v1 = vcombine.low %v15940_v37, %v15939_v36 }
 0x3d6   :  { %v4193_v51 = vsel %vm2024_vm4, %v4184_v25, %v11157_v50  ;;  %v4166_v61 = vsel %vm2024_vm4, %v4157_v49, %v11158_v33  ;;  %v4119_v5 = vrot.slane %v9857_v59, %v13560_v28  ;;  %v5209_v50 = vld [vmem:[%s15763_s4 + $0xd0] sm:$0xff]  ;;  %v5192_v25 = vld [vmem:[%s15763_s4 + $0x48] sm:$0xff]  ;;  %v5206_v49 = vld [vmem:[%s15763_s4 + $0xb8] sm:$0xff] }
 0x3d8   :  { %v11161_v19 = vpop.permute.xlu0 %11160  ;;  %v4120_v33 = vcombine.low %v15941_v52, %v4119_v5 }
 0x3d9   :  { %v11166_v14 = vpop.permute.xlu1 %11165  ;;  %v11163_v58 = vunpack.i.h.bf16 %v11161_v19  ;;  %v11162_v20 = vunpack.i.l.bf16 %v11161_v19  ;;  %v5204_v19 = vld [vmem:[%s15763_s4 + $0xa8] sm:$0xff] }
 0x3da   :  { %v11168_v54 = vunpack.i.h.bf16 %v11166_v14  ;;  %v11167_v15 = vunpack.i.l.bf16 %v11166_v14  ;;  %v5193_v14 = vld [vmem:[%s15763_s4 + $0x50] sm:$0xff] }
 0x3db   :  { %v4185_v48 = vsel %vm1445_vm0, %v3799_v7, %v11162_v20  ;;  %v4158_v11 = vsel %vm1445_vm0, %v15931_v24, %v11163_v58  ;;  %v15934_v7 = vcombine.low %v15932_v55, %v15933_v34 }
 0x3dc   :  { %v4202_v6 = vsel %vm2041_vm5, %v4193_v51, %v11167_v15  ;;  %v4175_v40 = vsel %vm2041_vm5, %v4166_v61, %v11168_v54  ;;  %v5208_v15 = vld [vmem:[%s15763_s4 + $0xc8] sm:$0xff]  ;;  %v5190_v51 = vld [vmem:[%s15763_s4 + $0x38] sm:$0xff] }
 0x3dd   :  { %4357 = vmatprep.mubr.f32.mxu1 %v4202_v6  ;;  %v11171_v56 = vpop.permute.xlu1 %11170  ;;  %v5205_v6 = vld [vmem:[%s15763_s4 + $0xb0] sm:$0xff] }
 0x3de   :  { %4358 = vmatmul.mubr.f32.gmra.mxu1 %v4175_v40  ;;  %v11173_v4 = vunpack.i.h.bf16 %v11171_v56  ;;  %v11172_v41 = vunpack.i.l.bf16 %v11171_v56  ;;  %v5189_v40 = vld [vmem:[%s15763_s4 + $0x30] sm:$0xff]  ;;  %v5188_v56 = vld [vmem:[%s15763_s4 + $0x28] sm:$0xff] }
 0x3e0   :  { %v4194_v26 = vsel %vm2024_vm4, %v4185_v48, %v11172_v41  ;;  %v4167_v62 = vsel %vm2024_vm4, %v4158_v11, %v11173_v4  ;;  %v14947_v11 = vld [vmem:[#allocation5 + $0x2] ss:$0 sm:$0xff] }
 0x3e3   :  { %v11176_v22 = vpop.permute.xlu0 %11175 }
 0x3e4   :  { %v11178_v38 = vunpack.i.h.bf16 %v11176_v22  ;;  %v11177_v8 = vunpack.i.l.bf16 %v11176_v22 }
 0x3e6   :  { %v4203_v35 = vsel %vm2041_vm5, %v4194_v26, %v11177_v8  ;;  %v4176_v32 = vsel %vm2041_vm5, %v4167_v62, %v11178_v38  ;;  %v14949_v62 = vld [vmem:[#allocation7 + $0x2] ss:$0 sm:$0xff] }
 0x3e7   :  { %4362 = vmatprep.mubr.f32.mxu1 %v4203_v35 }
 0x3e8   :  { %4363 = vmatmul.mubr.f32.gmra.mxu1 %v4176_v32 }
 0x3e9   :  { %10741 = vmatprep.mubr.msk.f32.mxu1 %vm11879_vm13, %v15900_v57 }
 0x3ec   :  { %10742 = vmatmul.mubr.msk.f32.vlgmr.msra.gmra.mxu1 %vm1445_vm0, %v15934_v7 }
 0x3ed   :  { %10744 = vmatprep.mubr.msk.f32.mxu1 %vm11879_vm13, %v15900_v57 }
 0x3f0   :  { %10745 = vmatmul.mubr.msk.f32.gmra.mxu1 %vm1445_vm0, %v4110_v0 }
 0x3f1   :  { %10747 = vmatprep.mubr.msk.f32.mxu1 %vm11879_vm13, %v15900_v57 }
 0x3f4   :  { %10748 = vmatmul.mubr.msk.f32.gmra.mxu1 %vm1445_vm0, %v4111_v1 }
 0x3f5   :  { %10750 = vmatprep.mubr.msk.f32.mxu1 %vm11879_vm13, %v15900_v57 }
 0x3f8   :  { %10751 = vmatmul.mubr.msk.f32.gmra.mxu1 %vm1445_vm0, %v4120_v33 }
 0x3f9   :  { %10753 = vmatprep.mubr.msk.f32.mxu1 %vm11879_vm13, %v15900_v57 }
 0x3fc   :  { %10754 = vmatmul.mubr.msk.f32.gmra.mxu1 %vm1445_vm0, %v4129_v21  ;;  %v5210_v21 = vld [vmem:[%s15763_s4 + $0xd8] sm:$0xff] }
 0x3fd   :  { %10756 = vmatprep.mubr.msk.f32.mxu1 %vm11879_vm13, %v15900_v57 }
 0x400   :  { %10757 = vmatmul.mubr.msk.f32.gmra.mxu1 %vm1445_vm0, %v4130_v31 }
 0x401   :  { %10759 = vmatprep.mubr.msk.f32.mxu1 %vm11879_vm13, %v15900_v57 }
 0x404   :  { %10760 = vmatmul.mubr.msk.f32.gmra.mxu1 %vm1445_vm0, %v4131_v53  ;;  %v5197_v53 = vld [vmem:[%s15763_s4 + $0x70] sm:$0xff] }
 0x405   :  { %10762 = vmatprep.mubr.msk.f32.mxu1 %vm11879_vm13, %v15900_v57  ;;  %10608 = vmatpush3.msra.mxu0 %v5197_v53 }
 0x406   :  { %10609 = vmatprep.subr.mxu0 %v5212_v10 }
 0x408   :  { %10763 = vmatmul.mubr.msk.f32.gmra.mxu1 %vm1445_vm0, %v4132_v13 }
 0x409   :  { %10765 = vmatprep.mubr.msk.f32.mxu1 %vm11879_vm13, %v15900_v57  ;;  %v5196_v57 = vld [vmem:[%s15763_s4 + $0x68] sm:$0xff] }
 0x40a   :  { %10610 = vmatpush3.msra.mxu0 %v5196_v57 }
 0x40b   :  { %10611 = vmatprep.subr.mxu0 %v5211_v45 }
 0x40c   :  { %10766 = vmatmul.mubr.msk.f32.gmra.mxu1 %vm1445_vm0, %v4149_v29  ;;  %v5194_v29 = vld [vmem:[%s15763_s4 + $0x58] sm:$0xff]  ;;  %10612 = vmatpush3.msra.mxu0 %v5195_v27 }
 0x40d   :  { %10613 = vmatprep.subr.mxu0 %v5210_v21 }
 0x40e   :  { %10614 = vmatpush3.msra.mxu0 %v5194_v29 }
 0x40f   :  { %10615 = vmatprep.subr.mxu0 %v5209_v50 }
 0x410   :  { %10616 = vmatpush3.msra.mxu0 %v5193_v14 }
 0x411   :  { %10617 = vmatprep.subr.mxu0 %v5208_v15 }
 0x412   :  { %10618 = vmatpush3.msra.mxu0 %v5192_v25 }
 0x413   :  { %10619 = vmatprep.subr.mxu0 %v5207_v47 }
 0x414   :  { %10620 = vmatpush3.msra.mxu0 %v5191_v63 }
 0x415   :  { %10621 = vmatprep.subr.mxu0 %v5206_v49 }
 0x416   :  { %10622 = vmatpush3.msra.mxu0 %v5190_v51 }
 0x417   :  { %10623 = vmatprep.subr.mxu0 %v5205_v6 }
 0x418   :  { %10624 = vmatpush3.msra.mxu0 %v5189_v40 }
 0x419   :  { %10625 = vmatprep.subr.mxu0 %v5204_v19 }
 0x41a   :  { %10626 = vmatpush3.msra.mxu0 %v5188_v56 }
 0x43a   :  { %v10565_v16 = vpop.f32.mrf.mxu1 }
 0x43c   :  { %v10566_v30 = vpop.f32.mrf.mxu1 }
 0x43d   :  { %v10567_v3 = vadd.f32 %v10566_v30, %v10565_v16 }
 0x453   :  { %v14875_v23 = vpop.f32.mrf.mxu1 }
 0x455   :  { %v14877_v31 = vpop.f32.mrf.mxu1 }
 0x456   :  { %v10570_v32 = vadd.f32 %v14877_v31, %v14875_v23 }
 0x459   :  { %v14891_v13 = vpop.f32.mrf.mxu1 }
 0x45b   :  { %v10572_v17 = vpop.f32.mrf.mxu1 }
 0x45c   :  { %v10573_v0 = vadd.f32 %v10572_v17, %v14891_v13 }
 0x465   :  { %v10574_v54 = vpop.f32.mrf.mxu1 }
 0x467   :  { %v10575_v9 = vpop.f32.mrf.mxu1 }
 0x468   :  { %v10576_v52 = vadd.f32 %v10575_v9, %v10574_v54 }
 0x482   :  { %v10577_v61 = vpop.f32.mrf.mxu1 }
 0x484   :  { %v10578_v58 = vpop.f32.mrf.mxu1 }
 0x485   :  { %v10579_v33 = vadd.f32 %v10578_v58, %v10577_v61 }
 0x489   :  { %v10580_v20 = vpop.f32.mrf.mxu1 }
 0x48b   :  { %v10581_v4 = vpop.f32.mrf.mxu1 }
 0x48c   :  { %v10582_v30 = vadd.f32 %v10581_v4, %v10580_v20 }
 0x494   :  { %v10583_v41 = vpop.f32.mrf.mxu1 }
 0x496   :  { %v10584_v22 = vpop.f32.mrf.mxu1 }
 0x497   :  { %v10585_v44 = vadd.f32 %v10584_v22, %v10583_v41 }
 0x49e   :  { %v10586_v38 = vpop.f32.mrf.mxu1 }
 0x4a0   :  { %v10587_v8 = vpop.f32.mrf.mxu1 }
 0x4a1   :  { %v14968_v18 = vadd.f32 %v10587_v8, %v10586_v38 }
 0x4a8   :  { %v10589_v48 = vpop.f32.mrf.mxu1 }
 0x4aa   :  { %v10590_v12 = vpop.f32.mrf.mxu1 }
 0x4ab   :  { %v14970_v53 = vadd.f32 %v10590_v12, %v10589_v48 }
 0x4ac   :  { %v4434_v24 = vpop.f32.mrf.mxu1 }
 0x4ad   :  { %v4435_v26 = vadd.f32 %v10567_v3, %v4434_v24 }
 0x4ae   :  { %v10743_v35 = vpop.f32.mrf.mxu1 }
 0x4af   :  { %v4483_v55 = vmul.f32 %v14947_v11, %v4435_v26 }
 0x4b0   :  { %v4439_v34 = vpop.f32.mrf.mxu1 }
 0x4b1   :  { %v4497_v7 = vadd.f32 %v14949_v62, %v4483_v55  ;;  %v4440_v46 = vadd.f32 %v10570_v32, %v4439_v34 }
 0x4b2   :  { %v10746_v60 = vpop.f32.mrf.mxu1 }
 0x4b3   :  { %v4506_v43 = vmax.f32 %v4497_v7, 0.0  ;;  %v4484_v39 = vmul.f32 %v14947_v11, %v4440_v46 }
 0x4b4   :  { %v4444_v59 = vpop.f32.mrf.mxu1 }
 0x4b5   :  { %v4524_v36 = vcombine.high %v4506_v43, %v4506_v43  ;;  %v14958_v37 = vrot.slane %v4506_v43, %v13560_v28  ;;  %v4498_v1 = vadd.f32 %v14949_v62, %v4484_v39  ;;  %v4445_v5 = vadd.f32 %v10573_v0, %v4444_v59 }
 0x4b6   :  { %v10749_v16 = vpop.f32.mrf.mxu1 }
 0x4b7   :  { %v14962_v23 = vrot.slane %v4524_v36, %v13560_v28  ;;  %v14966_v31 = vcombine.high %v14958_v37, %v14958_v37  ;;  %v4507_v42 = vmax.f32 %v4498_v1, 0.0  ;;  %v4485_v13 = vmul.f32 %v14947_v11, %v4445_v5 }
 0x4b8   :  { %v4449_v10 = vpop.f32.mrf.mxu1  ;;  %v9870_v45 = vrot.slane %v14958_v37, 9 }
 0x4b9   :  { %v14975_v57 = vcombine.high %v14962_v23, %v14962_v23  ;;  %v4761_v27 = vcombine.low %v14958_v37, %v14966_v31  ;;  %v4541_v17 = vcombine.high %v4507_v42, %v4507_v42  ;;  %v14981_v21 = vrot.slane %v4507_v42, %v13560_v28 }
 0x4ba   :  { %v4499_v29 = vadd.f32 %v14949_v62, %v4485_v13  ;;  %v4450_v50 = vadd.f32 %v10576_v52, %v4449_v10  ;;  %v10752_v14 = vpop.f32.mrf.mxu1  ;;  %v4679_v54 = vrot.slane %v14966_v31, 7  ;;  %v4682_v15 = vrot.slane %v14962_v23, 7 }
 0x4bb   :  { %v14987_v25 = vrot.slane %v4541_v17, %v13560_v28  ;;  %v9871_v47 = vrot.slane %v14975_v57, 9  ;;  %v4913_v63 = vcombine.low %v14966_v31, %v14962_v23  ;;  %v4686_v9 = vrot.slane %v14981_v21, 7 }
 0x4bc   :  { %v4508_v49 = vmax.f32 %v4499_v29, 0.0  ;;  %v4486_v51 = vmul.f32 %v14947_v11, %v4450_v50  ;;  %v4454_v61 = vpop.f32.mrf.mxu1  ;;  %v4556_v6 = vcombine.high %v14981_v21, %v14981_v21  ;;  %v4680_v58 = vsel %vm13579_vm12, %v9870_v45, %v4679_v54 }
 0x4bd   :  { %v14998_v40 = vcombine.high %v14987_v25, %v14987_v25  ;;  %v9872_v19 = vrot.slane %v14987_v25, 9  ;;  %v4455_v56 = vadd.f32 %v10579_v33, %v4454_v61  ;;  %v4681_v38 = vrot.slane %v4679_v54, 2 }
 0x4be   :  { %v4558_v20 = vcombine.high %v4508_v49, %v4508_v49  ;;  %v15004_v4 = vrot.slane %v4508_v49, %v13560_v28  ;;  %v4500_v41 = vadd.f32 %v14949_v62, %v4486_v51  ;;  %v10755_v22 = vpop.f32.mrf.mxu1  ;;  %v4687_v48 = vsel %vm13579_vm12, %v9871_v47, %v4686_v9  ;;  %v5203_v49 = vld [vmem:[%s15763_s4 + $0xa0] sm:$0xff] }
 0x4bf   :  { %v4487_v8 = vmul.f32 %v14947_v11, %v4455_v56  ;;  %v4688_v12 = vrot.slane %v4686_v9, 2  ;;  %v4689_v3 = vrot.slane %v4556_v6, 7  ;;  %v4683_v46 = vsel %vm13579_vm12, %v4681_v38, %v4682_v15  ;;  %10627 = vmatprep.subr.mxu0 %v5203_v49 }
 0x4c0   :  { %v15011_v24 = vrot.slane %v4558_v20, %v13560_v28  ;;  %v15015_v26 = vcombine.high %v15004_v4, %v15004_v4  ;;  %v4696_v35 = vrot.slane %v15004_v4, 7  ;;  %v4509_v32 = vmax.f32 %v4500_v41, 0.0  ;;  %v4459_v55 = vpop.f32.mrf.mxu1 }
 0x4c1   :  { %v4501_v34 = vadd.f32 %v14949_v62, %v4487_v8  ;;  %v4460_v7 = vadd.f32 %v10582_v30, %v4459_v55  ;;  %v4690_v60 = vsel %vm13579_vm12, %v4688_v12, %v4689_v3  ;;  %v4833_v36 = vcombine.low %v4680_v58, %v4683_v46  ;;  %v5187_v3 = vld [vmem:[%s15763_s4 + $0x20] sm:$0xff]  ;;  %v5186_v55 = vld [vmem:[%s15763_s4 + $0x18] sm:$0xff] }
 0x4c2   :  { %v9873_v0 = vrot.slane %v15015_v26, 9  ;;  %v4575_v43 = vcombine.high %v4509_v32, %v4509_v32  ;;  %v15025_v39 = vrot.slane %v4509_v32, %v13560_v28  ;;  %v10758_v59 = vpop.f32.mrf.mxu1  ;;  %v4834_v52 = vcombine.low %v4687_v48, %v4690_v60  ;;  %v5202_v32 = vld [vmem:[%s15763_s4 + $0x98] sm:$0xff]  ;;  %10628 = vmatpush3.msra.mxu0 %v5187_v3 }
 0x4c3   :  { %v4510_v1 = vmax.f32 %v4501_v34, 0.0  ;;  %v4488_v5 = vmul.f32 %v14947_v11, %v4460_v7  ;;  %v4914_v33 = vcombine.low %v14981_v21, %v4556_v6  ;;  %v4841_v10 = vrot.slane %v4833_v36, %v13560_v28  ;;  %v5201_v59 = vld [vmem:[%s15763_s4 + $0x90] sm:$0xff]  ;;  %10629 = vmatprep.subr.mxu0 %v5202_v32 }
 0x4c4   :  { %v15030_v16 = vrot.slane %v4575_v43, %v13560_v28  ;;  %v15034_v30 = vcombine.high %v15025_v39, %v15025_v39  ;;  %v9878_v42 = vrot.slane %v15025_v39, 9  ;;  %v4464_v13 = vpop.f32.mrf.mxu1  ;;  %v15045_v47 = vrot.slane %v4834_v52, %v13560_v28  ;;  %10630 = vmatpush3.msra.mxu0 %v5186_v55 }
 0x4c5   :  { %v4592_v45 = vcombine.high %v4510_v1, %v4510_v1  ;;  %v15039_v17 = vrot.slane %v4510_v1, %v13560_v28  ;;  %v4502_v29 = vadd.f32 %v14949_v62, %v4488_v5  ;;  %v4465_v50 = vadd.f32 %v10585_v44, %v4464_v13  ;;  %10631 = vmatprep.subr.mxu0 %v5201_v59 }
 0x4c6   :  { %v4735_v14 = vrot.slane %v15034_v30, 7  ;;  %v4738_v54 = vrot.slane %v15030_v16, 7  ;;  %v10761_v15 = vpop.f32.mrf.mxu1  ;;  %v15048_v9 = vrot.slane %v4914_v33, %v13560_v28  ;;  %v4849_v41 = vcombine.low %v4841_v10, %v15045_v47 }
 0x4c7   :  { %v15054_v51 = vrot.slane %v4592_v45, %v13560_v28  ;;  %v15058_v44 = vcombine.high %v15039_v17, %v15039_v17  ;;  %v4749_v61 = vrot.slane %v15039_v17, 7  ;;  %v4511_v6 = vmax.f32 %v4502_v29, 0.0 }
 0x4c8   :  { %v15063_v56 = vrot.slane %v4735_v14, 2  ;;  %v4489_v58 = vmul.f32 %v14947_v11, %v4465_v50  ;;  %v4469_v20 = vpop.f32.mrf.mxu1  ;;  %v4930_v22 = vcombine.low %v14998_v40, %v15004_v4  ;;  %v4778_v5 = vcombine.low %v14987_v25, %v14998_v40  ;;  %v5199_v4 = vld [vmem:[%s15763_s4 + $0x80] sm:$0xff] }
 0x4c9   :  { %v15071_v38 = vcombine.high %v15054_v51, %v15054_v51  ;;  %v9874_v8 = vrot.slane %v15054_v51, 9  ;;  %v15076_v48 = vrot.slane %v4749_v61, 2  ;;  %v4752_v12 = vrot.slane %v15058_v44, 7 }
 0x4ca   :  { %v4609_v34 = vcombine.high %v4511_v6, %v4511_v6  ;;  %v15089_v7 = vrot.slane %v4511_v6, %v13560_v28  ;;  %v4503_v46 = vadd.f32 %v14949_v62, %v4489_v58  ;;  %v4470_v60 = vadd.f32 %v14968_v18, %v4469_v20  ;;  %v10764_v43 = vpop.f32.mrf.mxu1  ;;  %v5185_v18 = vld [vmem:[%s15763_s4 + $0x10] sm:$0xff] }
 0x4cb   :  { %v4795_v36 = vcombine.low %v15054_v51, %v15071_v38  ;;  %v15099_v1 = vrot.slane %v4930_v22, %v13560_v28  ;;  %v4779_v52 = vcombine.low %v15015_v26, %v15011_v24  ;;  %v15120_v49 = vrot.slane %v4778_v5, %v13560_v28  ;;  %10632 = vmatpush3.msra.mxu0 %v5185_v18 }
 0x4cc   :  { %v15109_v33 = vrot.slane %v4609_v34, %v13560_v28  ;;  %v15113_v13 = vcombine.high %v15089_v7, %v15089_v7  ;;  %v4710_v10 = vrot.slane %v15089_v7, 7  ;;  %v4512_v45 = vmax.f32 %v4503_v46, 0.0  ;;  %v4474_v29 = vpop.f32.mrf.mxu1 }
 0x4cd   :  { %v4490_v50 = vmul.f32 %v14947_v11, %v4470_v60  ;;  %v5049_v15 = vcombine.low %v15048_v9, %v15099_v1  ;;  %v15123_v6 = vrot.slane %v4779_v52, %v13560_v28  ;;  %v4921_v3 = vrot.slane %v4913_v63, %v13560_v28 }
 0x4ce   :  { %v9875_v58 = vrot.slane %v15113_v13, 9  ;;  %v4626_v20 = vcombine.high %v4512_v45, %v4512_v45  ;;  %v15127_v22 = vrot.slane %v4512_v45, %v13560_v28  ;;  %v10767_v32 = vpop.f32.mrf.mxu1  ;;  %v4475_v60 = vadd.f32 %v14970_v53, %v4474_v29 }
 0x4cf   :  { %v4504_v55 = vadd.f32 %v14949_v62, %v4490_v50  ;;  %v11179_v34 = vpack.i.bf16 %v4849_v41, %v5049_v15  ;;  %v15136_v46 = vcombine.low %v15120_v49, %v15123_v6  ;;  %v4929_v63 = vcombine.low %v4921_v3, %v15048_v9 }
 0x4d0   :  { %v15140_v43 = vrot.slane %v4626_v20, %v13560_v28  ;;  %v15144_v59 = vcombine.high %v15127_v22, %v15127_v22  ;;  %v9876_v23 = vrot.slane %v15127_v22, 9  ;;  %v4491_v41 = vmul.f32 %v14947_v11, %v4475_v60  ;;  %v5200_v60 = vld [vmem:[%s15763_s4 + $0x88] sm:$0xff] }
 0x4d1   :  { %v4513_v5 = vmax.f32 %v4504_v55, 0.0  ;;  %11180 = vrot.lane.b32.xlu1 %v11179_v34, %s11863_s27  ;;  %v4574_v52 = vcombine.high %v15011_v24, %v15011_v24  ;;  %v4693_v53 = vrot.slane %v14998_v40, 7  ;;  %v11184_v45 = vpack.i.bf16 %v4929_v63, %v15136_v46  ;;  %v5184_v63 = vld [vmem:[%s15763_s4 + $0x8] sm:$0xff]  ;;  %10633 = vmatprep.subr.mxu0 %v5200_v60 }
 0x4d2   :  { %v4724_v18 = vrot.slane %v15140_v43, 7  ;;  %v4700_v29 = vrot.slane %v15011_v24, 7  ;;  %v4736_v9 = vsel %vm13579_vm12, %v9878_v42, %v4735_v14  ;;  %v4505_v15 = vadd.f32 %v14949_v62, %v4491_v41  ;;  %10634 = vmatpush3.msra.mxu0 %v5184_v63 }
 0x4d3   :  { %v4643_v50 = vcombine.high %v4513_v5, %v4513_v5  ;;  %v15163_v11 = vrot.slane %v4513_v5, %v13560_v28  ;;  %v4694_v40 = vsel %vm13579_vm12, %v9872_v19, %v4693_v53  ;;  %11185 = vrot.lane.b32.xlu0 %v11184_v45, %s11873_s6  ;;  %v4695_v20 = vrot.slane %v4693_v53, 2  ;;  %v5183_v5 = vld [vmem:[%s15763_s4] sm:$0xff]  ;;  %10635 = vmatprep.subr.mxu0 %v5199_v4 }
 0x4d4   :  { %v4701_v3 = vsel %vm13579_vm12, %v9873_v0, %v4700_v29  ;;  %v4702_v42 = vrot.slane %v4700_v29, 2  ;;  %v4703_v14 = vrot.slane %v4574_v52, 7  ;;  %v4514_v55 = vmax.f32 %v4505_v15, 0.0  ;;  %10636 = vmatpush3.msra.mxu0 %v5183_v5 }
 0x4d5   :  { %v15176_v32 = vrot.slane %v4643_v50, %v13560_v28  ;;  %v4728_v62 = vrot.slane %v15163_v11, 7  ;;  %v4739_v25 = vsel %vm13579_vm12, %v15063_v56, %v4738_v54  ;;  %v4697_v19 = vsel %vm13579_vm12, %v4695_v20, %v4696_v35 }
 0x4d6   :  { %v4704_v26 = vsel %vm13579_vm12, %v4702_v42, %v4703_v14  ;;  %v4931_v0 = vcombine.low %v15011_v24, %v4574_v52  ;;  %v5026_v34 = vcombine.low %v4736_v9, %v4739_v25  ;;  %v4660_v24 = vcombine.high %v4514_v55, %v4514_v55 }
 0x4d7   :  { %v15202_v35 = vcombine.high %v15176_v32, %v15176_v32  ;;  %v9879_v54 = vrot.slane %v15176_v32, 9  ;;  %v15206_v56 = vrot.slane %v4514_v55, %v13560_v28  ;;  %v4850_v41 = vcombine.low %v4694_v40, %v4697_v19 }
 0x4d8   :  { %v4851_v52 = vcombine.low %v4701_v3, %v4704_v26  ;;  %v4945_v53 = vrot.slane %v4931_v0, %v13560_v28  ;;  %v15213_v45 = vrot.slane %v5026_v34, %v13560_v28  ;;  %v15217_v9 = vrot.slane %v4660_v24, %v13560_v28 }
 0x4d9   :  { %v4742_v29 = vrot.slane %v15202_v35, 7  ;;  %v15221_v50 = vcombine.high %v15206_v56, %v15206_v56  ;;  %v4745_v15 = vrot.slane %v15206_v56, 7  ;;  %v15225_v40 = vrot.slane %v4850_v41, %v13560_v28 }
 0x4da   :  { %v15228_v20 = vrot.slane %v4851_v52, %v13560_v28  ;;  %v5050_v3 = vcombine.low %v15034_v30, %v15030_v16  ;;  %v5141_v42 = vcombine.low %v15039_v17, %v15058_v44  ;;  %v15236_v14 = vcombine.high %v15217_v9, %v15217_v9 }
 0x4db   :  { %v9881_v55 = vrot.slane %v15221_v50, 9  ;;  %v4756_v25 = vrot.slane %v15217_v9, 7  ;;  %v4762_v19 = vcombine.low %v14975_v57, %v14981_v21  ;;  %v5025_v63 = vcombine.low %v15045_v47, %v15225_v40  ;;  %v5217_v47 = vld [vmem:[%s15763_s4 + $0x110] sm:$0xff] }
 0x4dc   :  { %v4866_v26 = vcombine.low %v15225_v40, %v15228_v20  ;;  %v5034_v0 = vcombine.low %v15228_v20, %v15213_v45  ;;  %v15247_v34 = vrot.slane %v5050_v3, %v13560_v28  ;;  %v15250_v60 = vrot.slane %v5141_v42, %v13560_v28 }
 0x4dd   :  { %v15255_v4 = vrot.slane %v4762_v19, %v13560_v28  ;;  %v4591_v57 = vcombine.high %v15030_v16, %v15030_v16  ;;  %v15260_v21 = vcombine.low %v15099_v1, %v4945_v53  ;;  %v4994_v41 = vcombine.low %v15025_v39, %v15034_v30 }
 0x4de   :  { %v5058_v24 = vcombine.low %v4945_v53, %v15247_v34  ;;  %v4753_v52 = vsel %vm13579_vm12, %v15076_v48, %v4752_v12  ;;  %v4625_v53 = vcombine.high %v15109_v33, %v15109_v33  ;;  %v4707_v39 = vrot.slane %v15071_v38, 7 }
 0x4df   :  { %v4993_v16 = vcombine.low %v15255_v4, %v15120_v49  ;;  %v9880_v3 = vrot.slane %v4591_v57, 9  ;;  %v5081_v1 = vcombine.low %v4591_v57, %v15039_v17  ;;  %v5001_v19 = vrot.slane %v4994_v41, %v13560_v28 }
 0x4e0   :  { %v11194_v42 = vpack.i.bf16 %v4866_v26, %v5058_v24  ;;  %v4714_v30 = vrot.slane %v15109_v33, 7  ;;  %v4717_v12 = vrot.slane %v4625_v53, 7  ;;  %v4708_v24 = vsel %vm13579_vm12, %v9874_v8, %v4707_v39 }
 0x4e1   :  { %v11189_v44 = vpack.i.bf16 %v4993_v16, %v4866_v26  ;;  %v5088_v5 = vrot.slane %v5081_v1, %v13560_v28  ;;  %v4750_v48 = vsel %vm13579_vm12, %v9880_v3, %v4749_v61  ;;  %v5002_v49 = vcombine.low %v15123_v6, %v5001_v19  ;;  %v15294_v26 = vld [vmem:[%s15763_s4 + $0x118] sm:$0xff] }
 0x4e2   :  { %11195 = vrot.lane.b32.xlu0 %v11194_v42, %s11863_s27  ;;  %v5111_v57 = vcombine.low %v4750_v48, %v4753_v52  ;;  %v4709_v41 = vrot.slane %v4707_v39, 2  ;;  %v4715_v61 = vsel %vm13579_vm12, %v9875_v58, %v4714_v30  ;;  %v4716_v6 = vrot.slane %v4714_v30, 2  ;;  %10768 = vmatprep.subr.mxu0 %v15294_v26 }
 0x4e3   :  { %11190 = vrot.lane.b32.xlu1 %v11189_v44, %s11877_s24  ;;  %v5089_v17 = vcombine.low %v5001_v19, %v5088_v5  ;;  %v4948_v52 = vcombine.low %v15109_v33, %v4625_v53  ;;  %v4964_v5 = vcombine.low %v15144_v59, %v15140_v43  ;;  %v4642_v3 = vcombine.high %v15140_v43, %v15140_v43 }
 0x4e4   :  { %v5118_v8 = vrot.slane %v5111_v57, %v13560_v28  ;;  %v4711_v16 = vsel %vm13579_vm12, %v4709_v41, %v4710_v10  ;;  %v4718_v1 = vsel %vm13579_vm12, %v4716_v6, %v4717_v12  ;;  %v4812_v48 = vcombine.low %v15127_v22, %v15144_v59 }
 0x4e5   :  { %v11199_v58 = vpack.i.bf16 %v15260_v21, %v5089_v17  ;;  %v4867_v53 = vcombine.low %v4708_v24, %v4711_v16  ;;  %v4962_v42 = vrot.slane %v4948_v52, %v13560_v28  ;;  %v4868_v39 = vcombine.low %v4715_v61, %v4718_v1 }
 0x4e6   :  { %v5119_v19 = vcombine.low %v15213_v45, %v5118_v8  ;;  %v15318_v30 = vrot.slane %v4964_v5, %v13560_v28  ;;  %v9877_v10 = vrot.slane %v4642_v3, 9  ;;  %v4813_v57 = vcombine.low %v4642_v3, %v15163_v11  ;;  %v5215_v45 = vld [vmem:[%s15763_s4 + $0x100] sm:$0xff] }
 0x4e7   :  { %11200 = vrot.lane.b32.xlu1 %v11199_v58, %s11873_s6  ;;  %v4875_v44 = vrot.slane %v4867_v53, %v13560_v28  ;;  %v4947_v12 = vcombine.low %v15071_v38, %v15089_v7  ;;  %v15328_v41 = vrot.slane %v4868_v39, %v13560_v28  ;;  %v4658_v61 = vcombine.high %v15163_v11, %v15163_v11 }
 0x4e8   :  { %v11204_v24 = vpack.i.bf16 %v5002_v49, %v5119_v19  ;;  %v5059_v17 = vcombine.low %v4962_v42, %v15318_v30  ;;  %v4820_v6 = vrot.slane %v4812_v48, %v13560_v28  ;;  %v15335_v52 = vrot.slane %v4813_v57, %v13560_v28 }
 0x4e9   :  { %v4955_v8 = vrot.slane %v4947_v12, %v13560_v28  ;;  %v4721_v16 = vrot.slane %v15144_v59, 7  ;;  %v4883_v7 = vcombine.low %v4875_v44, %v15328_v41  ;;  %v4729_v49 = vsel %vm13579_vm12, %v9877_v10, %v4728_v62 }
 0x4ea   :  { %11205 = vrot.lane.b32.xlu0 %v11204_v24, %s11877_s24  ;;  %v4730_v5 = vrot.slane %v4728_v62, 2  ;;  %v4731_v3 = vrot.slane %v4658_v61, 7  ;;  %v15348_v58 = vcombine.low %v4820_v6, %v15335_v52  ;;  %v4743_v62 = vsel %vm13579_vm12, %v9879_v54, %v4742_v29 }
 0x4eb   :  { %v4963_v1 = vcombine.low %v4955_v8, %v4962_v42  ;;  %v4722_v59 = vsel %vm13579_vm12, %v9876_v23, %v4721_v16  ;;  %v4723_v53 = vrot.slane %v4721_v16, 2  ;;  %v11209_v19 = vpack.i.bf16 %v4883_v7, %v5059_v17 }
 0x4ec   :  { %v4732_v39 = vsel %vm13579_vm12, %v4730_v5, %v4731_v3  ;;  %v4744_v42 = vrot.slane %v4742_v29, 2  ;;  %v4965_v44 = vcombine.low %v15163_v11, %v4658_v61  ;;  %v5060_v29 = vcombine.low %v15202_v35, %v15206_v56 }
 0x4ed   :  { %v11214_v22 = vpack.i.bf16 %v4963_v1, %v15348_v58  ;;  %v4725_v23 = vsel %vm13579_vm12, %v4723_v53, %v4724_v18  ;;  %v4885_v10 = vcombine.low %v4729_v49, %v4732_v39  ;;  %11210 = vrot.lane.b32.xlu1 %v11209_v19, %s11863_s27  ;;  %v4796_v43 = vcombine.low %v15113_v13, %v15109_v33 }
 0x4ee   :  { %v4746_v54 = vsel %vm13579_vm12, %v4744_v42, %v4745_v15  ;;  %v4884_v48 = vcombine.low %v4722_v59, %v4725_v23  ;;  %v4979_v11 = vrot.slane %v4965_v44, %v13560_v28  ;;  %v5004_v12 = vcombine.low %v15176_v32, %v15202_v35 }
 0x4ef   :  { %11215 = vrot.lane.b32.xlu0 %v11214_v22, %s11873_s6  ;;  %v15381_v18 = vrot.slane %v4885_v10, %v13560_v28  ;;  %v5036_v57 = vcombine.low %v4743_v62, %v4746_v54  ;;  %v15390_v24 = vrot.slane %v5060_v29, %v13560_v28  ;;  %v15393_v56 = vrot.slane %v4796_v43, %v13560_v28 }
 0x4f0   :  { %v15387_v15 = vrot.slane %v4884_v48, %v13560_v28  ;;  %v5090_v33 = vcombine.low %v15221_v50, %v15217_v9  ;;  %v5011_v17 = vrot.slane %v5004_v12, %v13560_v28  ;;  %v4769_v32 = vrot.slane %v4761_v27, %v13560_v28 }
 0x4f1   :  { %v15398_v13 = vrot.slane %v5036_v57, %v13560_v28  ;;  %v5068_v61 = vcombine.low %v4979_v11, %v15390_v24  ;;  %v5003_v16 = vcombine.low %v15393_v56, %v4820_v6  ;;  %v4758_v5 = vrot.slane %v4756_v25, 2 }
 0x4f2   :  { %v4900_v35 = vcombine.low %v15387_v15, %v15381_v18  ;;  %v5035_v8 = vcombine.low %v15328_v41, %v15387_v15  ;;  %v5097_v49 = vrot.slane %v5090_v33, %v13560_v28  ;;  %v4759_v37 = vrot.slane %v15236_v14, 7 }
 0x4f3   :  { %v5044_v7 = vcombine.low %v15381_v18, %v15398_v13  ;;  %v4757_v3 = vsel %vm13579_vm12, %v9881_v55, %v4756_v25  ;;  %v4777_v6 = vcombine.low %v4769_v32, %v15255_v4  ;;  %v15430_v53 = vrot.slane %v4795_v36, %v13560_v28 }
 0x4f4   :  { %v11224_v31 = vpack.i.bf16 %v4900_v35, %v5068_v61  ;;  %v11219_v27 = vpack.i.bf16 %v5003_v16, %v4900_v35  ;;  %v5098_v1 = vcombine.low %v5011_v17, %v5097_v49  ;;  %v4760_v59 = vsel %vm13579_vm12, %v4758_v5, %v4759_v37  ;;  %v5216_v35 = vld [vmem:[%s15763_s4 + $0x108] sm:$0xff] }
 0x4f5   :  { %v5150_v19 = vcombine.low %v15217_v9, %v15236_v14  ;;  %v15437_v50 = vcombine.low %v15318_v30, %v4979_v11  ;;  %v5120_v55 = vcombine.low %v4757_v3, %v4760_v59  ;;  %v4811_v2 = vcombine.low %v15430_v53, %v15393_v56 }
 0x4f6   :  { %11225 = vrot.lane.b32.xlu0 %v11224_v31, %s11863_s27  ;;  %11220 = vrot.lane.b32.xlu1 %v11219_v27, %s11877_s24  ;;  %v5012_v9 = vcombine.low %v15335_v52, %v5011_v17  ;;  %v15942_v18 = vcombine.low %v15247_v34, %v15250_v60 }
 0x4f7   :  { %v15442_v25 = vrot.slane %v5150_v19, %v13560_v28  ;;  %v11229_v51 = vpack.i.bf16 %v15437_v50, %v5098_v1  ;;  %v5127_v38 = vrot.slane %v5120_v55, %v13560_v28 }
 0x4f9   :  { %v5158_v36 = vcombine.low %v15390_v24, %v15442_v25  ;;  %v5128_v14 = vcombine.low %v15398_v13, %v5127_v38  ;;  %v5584_v13 = vld [vmem:[#allocation8 + $0x1e0] sm:$0xff] }
 0x4fa   :  { %11230 = vrot.lane.b32.xlu1 %v11229_v51, %s11873_s6  ;;  %v5692_v24 = vld [vmem:[#allocation8 + $0x540] sm:$0xff] }
 0x4fb   :  { %v11234_v4 = vpack.i.bf16 %v5012_v9, %v5128_v14  ;;  %v5696_v25 = vld [vmem:[#allocation8 + $0x560] sm:$0xff] }
 0x4fd   :  { %11235 = vrot.lane.b32.xlu0 %v11234_v4, %s11877_s24 }
 0x543   :  { %v11181_v30 = vpop.permute.xlu1 %11180 }
 0x544   :  { %v11183_v62 = vunpack.i.h.bf16 %v11181_v30  ;;  %v11182_v42 = vunpack.i.l.bf16 %v11181_v30 }
 0x545   :  { %v11186_v39 = vpop.permute.xlu0 %11185 }
 0x546   :  { %v11188_v22 = vunpack.i.h.bf16 %v11186_v39  ;;  %v11187_v23 = vunpack.i.l.bf16 %v11186_v39  ;;  %v5159_v28 = vsel %vm1445_vm0, %v4777_v6, %v11183_v62  ;;  %v5171_v44 = vsel %vm1445_vm0, %v5025_v63, %v11182_v42 }
 0x548   :  { %v5163_v29 = vsel %vm2024_vm4, %v5159_v28, %v11188_v22  ;;  %v5175_v57 = vsel %vm2024_vm4, %v5171_v44, %v11187_v23 }
 0x554   :  { %v11196_v10 = vpop.permute.xlu0 %11195 }
 0x555   :  { %v11191_v52 = vpop.permute.xlu1 %11190  ;;  %v11198_v43 = vunpack.i.h.bf16 %v11196_v10  ;;  %v11197_v11 = vunpack.i.l.bf16 %v11196_v10 }
 0x556   :  { %v11193_v54 = vunpack.i.h.bf16 %v11191_v52  ;;  %v11192_v48 = vunpack.i.l.bf16 %v11191_v52 }
 0x557   :  { %v5172_v17 = vsel %vm1445_vm0, %v5034_v0, %v11197_v11  ;;  %v5160_v32 = vsel %vm1445_vm0, %v15136_v46, %v11198_v43  ;;  %v5576_v43 = vld [vmem:[#allocation8 + $0x1a0] sm:$0xff] }
 0x558   :  { %v5179_v12 = vsel %vm2041_vm5, %v5175_v57, %v11192_v48  ;;  %v5167_v56 = vsel %vm2041_vm5, %v5163_v29, %v11193_v54  ;;  %v5712_v29 = vld [vmem:[#allocation8 + $0x5e0] sm:$0xff] }
 0x559   :  { %v11201_v33 = vpop.permute.xlu1 %11200  ;;  %5291 = vmatprep.mubr.f32.mxu0 %v5179_v12  ;;  %v5700_v57 = vld [vmem:[#allocation8 + $0x580] sm:$0xff] }
 0x55a   :  { %v11203_v40 = vunpack.i.h.bf16 %v11201_v33  ;;  %v11202_v63 = vunpack.i.l.bf16 %v11201_v33  ;;  %5292 = vmatmul.mubr.f32.vlgmr.msra.gmra.mxu0 %v5167_v56  ;;  %v5704_v12 = vld [vmem:[#allocation8 + $0x5a0] sm:$0xff] }
 0x55b   :  { %10769 = vmatpush3.msra.mxu0 %v15294_v26  ;;  %v5564_v56 = vld [vmem:[#allocation8 + $0x140] sm:$0xff] }
 0x55c   :  { %v11206_v61 = vpop.permute.xlu0 %11205  ;;  %v5176_v16 = vsel %vm2024_vm4, %v5172_v17, %v11202_v63  ;;  %v5164_v49 = vsel %vm2024_vm4, %v5160_v32, %v11203_v40  ;;  %10770 = vmatprep.subr.mxu0 %v5217_v47  ;;  %v5568_v33 = vld [vmem:[#allocation8 + $0x160] sm:$0xff]  ;;  %v10057_v63 = vcombine.high %v5692_v24, %v5696_v25 }
 0x55d   :  { %v11208_v5 = vunpack.i.h.bf16 %v11206_v61  ;;  %v11207_v37 = vunpack.i.l.bf16 %v11206_v61  ;;  %10771 = vmatpush3.msra.mxu0 %v5217_v47  ;;  %v10064_v47 = vcombine.low %v5700_v57, %v5704_v12  ;;  %v9929_v40 = vcombine.high %v5564_v56, %v5568_v33  ;;  %v5556_v17 = vld [vmem:[#allocation8 + $0x100] sm:$0xff] }
 0x55e   :  { %10772 = vmatprep.subr.mxu0 %v5216_v35  ;;  %v5560_v32 = vld [vmem:[#allocation8 + $0x120] sm:$0xff] }
 0x55f   :  { %v5180_v46 = vsel %vm2041_vm5, %v5176_v16, %v11207_v37  ;;  %v5168_v20 = vsel %vm2041_vm5, %v5164_v49, %v11208_v5  ;;  %10773 = vmatpush3.msra.mxu0 %v5216_v35  ;;  %v11211_v0 = vpop.permute.xlu1 %11210  ;;  %v5684_v35 = vld [vmem:[#allocation8 + $0x500] sm:$0xff]  ;;  %v9928_v16 = vcombine.low %v5564_v56, %v5568_v33  ;;  %v10056_v49 = vcombine.low %v5692_v24, %v5696_v25 }
 0x560   :  { %5296 = vmatprep.mubr.f32.mxu0 %v5180_v46  ;;  %10774 = vmatprep.subr.mxu0 %v5215_v45  ;;  %v11213_v31 = vunpack.i.h.bf16 %v11211_v0  ;;  %v11212_v27 = vunpack.i.l.bf16 %v11211_v0  ;;  %v5688_v61 = vld [vmem:[#allocation8 + $0x520] sm:$0xff]  ;;  %v9921_v5 = vcombine.high %v5556_v17, %v5560_v32 }
 0x561   :  { %5297 = vmatmul.mubr.f32.gmra.mxu0 %v5168_v20  ;;  %v11216_v26 = vpop.permute.xlu0 %11215  ;;  %v10049_v37 = vcombine.high %v5684_v35, %v5688_v61  ;;  %v5552_v46 = vld [vmem:[#allocation8 + $0xe0] sm:$0xff] }
 0x562   :  { %10775 = vmatpush3.msra.mxu0 %v5215_v45  ;;  %v11218_v3 = vunpack.i.h.bf16 %v11216_v26  ;;  %v11217_v6 = vunpack.i.l.bf16 %v11216_v26  ;;  %v5173_v1 = vsel %vm1445_vm0, %v5035_v8, %v11212_v27  ;;  %v5161_v59 = vsel %vm1445_vm0, %v4811_v2, %v11213_v31  ;;  %v5548_v45 = vld [vmem:[#allocation8 + $0xc0] sm:$0xff] }
 0x563   :  { %v5676_v20 = vld [vmem:[#allocation8 + $0x4c0] sm:$0xff]  ;;  %v9920_v26 = vcombine.low %v5556_v17, %v5560_v32  ;;  %v10048_v31 = vcombine.low %v5684_v35, %v5688_v61  ;;  %v9913_v27 = vcombine.high %v5548_v45, %v5552_v46 }
 0x564   :  { %v5177_v38 = vsel %vm2024_vm4, %v5173_v1, %v11217_v6  ;;  %v5165_v9 = vsel %vm2024_vm4, %v5161_v59, %v11218_v3  ;;  %v5680_v0 = vld [vmem:[#allocation8 + $0x4e0] sm:$0xff] }
 0x565   :  { %v10041_v3 = vcombine.high %v5676_v20, %v5680_v0  ;;  %v5540_v6 = vld [vmem:[#allocation8 + $0x80] sm:$0xff] }
 0x566   :  { %v5544_v1 = vld [vmem:[#allocation8 + $0xa0] sm:$0xff] }
 0x567   :  { %v5668_v59 = vld [vmem:[#allocation8 + $0x480] sm:$0xff] }
 0x568   :  { %v11226_v53 = vpop.permute.xlu0 %11225  ;;  %v11221_v19 = vpop.permute.xlu1 %11220  ;;  %v5632_v33 = vld [vmem:[#allocation8 + $0x360] sm:$0xff] }
 0x569   :  { %v11223_v55 = vunpack.i.h.bf16 %v11221_v19  ;;  %v11222_v51 = vunpack.i.l.bf16 %v11221_v19  ;;  %v11228_v14 = vunpack.i.h.bf16 %v11226_v53  ;;  %v11227_v4 = vunpack.i.l.bf16 %v11226_v53  ;;  %v5672_v53 = vld [vmem:[#allocation8 + $0x4a0] sm:$0xff] }
 0x56a   :  { %v9912_v19 = vcombine.low %v5548_v45, %v5552_v46  ;;  %v5756_v24 = vld [vmem:[#allocation8 + $0x740] sm:$0xff] }
 0x56b   :  { %v5181_v30 = vsel %vm2041_vm5, %v5177_v38, %v11222_v51  ;;  %v5169_v39 = vsel %vm2041_vm5, %v5165_v9, %v11223_v55  ;;  %v5174_v8 = vsel %vm1445_vm0, %v5044_v7, %v11227_v4  ;;  %v5162_v2 = vsel %vm1445_vm0, %v15348_v58, %v11228_v14  ;;  %v5580_v58 = vld [vmem:[#allocation8 + $0x1c0] sm:$0xff] }
 0x56c   :  { %v11231_v62 = vpop.permute.xlu1 %11230  ;;  %5301 = vmatprep.mubr.f32.mxu0 %v5181_v30  ;;  %v5708_v7 = vld [vmem:[#allocation8 + $0x5c0] sm:$0xff]  ;;  %v9944_v54 = vcombine.low %v5580_v58, %v5584_v13  ;;  %v9945_v48 = vcombine.high %v5580_v58, %v5584_v13  ;;  %v10040_v55 = vcombine.low %v5676_v20, %v5680_v0  ;;  %v9905_v51 = vcombine.high %v5540_v6, %v5544_v1 }
 0x56d   :  { %v11233_v41 = vunpack.i.h.bf16 %v11231_v62  ;;  %v11232_v15 = vunpack.i.l.bf16 %v11231_v62  ;;  %5302 = vmatmul.mubr.f32.gmra.mxu0 %v5169_v39  ;;  %v10072_v11 = vcombine.low %v5708_v7, %v5712_v29  ;;  %v10073_v34 = vcombine.high %v5708_v7, %v5712_v29  ;;  %v5532_v9 = vld [vmem:[#allocation8 + $0x40] sm:$0xff] }
 0x56e   :  { %7060 = vmatprep.subr.bf16.mxu1 %v9945_v48  ;;  %v10033_v38 = vcombine.high %v5668_v59, %v5672_v53  ;;  %v5536_v14 = vld [vmem:[#allocation8 + $0x60] sm:$0xff]  ;;  %v9904_v39 = vcombine.low %v5540_v6, %v5544_v1  ;;  %v10032_v62 = vcombine.low %v5668_v59, %v5672_v53 }
 0x56f   :  { %v11236_v42 = vpop.permute.xlu0 %11235  ;;  %v5178_v22 = vsel %vm2024_vm4, %v5174_v8, %v11232_v15  ;;  %v5166_v23 = vsel %vm2024_vm4, %v5162_v2, %v11233_v41  ;;  %7101 = vmatprep.subr.bf16.mxu0 %v10073_v34  ;;  %7061 = vmatpush1.bf16.msra.mxu1 %v9944_v54  ;;  %v5660_v4 = vld [vmem:[#allocation8 + $0x440] sm:$0xff]  ;;  %v9897_v41 = vcombine.high %v5532_v9, %v5536_v14 }
 0x570   :  { %v11238_v28 = vunpack.i.h.bf16 %v11236_v42  ;;  %v11237_v10 = vunpack.i.l.bf16 %v11236_v42  ;;  %v5664_v30 = vld [vmem:[#allocation8 + $0x460] sm:$0xff] }
 0x571   :  { %v10025_v15 = vcombine.high %v5660_v4, %v5664_v30  ;;  %v5524_v8 = vld [vmem:[#allocation8] sm:$0xff] }
 0x572   :  { %v5182_v44 = vsel %vm2041_vm5, %v5178_v22, %v11237_v10  ;;  %v5170_v52 = vsel %vm2041_vm5, %v5166_v23, %v11238_v28  ;;  %v5528_v2 = vld [vmem:[#allocation8 + $0x20] sm:$0xff]  ;;  %v9896_v23 = vcombine.low %v5532_v9, %v5536_v14  ;;  %v10024_v28 = vcombine.low %v5660_v4, %v5664_v30 }
 0x573   :  { %5306 = vmatprep.mubr.f32.mxu0 %v5182_v44  ;;  %v5652_v42 = vld [vmem:[#allocation8 + $0x400] sm:$0xff]  ;;  %v9889_v10 = vcombine.high %v5524_v8, %v5528_v2  ;;  %v9888_v7 = vcombine.low %v5524_v8, %v5528_v2 }
 0x574   :  { %5307 = vmatmul.mubr.f32.gmra.mxu0 %v5170_v52  ;;  %v5656_v22 = vld [vmem:[#allocation8 + $0x420] sm:$0xff] }
 0x575   :  { %10776 = vmatprep.mubr.msk.f32.mxu0 %vm1445_vm0, %v15260_v21  ;;  %v5572_v21 = vld [vmem:[#allocation8 + $0x180] sm:$0xff]  ;;  %v10017_v44 = vcombine.high %v5652_v42, %v5656_v22  ;;  %v10016_v54 = vcombine.low %v5652_v42, %v5656_v22 }
 0x576   :  { %v9937_v60 = vcombine.high %v5572_v21, %v5576_v43  ;;  %v5644_v52 = vld [vmem:[#allocation8 + $0x3c0] sm:$0xff] }
 0x577   :  { %v5772_v58 = vld [vmem:[#allocation8 + $0x7c0] sm:$0xff] }
 0x578   :  { %10777 = vmatmul.mubr.msk.f32.vlgmr.msra.gmra.mxu0 %vm1445_vm0, %v15942_v18  ;;  %7062 = vmatprep.subr.bf16.mxu1 %v9937_v60  ;;  %v5648_v18 = vld [vmem:[#allocation8 + $0x3e0] sm:$0xff] }
 0x579   :  { %10779 = vmatprep.mubr.msk.f32.mxu0 %vm1445_vm0, %v15437_v50  ;;  %v10065_v50 = vcombine.high %v5700_v57, %v5704_v12  ;;  %7102 = vmatpush1.bf16.msra.mxu0 %v10072_v11  ;;  %v5776_v13 = vld [vmem:[#allocation8 + $0x7e0] sm:$0xff]  ;;  %v10009_v48 = vcombine.high %v5644_v52, %v5648_v18  ;;  %v10008_v60 = vcombine.low %v5644_v52, %v5648_v18 }
 0x57a   :  { %v10137_v29 = vcombine.high %v5772_v58, %v5776_v13  ;;  %v5764_v11 = vld [vmem:[#allocation8 + $0x780] sm:$0xff]  ;;  %v10136_v57 = vcombine.low %v5772_v58, %v5776_v13 }
 0x57b   :  { %7103 = vmatprep.subr.bf16.mxu0 %v10065_v50  ;;  %v5768_v34 = vld [vmem:[#allocation8 + $0x7a0] sm:$0xff] }
 0x57c   :  { %10780 = vmatmul.mubr.msk.f32.gmra.mxu0 %vm1445_vm0, %v5158_v36  ;;  %v9936_v36 = vcombine.low %v5572_v21, %v5576_v43  ;;  %v5636_v21 = vld [vmem:[#allocation8 + $0x380] sm:$0xff]  ;;  %v10129_v56 = vcombine.high %v5764_v11, %v5768_v34 }
 0x57d   :  { %7104 = vmatpush1.bf16.msra.mxu0 %v10064_v47  ;;  %v5640_v43 = vld [vmem:[#allocation8 + $0x3a0] sm:$0xff]  ;;  %v10128_v47 = vcombine.low %v5764_v11, %v5768_v34 }
 0x57e   :  { %7063 = vmatpush1.bf16.msra.mxu1 %v9936_v36  ;;  %7105 = vmatprep.subr.bf16.mxu0 %v10057_v63  ;;  %v10001_v12 = vcombine.high %v5636_v21, %v5640_v43  ;;  %v5628_v50 = vld [vmem:[#allocation8 + $0x340] sm:$0xff]  ;;  %v10000_v36 = vcombine.low %v5636_v21, %v5640_v43 }
 0x57f   :  { %7064 = vmatprep.subr.bf16.mxu1 %v9929_v40  ;;  %v5760_v25 = vld [vmem:[#allocation8 + $0x760] sm:$0xff]  ;;  %v9993_v40 = vcombine.high %v5628_v50, %v5632_v33 }
 0x580   :  { %v10121_v63 = vcombine.high %v5756_v24, %v5760_v25  ;;  %v5620_v17 = vld [vmem:[#allocation8 + $0x300] sm:$0xff] }
 0x581   :  { %7106 = vmatpush1.bf16.msra.mxu0 %v10056_v49  ;;  %v5624_v32 = vld [vmem:[#allocation8 + $0x320] sm:$0xff]  ;;  %v10120_v49 = vcombine.low %v5756_v24, %v5760_v25 }
 0x582   :  { %7065 = vmatpush1.bf16.msra.mxu1 %v9928_v16  ;;  %7107 = vmatprep.subr.bf16.mxu0 %v10049_v37  ;;  %v5748_v35 = vld [vmem:[#allocation8 + $0x700] sm:$0xff]  ;;  %v9992_v16 = vcombine.low %v5628_v50, %v5632_v33 }
 0x583   :  { %7066 = vmatprep.subr.bf16.mxu1 %v9921_v5  ;;  %v5752_v61 = vld [vmem:[#allocation8 + $0x720] sm:$0xff]  ;;  %v9985_v5 = vcombine.high %v5620_v17, %v5624_v32 }
 0x584   :  { %v10113_v37 = vcombine.high %v5748_v35, %v5752_v61  ;;  %v5612_v45 = vld [vmem:[#allocation8 + $0x2c0] sm:$0xff] }
 0x585   :  { %7108 = vmatpush1.bf16.msra.mxu0 %v10048_v31  ;;  %v5616_v46 = vld [vmem:[#allocation8 + $0x2e0] sm:$0xff]  ;;  %v10112_v31 = vcombine.low %v5748_v35, %v5752_v61 }
 0x586   :  { %7067 = vmatpush1.bf16.msra.mxu1 %v9920_v26  ;;  %7109 = vmatprep.subr.bf16.mxu0 %v10041_v3  ;;  %v5740_v20 = vld [vmem:[#allocation8 + $0x6c0] sm:$0xff]  ;;  %v9984_v26 = vcombine.low %v5620_v17, %v5624_v32  ;;  %v9976_v6 = vcombine.low %v5612_v45, %v5616_v46 }
 0x587   :  { %7068 = vmatprep.subr.bf16.mxu1 %v9913_v27  ;;  %v5744_v0 = vld [vmem:[#allocation8 + $0x6e0] sm:$0xff]  ;;  %v9977_v27 = vcombine.high %v5612_v45, %v5616_v46 }
 0x588   :  { %v10105_v3 = vcombine.high %v5740_v20, %v5744_v0  ;;  %v10104_v1 = vcombine.low %v5740_v20, %v5744_v0 }
 0x589   :  { %7110 = vmatpush1.bf16.msra.mxu0 %v10040_v55 }
 0x58a   :  { %7069 = vmatpush1.bf16.msra.mxu1 %v9912_v19  ;;  %7111 = vmatprep.subr.bf16.mxu0 %v10033_v38 }
 0x58b   :  { %7070 = vmatprep.subr.bf16.mxu1 %v9905_v51 }
 0x58d   :  { %7112 = vmatpush1.bf16.msra.mxu0 %v10032_v62 }
 0x58e   :  { %7071 = vmatpush1.bf16.msra.mxu1 %v9904_v39  ;;  %7113 = vmatprep.subr.bf16.mxu0 %v10025_v15  ;;  %v9886_v39 = vld [vmem:[#allocation5 + $0x3] ss:$0 sm:$0xff]  ;;  %v9887_v15 = vld [vmem:[#allocation7 + $0x3] ss:$0 sm:$0xff] }
 0x58f   :  { %7072 = vmatprep.subr.bf16.mxu1 %v9897_v41 }
 0x591   :  { %7114 = vmatpush1.bf16.msra.mxu0 %v10024_v28 }
 0x592   :  { %7073 = vmatpush1.bf16.msra.mxu1 %v9896_v23  ;;  %7115 = vmatprep.subr.bf16.mxu0 %v10017_v44 }
 0x593   :  { %7074 = vmatprep.subr.bf16.mxu1 %v9889_v10 }
 0x595   :  { %7116 = vmatpush1.bf16.msra.mxu0 %v10016_v54 }
 0x596   :  { %7075 = vmatpush1.bf16.msra.mxu1 %v9888_v7  ;;  %7117 = vmatprep.subr.bf16.mxu0 %v10137_v29 }
 0x597   :  { %7076 = vmatprep.subr.bf16.mxu1 %v10009_v48 }
 0x599   :  { %7118 = vmatpush2.bf16.msra.mxu0 %v10136_v57 }
 0x59a   :  { %7077 = vmatpush2.bf16.msra.mxu1 %v10008_v60  ;;  %7119 = vmatprep.subr.bf16.mxu0 %v10129_v56 }
 0x59b   :  { %7078 = vmatprep.subr.bf16.mxu1 %v10001_v12 }
 0x59d   :  { %7120 = vmatpush2.bf16.msra.mxu0 %v10128_v47 }
 0x59e   :  { %7079 = vmatpush2.bf16.msra.mxu1 %v10000_v36  ;;  %7121 = vmatprep.subr.bf16.mxu0 %v10121_v63 }
 0x59f   :  { %7080 = vmatprep.subr.bf16.mxu1 %v9993_v40 }
 0x5a1   :  { %7122 = vmatpush2.bf16.msra.mxu0 %v10120_v49 }
 0x5a2   :  { %7081 = vmatpush2.bf16.msra.mxu1 %v9992_v16  ;;  %7123 = vmatprep.subr.bf16.mxu0 %v10113_v37 }
 0x5a3   :  { %7082 = vmatprep.subr.bf16.mxu1 %v9985_v5 }
 0x5a5   :  { %7124 = vmatpush2.bf16.msra.mxu0 %v10112_v31 }
 0x5a6   :  { %7083 = vmatpush2.bf16.msra.mxu1 %v9984_v26  ;;  %7125 = vmatprep.subr.bf16.mxu0 %v10105_v3 }
 0x5a7   :  { %7084 = vmatprep.subr.bf16.mxu1 %v9977_v27 }
 0x5a9   :  { %7126 = vmatpush2.bf16.msra.mxu0 %v10104_v1 }
 0x5aa   :  { %7085 = vmatpush2.bf16.msra.mxu1 %v9976_v6 }
 0x61a   :  { %v10637_v59 = vpop.f32.mrf.mxu0 }
 0x61c   :  { %v10638_v53 = vpop.f32.mrf.mxu0 }
 0x61d   :  { %v10639_v62 = vadd.f32 %v10638_v53, %v10637_v59 }
 0x621   :  { %v10640_v19 = vpop.f32.mrf.mxu0 }
 0x623   :  { %v10641_v55 = vpop.f32.mrf.mxu0 }
 0x624   :  { %v10642_v4 = vadd.f32 %v10641_v55, %v10640_v19 }
 0x62d   :  { %v10643_v51 = vpop.f32.mrf.mxu0 }
 0x62f   :  { %v10644_v38 = vpop.f32.mrf.mxu0 }
 0x630   :  { %v10645_v28 = vadd.f32 %v10644_v38, %v10643_v51  ;;  %v5604_v38 = vld [vmem:[#allocation8 + $0x280] sm:$0xff] }
 0x634   :  { %v10646_v9 = vpop.f32.mrf.mxu0 }
 0x636   :  { %v10647_v14 = vpop.f32.mrf.mxu0 }
 0x637   :  { %v10648_v2 = vadd.f32 %v10647_v14, %v10646_v9  ;;  %v5608_v9 = vld [vmem:[#allocation8 + $0x2a0] sm:$0xff] }
 0x638   :  { %v10778_v30 = vpop.f32.mrf.mxu0 }
 0x639   :  { %v5384_v41 = vadd.f32 %v10778_v30, %v10642_v4 }
 0x63a   :  { %v5378_v8 = vpop.f32.mrf.mxu0 }
 0x63b   :  { %v5403_v42 = vmul.f32 %v9886_v39, %v5384_v41  ;;  %v5379_v22 = vadd.f32 %v10639_v62, %v5378_v8  ;;  %v5732_v62 = vld [vmem:[#allocation8 + $0x680] sm:$0xff] }
 0x63c   :  { %v10781_v23 = vpop.f32.mrf.mxu0  ;;  %v5736_v41 = vld [vmem:[#allocation8 + $0x6a0] sm:$0xff] }
 0x63d   :  { %v5412_v10 = vadd.f32 %v9887_v15, %v5403_v42  ;;  %v5402_v44 = vmul.f32 %v9886_v39, %v5379_v22  ;;  %v5394_v52 = vadd.f32 %v10781_v23, %v10648_v2  ;;  %v5596_v22 = vld [vmem:[#allocation8 + $0x240] sm:$0xff] }
 0x63e   :  { %v5388_v18 = vpop.f32.mrf.mxu0  ;;  %v5600_v23 = vld [vmem:[#allocation8 + $0x260] sm:$0xff] }
 0x63f   :  { %v15512_v58 = vmax.f32 %v5412_v10, 0.0  ;;  %v5411_v13 = vadd.f32 %v9887_v15, %v5402_v44  ;;  %v5405_v7 = vmul.f32 %v9886_v39, %v5394_v52  ;;  %v5389_v54 = vadd.f32 %v10645_v28, %v5388_v18  ;;  %v5724_v28 = vld [vmem:[#allocation8 + $0x640] sm:$0xff] }
 0x640   :  { %v9968_v52 = vcombine.low %v5604_v38, %v5608_v9  ;;  %v9969_v18 = vcombine.high %v5604_v38, %v5608_v9 }
 0x641   :  { %v15514_v48 = vmax.f32 %v5411_v13, 0.0  ;;  %v5414_v29 = vadd.f32 %v9887_v15, %v5405_v7  ;;  %v5404_v21 = vmul.f32 %v9886_v39, %v5389_v54  ;;  %v5469_v43 = vrot.slane %v15512_v58, 1  ;;  %v5728_v13 = vld [vmem:[#allocation8 + $0x660] sm:$0xff] }
 0x642   :  { %v5490_v11 = vrot.slane %v15512_v58, 5  ;;  %v5474_v57 = vrot.slane %v15512_v58, 2  ;;  %v5496_v12 = vrot.slane %v15512_v58, 6  ;;  %v5480_v24 = vrot.slane %v15512_v58, 3  ;;  %v5588_v7 = vld [vmem:[#allocation8 + $0x200] sm:$0xff]  ;;  %7086 = vmatprep.subr.bf16.mxu1 %v9969_v18 }
 0x643   :  { %v15518_v34 = vmax.f32 %v5414_v29, 0.0  ;;  %v5413_v60 = vadd.f32 %v9887_v15, %v5404_v21  ;;  %v5425_v56 = vrot.slane %v15514_v48, 1  ;;  %v5446_v50 = vrot.slane %v15514_v48, 5  ;;  %v5592_v54 = vld [vmem:[#allocation8 + $0x220] sm:$0xff]  ;;  %7087 = vmatpush2.bf16.msra.mxu1 %v9968_v52 }
 0x644   :  { %v5430_v33 = vrot.slane %v15514_v48, 2  ;;  %v5452_v47 = vrot.slane %v15514_v48, 6  ;;  %v5436_v40 = vrot.slane %v15514_v48, 3  ;;  %v5458_v35 = vrot.slane %v15514_v48, 7 }
 0x645   :  { %v15526_v25 = vmax.f32 %v5413_v60, 0.0  ;;  %v5491_v36 = vrot.slane %v15518_v34, 4  ;;  %v5470_v63 = vsel %vm5422_vm14, %v15518_v34, %v5469_v43  ;;  %v5475_v17 = vrot.slane %v15518_v34, 1  ;;  %v15574_v60 = vld [vmem:[#allocation8 + $0x1c8] sm:$0xff] }
 0x646   :  { %v5497_v32 = vrot.slane %v15518_v34, 5  ;;  %v5481_v5 = vrot.slane %v15518_v34, 2  ;;  %v5502_v46 = vrot.slane %v15512_v58, 7  ;;  %v5503_v20 = vrot.slane %v15518_v34, 6 }
 0x647   :  { %v5426_v61 = vsel %vm5422_vm14, %v15526_v25, %v5425_v56  ;;  %v5447_v16 = vrot.slane %v15526_v25, 4  ;;  %v5431_v49 = vrot.slane %v15526_v25, 1  ;;  %v5453_v45 = vrot.slane %v15526_v25, 5  ;;  %v5720_v56 = vld [vmem:[#allocation8 + $0x620] sm:$0xff] }
 0x648   :  { %v11239_v37 = vpack.i.bf16 %v5470_v63, %v5426_v61  ;;  %v5492_v26 = vsel %vm5422_vm14, %v5491_v36, %v5490_v11  ;;  %v5437_v27 = vrot.slane %v15526_v25, 2  ;;  %v5476_v6 = vsel %vm5422_vm14, %v5475_v17, %v5474_v57  ;;  %v15576_v57 = vld [vmem:[#allocation8 + $0x1e8] sm:$0xff] }
 0x649   :  { %v5448_v0 = vsel %vm5422_vm14, %v5447_v16, %v5446_v50  ;;  %v5432_v31 = vsel %vm5422_vm14, %v5431_v49, %v5430_v33  ;;  %v5454_v1 = vsel %vm5422_vm14, %v5453_v45, %v5452_v47  ;;  %v5459_v59 = vrot.slane %v15526_v25, 6  ;;  %v15580_v50 = vld [vmem:[#allocation8 + $0x5c8] sm:$0xff] }
 0x64a   :  { %11240 = vrot.lane.b32.xlu0 %v11239_v37, %s11863_s27  ;;  %v11244_v3 = vpack.i.bf16 %v5492_v26, %v5448_v0  ;;  %v11254_v53 = vpack.i.bf16 %v5476_v6, %v5432_v31  ;;  %v5498_v19 = vsel %vm5422_vm14, %v5497_v32, %v5496_v12  ;;  %v5482_v55 = vsel %vm5422_vm14, %v5481_v5, %v5480_v24  ;;  %v15582_v33 = vld [vmem:[#allocation8 + $0x5e8] sm:$0xff] }
 0x64b   :  { %v5421_v51 = vrot.slane %v15526_v25, 7  ;;  %v11249_v14 = vpack.i.bf16 %v5498_v19, %v5454_v1  ;;  %v5438_v4 = vsel %vm5422_vm14, %v5437_v27, %v5436_v40  ;;  %v5466_v30 = vrot.slane %v15518_v34, 7 }
 0x64c   :  { %11245 = vrot.lane.b32.xlu1 %v11244_v3, %s11863_s27  ;;  %v5443_v39 = vrot.slane %v15526_v25, 3  ;;  %v5460_v15 = vsel %vm5422_vm14, %v5459_v59, %v5458_v35  ;;  %v5486_v2 = vrot.slane %v15512_v58, 4  ;;  %v5487_v42 = vrot.slane %v15518_v34, 3  ;;  %v5716_v34 = vld [vmem:[#allocation8 + $0x600] sm:$0xff] }
 0x64d   :  { %v15562_v8 = vsel %vm5422_vm14, %v5421_v51, %v15514_v48  ;;  %v15569_v10 = vsel %vm5422_vm14, %v5466_v30, %v15512_v58  ;;  %v5442_v44 = vrot.slane %v15514_v48, 4  ;;  %v5504_v29 = vsel %vm5422_vm14, %v5503_v20, %v5502_v46 }
 0x64e   :  { %11255 = vrot.lane.b32.xlu0 %v11254_v53, %s11873_s6  ;;  %v5488_v21 = vsel %vm5422_vm14, %v5487_v42, %v5486_v2  ;;  %v10096_v43 = vcombine.low %v5732_v62, %v5736_v41  ;;  %v10097_v11 = vcombine.high %v5732_v62, %v5736_v41  ;;  %v11264_v58 = vpack.i.bf16 %v5482_v55, %v5438_v4 }
 0x64f   :  { %v5444_v48 = vsel %vm5422_vm14, %v5443_v39, %v5442_v44  ;;  %v9961_v12 = vcombine.high %v5596_v22, %v5600_v23  ;;  %v11259_v24 = vpack.i.bf16 %v5504_v29, %v5460_v15  ;;  %v9960_v25 = vcombine.low %v5596_v22, %v5600_v23  ;;  %v5705_v44 = vld [vmem:[#allocation8 + $0x5a8] sm:$0xff] }
 0x650   :  { %11250 = vrot.lane.b32.xlu1 %v11249_v14, %s11873_s6  ;;  %7127 = vmatprep.subr.bf16.mxu0 %v10097_v11  ;;  %v10089_v36 = vcombine.high %v5724_v28, %v5728_v13  ;;  %v10088_v47 = vcombine.low %v5724_v28, %v5728_v13  ;;  %v9953_v40 = vcombine.high %v5588_v7, %v5592_v54  ;;  %v5577_v28 = vld [vmem:[#allocation8 + $0x1a8] sm:$0xff] }
 0x651   :  { %7128 = vmatpush2.bf16.msra.mxu0 %v10096_v43  ;;  %v9946_v63 = vcombine.low %v15574_v60, %v15576_v57  ;;  %7088 = vmatprep.subr.bf16.mxu1 %v9961_v12  ;;  %v10081_v17 = vcombine.high %v5716_v34, %v5720_v56  ;;  %v10074_v32 = vcombine.low %v15580_v50, %v15582_v33  ;;  %v5569_v43 = vld [vmem:[#allocation8 + $0x168] sm:$0xff] }
 0x652   :  { %11265 = vrot.lane.b32.xlu0 %v11264_v58, %s11877_s24  ;;  %7129 = vmatprep.subr.bf16.mxu0 %v10089_v36  ;;  %v9952_v35 = vcombine.low %v5588_v7, %v5592_v54  ;;  %v10080_v61 = vcombine.low %v5716_v34, %v5720_v56  ;;  %v9947_v16 = vcombine.high %v15574_v60, %v15576_v57  ;;  %v5565_v54 = vld [vmem:[#allocation8 + $0x148] sm:$0xff] }
 0x653   :  { %7089 = vmatpush2.bf16.msra.mxu1 %v9960_v25  ;;  %v10075_v49 = vcombine.high %v15580_v50, %v15582_v33  ;;  %v5693_v11 = vld [vmem:[#allocation8 + $0x548] sm:$0xff]  ;;  %v9931_v12 = vcombine.high %v5565_v54, %v5569_v43  ;;  %v9930_v36 = vcombine.low %v5565_v54, %v5569_v43 }
 0x654   :  { %11260 = vrot.lane.b32.xlu1 %v11259_v24, %s11877_s24  ;;  %7090 = vmatprep.subr.bf16.mxu1 %v9953_v40  ;;  %v5697_v34 = vld [vmem:[#allocation8 + $0x568] sm:$0xff] }
 0x655   :  { %7130 = vmatpush2.bf16.msra.mxu0 %v10088_v47  ;;  %v10059_v56 = vcombine.high %v5693_v11, %v5697_v34  ;;  %v5557_v50 = vld [vmem:[#allocation8 + $0x108] sm:$0xff]  ;;  %v10058_v60 = vcombine.low %v5693_v11, %v5697_v34 }
 0x656   :  { %7131 = vmatprep.subr.bf16.mxu0 %v10081_v17  ;;  %v5561_v33 = vld [vmem:[#allocation8 + $0x128] sm:$0xff] }
 0x657   :  { %7091 = vmatpush2.bf16.msra.mxu1 %v9952_v35  ;;  %v5685_v24 = vld [vmem:[#allocation8 + $0x508] sm:$0xff]  ;;  %v9923_v57 = vcombine.high %v5557_v50, %v5561_v33  ;;  %v9922_v35 = vcombine.low %v5557_v50, %v5561_v33 }
 0x658   :  { %7142 = vmatprep.subr.bf16.mxu1 %v9947_v16  ;;  %v5689_v25 = vld [vmem:[#allocation8 + $0x528] sm:$0xff] }
 0x659   :  { %7132 = vmatpush2.bf16.msra.mxu0 %v10080_v61  ;;  %v10051_v47 = vcombine.high %v5685_v24, %v5689_v25  ;;  %v5549_v40 = vld [vmem:[#allocation8 + $0xc8] sm:$0xff]  ;;  %v10050_v61 = vcombine.low %v5685_v24, %v5689_v25 }
 0x65a   :  { %7183 = vmatprep.subr.bf16.mxu0 %v10075_v49  ;;  %v5677_v17 = vld [vmem:[#allocation8 + $0x4c8] sm:$0xff] }
 0x65b   :  { %v5765_v54 = vld [vmem:[#allocation8 + $0x788] sm:$0xff] }
 0x6bc   :  { %v11241_v5 = vpop.permute.xlu0 %11240 }
 0x6bd   :  { %v11243_v46 = vunpack.i.h.bf16 %v11241_v5  ;;  %v11242_v20 = vunpack.i.l.bf16 %v11241_v5  ;;  %v5541_v5 = vld [vmem:[#allocation8 + $0x88] sm:$0xff] }
 0x6be   :  { %v11246_v37 = vpop.permute.xlu1 %11245 }
 0x6bf   :  { %v11248_v0 = vunpack.i.h.bf16 %v11246_v37  ;;  %v11247_v26 = vunpack.i.l.bf16 %v11246_v37  ;;  %v5514_v55 = vsel %vm1445_vm0, %v15569_v10, %v11243_v46  ;;  %v5508_v51 = vsel %vm1445_vm0, %v15562_v8, %v11242_v20  ;;  %v5573_v8 = vld [vmem:[#allocation8 + $0x188] sm:$0xff] }
 0x6c0   :  { %v11256_v45 = vpop.permute.xlu0 %11255  ;;  %v5701_v10 = vld [vmem:[#allocation8 + $0x588] sm:$0xff]  ;;  %v9939_v29 = vcombine.high %v5573_v8, %v5577_v28  ;;  %v9938_v58 = vcombine.low %v5573_v8, %v5577_v28 }
 0x6c1   :  { %v11258_v27 = vunpack.i.h.bf16 %v11256_v45  ;;  %v11257_v3 = vunpack.i.l.bf16 %v11256_v45  ;;  %v5517_v38 = vsel %vm1445_vm0, %v5488_v21, %v11248_v0  ;;  %v5511_v9 = vsel %vm1445_vm0, %v5444_v48, %v11247_v26  ;;  %v5545_v37 = vld [vmem:[#allocation8 + $0xa8] sm:$0xff] }
 0x6c2   :  { %v11251_v31 = vpop.permute.xlu1 %11250  ;;  %v10067_v21 = vcombine.high %v5701_v10, %v5705_v44  ;;  %v10066_v48 = vcombine.low %v5701_v10, %v5705_v44  ;;  %v5669_v45 = vld [vmem:[#allocation8 + $0x488] sm:$0xff]  ;;  %v9907_v26 = vcombine.high %v5541_v5, %v5545_v37  ;;  %vm9775_vm0 = vcmask 1041408  }
 0x6c3   :  { %v11253_v6 = vunpack.i.h.bf16 %v11251_v31  ;;  %v11252_v1 = vunpack.i.l.bf16 %v11251_v31  ;;  %v5509_v4 = vsel %vm2024_vm4, %v5508_v51, %v11257_v3  ;;  %v5515_v30 = vsel %vm2024_vm4, %v5514_v55, %v11258_v27  ;;  %v5673_v46 = vld [vmem:[#allocation8 + $0x4a8] sm:$0xff] }
 0x6c4   :  { %v11266_v59 = vpop.permute.xlu0 %11265  ;;  %v10035_v31 = vcombine.high %v5669_v45, %v5673_v46  ;;  %v5533_v27 = vld [vmem:[#allocation8 + $0x48] sm:$0xff] }
 0x6c5   :  { %v11268_v53 = vunpack.i.h.bf16 %v11266_v59  ;;  %v11267_v19 = vunpack.i.l.bf16 %v11266_v59  ;;  %v5512_v41 = vsel %vm2024_vm4, %v5511_v9, %v11252_v1  ;;  %v5518_v15 = vsel %vm2024_vm4, %v5517_v38, %v11253_v6  ;;  %v5537_v3 = vld [vmem:[#allocation8 + $0x68] sm:$0xff] }
 0x6c6   :  { %v11261_v14 = vpop.permute.xlu1 %11260  ;;  %v5661_v6 = vld [vmem:[#allocation8 + $0x448] sm:$0xff]  ;;  %v9906_v59 = vcombine.low %v5541_v5, %v5545_v37 }
 0x6c7   :  { %v11263_v39 = vunpack.i.h.bf16 %v11261_v14  ;;  %v11262_v62 = vunpack.i.l.bf16 %v11261_v14  ;;  %v5510_v2 = vsel %vm2041_vm5, %v5509_v4, %v11267_v19  ;;  %v5516_v42 = vsel %vm2041_vm5, %v5515_v30, %v11268_v53  ;;  %v5665_v1 = vld [vmem:[#allocation8 + $0x468] sm:$0xff] }
 0x6c8   :  { %v15612_v13 = vpack.c.bf16 %v5510_v2, %v5510_v2  ;;  %v15614_v7 = vpack.c.bf16 %v5516_v42, %v5516_v42  ;;  %v10034_v53 = vcombine.low %v5669_v45, %v5673_v46  ;;  %v9899_v19 = vcombine.high %v5533_v27, %v5537_v3  ;;  %v5525_v51 = vld [vmem:[#allocation8 + $0x8] sm:$0xff] }
 0x6c9   :  { %v5513_v22 = vsel %vm2041_vm5, %v5512_v41, %v11262_v62  ;;  %v5519_v23 = vsel %vm2041_vm5, %v5518_v15, %v11263_v39  ;;  %v10027_v55 = vcombine.high %v5661_v6, %v5665_v1  ;;  %v5529_v38 = vld [vmem:[#allocation8 + $0x28] sm:$0xff]  ;;  %v9898_v4 = vcombine.low %v5533_v27, %v5537_v3 }
 0x6ca   :  { %v15608_v52 = vpack.c.bf16 %v5513_v22, %v5513_v22  ;;  %v15610_v18 = vpack.c.bf16 %v5519_v23, %v5519_v23  ;;  %v5653_v9 = vld [vmem:[#allocation8 + $0x408] sm:$0xff]  ;;  %v10026_v30 = vcombine.low %v5661_v6, %v5665_v1  ;;  %v9891_v39 = vcombine.high %v5525_v51, %v5529_v38 }
 0x6cb   :  { %v5657_v14 = vld [vmem:[#allocation8 + $0x428] sm:$0xff]  ;;  %v9890_v8 = vcombine.low %v5525_v51, %v5529_v38 }
 0x6cc   :  { %7092 = vmatprep.mubr.bf16.mxu1 %v15608_v52  ;;  %7133 = vmatprep.mubr.bf16.mxu0 %v15610_v18  ;;  %v10019_v62 = vcombine.high %v5653_v9, %v5657_v14  ;;  %v5645_v41 = vld [vmem:[#allocation8 + $0x3c8] sm:$0xff]  ;;  %v10018_v22 = vcombine.low %v5653_v9, %v5657_v14 }
 0x6cd   :  { %7093 = vmatmul.mubr.bf16.vlgmr.msra.gmra.mxu1 %v15612_v13  ;;  %7134 = vmatmul.mubr.bf16.vlgmr.msra.gmra.mxu0 %v15614_v7  ;;  %v5649_v15 = vld [vmem:[#allocation8 + $0x3e8] sm:$0xff] }
 0x6ce   :  { %7143 = vmatpush1.bf16.msra.mxu1 %v9946_v63  ;;  %7184 = vmatpush1.bf16.msra.mxu0 %v10074_v32  ;;  %v5553_v63 = vld [vmem:[#allocation8 + $0xe8] sm:$0xff]  ;;  %v10011_v23 = vcombine.high %v5645_v41, %v5649_v15 }
 0x6cf   :  { %7174 = vmatprep.mubr.bf16.mxu1 %v15608_v52  ;;  %7215 = vmatprep.mubr.bf16.mxu0 %v15610_v18  ;;  %v5681_v32 = vld [vmem:[#allocation8 + $0x4e8] sm:$0xff]  ;;  %v9915_v16 = vcombine.high %v5549_v40, %v5553_v63  ;;  %v9914_v20 = vcombine.low %v5549_v40, %v5553_v63 }
 0x6d0   :  { %7144 = vmatprep.subr.bf16.mxu1 %v9939_v29  ;;  %7185 = vmatprep.subr.bf16.mxu0 %v10067_v21  ;;  %v10043_v49 = vcombine.high %v5677_v17, %v5681_v32  ;;  %v10042_v0 = vcombine.low %v5677_v17, %v5681_v32  ;;  %v5773_v2 = vld [vmem:[#allocation8 + $0x7c8] sm:$0xff]  ;;  %v10010_v21 = vcombine.low %v5645_v41, %v5649_v15 }
 0x6d1   :  { %v5777_v42 = vld [vmem:[#allocation8 + $0x7e8] sm:$0xff] }
 0x6d2   :  { %7145 = vmatpush1.bf16.msra.mxu1 %v9938_v58  ;;  %7186 = vmatpush1.bf16.msra.mxu0 %v10066_v48  ;;  %v10139_v28 = vcombine.high %v5773_v2, %v5777_v42  ;;  %v5637_v10 = vld [vmem:[#allocation8 + $0x388] sm:$0xff]  ;;  %v10138_v43 = vcombine.low %v5773_v2, %v5777_v42 }
 0x6d3   :  { %7146 = vmatprep.subr.bf16.mxu1 %v9931_v12  ;;  %7187 = vmatprep.subr.bf16.mxu0 %v10059_v56  ;;  %v5641_v44 = vld [vmem:[#allocation8 + $0x3a8] sm:$0xff] }
 0x6d4   :  { %v5769_v29 = vld [vmem:[#allocation8 + $0x7a8] sm:$0xff]  ;;  %v10003_v11 = vcombine.high %v5637_v10, %v5641_v44  ;;  %v10002_v50 = vcombine.low %v5637_v10, %v5641_v44 }
 0x6d5   :  { %v10131_v34 = vcombine.high %v5765_v54, %v5769_v29  ;;  %v5629_v58 = vld [vmem:[#allocation8 + $0x348] sm:$0xff]  ;;  %v10130_v33 = vcombine.low %v5765_v54, %v5769_v29 }
 0x6d6   :  { %7147 = vmatpush1.bf16.msra.mxu1 %v9930_v36  ;;  %7188 = vmatpush1.bf16.msra.mxu0 %v10058_v60  ;;  %v5633_v48 = vld [vmem:[#allocation8 + $0x368] sm:$0xff] }
 0x6d7   :  { %7148 = vmatprep.subr.bf16.mxu1 %v9923_v57  ;;  %7189 = vmatprep.subr.bf16.mxu0 %v10051_v47  ;;  %v5757_v12 = vld [vmem:[#allocation8 + $0x748] sm:$0xff]  ;;  %v9995_v24 = vcombine.high %v5629_v58, %v5633_v48  ;;  %v9994_v40 = vcombine.low %v5629_v58, %v5633_v48 }
 0x6d8   :  { %v5761_v56 = vld [vmem:[#allocation8 + $0x768] sm:$0xff] }
 0x6d9   :  { %v10123_v25 = vcombine.high %v5757_v12, %v5761_v56  ;;  %v5621_v36 = vld [vmem:[#allocation8 + $0x308] sm:$0xff]  ;;  %v10122_v63 = vcombine.low %v5757_v12, %v5761_v56 }
 0x6da   :  { %7149 = vmatpush1.bf16.msra.mxu1 %v9922_v35  ;;  %7190 = vmatpush1.bf16.msra.mxu0 %v10050_v61  ;;  %v5625_v60 = vld [vmem:[#allocation8 + $0x328] sm:$0xff] }
 0x6db   :  { %7150 = vmatprep.subr.bf16.mxu1 %v9915_v16  ;;  %7191 = vmatprep.subr.bf16.mxu0 %v10043_v49  ;;  %v5749_v57 = vld [vmem:[#allocation8 + $0x708] sm:$0xff]  ;;  %v9987_v17 = vcombine.high %v5621_v36, %v5625_v60  ;;  %v9986_v5 = vcombine.low %v5621_v36, %v5625_v60 }
 0x6dc   :  { %v5753_v47 = vld [vmem:[#allocation8 + $0x728] sm:$0xff] }
 0x6dd   :  { %v10115_v32 = vcombine.high %v5749_v57, %v5753_v47  ;;  %v5613_v35 = vld [vmem:[#allocation8 + $0x2c8] sm:$0xff]  ;;  %v10114_v37 = vcombine.low %v5749_v57, %v5753_v47 }
 0x6de   :  { %7151 = vmatpush1.bf16.msra.mxu1 %v9914_v20  ;;  %7192 = vmatpush1.bf16.msra.mxu0 %v10042_v0  ;;  %v5617_v61 = vld [vmem:[#allocation8 + $0x2e8] sm:$0xff] }
 0x6df   :  { %7152 = vmatprep.subr.bf16.mxu1 %v9907_v26  ;;  %7193 = vmatprep.subr.bf16.mxu0 %v10035_v31  ;;  %v5741_v16 = vld [vmem:[#allocation8 + $0x6c8] sm:$0xff]  ;;  %v9979_v45 = vcombine.high %v5613_v35, %v5617_v61  ;;  %v9978_v27 = vcombine.low %v5613_v35, %v5617_v61 }
 0x6e0   :  { %v5745_v49 = vld [vmem:[#allocation8 + $0x6e8] sm:$0xff] }
 0x6e1   :  { %v10107_v46 = vcombine.high %v5741_v16, %v5745_v49  ;;  %v5605_v20 = vld [vmem:[#allocation8 + $0x288] sm:$0xff]  ;;  %v10106_v3 = vcombine.low %v5741_v16, %v5745_v49 }
 0x6e2   :  { %7153 = vmatpush1.bf16.msra.mxu1 %v9906_v59  ;;  %7194 = vmatpush1.bf16.msra.mxu0 %v10034_v53  ;;  %v5609_v0 = vld [vmem:[#allocation8 + $0x2a8] sm:$0xff] }
 0x6e3   :  { %7154 = vmatprep.subr.bf16.mxu1 %v9899_v19  ;;  %7195 = vmatprep.subr.bf16.mxu0 %v10027_v55  ;;  %v5733_v26 = vld [vmem:[#allocation8 + $0x688] sm:$0xff]  ;;  %v9971_v6 = vcombine.high %v5605_v20, %v5609_v0  ;;  %v9970_v51 = vcombine.low %v5605_v20, %v5609_v0 }
 0x6e4   :  { %v5737_v31 = vld [vmem:[#allocation8 + $0x6a8] sm:$0xff] }
 0x6e5   :  { %v10099_v1 = vcombine.high %v5733_v26, %v5737_v31  ;;  %v5597_v59 = vld [vmem:[#allocation8 + $0x248] sm:$0xff]  ;;  %v10098_v38 = vcombine.low %v5733_v26, %v5737_v31 }
 0x6e6   :  { %7155 = vmatpush1.bf16.msra.mxu1 %v9898_v4  ;;  %7196 = vmatpush1.bf16.msra.mxu0 %v10026_v30  ;;  %v5601_v53 = vld [vmem:[#allocation8 + $0x268] sm:$0xff] }
 0x6e7   :  { %7156 = vmatprep.subr.bf16.mxu1 %v9891_v39  ;;  %7197 = vmatprep.subr.bf16.mxu0 %v10019_v62  ;;  %v5725_v19 = vld [vmem:[#allocation8 + $0x648] sm:$0xff]  ;;  %v9963_v9 = vcombine.high %v5597_v59, %v5601_v53  ;;  %v9962_v41 = vcombine.low %v5597_v59, %v5601_v53 }
 0x6e8   :  { %v5729_v55 = vld [vmem:[#allocation8 + $0x668] sm:$0xff] }
 0x6e9   :  { %v10091_v14 = vcombine.high %v5725_v19, %v5729_v55  ;;  %v5589_v4 = vld [vmem:[#allocation8 + $0x208] sm:$0xff]  ;;  %v10090_v15 = vcombine.low %v5725_v19, %v5729_v55 }
 0x6ea   :  { %7157 = vmatpush1.bf16.msra.mxu1 %v9890_v8  ;;  %7198 = vmatpush1.bf16.msra.mxu0 %v10018_v22  ;;  %v5593_v30 = vld [vmem:[#allocation8 + $0x228] sm:$0xff]  ;;  %v5582_v8 = vld [vmem:[#allocation8 + $0x1d0] sm:$0xff] }
 0x6eb   :  { %7158 = vmatprep.subr.bf16.mxu1 %v10011_v23  ;;  %7199 = vmatprep.subr.bf16.mxu0 %v10139_v28  ;;  %v5717_v39 = vld [vmem:[#allocation8 + $0x608] sm:$0xff]  ;;  %v9955_v2 = vcombine.high %v5589_v4, %v5593_v30  ;;  %v5586_v22 = vld [vmem:[#allocation8 + $0x1f0] sm:$0xff]  ;;  %v9954_v10 = vcombine.low %v5589_v4, %v5593_v30 }
 0x6ec   :  { %v5721_v62 = vld [vmem:[#allocation8 + $0x628] sm:$0xff]  ;;  %v5710_v23 = vld [vmem:[#allocation8 + $0x5d0] sm:$0xff]  ;;  %v9949_v54 = vcombine.high %v5582_v8, %v5586_v22  ;;  %v9948_v58 = vcombine.low %v5582_v8, %v5586_v22 }
 0x6ed   :  { %v10083_v42 = vcombine.high %v5717_v39, %v5721_v62  ;;  %v5714_v28 = vld [vmem:[#allocation8 + $0x5f0] sm:$0xff]  ;;  %v10082_v44 = vcombine.low %v5717_v39, %v5721_v62 }
 0x6ee   :  { %7159 = vmatpush2.bf16.msra.mxu1 %v10010_v21  ;;  %7200 = vmatpush2.bf16.msra.mxu0 %v10138_v43  ;;  %v10077_v29 = vcombine.high %v5710_v23, %v5714_v28  ;;  %v5574_v21 = vld [vmem:[#allocation8 + $0x190] sm:$0xff]  ;;  %v10076_v48 = vcombine.low %v5710_v23, %v5714_v28 }
 0x6ef   :  { %7160 = vmatprep.subr.bf16.mxu1 %v10003_v11  ;;  %7201 = vmatprep.subr.bf16.mxu0 %v10131_v34  ;;  %v5578_v43 = vld [vmem:[#allocation8 + $0x1b0] sm:$0xff] }
 0x6f0   :  { %v5702_v11 = vld [vmem:[#allocation8 + $0x590] sm:$0xff]  ;;  %v9941_v12 = vcombine.high %v5574_v21, %v5578_v43  ;;  %v9940_v36 = vcombine.low %v5574_v21, %v5578_v43 }
 0x6f1   :  { %v5706_v34 = vld [vmem:[#allocation8 + $0x5b0] sm:$0xff] }
 0x6f2   :  { %7161 = vmatpush2.bf16.msra.mxu1 %v10002_v50  ;;  %7202 = vmatpush2.bf16.msra.mxu0 %v10130_v33  ;;  %v10069_v56 = vcombine.high %v5702_v11, %v5706_v34  ;;  %v5566_v50 = vld [vmem:[#allocation8 + $0x150] sm:$0xff]  ;;  %v10068_v60 = vcombine.low %v5702_v11, %v5706_v34 }
 0x6f3   :  { %7162 = vmatprep.subr.bf16.mxu1 %v9995_v24  ;;  %7203 = vmatprep.subr.bf16.mxu0 %v10123_v25  ;;  %v5570_v33 = vld [vmem:[#allocation8 + $0x170] sm:$0xff] }
 0x6f4   :  { %v5694_v24 = vld [vmem:[#allocation8 + $0x550] sm:$0xff]  ;;  %v9933_v57 = vcombine.high %v5566_v50, %v5570_v33  ;;  %v9932_v35 = vcombine.low %v5566_v50, %v5570_v33 }
 0x6f5   :  { %v5698_v25 = vld [vmem:[#allocation8 + $0x570] sm:$0xff] }
 0x6f6   :  { %7163 = vmatpush2.bf16.msra.mxu1 %v9994_v40  ;;  %7204 = vmatpush2.bf16.msra.mxu0 %v10122_v63  ;;  %v10061_v47 = vcombine.high %v5694_v24, %v5698_v25  ;;  %v5558_v40 = vld [vmem:[#allocation8 + $0x110] sm:$0xff]  ;;  %v10060_v61 = vcombine.low %v5694_v24, %v5698_v25 }
 0x6f7   :  { %7164 = vmatprep.subr.bf16.mxu1 %v9987_v17  ;;  %7205 = vmatprep.subr.bf16.mxu0 %v10115_v32  ;;  %v5562_v63 = vld [vmem:[#allocation8 + $0x130] sm:$0xff] }
 0x6f8   :  { %v5686_v17 = vld [vmem:[#allocation8 + $0x510] sm:$0xff]  ;;  %v9925_v16 = vcombine.high %v5558_v40, %v5562_v63  ;;  %v9924_v20 = vcombine.low %v5558_v40, %v5562_v63 }
 0x6f9   :  { %v5690_v32 = vld [vmem:[#allocation8 + $0x530] sm:$0xff] }
 0x6fa   :  { %7165 = vmatpush2.bf16.msra.mxu1 %v9986_v5  ;;  %7206 = vmatpush2.bf16.msra.mxu0 %v10114_v37  ;;  %v10053_v49 = vcombine.high %v5686_v17, %v5690_v32  ;;  %v5550_v5 = vld [vmem:[#allocation8 + $0xd0] sm:$0xff]  ;;  %v10052_v0 = vcombine.low %v5686_v17, %v5690_v32 }
 0x6fb   :  { %7166 = vmatprep.subr.bf16.mxu1 %v9979_v45  ;;  %7207 = vmatprep.subr.bf16.mxu0 %v10107_v46  ;;  %v5554_v37 = vld [vmem:[#allocation8 + $0xf0] sm:$0xff] }
 0x6fc   :  { %v5678_v45 = vld [vmem:[#allocation8 + $0x4d0] sm:$0xff]  ;;  %v9917_v26 = vcombine.high %v5550_v5, %v5554_v37  ;;  %v9916_v59 = vcombine.low %v5550_v5, %v5554_v37 }
 0x6fd   :  { %v5682_v46 = vld [vmem:[#allocation8 + $0x4f0] sm:$0xff] }
 0x6fe   :  { %7167 = vmatpush2.bf16.msra.mxu1 %v9978_v27  ;;  %7208 = vmatpush2.bf16.msra.mxu0 %v10106_v3  ;;  %v10045_v31 = vcombine.high %v5678_v45, %v5682_v46  ;;  %v5542_v27 = vld [vmem:[#allocation8 + $0x90] sm:$0xff]  ;;  %v10044_v53 = vcombine.low %v5678_v45, %v5682_v46 }
 0x6ff   :  { %7168 = vmatprep.subr.bf16.mxu1 %v9971_v6  ;;  %7209 = vmatprep.subr.bf16.mxu0 %v10099_v1  ;;  %v5546_v3 = vld [vmem:[#allocation8 + $0xb0] sm:$0xff] }
 0x700   :  { %v5670_v6 = vld [vmem:[#allocation8 + $0x490] sm:$0xff]  ;;  %v9909_v19 = vcombine.high %v5542_v27, %v5546_v3  ;;  %v9908_v4 = vcombine.low %v5542_v27, %v5546_v3 }
 0x701   :  { %v5674_v1 = vld [vmem:[#allocation8 + $0x4b0] sm:$0xff] }
 0x702   :  { %7169 = vmatpush2.bf16.msra.mxu1 %v9970_v51  ;;  %7210 = vmatpush2.bf16.msra.mxu0 %v10098_v38  ;;  %v10037_v55 = vcombine.high %v5670_v6, %v5674_v1  ;;  %v5534_v51 = vld [vmem:[#allocation8 + $0x50] sm:$0xff]  ;;  %v10036_v30 = vcombine.low %v5670_v6, %v5674_v1 }
 0x703   :  { %7170 = vmatprep.subr.bf16.mxu1 %v9963_v9  ;;  %7211 = vmatprep.subr.bf16.mxu0 %v10091_v14  ;;  %v5538_v38 = vld [vmem:[#allocation8 + $0x70] sm:$0xff] }
 0x704   :  { %v5662_v9 = vld [vmem:[#allocation8 + $0x450] sm:$0xff]  ;;  %v9901_v39 = vcombine.high %v5534_v51, %v5538_v38  ;;  %v9900_v8 = vcombine.low %v5534_v51, %v5538_v38 }
 0x705   :  { %v5666_v14 = vld [vmem:[#allocation8 + $0x470] sm:$0xff] }
 0x706   :  { %7171 = vmatpush2.bf16.msra.mxu1 %v9962_v41  ;;  %7212 = vmatpush2.bf16.msra.mxu0 %v10090_v15  ;;  %v10029_v62 = vcombine.high %v5662_v9, %v5666_v14  ;;  %v5526_v41 = vld [vmem:[#allocation8 + $0x10] sm:$0xff]  ;;  %v10028_v22 = vcombine.low %v5662_v9, %v5666_v14 }
 0x707   :  { %7172 = vmatprep.subr.bf16.mxu1 %v9955_v2  ;;  %7213 = vmatprep.subr.bf16.mxu0 %v10083_v42  ;;  %v5530_v15 = vld [vmem:[#allocation8 + $0x30] sm:$0xff] }
 0x708   :  { %v5654_v2 = vld [vmem:[#allocation8 + $0x410] sm:$0xff]  ;;  %v9893_v23 = vcombine.high %v5526_v41, %v5530_v15  ;;  %v9892_v21 = vcombine.low %v5526_v41, %v5530_v15 }
 0x709   :  { %v5658_v42 = vld [vmem:[#allocation8 + $0x430] sm:$0xff] }
 0x70a   :  { %7173 = vmatpush2.bf16.msra.mxu1 %v9954_v10  ;;  %7214 = vmatpush2.bf16.msra.mxu0 %v10082_v44  ;;  %v10021_v28 = vcombine.high %v5654_v2, %v5658_v42  ;;  %v5646_v10 = vld [vmem:[#allocation8 + $0x3d0] sm:$0xff]  ;;  %v10020_v43 = vcombine.low %v5654_v2, %v5658_v42 }
 0x70b   :  { %7224 = vmatprep.subr.bf16.mxu1 %v9949_v54  ;;  %7265 = vmatprep.subr.bf16.mxu0 %v10077_v29  ;;  %v5650_v44 = vld [vmem:[#allocation8 + $0x3f0] sm:$0xff] }
 0x70c   :  { %v5774_v54 = vld [vmem:[#allocation8 + $0x7d0] sm:$0xff]  ;;  %v10013_v11 = vcombine.high %v5646_v10, %v5650_v44  ;;  %v10012_v50 = vcombine.low %v5646_v10, %v5650_v44 }
 0x70d   :  { %7175 = vmatmul.mubr.bf16.vlgmr.msra.gmra.mxu1 %v15612_v13  ;;  %7216 = vmatmul.mubr.bf16.vlgmr.msra.gmra.mxu0 %v15614_v7  ;;  %v5778_v29 = vld [vmem:[#allocation8 + $0x7f0] sm:$0xff] }
 0x70e   :  { %7225 = vmatpush1.bf16.msra.mxu1 %v9948_v58  ;;  %7256 = vmatprep.mubr.bf16.mxu1 %v15608_v52  ;;  %v10141_v34 = vcombine.high %v5774_v54, %v5778_v29  ;;  %v5638_v58 = vld [vmem:[#allocation8 + $0x390] sm:$0xff]  ;;  %v10140_v33 = vcombine.low %v5774_v54, %v5778_v29 }
 0x70f   :  { %7266 = vmatpush1.bf16.msra.mxu0 %v10076_v48  ;;  %7297 = vmatprep.mubr.bf16.mxu0 %v15610_v18  ;;  %v5642_v48 = vld [vmem:[#allocation8 + $0x3b0] sm:$0xff] }
 0x710   :  { %7226 = vmatprep.subr.bf16.mxu1 %v9941_v12  ;;  %7267 = vmatprep.subr.bf16.mxu0 %v10069_v56  ;;  %v5766_v12 = vld [vmem:[#allocation8 + $0x790] sm:$0xff]  ;;  %v10005_v24 = vcombine.high %v5638_v58, %v5642_v48  ;;  %v10004_v40 = vcombine.low %v5638_v58, %v5642_v48 }
 0x711   :  { %v5770_v56 = vld [vmem:[#allocation8 + $0x7b0] sm:$0xff] }
 0x712   :  { %7227 = vmatpush1.bf16.msra.mxu1 %v9940_v36  ;;  %v10133_v25 = vcombine.high %v5766_v12, %v5770_v56  ;;  %v5630_v36 = vld [vmem:[#allocation8 + $0x350] sm:$0xff]  ;;  %v10132_v63 = vcombine.low %v5766_v12, %v5770_v56 }
 0x713   :  { %7268 = vmatpush1.bf16.msra.mxu0 %v10068_v60  ;;  %7228 = vmatprep.subr.bf16.mxu1 %v9933_v57  ;;  %v5634_v60 = vld [vmem:[#allocation8 + $0x370] sm:$0xff] }
 0x714   :  { %7269 = vmatprep.subr.bf16.mxu0 %v10061_v47  ;;  %v5758_v57 = vld [vmem:[#allocation8 + $0x750] sm:$0xff]  ;;  %v9997_v17 = vcombine.high %v5630_v36, %v5634_v60  ;;  %v9996_v5 = vcombine.low %v5630_v36, %v5634_v60  ;;  %v5707_v36 = vld [vmem:[#allocation8 + $0x5b8] sm:$0xff] }
 0x715   :  { %v5762_v47 = vld [vmem:[#allocation8 + $0x770] sm:$0xff] }
 0x716   :  { %7229 = vmatpush1.bf16.msra.mxu1 %v9932_v35  ;;  %v10125_v32 = vcombine.high %v5758_v57, %v5762_v47  ;;  %v5622_v35 = vld [vmem:[#allocation8 + $0x310] sm:$0xff]  ;;  %v10124_v37 = vcombine.low %v5758_v57, %v5762_v47  ;;  %v5567_v47 = vld [vmem:[#allocation8 + $0x158] sm:$0xff] }
 0x717   :  { %7270 = vmatpush1.bf16.msra.mxu0 %v10060_v61  ;;  %7230 = vmatprep.subr.bf16.mxu1 %v9925_v16  ;;  %v5626_v61 = vld [vmem:[#allocation8 + $0x330] sm:$0xff] }
 0x718   :  { %7271 = vmatprep.subr.bf16.mxu0 %v10053_v49  ;;  %v5750_v16 = vld [vmem:[#allocation8 + $0x710] sm:$0xff]  ;;  %v9989_v45 = vcombine.high %v5622_v35, %v5626_v61  ;;  %v9988_v27 = vcombine.low %v5622_v35, %v5626_v61 }
 0x719   :  { %v5754_v49 = vld [vmem:[#allocation8 + $0x730] sm:$0xff] }
 0x71a   :  { %7231 = vmatpush1.bf16.msra.mxu1 %v9924_v20  ;;  %v10117_v46 = vcombine.high %v5750_v16, %v5754_v49  ;;  %v5614_v20 = vld [vmem:[#allocation8 + $0x2d0] sm:$0xff]  ;;  %v10116_v3 = vcombine.low %v5750_v16, %v5754_v49 }
 0x71b   :  { %7272 = vmatpush1.bf16.msra.mxu0 %v10052_v0  ;;  %7232 = vmatprep.subr.bf16.mxu1 %v9917_v26  ;;  %v5618_v0 = vld [vmem:[#allocation8 + $0x2f0] sm:$0xff] }
 0x71c   :  { %7273 = vmatprep.subr.bf16.mxu0 %v10045_v31  ;;  %v5742_v26 = vld [vmem:[#allocation8 + $0x6d0] sm:$0xff]  ;;  %v9981_v6 = vcombine.high %v5614_v20, %v5618_v0  ;;  %v9980_v51 = vcombine.low %v5614_v20, %v5618_v0 }
 0x71d   :  { %v5746_v31 = vld [vmem:[#allocation8 + $0x6f0] sm:$0xff] }
 0x71e   :  { %7233 = vmatpush1.bf16.msra.mxu1 %v9916_v59  ;;  %v10109_v1 = vcombine.high %v5742_v26, %v5746_v31  ;;  %v5606_v59 = vld [vmem:[#allocation8 + $0x290] sm:$0xff]  ;;  %v10108_v38 = vcombine.low %v5742_v26, %v5746_v31  ;;  %v5551_v31 = vld [vmem:[#allocation8 + $0xd8] sm:$0xff] }
 0x71f   :  { %7274 = vmatpush1.bf16.msra.mxu0 %v10044_v53  ;;  %7234 = vmatprep.subr.bf16.mxu1 %v9909_v19  ;;  %v5610_v53 = vld [vmem:[#allocation8 + $0x2b0] sm:$0xff] }
 0x720   :  { %7275 = vmatprep.subr.bf16.mxu0 %v10037_v55  ;;  %v5734_v19 = vld [vmem:[#allocation8 + $0x690] sm:$0xff]  ;;  %v9973_v9 = vcombine.high %v5606_v59, %v5610_v53  ;;  %v9972_v41 = vcombine.low %v5606_v59, %v5610_v53 }
 0x721   :  { %v5738_v55 = vld [vmem:[#allocation8 + $0x6b0] sm:$0xff] }
 0x722   :  { %7235 = vmatpush1.bf16.msra.mxu1 %v9908_v4  ;;  %v10101_v14 = vcombine.high %v5734_v19, %v5738_v55  ;;  %v5598_v4 = vld [vmem:[#allocation8 + $0x250] sm:$0xff]  ;;  %v10100_v15 = vcombine.low %v5734_v19, %v5738_v55  ;;  %v5543_v19 = vld [vmem:[#allocation8 + $0x98] sm:$0xff] }
 0x723   :  { %7276 = vmatpush1.bf16.msra.mxu0 %v10036_v30  ;;  %7236 = vmatprep.subr.bf16.mxu1 %v9901_v39  ;;  %v5602_v30 = vld [vmem:[#allocation8 + $0x270] sm:$0xff]  ;;  %v5547_v55 = vld [vmem:[#allocation8 + $0xb8] sm:$0xff] }
 0x724   :  { %7277 = vmatprep.subr.bf16.mxu0 %v10029_v62  ;;  %v5726_v39 = vld [vmem:[#allocation8 + $0x650] sm:$0xff]  ;;  %v9965_v2 = vcombine.high %v5598_v4, %v5602_v30  ;;  %v9964_v10 = vcombine.low %v5598_v4, %v5602_v30  ;;  %v9911_v4 = vcombine.high %v5543_v19, %v5547_v55 }
 0x725   :  { %v5730_v62 = vld [vmem:[#allocation8 + $0x670] sm:$0xff] }
 0x726   :  { %7237 = vmatpush1.bf16.msra.mxu1 %v9900_v8  ;;  %v10093_v42 = vcombine.high %v5726_v39, %v5730_v62  ;;  %v5590_v8 = vld [vmem:[#allocation8 + $0x210] sm:$0xff]  ;;  %v10092_v44 = vcombine.low %v5726_v39, %v5730_v62  ;;  %v5535_v39 = vld [vmem:[#allocation8 + $0x58] sm:$0xff] }
 0x727   :  { %7278 = vmatpush1.bf16.msra.mxu0 %v10028_v22  ;;  %7238 = vmatprep.subr.bf16.mxu1 %v9893_v23  ;;  %v5594_v22 = vld [vmem:[#allocation8 + $0x230] sm:$0xff]  ;;  %v5539_v62 = vld [vmem:[#allocation8 + $0x78] sm:$0xff] }
 0x728   :  { %7279 = vmatprep.subr.bf16.mxu0 %v10021_v28  ;;  %v5718_v23 = vld [vmem:[#allocation8 + $0x610] sm:$0xff]  ;;  %v9957_v54 = vcombine.high %v5590_v8, %v5594_v22  ;;  %v9956_v58 = vcombine.low %v5590_v8, %v5594_v22  ;;  %v9903_v8 = vcombine.high %v5535_v39, %v5539_v62 }
 0x729   :  { %v5722_v28 = vld [vmem:[#allocation8 + $0x630] sm:$0xff] }
 0x72a   :  { %7239 = vmatpush1.bf16.msra.mxu1 %v9892_v21  ;;  %v10085_v29 = vcombine.high %v5718_v23, %v5722_v28  ;;  %v5583_v21 = vld [vmem:[#allocation8 + $0x1d8] sm:$0xff]  ;;  %v10084_v48 = vcombine.low %v5718_v23, %v5722_v28 }
 0x72b   :  { %7280 = vmatpush1.bf16.msra.mxu0 %v10020_v43  ;;  %7240 = vmatprep.subr.bf16.mxu1 %v10013_v11  ;;  %v5587_v43 = vld [vmem:[#allocation8 + $0x1f8] sm:$0xff] }
 0x72c   :  { %7281 = vmatprep.subr.bf16.mxu0 %v10141_v34  ;;  %v5711_v11 = vld [vmem:[#allocation8 + $0x5d8] sm:$0xff]  ;;  %v9951_v12 = vcombine.high %v5583_v21, %v5587_v43 }
 0x72d   :  { %v5715_v34 = vld [vmem:[#allocation8 + $0x5f8] sm:$0xff] }
 0x72e   :  { %7241 = vmatpush2.bf16.msra.mxu1 %v10012_v50  ;;  %v10079_v56 = vcombine.high %v5711_v11, %v5715_v34  ;;  %v5575_v50 = vld [vmem:[#allocation8 + $0x198] sm:$0xff]  ;;  %v10078_v60 = vcombine.low %v5711_v11, %v5715_v34 }
 0x72f   :  { %7282 = vmatpush2.bf16.msra.mxu0 %v10140_v33  ;;  %7242 = vmatprep.subr.bf16.mxu1 %v10005_v24  ;;  %v5579_v33 = vld [vmem:[#allocation8 + $0x1b8] sm:$0xff]  ;;  %v9950_v24 = vcombine.low %v5583_v21, %v5587_v43 }
 0x730   :  { %7283 = vmatprep.subr.bf16.mxu0 %v10133_v25  ;;  %v5703_v25 = vld [vmem:[#allocation8 + $0x598] sm:$0xff]  ;;  %v9943_v57 = vcombine.high %v5575_v50, %v5579_v33  ;;  %v9942_v35 = vcombine.low %v5575_v50, %v5579_v33 }
 0x731   :  { %v10070_v61 = vcombine.low %v5703_v25, %v5707_v36  ;;  %v5527_v23 = vld [vmem:[#allocation8 + $0x18] sm:$0xff] }
 0x732   :  { %7243 = vmatpush2.bf16.msra.mxu1 %v10004_v40  ;;  %v5571_v40 = vld [vmem:[#allocation8 + $0x178] sm:$0xff] }
 0x733   :  { %7284 = vmatpush2.bf16.msra.mxu0 %v10132_v63  ;;  %7244 = vmatprep.subr.bf16.mxu1 %v9997_v17  ;;  %v10071_v63 = vcombine.high %v5703_v25, %v5707_v36  ;;  %v5695_v17 = vld [vmem:[#allocation8 + $0x558] sm:$0xff]  ;;  %v9935_v16 = vcombine.high %v5567_v47, %v5571_v40  ;;  %v9934_v20 = vcombine.low %v5567_v47, %v5571_v40 }
 0x734   :  { %7285 = vmatprep.subr.bf16.mxu0 %v10125_v32  ;;  %v5699_v32 = vld [vmem:[#allocation8 + $0x578] sm:$0xff] }
 0x735   :  { %v10063_v49 = vcombine.high %v5695_v17, %v5699_v32  ;;  %v10062_v0 = vcombine.low %v5695_v17, %v5699_v32  ;;  %v5531_v28 = vld [vmem:[#allocation8 + $0x38] sm:$0xff] }
 0x736   :  { %7245 = vmatpush2.bf16.msra.mxu1 %v9996_v5  ;;  %v5559_v5 = vld [vmem:[#allocation8 + $0x118] sm:$0xff]  ;;  %v9895_v21 = vcombine.high %v5527_v23, %v5531_v28 }
 0x737   :  { %7286 = vmatpush2.bf16.msra.mxu0 %v10124_v37  ;;  %7246 = vmatprep.subr.bf16.mxu1 %v9989_v45  ;;  %v5563_v37 = vld [vmem:[#allocation8 + $0x138] sm:$0xff] }
 0x738   :  { %7287 = vmatprep.subr.bf16.mxu0 %v10117_v46  ;;  %v5687_v45 = vld [vmem:[#allocation8 + $0x518] sm:$0xff]  ;;  %v9927_v26 = vcombine.high %v5559_v5, %v5563_v37 }
 0x739   :  { %v5691_v46 = vld [vmem:[#allocation8 + $0x538] sm:$0xff] }
 0x73a   :  { %7247 = vmatpush2.bf16.msra.mxu1 %v9988_v27  ;;  %v5555_v27 = vld [vmem:[#allocation8 + $0xf8] sm:$0xff] }
 0x73b   :  { %7288 = vmatpush2.bf16.msra.mxu0 %v10116_v3  ;;  %7248 = vmatprep.subr.bf16.mxu1 %v9981_v6  ;;  %v5679_v3 = vld [vmem:[#allocation8 + $0x4d8] sm:$0xff]  ;;  %v9919_v59 = vcombine.high %v5551_v31, %v5555_v27 }
 0x73c   :  { %7289 = vmatprep.subr.bf16.mxu0 %v10109_v1  ;;  %v5683_v6 = vld [vmem:[#allocation8 + $0x4f8] sm:$0xff]  ;;  %v10054_v1 = vcombine.low %v5687_v45, %v5691_v46 }
 0x73d   :  { %v10047_v53 = vcombine.high %v5679_v3, %v5683_v6  ;;  %v5647_v11 = vld [vmem:[#allocation8 + $0x3d8] sm:$0xff] }
 0x73e   :  { %7249 = vmatpush2.bf16.msra.mxu1 %v9980_v51  ;;  %v5671_v51 = vld [vmem:[#allocation8 + $0x498] sm:$0xff] }
 0x73f   :  { %7290 = vmatpush2.bf16.msra.mxu0 %v10108_v38  ;;  %7250 = vmatprep.subr.bf16.mxu1 %v9973_v9  ;;  %v5675_v38 = vld [vmem:[#allocation8 + $0x4b8] sm:$0xff]  ;;  %v9918_v9 = vcombine.low %v5551_v31, %v5555_v27 }
 0x740   :  { %7291 = vmatprep.subr.bf16.mxu0 %v10101_v14  ;;  %v10046_v14 = vcombine.low %v5679_v3, %v5683_v6  ;;  %v10039_v30 = vcombine.high %v5671_v51, %v5675_v38  ;;  %v5651_v34 = vld [vmem:[#allocation8 + $0x3f8] sm:$0xff] }
 0x741   :  { %v10015_v50 = vcombine.high %v5647_v11, %v5651_v34  ;;  %v5643_v25 = vld [vmem:[#allocation8 + $0x3b8] sm:$0xff] }
 0x742   :  { %7251 = vmatpush2.bf16.msra.mxu1 %v9972_v41  ;;  %v5663_v41 = vld [vmem:[#allocation8 + $0x458] sm:$0xff] }
 0x743   :  { %7292 = vmatpush2.bf16.msra.mxu0 %v10100_v15  ;;  %7252 = vmatprep.subr.bf16.mxu1 %v9965_v2  ;;  %v5667_v15 = vld [vmem:[#allocation8 + $0x478] sm:$0xff]  ;;  %v9910_v2 = vcombine.low %v5543_v19, %v5547_v55 }
 0x744   :  { %7293 = vmatprep.subr.bf16.mxu0 %v10093_v42  ;;  %v10038_v42 = vcombine.low %v5671_v51, %v5675_v38  ;;  %v10031_v22 = vcombine.high %v5663_v41, %v5667_v15  ;;  %v5767_v36 = vld [vmem:[#allocation8 + $0x798] sm:$0xff] }
 0x745   :  { %v5631_v17 = vld [vmem:[#allocation8 + $0x358] sm:$0xff] }
 0x746   :  { %7253 = vmatpush2.bf16.msra.mxu1 %v9964_v10  ;;  %v5655_v10 = vld [vmem:[#allocation8 + $0x418] sm:$0xff] }
 0x747   :  { %7294 = vmatpush2.bf16.msra.mxu0 %v10092_v44  ;;  %7254 = vmatprep.subr.bf16.mxu1 %v9957_v54  ;;  %v5659_v44 = vld [vmem:[#allocation8 + $0x438] sm:$0xff]  ;;  %v9902_v54 = vcombine.low %v5535_v39, %v5539_v62 }
 0x748   :  { %7295 = vmatprep.subr.bf16.mxu0 %v10085_v29  ;;  %v10030_v29 = vcombine.low %v5663_v41, %v5667_v15  ;;  %v10023_v43 = vcombine.high %v5655_v10, %v5659_v44  ;;  %v5635_v32 = vld [vmem:[#allocation8 + $0x378] sm:$0xff] }
 0x749   :  { %v5615_v3 = vld [vmem:[#allocation8 + $0x2d8] sm:$0xff] }
 0x74a   :  { %7255 = vmatpush2.bf16.msra.mxu1 %v9956_v58  ;;  %v5775_v58 = vld [vmem:[#allocation8 + $0x7d8] sm:$0xff] }
 0x74b   :  { %7296 = vmatpush2.bf16.msra.mxu0 %v10084_v48  ;;  %7306 = vmatprep.subr.bf16.mxu1 %v9951_v12  ;;  %v5779_v48 = vld [vmem:[#allocation8 + $0x7f8] sm:$0xff]  ;;  %v9894_v12 = vcombine.low %v5527_v23, %v5531_v28 }
 0x74c   :  { %7347 = vmatprep.subr.bf16.mxu0 %v10079_v56  ;;  %v10022_v56 = vcombine.low %v5655_v10, %v5659_v44  ;;  %v10143_v33 = vcombine.high %v5775_v58, %v5779_v48  ;;  %v10142_v47 = vcombine.low %v5775_v58, %v5779_v48  ;;  %v5619_v6 = vld [vmem:[#allocation8 + $0x2f8] sm:$0xff] }
 0x74d   :  { %7257 = vmatmul.mubr.bf16.vlgmr.msra.gmra.mxu1 %v15612_v13  ;;  %v9983_v19 = vcombine.high %v5615_v3, %v5619_v6  ;;  %v5607_v51 = vld [vmem:[#allocation8 + $0x298] sm:$0xff] }
 0x74e   :  { %7298 = vmatmul.mubr.bf16.vlgmr.msra.gmra.mxu0 %v15614_v7  ;;  %7307 = vmatpush1.bf16.msra.mxu1 %v9950_v24  ;;  %v5639_v24 = vld [vmem:[#allocation8 + $0x398] sm:$0xff] }
 0x74f   :  { %7338 = vmatprep.mubr.bf16.mxu1 %v15608_v52  ;;  %7348 = vmatpush1.bf16.msra.mxu0 %v10078_v60  ;;  %v10055_v52 = vcombine.high %v5687_v45, %v5691_v46  ;;  %v5771_v60 = vld [vmem:[#allocation8 + $0x7b8] sm:$0xff]  ;;  %v10007_v40 = vcombine.high %v5639_v24, %v5643_v25 }
 0x750   :  { %7379 = vmatprep.mubr.bf16.mxu0 %v15610_v18  ;;  %7308 = vmatprep.subr.bf16.mxu1 %v9943_v57  ;;  %v9926_v18 = vcombine.low %v5559_v5, %v5563_v37  ;;  %v10014_v57 = vcombine.low %v5647_v11, %v5651_v34  ;;  %v9999_v5 = vcombine.high %v5631_v17, %v5635_v32  ;;  %v5623_v45 = vld [vmem:[#allocation8 + $0x318] sm:$0xff] }
 0x751   :  { %7349 = vmatprep.subr.bf16.mxu0 %v10071_v63  ;;  %v10135_v63 = vcombine.high %v5767_v36, %v5771_v60  ;;  %v5627_v46 = vld [vmem:[#allocation8 + $0x338] sm:$0xff] }
 0x752   :  { %7309 = vmatpush1.bf16.msra.mxu1 %v9942_v35  ;;  %v5759_v35 = vld [vmem:[#allocation8 + $0x758] sm:$0xff]  ;;  %v9991_v31 = vcombine.high %v5623_v45, %v5627_v46 }
 0x753   :  { %7350 = vmatpush1.bf16.msra.mxu0 %v10070_v61  ;;  %7310 = vmatprep.subr.bf16.mxu1 %v9935_v16  ;;  %v5763_v61 = vld [vmem:[#allocation8 + $0x778] sm:$0xff]  ;;  %v10006_v16 = vcombine.low %v5639_v24, %v5643_v25 }
 0x754   :  { %7351 = vmatprep.subr.bf16.mxu0 %v10063_v49  ;;  %v10134_v49 = vcombine.low %v5767_v36, %v5771_v60  ;;  %v10127_v37 = vcombine.high %v5759_v35, %v5763_v61  ;;  %v5611_v38 = vld [vmem:[#allocation8 + $0x2b8] sm:$0xff] }
 0x755   :  { %v9975_v39 = vcombine.high %v5607_v51, %v5611_v38  ;;  %v5599_v41 = vld [vmem:[#allocation8 + $0x258] sm:$0xff] }
 0x756   :  { %7311 = vmatpush1.bf16.msra.mxu1 %v9934_v20  ;;  %v5751_v20 = vld [vmem:[#allocation8 + $0x718] sm:$0xff] }
 0x757   :  { %7352 = vmatpush1.bf16.msra.mxu0 %v10062_v0  ;;  %7312 = vmatprep.subr.bf16.mxu1 %v9927_v26  ;;  %v5755_v0 = vld [vmem:[#allocation8 + $0x738] sm:$0xff]  ;;  %v9998_v26 = vcombine.low %v5631_v17, %v5635_v32 }
 0x758   :  { %7353 = vmatprep.subr.bf16.mxu0 %v10055_v52  ;;  %v10126_v52 = vcombine.low %v5759_v35, %v5763_v61  ;;  %v10119_v27 = vcombine.high %v5751_v20, %v5755_v0  ;;  %v5603_v15 = vld [vmem:[#allocation8 + $0x278] sm:$0xff] }
 0x759   :  { %v9967_v23 = vcombine.high %v5599_v41, %v5603_v15  ;;  %v5591_v10 = vld [vmem:[#allocation8 + $0x218] sm:$0xff] }
 0x75a   :  { %7313 = vmatpush1.bf16.msra.mxu1 %v9926_v18  ;;  %v5743_v18 = vld [vmem:[#allocation8 + $0x6d8] sm:$0xff] }
 0x75b   :  { %7354 = vmatpush1.bf16.msra.mxu0 %v10054_v1  ;;  %7314 = vmatprep.subr.bf16.mxu1 %v9919_v59  ;;  %v5747_v1 = vld [vmem:[#allocation8 + $0x6f8] sm:$0xff]  ;;  %v9990_v59 = vcombine.low %v5623_v45, %v5627_v46 }
 0x75c   :  { %7355 = vmatprep.subr.bf16.mxu0 %v10047_v53  ;;  %v10118_v53 = vcombine.low %v5751_v20, %v5755_v0  ;;  %v10111_v55 = vcombine.high %v5743_v18, %v5747_v1  ;;  %v5595_v44 = vld [vmem:[#allocation8 + $0x238] sm:$0xff] }
 0x75d   :  { %v9959_v11 = vcombine.high %v5591_v10, %v5595_v44  ;;  %v9958_v58 = vcombine.low %v5591_v10, %v5595_v44  ;;  %v11274_v25 = vld [vmem:[#allocation11 + $0xc4] ss:$16 sps:$4 sm:$0xff]   ;;  %v11281_v36 = vld [vmem:[#allocation11 + $0x2e0] ss:$16 sps:$4 sm:$0xff]  }
 0x75e   :  { %7315 = vmatpush1.bf16.msra.mxu1 %v9918_v9  ;;  %v5735_v9 = vld [vmem:[#allocation8 + $0x698] sm:$0xff] }
 0x75f   :  { %7356 = vmatpush1.bf16.msra.mxu0 %v10046_v14  ;;  %7316 = vmatprep.subr.bf16.mxu1 %v9911_v4  ;;  %v5739_v14 = vld [vmem:[#allocation8 + $0x6b8] sm:$0xff]  ;;  %v9982_v4 = vcombine.low %v5615_v3, %v5619_v6 }
 0x760   :  { %7357 = vmatprep.subr.bf16.mxu0 %v10039_v30  ;;  %v10110_v30 = vcombine.low %v5743_v18, %v5747_v1  ;;  %v10103_v62 = vcombine.high %v5735_v9, %v5739_v14  ;;  %v11289_v60 = vld [vmem:[#allocation11 + $0x2c4] ss:$16 sps:$4 sm:$0xff]   ;;  %v11272_v17 = vld [vmem:[#allocation11 + $0xc0] ss:$16 sps:$4 sm:$0xff]  }
 0x761   :  { %v15649_v32 = vld [vmem:[%s15768_s9] sm:$0xff] }
 0x762   :  { %7317 = vmatpush1.bf16.msra.mxu1 %v9910_v2  ;;  %v5727_v2 = vld [vmem:[#allocation8 + $0x658] sm:$0xff] }
 0x763   :  { %7358 = vmatpush1.bf16.msra.mxu0 %v10038_v42  ;;  %7318 = vmatprep.subr.bf16.mxu1 %v9903_v8  ;;  %v5731_v42 = vld [vmem:[#allocation8 + $0x678] sm:$0xff]  ;;  %v9974_v8 = vcombine.low %v5607_v51, %v5611_v38 }
 0x764   :  { %7359 = vmatprep.subr.bf16.mxu0 %v10031_v22  ;;  %v10102_v22 = vcombine.low %v5735_v9, %v5739_v14  ;;  %v10095_v28 = vcombine.high %v5727_v2, %v5731_v42  ;;  %v11277_v61 = vld [vmem:[#allocation11 + $0xa4] ss:$16 sps:$4 sm:$0xff]   ;;  %v11275_v20 = vld [vmem:[#allocation11 + $0xa0] ss:$16 sps:$4 sm:$0xff]  }
 0x765   :  { %v11301_v3 = vld [vmem:[#allocation11 + $0x284] ss:$16 sps:$4 sm:$0xff]   ;;  %v11278_v6 = vld [vmem:[#allocation11 + $0x80] ss:$16 sps:$4 sm:$0xff]  }
 0x766   :  { %7319 = vmatpush1.bf16.msra.mxu1 %v9902_v54  ;;  %v5719_v54 = vld [vmem:[#allocation8 + $0x618] sm:$0xff] }
 0x767   :  { %7360 = vmatpush1.bf16.msra.mxu0 %v10030_v29  ;;  %7320 = vmatprep.subr.bf16.mxu1 %v9895_v21  ;;  %v5723_v29 = vld [vmem:[#allocation8 + $0x638] sm:$0xff]  ;;  %v9966_v21 = vcombine.low %v5599_v41, %v5603_v15 }
 0x768   :  { %7361 = vmatprep.subr.bf16.mxu0 %v10023_v43  ;;  %v10094_v43 = vcombine.low %v5727_v2, %v5731_v42  ;;  %v10087_v34 = vcombine.high %v5719_v54, %v5723_v29  ;;  %v10086_v48 = vcombine.low %v5719_v54, %v5723_v29  ;;  %v11286_v1 = vld [vmem:[#allocation11 + $0x64] ss:$16 sps:$4 sm:$0xff]   ;;  %v11305_v38 = vld [vmem:[#allocation11 + $0x260] ss:$16 sps:$4 sm:$0xff]  }
 0x769   :  { %v11292_v51 = vld [vmem:[#allocation11 + $0x44] ss:$16 sps:$4 sm:$0xff]   ;;  %v11290_v14 = vld [vmem:[#allocation11 + $0x40] ss:$16 sps:$4 sm:$0xff]  }
 0x76a   :  { %7321 = vmatpush1.bf16.msra.mxu1 %v9894_v12  ;;  %v11271_v12 = vld [vmem:[#allocation11 + $0xe4] ss:$16 sps:$4 sm:$0xff]   ;;  %v11317_v15 = vld [vmem:[#allocation11 + $0x220] ss:$16 sps:$4 sm:$0xff]  }
 0x76b   :  { %7362 = vmatpush1.bf16.msra.mxu0 %v10022_v56  ;;  %7322 = vmatprep.subr.bf16.mxu1 %v10015_v50  ;;  %v11283_v56 = vld [vmem:[#allocation11 + $0x2e4] ss:$16 sps:$4 sm:$0xff]   ;;  %v11269_v50 = vld [vmem:[#allocation11 + $0xe0] ss:$16 sps:$4 sm:$0xff]  }
 0x76c   :  { %7363 = vmatprep.subr.bf16.mxu0 %v10143_v33  ;;  %v15943_v33 = vld [vmem:[#allocation18_spill] sm:$0xff] }
 0x76d   :  { %v15634_v24 = vsub.s32 1, %v15943_v33  ;;  %v11313_v9 = vld [vmem:[#allocation11 + $0x244] ss:$16 sps:$4 sm:$0xff]   ;;  %v11302_v42 = vld [vmem:[#allocation11] ss:$16 sps:$4 sm:$0xff]  }
 0x76e   :  { %7323 = vmatpush2.bf16.msra.mxu1 %v10014_v57  ;;  %v11304_v41 = vld [vmem:[#allocation11 + $0x4] ss:$16 sps:$4 sm:$0xff]   ;;  %v11329_v44 = vld [vmem:[#allocation11 + $0x3e0] ss:$16 sps:$4 sm:$0xff]  }
 0x76f   :  { %7364 = vmatpush2.bf16.msra.mxu0 %v10142_v47  ;;  %7324 = vmatprep.subr.bf16.mxu1 %v10007_v40  ;;  %v15641_v40 = vld [vmem:[#allocation10] sm:$0xff]  ;;  %v11325_v2 = vld [vmem:[#allocation11 + $0x204] ss:$16 sps:$4 sm:$0xff]   ;;  %v11314_v29 = vld [vmem:[#allocation11 + $0x1c0] ss:$16 sps:$4 sm:$0xff]  }
 0x770   :  { %7365 = vmatprep.subr.bf16.mxu0 %v10135_v63  ;;  %v7397_v63 = vrot.slane %v15641_v40, %v15634_v24  ;;  %v11316_v10 = vld [vmem:[#allocation11 + $0x1c4] ss:$16 sps:$4 sm:$0xff]  }
 0x771   :  { %v11337_v54 = vld [vmem:[#allocation11 + $0x3c4] ss:$16 sps:$4 sm:$0xff]  }
 0x772   :  { %7325 = vmatpush2.bf16.msra.mxu1 %v10006_v16  ;;  %v11287_v16 = vld [vmem:[#allocation11 + $0x2c0] ss:$16 sps:$4 sm:$0xff]  }
 0x773   :  { %7366 = vmatpush2.bf16.msra.mxu0 %v10134_v49  ;;  %7326 = vmatprep.subr.bf16.mxu1 %v9999_v5  ;;  %v11295_v5 = vld [vmem:[#allocation11 + $0x2a4] ss:$16 sps:$4 sm:$0xff]  }
 0x774   :  { %7367 = vmatprep.subr.bf16.mxu0 %v10127_v37 }
 0x776   :  { %7327 = vmatpush2.bf16.msra.mxu1 %v9998_v26 }
 0x777   :  { %7368 = vmatpush2.bf16.msra.mxu0 %v10126_v52  ;;  %7328 = vmatprep.subr.bf16.mxu1 %v9991_v31  ;;  %v11280_v52 = vld [vmem:[#allocation11 + $0x84] ss:$16 sps:$4 sm:$0xff]   ;;  %v11293_v31 = vld [vmem:[#allocation11 + $0x2a0] ss:$16 sps:$4 sm:$0xff]  }
 0x778   :  { %7369 = vmatprep.subr.bf16.mxu0 %v10119_v27 }
 0x77a   :  { %7329 = vmatpush2.bf16.msra.mxu1 %v9990_v59  ;;  %v11299_v59 = vld [vmem:[#allocation11 + $0x280] ss:$16 sps:$4 sm:$0xff]  }
 0x77b   :  { %7370 = vmatpush2.bf16.msra.mxu0 %v10118_v53  ;;  %7330 = vmatprep.subr.bf16.mxu1 %v9983_v19  ;;  %v11307_v19 = vld [vmem:[#allocation11 + $0x264] ss:$16 sps:$4 sm:$0xff]  }
 0x77c   :  { %7371 = vmatprep.subr.bf16.mxu0 %v10111_v55  ;;  %v11284_v55 = vld [vmem:[#allocation11 + $0x60] ss:$16 sps:$4 sm:$0xff]  }
 0x77e   :  { %7331 = vmatpush2.bf16.msra.mxu1 %v9982_v4  ;;  %v11298_v4 = vld [vmem:[#allocation11 + $0x24] ss:$16 sps:$4 sm:$0xff]  }
 0x77f   :  { %7372 = vmatpush2.bf16.msra.mxu0 %v10110_v30  ;;  %7332 = vmatprep.subr.bf16.mxu1 %v9975_v39  ;;  %v11311_v30 = vld [vmem:[#allocation11 + $0x240] ss:$16 sps:$4 sm:$0xff]   ;;  %v11319_v39 = vld [vmem:[#allocation11 + $0x224] ss:$16 sps:$4 sm:$0xff]  }
 0x780   :  { %7373 = vmatprep.subr.bf16.mxu0 %v10103_v62  ;;  %v11296_v62 = vld [vmem:[#allocation11 + $0x20] ss:$16 sps:$4 sm:$0xff]  }
 0x782   :  { %7333 = vmatpush2.bf16.msra.mxu1 %v9974_v8  ;;  %v11310_v8 = vld [vmem:[#allocation11 + $0x1e4] ss:$16 sps:$4 sm:$0xff]  }
 0x783   :  { %7374 = vmatpush2.bf16.msra.mxu0 %v10102_v22  ;;  %7334 = vmatprep.subr.bf16.mxu1 %v9967_v23  ;;  %v11323_v22 = vld [vmem:[#allocation11 + $0x200] ss:$16 sps:$4 sm:$0xff]   ;;  %v11331_v23 = vld [vmem:[#allocation11 + $0x3e4] ss:$16 sps:$4 sm:$0xff]  }
 0x784   :  { %7375 = vmatprep.subr.bf16.mxu0 %v10095_v28  ;;  %v11308_v28 = vld [vmem:[#allocation11 + $0x1e0] ss:$16 sps:$4 sm:$0xff]  }
 0x786   :  { %7335 = vmatpush2.bf16.msra.mxu1 %v9966_v21  ;;  %v11322_v21 = vld [vmem:[#allocation11 + $0x1a4] ss:$16 sps:$4 sm:$0xff]  }
 0x787   :  { %7376 = vmatpush2.bf16.msra.mxu0 %v10094_v43  ;;  %7336 = vmatprep.subr.bf16.mxu1 %v9959_v11  ;;  %v11335_v43 = vld [vmem:[#allocation11 + $0x3c0] ss:$16 sps:$4 sm:$0xff]   ;;  %v11343_v11 = vld [vmem:[#allocation11 + $0x3a4] ss:$16 sps:$4 sm:$0xff]  }
 0x788   :  { %7377 = vmatprep.subr.bf16.mxu0 %v10087_v34  ;;  %v11320_v34 = vld [vmem:[#allocation11 + $0x1a0] ss:$16 sps:$4 sm:$0xff]  }
 0x78a   :  { %7337 = vmatpush2.bf16.msra.mxu1 %v9958_v58  ;;  %v11328_v58 = vld [vmem:[#allocation11 + $0x184] ss:$16 sps:$4 sm:$0xff]  }
 0x78b   :  { %7378 = vmatpush2.bf16.msra.mxu0 %v10086_v48  ;;  %9040 = vmatprep.subr.bf16.mxu1 %v11271_v12  ;;  %v11341_v48 = vld [vmem:[#allocation11 + $0x3a0] ss:$16 sps:$4 sm:$0xff]   ;;  %v11349_v12 = vld [vmem:[#allocation11 + $0x384] ss:$16 sps:$4 sm:$0xff]  }
 0x78c   :  { %9081 = vmatprep.subr.bf16.mxu0 %v11283_v56  ;;  %v11326_v56 = vld [vmem:[#allocation11 + $0x180] ss:$16 sps:$4 sm:$0xff]  }
 0x78d   :  { %7339 = vmatmul.mubr.bf16.vlgmr.msra.gmra.mxu1 %v15612_v13  ;;  %v15637_v57 = vpop.f32.mrf.mxu1  ;;  %v15639_v47 = vpop.f32.mrf.mxu0 }
 0x78e   :  { %7380 = vmatmul.mubr.bf16.vlgmr.msra.gmra.mxu0 %v15614_v7  ;;  %9041 = vmatpush1.bf16.msra.mxu1 %v11269_v50  ;;  %v7447_v7 = vrot.slane %v15649_v32, %v15634_v24  ;;  %v15657_v50 = vsub.s32 0, %v15943_v33 }
 0x78f   :  { %v7096_v35 = vpop.f32.mrf.mxu1  ;;  %v7137_v13 = vpop.f32.mrf.mxu0  ;;  %9042 = vmatprep.subr.bf16.mxu1 %v11274_v25  ;;  %9082 = vmatpush1.bf16.msra.mxu0 %v11281_v36  ;;  %v11334_v25 = vld [vmem:[#allocation11 + $0x164] ss:$16 sps:$4 sm:$0xff]   ;;  %v11347_v36 = vld [vmem:[#allocation11 + $0x380] ss:$16 sps:$4 sm:$0xff]  }
 0x790   :  { %v7138_v49 = vadd.f32 %v7137_v13, %v7096_v35  ;;  %9083 = vmatprep.subr.bf16.mxu0 %v11289_v60  ;;  %v11355_v60 = vld [vmem:[#allocation11 + $0x364] ss:$16 sps:$4 sm:$0xff]   ;;  %v7393_v35 = vrot.slane %v15641_v40, %v15657_v50 }
 0x791   :  { %v7098_v37 = vpop.f32.mrf.mxu1  ;;  %v7139_v45 = vpop.f32.mrf.mxu0  ;;  %v11340_v13 = vld [vmem:[#allocation11 + $0x144] ss:$16 sps:$4 sm:$0xff]  }
 0x792   :  { %v7431_v46 = vmul.f32 %v7397_v63, %v7138_v49  ;;  %9043 = vmatpush1.bf16.msra.mxu1 %v11272_v17  ;;  %v11332_v63 = vld [vmem:[#allocation11 + $0x160] ss:$16 sps:$4 sm:$0xff]   ;;  %v7136_v17 = vadd.f32 %v15639_v47, %v15637_v57  ;;  %v11346_v37 = vld [vmem:[#allocation11 + $0x124] ss:$16 sps:$4 sm:$0xff]  }
 0x793   :  { %v7099_v0 = vpop.f32.mrf.mxu1  ;;  %v7140_v26 = vpop.f32.mrf.mxu0  ;;  %9044 = vmatprep.subr.bf16.mxu1 %v11277_v61  ;;  %9084 = vmatpush1.bf16.msra.mxu0 %v11287_v16  ;;  %v11353_v61 = vld [vmem:[#allocation11 + $0x360] ss:$16 sps:$4 sm:$0xff]   ;;  %v11358_v16 = vld [vmem:[#allocation11 + $0x344] ss:$16 sps:$4 sm:$0xff]  }
 0x794   :  { %v7481_v27 = vadd.f32 %v7447_v7, %v7431_v46  ;;  %9085 = vmatprep.subr.bf16.mxu0 %v11295_v5  ;;  %v11338_v49 = vld [vmem:[#allocation11 + $0x140] ss:$16 sps:$4 sm:$0xff]   ;;  %v7430_v7 = vmul.f32 %v7393_v35, %v7136_v17  ;;  %v7443_v5 = vrot.slane %v15649_v32, %v15657_v50  ;;  %v11361_v57 = vld [vmem:[#allocation11 + $0x324] ss:$16 sps:$4 sm:$0xff]  }
 0x795   :  { %v11356_v45 = vld [vmem:[#allocation11 + $0x340] ss:$16 sps:$4 sm:$0xff]   ;;  %v11364_v26 = vld [vmem:[#allocation11 + $0x304] ss:$16 sps:$4 sm:$0xff]  }
 0x796   :  { %9045 = vmatpush1.bf16.msra.mxu1 %v11275_v20  ;;  %v7489_v18 = vmax.f32 %v7481_v27, 0.0  ;;  %v11344_v47 = vld [vmem:[#allocation11 + $0x120] ss:$16 sps:$4 sm:$0xff]   ;;  %v7480_v46 = vadd.f32 %v7443_v5, %v7430_v7  ;;  %v11352_v20 = vld [vmem:[#allocation11 + $0x104] ss:$16 sps:$4 sm:$0xff]  }
 0x797   :  { %9046 = vmatprep.subr.bf16.mxu1 %v11280_v52  ;;  %9086 = vmatpush1.bf16.msra.mxu0 %v11293_v31  ;;  %v11359_v0 = vld [vmem:[#allocation11 + $0x320] ss:$16 sps:$4 sm:$0xff]   ;;  %v11427_v35 = vld [vmem:[#allocation11 + $0x6a4] ss:$16 sps:$4 sm:$0xff]  }
 0x798   :  { %v15653_v53 = vpack.c.bf16 %v7489_v18, %v7489_v18  ;;  %9087 = vmatprep.subr.bf16.mxu0 %v11301_v3  ;;  %v11350_v52 = vld [vmem:[#allocation11 + $0x100] ss:$16 sps:$4 sm:$0xff]   ;;  %v7488_v31 = vmax.f32 %v7480_v46, 0.0  ;;  %v11367_v3 = vld [vmem:[#allocation11 + $0x4e4] ss:$16 sps:$4 sm:$0xff]  }
 0x799   :  { %v11362_v27 = vld [vmem:[#allocation11 + $0x300] ss:$16 sps:$4 sm:$0xff]   ;;  %v11415_v18 = vld [vmem:[#allocation11 + $0x6e4] ss:$16 sps:$4 sm:$0xff]  }
 0x79a   :  { %9047 = vmatpush1.bf16.msra.mxu1 %v11278_v6  ;;  %9072 = vmatprep.mubr.bf16.mxu1 %v15653_v53  ;;  %v15666_v6 = vsub.s32 2, %v15943_v33  ;;  %v11419_v17 = vld [vmem:[#allocation11 + $0x6c0] ss:$16 sps:$4 sm:$0xff]   ;;  %v11388_v5 = vld [vmem:[#allocation11 + $0x404] ss:$16 sps:$4 sm:$0xff]  }
 0x79b   :  { %9048 = vmatprep.subr.bf16.mxu1 %v11286_v1  ;;  %9088 = vmatpush1.bf16.msra.mxu0 %v11299_v59  ;;  %v15669_v1 = vsub.s32 3, %v15943_v33  ;;  %v11365_v59 = vld [vmem:[#allocation11 + $0x4e0] ss:$16 sps:$4 sm:$0xff]  }
 0x79c   :  { %9089 = vmatprep.subr.bf16.mxu0 %v11307_v19  ;;  %v15671_v19 = vpack.c.bf16 %v7488_v31, %v7488_v31  ;;  %v11383_v7 = vld [vmem:[#allocation11 + $0x420] ss:$16 sps:$4 sm:$0xff]   ;;  %v11451_v31 = vld [vmem:[#allocation11 + $0x624] ss:$16 sps:$4 sm:$0xff]  }
 0x79d   :  { %v11437_v46 = vld [vmem:[#allocation11 + $0x660] ss:$16 sps:$4 sm:$0xff]  }
 0x79e   :  { %9049 = vmatpush1.bf16.msra.mxu1 %v11284_v55  ;;  %v11370_v55 = vld [vmem:[#allocation11 + $0x4c4] ss:$16 sps:$4 sm:$0xff]  }
 0x79f   :  { %9050 = vmatprep.subr.bf16.mxu1 %v11292_v51  ;;  %9090 = vmatpush1.bf16.msra.mxu0 %v11305_v38  ;;  %v7401_v51 = vrot.slane %v15641_v40, %v15666_v6 }
 0x7a0   :  { %9091 = vmatprep.subr.bf16.mxu0 %v11313_v9 }
 0x7a2   :  { %9051 = vmatpush1.bf16.msra.mxu1 %v11290_v14 }
 0x7a3   :  { %9052 = vmatprep.subr.bf16.mxu1 %v11298_v4  ;;  %9092 = vmatpush1.bf16.msra.mxu0 %v11311_v30  ;;  %v7451_v4 = vrot.slane %v15649_v32, %v15666_v6  ;;  %v7405_v30 = vrot.slane %v15641_v40, %v15669_v1 }
 0x7a4   :  { %9093 = vmatprep.subr.bf16.mxu0 %v11319_v39  ;;  %v11368_v39 = vld [vmem:[#allocation11 + $0x4c0] ss:$16 sps:$4 sm:$0xff]  }
 0x7a6   :  { %9053 = vmatpush1.bf16.msra.mxu1 %v11296_v62 }
 0x7a7   :  { %9054 = vmatprep.subr.bf16.mxu1 %v11304_v41  ;;  %9094 = vmatpush1.bf16.msra.mxu0 %v11317_v15  ;;  %v11373_v15 = vld [vmem:[#allocation11 + $0x4a4] ss:$16 sps:$4 sm:$0xff]  }
 0x7a8   :  { %9095 = vmatprep.subr.bf16.mxu0 %v11325_v2 }
 0x7aa   :  { %9055 = vmatpush1.bf16.msra.mxu1 %v11302_v42 }
 0x7ab   :  { %9056 = vmatprep.subr.bf16.mxu1 %v11310_v8  ;;  %9096 = vmatpush1.bf16.msra.mxu0 %v11323_v22  ;;  %v7455_v8 = vrot.slane %v15649_v32, %v15669_v1 }
 0x7ac   :  { %9097 = vmatprep.subr.bf16.mxu0 %v11331_v23 }
 0x7ae   :  { %9057 = vmatpush2.bf16.msra.mxu1 %v11308_v28 }
 0x7af   :  { %9058 = vmatprep.subr.bf16.mxu1 %v11316_v10  ;;  %9098 = vmatpush2.bf16.msra.mxu0 %v11329_v44  ;;  %v11371_v44 = vld [vmem:[#allocation11 + $0x4a0] ss:$16 sps:$4 sm:$0xff]  }
 0x7b0   :  { %9099 = vmatprep.subr.bf16.mxu0 %v11337_v54 }
 0x7b2   :  { %9059 = vmatpush2.bf16.msra.mxu1 %v11314_v29 }
 0x7b3   :  { %9060 = vmatprep.subr.bf16.mxu1 %v11322_v21  ;;  %9100 = vmatpush2.bf16.msra.mxu0 %v11335_v43  ;;  %v11376_v21 = vld [vmem:[#allocation11 + $0x484] ss:$16 sps:$4 sm:$0xff]  }
 0x7b4   :  { %9101 = vmatprep.subr.bf16.mxu0 %v11343_v11 }
 0x7b6   :  { %9061 = vmatpush2.bf16.msra.mxu1 %v11320_v34 }
 0x7b7   :  { %9062 = vmatprep.subr.bf16.mxu1 %v11328_v58  ;;  %9102 = vmatpush2.bf16.msra.mxu0 %v11341_v48  ;;  %v11374_v58 = vld [vmem:[#allocation11 + $0x480] ss:$16 sps:$4 sm:$0xff]   ;;  %v11379_v48 = vld [vmem:[#allocation11 + $0x464] ss:$16 sps:$4 sm:$0xff]  }
 0x7b8   :  { %9103 = vmatprep.subr.bf16.mxu0 %v11349_v12 }
 0x7ba   :  { %9063 = vmatpush2.bf16.msra.mxu1 %v11326_v56  ;;  %v11413_v56 = vld [vmem:[#allocation11 + $0x6e0] ss:$16 sps:$4 sm:$0xff]  }
 0x7bb   :  { %9064 = vmatprep.subr.bf16.mxu1 %v11334_v25  ;;  %9104 = vmatpush2.bf16.msra.mxu0 %v11347_v36  ;;  %v11421_v36 = vld [vmem:[#allocation11 + $0x6c4] ss:$16 sps:$4 sm:$0xff]  }
 0x7bc   :  { %9105 = vmatprep.subr.bf16.mxu0 %v11355_v60  ;;  %v11377_v60 = vld [vmem:[#allocation11 + $0x460] ss:$16 sps:$4 sm:$0xff]  }
 0x7be   :  { %9065 = vmatpush2.bf16.msra.mxu1 %v11332_v63  ;;  %v11382_v63 = vld [vmem:[#allocation11 + $0x444] ss:$16 sps:$4 sm:$0xff]  }
 0x7bf   :  { %9066 = vmatprep.subr.bf16.mxu1 %v11340_v13  ;;  %9106 = vmatpush2.bf16.msra.mxu0 %v11353_v61  ;;  %v11380_v13 = vld [vmem:[#allocation11 + $0x440] ss:$16 sps:$4 sm:$0xff]   ;;  %v11385_v61 = vld [vmem:[#allocation11 + $0x424] ss:$16 sps:$4 sm:$0xff]  }
 0x7c0   :  { %9107 = vmatprep.subr.bf16.mxu0 %v11358_v16  ;;  %v11425_v16 = vld [vmem:[#allocation11 + $0x6a0] ss:$16 sps:$4 sm:$0xff]  }
 0x7c2   :  { %9067 = vmatpush2.bf16.msra.mxu1 %v11338_v49  ;;  %v11433_v49 = vld [vmem:[#allocation11 + $0x684] ss:$16 sps:$4 sm:$0xff]  }
 0x7c3   :  { %9068 = vmatprep.subr.bf16.mxu1 %v11346_v37  ;;  %9108 = vmatpush2.bf16.msra.mxu0 %v11356_v45  ;;  %v11431_v37 = vld [vmem:[#allocation11 + $0x680] ss:$16 sps:$4 sm:$0xff]   ;;  %v11439_v45 = vld [vmem:[#allocation11 + $0x664] ss:$16 sps:$4 sm:$0xff]  }
 0x7c4   :  { %9109 = vmatprep.subr.bf16.mxu0 %v11361_v57  ;;  %v11386_v57 = vld [vmem:[#allocation11 + $0x400] ss:$16 sps:$4 sm:$0xff]  }
 0x7c6   :  { %9069 = vmatpush2.bf16.msra.mxu1 %v11344_v47  ;;  %v11391_v47 = vld [vmem:[#allocation11 + $0x5e4] ss:$16 sps:$4 sm:$0xff]  }
 0x7c7   :  { %9070 = vmatprep.subr.bf16.mxu1 %v11352_v20  ;;  %9110 = vmatpush2.bf16.msra.mxu0 %v11359_v0  ;;  %v11445_v20 = vld [vmem:[#allocation11 + $0x644] ss:$16 sps:$4 sm:$0xff]   ;;  %v11389_v0 = vld [vmem:[#allocation11 + $0x5e0] ss:$16 sps:$4 sm:$0xff]  }
 0x7c8   :  { %9111 = vmatprep.subr.bf16.mxu0 %v11364_v26  ;;  %v11394_v26 = vld [vmem:[#allocation11 + $0x5c4] ss:$16 sps:$4 sm:$0xff]  }
 0x7ca   :  { %9071 = vmatpush2.bf16.msra.mxu1 %v11350_v52  ;;  %v11443_v52 = vld [vmem:[#allocation11 + $0x640] ss:$16 sps:$4 sm:$0xff]  }
 0x7cb   :  { %9112 = vmatpush2.bf16.msra.mxu0 %v11362_v27  ;;  %9122 = vmatprep.subr.bf16.mxu1 %v11367_v3  ;;  %v11392_v27 = vld [vmem:[#allocation11 + $0x5c0] ss:$16 sps:$4 sm:$0xff]   ;;  %v11397_v3 = vld [vmem:[#allocation11 + $0x5a4] ss:$16 sps:$4 sm:$0xff]  }
 0x7cc   :  { %9163 = vmatprep.subr.bf16.mxu0 %v11415_v18  ;;  %v11449_v18 = vld [vmem:[#allocation11 + $0x620] ss:$16 sps:$4 sm:$0xff]  }
 0x7cd   :  { %v7176_v38 = vpop.f32.mrf.mxu1  ;;  %v7217_v9 = vpop.f32.mrf.mxu0  ;;  %9073 = vmatmul.mubr.bf16.vlgmr.msra.gmra.mxu1 %v15671_v19 }
 0x7ce   :  { %v7218_v14 = vadd.f32 %v7217_v9, %v7176_v38  ;;  %9123 = vmatpush1.bf16.msra.mxu1 %v11365_v59  ;;  %v11457_v59 = vld [vmem:[#allocation11 + $0x604] ss:$16 sps:$4 sm:$0xff]   ;;  %v11455_v38 = vld [vmem:[#allocation11 + $0x600] ss:$16 sps:$4 sm:$0xff]  }
 0x7cf   :  { %v7178_v62 = vpop.f32.mrf.mxu1  ;;  %v7219_v41 = vpop.f32.mrf.mxu0  ;;  %9124 = vmatprep.subr.bf16.mxu1 %v11370_v55  ;;  %v11395_v55 = vld [vmem:[#allocation11 + $0x5a0] ss:$16 sps:$4 sm:$0xff]   ;;  %v11463_v9 = vld [vmem:[#allocation11 + $0x7e4] ss:$16 sps:$4 sm:$0xff]  }
 0x7d0   :  { %v7432_v2 = vmul.f32 %v7401_v51, %v7218_v14  ;;  %v7220_v42 = vadd.f32 %v7219_v41, %v7178_v62  ;;  %v11400_v51 = vld [vmem:[#allocation11 + $0x584] ss:$16 sps:$4 sm:$0xff]   ;;  %v11398_v14 = vld [vmem:[#allocation11 + $0x580] ss:$16 sps:$4 sm:$0xff]  }
 0x7d1   :  { %v7180_v22 = vpop.f32.mrf.mxu1  ;;  %v7221_v23 = vpop.f32.mrf.mxu0  ;;  %v11401_v62 = vld [vmem:[#allocation11 + $0x560] ss:$16 sps:$4 sm:$0xff]   ;;  %v11406_v41 = vld [vmem:[#allocation11 + $0x544] ss:$16 sps:$4 sm:$0xff]  }
 0x7d2   :  { %v7482_v28 = vadd.f32 %v7451_v4, %v7432_v2  ;;  %v7433_v10 = vmul.f32 %v7405_v30, %v7220_v42  ;;  %9125 = vmatpush1.bf16.msra.mxu1 %v11368_v39  ;;  %v11403_v4 = vld [vmem:[#allocation11 + $0x564] ss:$16 sps:$4 sm:$0xff]   ;;  %v11461_v30 = vld [vmem:[#allocation11 + $0x7e0] ss:$16 sps:$4 sm:$0xff]  }
 0x7d3   :  { %v7181_v54 = vpop.f32.mrf.mxu1  ;;  %v7222_v29 = vpop.f32.mrf.mxu0  ;;  %9126 = vmatprep.subr.bf16.mxu1 %v11373_v15  ;;  %v11469_v39 = vld [vmem:[#allocation11 + $0x7c4] ss:$16 sps:$4 sm:$0xff]   ;;  %v11467_v15 = vld [vmem:[#allocation11 + $0x7c0] ss:$16 sps:$4 sm:$0xff]  }
 0x7d4   :  { %v7483_v43 = vadd.f32 %v7455_v8, %v7433_v10  ;;  %v7490_v11 = vmax.f32 %v7482_v28, 0.0  ;;  %v11475_v2 = vld [vmem:[#allocation11 + $0x7a4] ss:$16 sps:$4 sm:$0xff]   ;;  %v11404_v42 = vld [vmem:[#allocation11 + $0x540] ss:$16 sps:$4 sm:$0xff]  }
 0x7d5   :  { %v11409_v8 = vld [vmem:[#allocation11 + $0x524] ss:$16 sps:$4 sm:$0xff]   ;;  %v11473_v22 = vld [vmem:[#allocation11 + $0x7a0] ss:$16 sps:$4 sm:$0xff]  }
 0x7d6   :  { %v7491_v34 = vmax.f32 %v7483_v43, 0.0  ;;  %9127 = vmatpush1.bf16.msra.mxu1 %v11371_v44  ;;  %v15684_v25 = vpack.c.bf16 %v7490_v11, %v7490_v11  ;;  %v11481_v23 = vld [vmem:[#allocation11 + $0x784] ss:$16 sps:$4 sm:$0xff]   ;;  %v11407_v28 = vld [vmem:[#allocation11 + $0x520] ss:$16 sps:$4 sm:$0xff]   ;;  %v7408_v11 = vsub.s32 4, %v15943_v33 }
 0x7d7   :  { %9128 = vmatprep.subr.bf16.mxu1 %v11376_v21  ;;  %v11412_v10 = vld [vmem:[#allocation11 + $0x504] ss:$16 sps:$4 sm:$0xff]   ;;  %v11479_v44 = vld [vmem:[#allocation11 + $0x780] ss:$16 sps:$4 sm:$0xff]   ;;  %v11418_v21 = vld [vmem:[#allocation11 + $0xec] ss:$16 sps:$4 sm:$0xff]  }
 0x7d8   :  { %v15682_v12 = vpack.c.bf16 %v7491_v34, %v7491_v34  ;;  %v11487_v54 = vld [vmem:[#allocation11 + $0x764] ss:$16 sps:$4 sm:$0xff]   ;;  %v11410_v29 = vld [vmem:[#allocation11 + $0x500] ss:$16 sps:$4 sm:$0xff]  }
 0x7d9   :  { %v11485_v43 = vld [vmem:[#allocation11 + $0x760] ss:$16 sps:$4 sm:$0xff]   ;;  %v11493_v34 = vld [vmem:[#allocation11 + $0x744] ss:$16 sps:$4 sm:$0xff]  }
 0x7da   :  { %9113 = vmatprep.mubr.bf16.mxu0 %v15682_v12  ;;  %9129 = vmatpush1.bf16.msra.mxu1 %v11374_v58  ;;  %v7412_v58 = vsub.s32 5, %v15943_v33 }
 0x7db   :  { %9114 = vmatmul.mubr.bf16.vlgmr.msra.gmra.mxu0 %v15684_v25  ;;  %9130 = vmatprep.subr.bf16.mxu1 %v11379_v48  ;;  %v11491_v48 = vld [vmem:[#allocation11 + $0x740] ss:$16 sps:$4 sm:$0xff]  }
 0x7dc   :  { %9164 = vmatpush1.bf16.msra.mxu0 %v11413_v56 }
 0x7dd   :  { %9165 = vmatprep.subr.bf16.mxu0 %v11421_v36  ;;  %v7409_v36 = vrot.slane %v15641_v40, %v7408_v11 }
 0x7de   :  { %9131 = vmatpush1.bf16.msra.mxu1 %v11377_v60  ;;  %v11499_v60 = vld [vmem:[#allocation11 + $0x724] ss:$16 sps:$4 sm:$0xff]  }
 0x7df   :  { %9132 = vmatprep.subr.bf16.mxu1 %v11382_v63 }
 0x7e0   :  { %9166 = vmatpush1.bf16.msra.mxu0 %v11419_v17 }
 0x7e1   :  { %9167 = vmatprep.subr.bf16.mxu0 %v11427_v35  ;;  %v7459_v35 = vrot.slane %v15649_v32, %v7408_v11  ;;  %v11490_v11 = vld [vmem:[#allocation11 + $0x16c] ss:$16 sps:$4 sm:$0xff]  }
 0x7e2   :  { %9133 = vmatpush1.bf16.msra.mxu1 %v11380_v13 }
 0x7e3   :  { %9134 = vmatprep.subr.bf16.mxu1 %v11385_v61  ;;  %v7413_v61 = vrot.slane %v15641_v40, %v7412_v58 }
 0x7e4   :  { %9168 = vmatpush1.bf16.msra.mxu0 %v11425_v16 }
 0x7e5   :  { %9169 = vmatprep.subr.bf16.mxu0 %v11433_v49  ;;  %v11497_v49 = vld [vmem:[#allocation11 + $0x720] ss:$16 sps:$4 sm:$0xff]  }
 0x7e6   :  { %9135 = vmatpush1.bf16.msra.mxu1 %v11383_v7 }
 0x7e7   :  { %9136 = vmatprep.subr.bf16.mxu1 %v11388_v5 }
 0x7e8   :  { %9170 = vmatpush1.bf16.msra.mxu0 %v11431_v37  ;;  %v7463_v37 = vrot.slane %v15649_v32, %v7412_v58  ;;  %v7416_v58 = vsub.s32 6, %v15943_v33 }
 0x7e9   :  { %9171 = vmatprep.subr.bf16.mxu0 %v11439_v45 }
 0x7ea   :  { %9137 = vmatpush1.bf16.msra.mxu1 %v11386_v57  ;;  %v11505_v57 = vld [vmem:[#allocation11 + $0x704] ss:$16 sps:$4 sm:$0xff]  }
 0x7eb   :  { %9138 = vmatprep.subr.bf16.mxu1 %v11391_v47 }
 0x7ec   :  { %9172 = vmatpush1.bf16.msra.mxu0 %v11437_v46 }
 0x7ed   :  { %9173 = vmatprep.subr.bf16.mxu0 %v11445_v20 }
 0x7ee   :  { %9139 = vmatpush2.bf16.msra.mxu1 %v11389_v0 }
 0x7ef   :  { %9140 = vmatprep.subr.bf16.mxu1 %v11394_v26 }
 0x7f0   :  { %9174 = vmatpush1.bf16.msra.mxu0 %v11443_v52  ;;  %v11503_v52 = vld [vmem:[#allocation11 + $0x700] ss:$16 sps:$4 sm:$0xff]  }
 0x7f1   :  { %9175 = vmatprep.subr.bf16.mxu0 %v11451_v31 }
 0x7f2   :  { %9141 = vmatpush2.bf16.msra.mxu1 %v11392_v27  ;;  %v11511_v27 = vld [vmem:[#allocation11 + $0x2ec] ss:$16 sps:$4 sm:$0xff]  }
 0x7f3   :  { %9142 = vmatprep.subr.bf16.mxu1 %v11397_v3 }
 0x7f4   :  { %9176 = vmatpush1.bf16.msra.mxu0 %v11449_v18 }
 0x7f5   :  { %9177 = vmatprep.subr.bf16.mxu0 %v11457_v59 }
 0x7f6   :  { %9143 = vmatpush2.bf16.msra.mxu1 %v11395_v55  ;;  %v11416_v55 = vld [vmem:[#allocation11 + $0xe8] ss:$16 sps:$4 sm:$0xff]  }
 0x7f7   :  { %9144 = vmatprep.subr.bf16.mxu1 %v11400_v51 }
 0x7f8   :  { %9178 = vmatpush1.bf16.msra.mxu0 %v11455_v38  ;;  %v11424_v38 = vld [vmem:[#allocation11 + $0xcc] ss:$16 sps:$4 sm:$0xff]  }
 0x7f9   :  { %9179 = vmatprep.subr.bf16.mxu0 %v11463_v9  ;;  %v11422_v9 = vld [vmem:[#allocation11 + $0xc8] ss:$16 sps:$4 sm:$0xff]  }
 0x7fa   :  { %9145 = vmatpush2.bf16.msra.mxu1 %v11398_v14  ;;  %v11430_v14 = vld [vmem:[#allocation11 + $0xac] ss:$16 sps:$4 sm:$0xff]  }
 0x7fb   :  { %9146 = vmatprep.subr.bf16.mxu1 %v11403_v4  ;;  %v11428_v4 = vld [vmem:[#allocation11 + $0xa8] ss:$16 sps:$4 sm:$0xff]  }
 0x7fc   :  { %9180 = vmatpush2.bf16.msra.mxu0 %v11461_v30  ;;  %v11436_v30 = vld [vmem:[#allocation11 + $0x8c] ss:$16 sps:$4 sm:$0xff]  }
 0x7fd   :  { %9181 = vmatprep.subr.bf16.mxu0 %v11469_v39  ;;  %v11434_v39 = vld [vmem:[#allocation11 + $0x88] ss:$16 sps:$4 sm:$0xff]  }
 0x7fe   :  { %9147 = vmatpush2.bf16.msra.mxu1 %v11401_v62  ;;  %v11442_v62 = vld [vmem:[#allocation11 + $0x6c] ss:$16 sps:$4 sm:$0xff]  }
 0x7ff   :  { %9148 = vmatprep.subr.bf16.mxu1 %v11406_v41  ;;  %v11440_v41 = vld [vmem:[#allocation11 + $0x68] ss:$16 sps:$4 sm:$0xff]  }
 0x800   :  { %9182 = vmatpush2.bf16.msra.mxu0 %v11467_v15  ;;  %v11448_v15 = vld [vmem:[#allocation11 + $0x4c] ss:$16 sps:$4 sm:$0xff]  }
 0x801   :  { %9183 = vmatprep.subr.bf16.mxu0 %v11475_v2  ;;  %v11446_v2 = vld [vmem:[#allocation11 + $0x48] ss:$16 sps:$4 sm:$0xff]  }
 0x802   :  { %9149 = vmatpush2.bf16.msra.mxu1 %v11404_v42  ;;  %v11454_v42 = vld [vmem:[#allocation11 + $0x2c] ss:$16 sps:$4 sm:$0xff]  }
 0x803   :  { %9150 = vmatprep.subr.bf16.mxu1 %v11409_v8  ;;  %v11460_v8 = vld [vmem:[#allocation11 + $0xc] ss:$16 sps:$4 sm:$0xff]  }
 0x804   :  { %9184 = vmatpush2.bf16.msra.mxu0 %v11473_v22  ;;  %v11458_v22 = vld [vmem:[#allocation11 + $0x8] ss:$16 sps:$4 sm:$0xff]  }
 0x805   :  { %9185 = vmatprep.subr.bf16.mxu0 %v11481_v23  ;;  %v11466_v23 = vld [vmem:[#allocation11 + $0x1ec] ss:$16 sps:$4 sm:$0xff]  }
 0x806   :  { %9151 = vmatpush2.bf16.msra.mxu1 %v11407_v28  ;;  %v11464_v28 = vld [vmem:[#allocation11 + $0x1e8] ss:$16 sps:$4 sm:$0xff]  }
 0x807   :  { %9152 = vmatprep.subr.bf16.mxu1 %v11412_v10  ;;  %v11472_v10 = vld [vmem:[#allocation11 + $0x1cc] ss:$16 sps:$4 sm:$0xff]  }
 0x808   :  { %9186 = vmatpush2.bf16.msra.mxu0 %v11479_v44  ;;  %v11470_v44 = vld [vmem:[#allocation11 + $0x1c8] ss:$16 sps:$4 sm:$0xff]  }
 0x809   :  { %9187 = vmatprep.subr.bf16.mxu0 %v11487_v54  ;;  %v11478_v54 = vld [vmem:[#allocation11 + $0x1ac] ss:$16 sps:$4 sm:$0xff]  }
 0x80a   :  { %9153 = vmatpush2.bf16.msra.mxu1 %v11410_v29  ;;  %v11476_v29 = vld [vmem:[#allocation11 + $0x1a8] ss:$16 sps:$4 sm:$0xff]  }
 0x80b   :  { %9204 = vmatprep.subr.bf16.mxu1 %v11418_v21  ;;  %v11484_v21 = vld [vmem:[#allocation11 + $0x18c] ss:$16 sps:$4 sm:$0xff]  }
 0x80c   :  { %9188 = vmatpush2.bf16.msra.mxu0 %v11485_v43  ;;  %v11482_v43 = vld [vmem:[#allocation11 + $0x188] ss:$16 sps:$4 sm:$0xff]  }
 0x80d   :  { %v7258_v56 = vpop.f32.mrf.mxu1  ;;  %9189 = vmatprep.subr.bf16.mxu0 %v11493_v34  ;;  %v11488_v34 = vld [vmem:[#allocation11 + $0x168] ss:$16 sps:$4 sm:$0xff]  }
 0x80e   :  { %v7299_v63 = vpop.f32.mrf.mxu0 }
 0x80f   :  { %v7300_v17 = vadd.f32 %v7299_v63, %v7258_v56  ;;  %v7260_v13 = vpop.f32.mrf.mxu1  ;;  %v7420_v56 = vsub.s32 7, %v15943_v33  ;;  %v11494_v63 = vld [vmem:[#allocation11 + $0x148] ss:$16 sps:$4 sm:$0xff]  }
 0x810   :  { %v7301_v16 = vpop.f32.mrf.mxu0  ;;  %9190 = vmatpush2.bf16.msra.mxu0 %v11491_v48  ;;  %v11496_v48 = vld [vmem:[#allocation11 + $0x14c] ss:$16 sps:$4 sm:$0xff]  }
 0x811   :  { %v7434_v7 = vmul.f32 %v7409_v36, %v7300_v17  ;;  %v7302_v5 = vadd.f32 %v7301_v16, %v7260_v13  ;;  %v7262_v45 = vpop.f32.mrf.mxu1  ;;  %9191 = vmatprep.subr.bf16.mxu0 %v11499_v60  ;;  %v7417_v60 = vrot.slane %v15641_v40, %v7416_v58 }
 0x812   :  { %v7303_v47 = vpop.f32.mrf.mxu0  ;;  %v7471_v45 = vrot.slane %v15649_v32, %v7420_v56 }
 0x813   :  { %v7484_v46 = vadd.f32 %v7459_v35, %v7434_v7  ;;  %v7435_v20 = vmul.f32 %v7413_v61, %v7302_v5  ;;  %v7263_v0 = vpop.f32.mrf.mxu1  ;;  %v11502_v35 = vld [vmem:[#allocation11 + $0x12c] ss:$16 sps:$4 sm:$0xff]   ;;  %v7467_v61 = vrot.slane %v15649_v32, %v7416_v58  ;;  %v11509_v32 = vld [vmem:[#allocation11 + $0x2e8] ss:$16 sps:$4 sm:$0xff]  }
 0x814   :  { %v7304_v26 = vpop.f32.mrf.mxu0  ;;  %9192 = vmatpush2.bf16.msra.mxu0 %v11497_v49  ;;  %v7421_v49 = vrot.slane %v15641_v40, %v7420_v56  ;;  %v11514_v40 = vld [vmem:[#allocation11 + $0x4ec] ss:$16 sps:$4 sm:$0xff]   ;;  %v11554_v56 = vld [vmem:[#allocation11 + $0x408] ss:$16 sps:$4 sm:$0xff]  }
 0x815   :  { %v7485_v31 = vadd.f32 %v7463_v37, %v7435_v20  ;;  %9193 = vmatprep.subr.bf16.mxu0 %v11505_v57  ;;  %v7492_v3 = vmax.f32 %v7484_v46, 0.0  ;;  %v11500_v57 = vld [vmem:[#allocation11 + $0x128] ss:$16 sps:$4 sm:$0xff]   ;;  %v11508_v46 = vld [vmem:[#allocation11 + $0x10c] ss:$16 sps:$4 sm:$0xff]  }
 0x816   :  { %v11556_v58 = vld [vmem:[#allocation11 + $0x40c] ss:$16 sps:$4 sm:$0xff]  }
 0x817   :  { %v7493_v18 = vmax.f32 %v7485_v31, 0.0  ;;  %v15696_v51 = vpack.c.bf16 %v7492_v3, %v7492_v3 }
 0x818   :  { %9194 = vmatpush2.bf16.msra.mxu0 %v11503_v52 }
 0x819   :  { %v15694_v59 = vpack.c.bf16 %v7493_v18, %v7493_v18  ;;  %9245 = vmatprep.subr.bf16.mxu0 %v11511_v27  ;;  %v11506_v27 = vld [vmem:[#allocation11 + $0x108] ss:$16 sps:$4 sm:$0xff]  }
 0x81b   :  { %9154 = vmatprep.mubr.bf16.mxu1 %v15694_v59 }
 0x81c   :  { %9155 = vmatmul.mubr.bf16.vlgmr.msra.gmra.mxu1 %v15696_v51 }
 0x81d   :  { %9205 = vmatpush1.bf16.msra.mxu1 %v11416_v55  ;;  %9236 = vmatprep.mubr.bf16.mxu1 %v15653_v53  ;;  %v11452_v53 = vld [vmem:[#allocation11 + $0x28] ss:$16 sps:$4 sm:$0xff]  }
 0x81e   :  { %9206 = vmatprep.subr.bf16.mxu1 %v11424_v38  ;;  %v11512_v38 = vld [vmem:[#allocation11 + $0x4e8] ss:$16 sps:$4 sm:$0xff]  }
 0x821   :  { %9207 = vmatpush1.bf16.msra.mxu1 %v11422_v9 }
 0x822   :  { %9208 = vmatprep.subr.bf16.mxu1 %v11430_v14  ;;  %v11517_v14 = vld [vmem:[#allocation11 + $0x2cc] ss:$16 sps:$4 sm:$0xff]  }
 0x825   :  { %9209 = vmatpush1.bf16.msra.mxu1 %v11428_v4  ;;  %v11520_v4 = vld [vmem:[#allocation11 + $0x4cc] ss:$16 sps:$4 sm:$0xff]  }
 0x826   :  { %9210 = vmatprep.subr.bf16.mxu1 %v11436_v30  ;;  %v11515_v30 = vld [vmem:[#allocation11 + $0x2c8] ss:$16 sps:$4 sm:$0xff]  }
 0x829   :  { %9211 = vmatpush1.bf16.msra.mxu1 %v11434_v39  ;;  %v11518_v39 = vld [vmem:[#allocation11 + $0x4c8] ss:$16 sps:$4 sm:$0xff]  }
 0x82a   :  { %9212 = vmatprep.subr.bf16.mxu1 %v11442_v62  ;;  %v11523_v62 = vld [vmem:[#allocation11 + $0x2ac] ss:$16 sps:$4 sm:$0xff]  }
 0x82d   :  { %9213 = vmatpush1.bf16.msra.mxu1 %v11440_v41  ;;  %v11526_v41 = vld [vmem:[#allocation11 + $0x4ac] ss:$16 sps:$4 sm:$0xff]  }
 0x82e   :  { %9214 = vmatprep.subr.bf16.mxu1 %v11448_v15  ;;  %v11521_v15 = vld [vmem:[#allocation11 + $0x2a8] ss:$16 sps:$4 sm:$0xff]  }
 0x831   :  { %9215 = vmatpush1.bf16.msra.mxu1 %v11446_v2  ;;  %v11524_v2 = vld [vmem:[#allocation11 + $0x4a8] ss:$16 sps:$4 sm:$0xff]  }
 0x832   :  { %9216 = vmatprep.subr.bf16.mxu1 %v11454_v42  ;;  %v11532_v42 = vld [vmem:[#allocation11 + $0x48c] ss:$16 sps:$4 sm:$0xff]  }
 0x835   :  { %9217 = vmatpush1.bf16.msra.mxu1 %v11452_v53  ;;  %v11527_v53 = vld [vmem:[#allocation11 + $0x288] ss:$16 sps:$4 sm:$0xff]  }
 0x836   :  { %9218 = vmatprep.subr.bf16.mxu1 %v11460_v8  ;;  %v11530_v8 = vld [vmem:[#allocation11 + $0x488] ss:$16 sps:$4 sm:$0xff]  }
 0x839   :  { %9219 = vmatpush1.bf16.msra.mxu1 %v11458_v22  ;;  %v11533_v22 = vld [vmem:[#allocation11 + $0x268] ss:$16 sps:$4 sm:$0xff]  }
 0x83a   :  { %9220 = vmatprep.subr.bf16.mxu1 %v11466_v23  ;;  %v11536_v23 = vld [vmem:[#allocation11 + $0x468] ss:$16 sps:$4 sm:$0xff]  }
 0x83d   :  { %9221 = vmatpush2.bf16.msra.mxu1 %v11464_v28  ;;  %v11541_v28 = vld [vmem:[#allocation11 + $0x24c] ss:$16 sps:$4 sm:$0xff]  }
 0x83e   :  { %9222 = vmatprep.subr.bf16.mxu1 %v11472_v10  ;;  %v11544_v10 = vld [vmem:[#allocation11 + $0x44c] ss:$16 sps:$4 sm:$0xff]  }
 0x841   :  { %9223 = vmatpush2.bf16.msra.mxu1 %v11470_v44  ;;  %v11539_v44 = vld [vmem:[#allocation11 + $0x248] ss:$16 sps:$4 sm:$0xff]  }
 0x842   :  { %9224 = vmatprep.subr.bf16.mxu1 %v11478_v54  ;;  %v11542_v54 = vld [vmem:[#allocation11 + $0x448] ss:$16 sps:$4 sm:$0xff]  }
 0x845   :  { %9225 = vmatpush2.bf16.msra.mxu1 %v11476_v29  ;;  %v11547_v29 = vld [vmem:[#allocation11 + $0x22c] ss:$16 sps:$4 sm:$0xff]  }
 0x846   :  { %9226 = vmatprep.subr.bf16.mxu1 %v11484_v21  ;;  %v11550_v21 = vld [vmem:[#allocation11 + $0x42c] ss:$16 sps:$4 sm:$0xff]  }
 0x849   :  { %9227 = vmatpush2.bf16.msra.mxu1 %v11482_v43  ;;  %v11545_v43 = vld [vmem:[#allocation11 + $0x228] ss:$16 sps:$4 sm:$0xff]  }
 0x84a   :  { %9228 = vmatprep.subr.bf16.mxu1 %v11490_v11  ;;  %v11548_v11 = vld [vmem:[#allocation11 + $0x428] ss:$16 sps:$4 sm:$0xff]  }
 0x84d   :  { %9229 = vmatpush2.bf16.msra.mxu1 %v11488_v34  ;;  %v7340_v36 = vpop.f32.mrf.mxu1  ;;  %v11553_v34 = vld [vmem:[#allocation11 + $0x20c] ss:$16 sps:$4 sm:$0xff]  }
 0x84e   :  { %v7381_v17 = vpop.f32.mrf.mxu0  ;;  %9230 = vmatprep.subr.bf16.mxu1 %v11496_v48  ;;  %v11551_v48 = vld [vmem:[#allocation11 + $0x208] ss:$16 sps:$4 sm:$0xff]  }
 0x84f   :  { %v7382_v13 = vadd.f32 %v7381_v17, %v7340_v36  ;;  %v7342_v16 = vpop.f32.mrf.mxu1  ;;  %v11559_v36 = vld [vmem:[#allocation11 + $0x3ec] ss:$16 sps:$4 sm:$0xff]   ;;  %v11560_v17 = vld [vmem:[#allocation11 + $0x5e8] ss:$16 sps:$4 sm:$0xff]  }
 0x850   :  { %v7383_v7 = vpop.f32.mrf.mxu0 }
 0x851   :  { %v7436_v5 = vmul.f32 %v7417_v60, %v7382_v13  ;;  %v7384_v37 = vadd.f32 %v7383_v7, %v7342_v16  ;;  %9231 = vmatpush2.bf16.msra.mxu1 %v11494_v63  ;;  %v7344_v33 = vpop.f32.mrf.mxu1  ;;  %v11562_v60 = vld [vmem:[#allocation11 + $0x5ec] ss:$16 sps:$4 sm:$0xff]   ;;  %v11557_v63 = vld [vmem:[#allocation11 + $0x3e8] ss:$16 sps:$4 sm:$0xff]  }
 0x852   :  { %v7385_v47 = vpop.f32.mrf.mxu0  ;;  %9232 = vmatprep.subr.bf16.mxu1 %v11502_v35  ;;  %v11565_v35 = vld [vmem:[#allocation11 + $0x3cc] ss:$16 sps:$4 sm:$0xff]   ;;  %v11566_v16 = vld [vmem:[#allocation11 + $0x5c8] ss:$16 sps:$4 sm:$0xff]  }
 0x853   :  { %v7486_v20 = vadd.f32 %v7467_v61, %v7436_v5  ;;  %v7437_v0 = vmul.f32 %v7421_v49, %v7384_v37  ;;  %v7345_v26 = vpop.f32.mrf.mxu1  ;;  %v11568_v13 = vld [vmem:[#allocation11 + $0x5cc] ss:$16 sps:$4 sm:$0xff]   ;;  %v11563_v61 = vld [vmem:[#allocation11 + $0x3c8] ss:$16 sps:$4 sm:$0xff]  }
 0x854   :  { %v7386_v52 = vpop.f32.mrf.mxu0  ;;  %v11571_v49 = vld [vmem:[#allocation11 + $0x3ac] ss:$16 sps:$4 sm:$0xff]   ;;  %v11569_v5 = vld [vmem:[#allocation11 + $0x3a8] ss:$16 sps:$4 sm:$0xff]  }
 0x855   :  { %v7487_v31 = vadd.f32 %v7471_v45, %v7437_v0  ;;  %9233 = vmatpush2.bf16.msra.mxu1 %v11500_v57  ;;  %v7494_v3 = vmax.f32 %v7486_v20, 0.0  ;;  %v11574_v7 = vld [vmem:[#allocation11 + $0x5ac] ss:$16 sps:$4 sm:$0xff]   ;;  %v11572_v37 = vld [vmem:[#allocation11 + $0x5a8] ss:$16 sps:$4 sm:$0xff]  }
 0x856   :  { %9234 = vmatprep.subr.bf16.mxu1 %v11508_v46  ;;  %v11577_v45 = vld [vmem:[#allocation11 + $0x38c] ss:$16 sps:$4 sm:$0xff]   ;;  %v11575_v57 = vld [vmem:[#allocation11 + $0x388] ss:$16 sps:$4 sm:$0xff]  }
 0x857   :  { %v7495_v18 = vmax.f32 %v7487_v31, 0.0  ;;  %v15709_v9 = vpack.c.bf16 %v7494_v3, %v7494_v3  ;;  %v11580_v33 = vld [vmem:[#allocation11 + $0x58c] ss:$16 sps:$4 sm:$0xff]   ;;  %v11578_v47 = vld [vmem:[#allocation11 + $0x588] ss:$16 sps:$4 sm:$0xff]  }
 0x858   :  { %v11583_v46 = vld [vmem:[#allocation11 + $0x36c] ss:$16 sps:$4 sm:$0xff]   ;;  %v11581_v0 = vld [vmem:[#allocation11 + $0x368] ss:$16 sps:$4 sm:$0xff]  }
 0x859   :  { %9235 = vmatpush2.bf16.msra.mxu1 %v11506_v27  ;;  %v15707_v55 = vpack.c.bf16 %v7495_v18, %v7495_v18  ;;  %v11586_v20 = vld [vmem:[#allocation11 + $0x56c] ss:$16 sps:$4 sm:$0xff]   ;;  %v11584_v26 = vld [vmem:[#allocation11 + $0x568] ss:$16 sps:$4 sm:$0xff]  }
 0x85a   :  { %9286 = vmatprep.subr.bf16.mxu1 %v11514_v40  ;;  %v11589_v52 = vld [vmem:[#allocation11 + $0x34c] ss:$16 sps:$4 sm:$0xff]   ;;  %v11587_v3 = vld [vmem:[#allocation11 + $0x348] ss:$16 sps:$4 sm:$0xff]  }
 0x85b   :  { %9195 = vmatprep.mubr.bf16.mxu0 %v15707_v55  ;;  %v11592_v31 = vld [vmem:[#allocation11 + $0x54c] ss:$16 sps:$4 sm:$0xff]   ;;  %v11590_v40 = vld [vmem:[#allocation11 + $0x548] ss:$16 sps:$4 sm:$0xff]  }
 0x85c   :  { %9237 = vmatmul.mubr.bf16.vlgmr.msra.gmra.mxu1 %v15671_v19  ;;  %9196 = vmatmul.mubr.bf16.vlgmr.msra.gmra.mxu0 %v15709_v9  ;;  %v11529_v19 = vld [vmem:[#allocation11 + $0x28c] ss:$16 sps:$4 sm:$0xff]  }
 0x85d   :  { %9246 = vmatpush1.bf16.msra.mxu0 %v11509_v32  ;;  %9287 = vmatpush1.bf16.msra.mxu1 %v11512_v38  ;;  %v11595_v18 = vld [vmem:[#allocation11 + $0x32c] ss:$16 sps:$4 sm:$0xff]  }
 0x85e   :  { %9318 = vmatprep.mubr.bf16.mxu1 %v15694_v59  ;;  %9277 = vmatprep.mubr.bf16.mxu0 %v15682_v12  ;;  %v11535_v59 = vld [vmem:[#allocation11 + $0x26c] ss:$16 sps:$4 sm:$0xff]  }
 0x85f   :  { %9247 = vmatprep.subr.bf16.mxu0 %v11517_v14  ;;  %9288 = vmatprep.subr.bf16.mxu1 %v11520_v4  ;;  %v11538_v12 = vld [vmem:[#allocation11 + $0x46c] ss:$16 sps:$4 sm:$0xff]   ;;  %v11593_v4 = vld [vmem:[#allocation11 + $0x328] ss:$16 sps:$4 sm:$0xff]  }
 0x860   :  { %v11598_v32 = vld [vmem:[#allocation11 + $0x52c] ss:$16 sps:$4 sm:$0xff]  }
 0x861   :  { %9248 = vmatpush1.bf16.msra.mxu0 %v11515_v30  ;;  %9289 = vmatpush1.bf16.msra.mxu1 %v11518_v39  ;;  %v11596_v30 = vld [vmem:[#allocation11 + $0x528] ss:$16 sps:$4 sm:$0xff]   ;;  %v11601_v39 = vld [vmem:[#allocation11 + $0x30c] ss:$16 sps:$4 sm:$0xff]  }
 0x862   :  { %9249 = vmatprep.subr.bf16.mxu0 %v11523_v62  ;;  %9290 = vmatprep.subr.bf16.mxu1 %v11526_v41  ;;  %v11604_v62 = vld [vmem:[#allocation11 + $0x50c] ss:$16 sps:$4 sm:$0xff]  }
 0x865   :  { %9250 = vmatpush1.bf16.msra.mxu0 %v11521_v15  ;;  %9291 = vmatpush1.bf16.msra.mxu1 %v11524_v2  ;;  %v11599_v15 = vld [vmem:[#allocation11 + $0x308] ss:$16 sps:$4 sm:$0xff]  }
 0x866   :  { %9251 = vmatprep.subr.bf16.mxu0 %v11529_v19  ;;  %9292 = vmatprep.subr.bf16.mxu1 %v11532_v42  ;;  %v11602_v2 = vld [vmem:[#allocation11 + $0x508] ss:$16 sps:$4 sm:$0xff]   ;;  %v11607_v19 = vld [vmem:[#allocation11 + $0x6ec] ss:$16 sps:$4 sm:$0xff]  }
 0x867   :  { %v11653_v42 = vld [vmem:[#allocation13 + $0x78] sm:$0xff]  }
 0x869   :  { %9252 = vmatpush1.bf16.msra.mxu0 %v11527_v53  ;;  %9293 = vmatpush1.bf16.msra.mxu1 %v11530_v8  ;;  %v11605_v53 = vld [vmem:[#allocation11 + $0x6e8] ss:$16 sps:$4 sm:$0xff]   ;;  %v11610_v8 = vld [vmem:[#allocation11 + $0x6cc] ss:$16 sps:$4 sm:$0xff]  }
 0x86a   :  { %9253 = vmatprep.subr.bf16.mxu0 %v11535_v59  ;;  %9294 = vmatprep.subr.bf16.mxu1 %v11538_v12  ;;  %v11654_v59 = vld [vmem:[#allocation13 + $0x38] sm:$0xff]  }
 0x86d   :  { %9254 = vmatpush1.bf16.msra.mxu0 %v11533_v22  ;;  %9295 = vmatpush1.bf16.msra.mxu1 %v11536_v23  ;;  %v11655_v22 = vld [vmem:[#allocation13 + $0x70] sm:$0xff]  }
 0x86e   :  { %9255 = vmatprep.subr.bf16.mxu0 %v11541_v28  ;;  %9296 = vmatprep.subr.bf16.mxu1 %v11544_v10  ;;  %v11608_v10 = vld [vmem:[#allocation11 + $0x6c8] ss:$16 sps:$4 sm:$0xff]  }
 0x871   :  { %9256 = vmatpush1.bf16.msra.mxu0 %v11539_v44  ;;  %9297 = vmatpush1.bf16.msra.mxu1 %v11542_v54  ;;  %v11613_v54 = vld [vmem:[#allocation11 + $0x6ac] ss:$16 sps:$4 sm:$0xff]  }
 0x872   :  { %9257 = vmatprep.subr.bf16.mxu0 %v11547_v29  ;;  %9298 = vmatprep.subr.bf16.mxu1 %v11550_v21  ;;  %v11656_v29 = vld [vmem:[#allocation13 + $0x30] sm:$0xff]  }
 0x875   :  { %9258 = vmatpush1.bf16.msra.mxu0 %v11545_v43  ;;  %9299 = vmatpush1.bf16.msra.mxu1 %v11548_v11  ;;  %v11657_v43 = vld [vmem:[#allocation13 + $0x68] sm:$0xff]  }
 0x876   :  { %9259 = vmatprep.subr.bf16.mxu0 %v11553_v34  ;;  %9300 = vmatprep.subr.bf16.mxu1 %v11556_v58  ;;  %v11611_v11 = vld [vmem:[#allocation11 + $0x6a8] ss:$16 sps:$4 sm:$0xff]  }
 0x877   :  { %v11658_v34 = vld [vmem:[#allocation13 + $0x28] sm:$0xff]  }
 0x878   :  { %v11614_v58 = vld [vmem:[#allocation11 + $0x688] ss:$16 sps:$4 sm:$0xff]  }
 0x879   :  { %9260 = vmatpush1.bf16.msra.mxu0 %v11551_v48  ;;  %9301 = vmatpush1.bf16.msra.mxu1 %v11554_v56  ;;  %v11619_v48 = vld [vmem:[#allocation11 + $0x66c] ss:$16 sps:$4 sm:$0xff]   ;;  %v11660_v56 = vld [vmem:[#allocation13 + $0x20] sm:$0xff]  }
 0x87a   :  { %9261 = vmatprep.subr.bf16.mxu0 %v11559_v36  ;;  %9302 = vmatprep.subr.bf16.mxu1 %v11562_v60  ;;  %v11661_v36 = vld [vmem:[#allocation13 + $0x58] sm:$0xff]  }
 0x87b   :  { %v11617_v60 = vld [vmem:[#allocation11 + $0x668] ss:$16 sps:$4 sm:$0xff]  }
 0x87d   :  { %9262 = vmatpush2.bf16.msra.mxu0 %v11557_v63  ;;  %9303 = vmatpush2.bf16.msra.mxu1 %v11560_v17  ;;  %v11622_v63 = vld [vmem:[#allocation11 + $0x64c] ss:$16 sps:$4 sm:$0xff]  }
 0x87e   :  { %9263 = vmatprep.subr.bf16.mxu0 %v11565_v35  ;;  %9304 = vmatprep.subr.bf16.mxu1 %v11568_v13  ;;  %v11662_v17 = vld [vmem:[#allocation13 + $0x18] sm:$0xff]   ;;  %v11663_v35 = vld [vmem:[#allocation13 + $0x50] sm:$0xff]  }
 0x87f   :  { %v11620_v13 = vld [vmem:[#allocation11 + $0x648] ss:$16 sps:$4 sm:$0xff]  }
 0x881   :  { %9264 = vmatpush2.bf16.msra.mxu0 %v11563_v61  ;;  %9305 = vmatpush2.bf16.msra.mxu1 %v11566_v16  ;;  %v11625_v61 = vld [vmem:[#allocation11 + $0x62c] ss:$16 sps:$4 sm:$0xff]   ;;  %v11664_v16 = vld [vmem:[#allocation13 + $0x10] sm:$0xff]  }
 0x882   :  { %9265 = vmatprep.subr.bf16.mxu0 %v11571_v49  ;;  %9306 = vmatprep.subr.bf16.mxu1 %v11574_v7  ;;  %v11665_v49 = vld [vmem:[#allocation13 + $0x48] sm:$0xff]  }
 0x883   :  { %v11623_v7 = vld [vmem:[#allocation11 + $0x628] ss:$16 sps:$4 sm:$0xff]  }
 0x885   :  { %9266 = vmatpush2.bf16.msra.mxu0 %v11569_v5  ;;  %9307 = vmatpush2.bf16.msra.mxu1 %v11572_v37  ;;  %v11628_v5 = vld [vmem:[#allocation11 + $0x60c] ss:$16 sps:$4 sm:$0xff]  }
 0x886   :  { %9267 = vmatprep.subr.bf16.mxu0 %v11577_v45  ;;  %9308 = vmatprep.subr.bf16.mxu1 %v11580_v33  ;;  %v11666_v37 = vld [vmem:[#allocation13 + $0x8] sm:$0xff]   ;;  %v11667_v45 = vld [vmem:[#allocation13 + $0x40] sm:$0xff]  }
 0x887   :  { %v11626_v33 = vld [vmem:[#allocation11 + $0x608] ss:$16 sps:$4 sm:$0xff]  }
 0x889   :  { %9268 = vmatpush2.bf16.msra.mxu0 %v11575_v57  ;;  %9309 = vmatpush2.bf16.msra.mxu1 %v11578_v47  ;;  %v11631_v57 = vld [vmem:[#allocation11 + $0x7ec] ss:$16 sps:$4 sm:$0xff]   ;;  %v11668_v47 = vld [vmem:[#allocation13] sm:$0xff]  }
 0x88a   :  { %9269 = vmatprep.subr.bf16.mxu0 %v11583_v46  ;;  %9310 = vmatprep.subr.bf16.mxu1 %v11586_v20  ;;  %v11629_v46 = vld [vmem:[#allocation11 + $0x7e8] ss:$16 sps:$4 sm:$0xff]   ;;  %v11634_v20 = vld [vmem:[#allocation11 + $0x7cc] ss:$16 sps:$4 sm:$0xff]  }
 0x88d   :  { %9270 = vmatpush2.bf16.msra.mxu0 %v11581_v0  ;;  %9311 = vmatpush2.bf16.msra.mxu1 %v11584_v26  ;;  %v9074_v27 = vpop.f32.mrf.mxu1  ;;  %v11632_v0 = vld [vmem:[#allocation11 + $0x7c8] ss:$16 sps:$4 sm:$0xff]   ;;  %v11637_v26 = vld [vmem:[#allocation11 + $0x7ac] ss:$16 sps:$4 sm:$0xff]  }
 0x88e   :  { %9271 = vmatprep.subr.bf16.mxu0 %v11589_v52  ;;  %9312 = vmatprep.subr.bf16.mxu1 %v11592_v31  ;;  %v11635_v52 = vld [vmem:[#allocation11 + $0x7a8] ss:$16 sps:$4 sm:$0xff]   ;;  %v11640_v31 = vld [vmem:[#allocation11 + $0x78c] ss:$16 sps:$4 sm:$0xff]  }
 0x88f   :  { %v9076_v38 = vpop.f32.mrf.mxu1 }
 0x891   :  { %9272 = vmatpush2.bf16.msra.mxu0 %v11587_v3  ;;  %9313 = vmatpush2.bf16.msra.mxu1 %v11590_v40  ;;  %v9078_v14 = vpop.f32.mrf.mxu1  ;;  %v11643_v3 = vld [vmem:[#allocation11 + $0x76c] ss:$16 sps:$4 sm:$0xff]   ;;  %v11641_v40 = vld [vmem:[#allocation11 + $0x768] ss:$16 sps:$4 sm:$0xff]  }
 0x892   :  { %9273 = vmatprep.subr.bf16.mxu0 %v11595_v18  ;;  %9314 = vmatprep.subr.bf16.mxu1 %v11598_v32  ;;  %v11646_v18 = vld [vmem:[#allocation11 + $0x74c] ss:$16 sps:$4 sm:$0xff]   ;;  %v11644_v32 = vld [vmem:[#allocation11 + $0x748] ss:$16 sps:$4 sm:$0xff]  }
 0x893   :  { %v9079_v41 = vpop.f32.mrf.mxu1  ;;  %v11647_v14 = vld [vmem:[#allocation11 + $0x728] ss:$16 sps:$4 sm:$0xff]  }
 0x895   :  { %9274 = vmatpush2.bf16.msra.mxu0 %v11593_v4  ;;  %9315 = vmatpush2.bf16.msra.mxu1 %v11596_v30  ;;  %v11652_v4 = vld [vmem:[#allocation11 + $0x70c] ss:$16 sps:$4 sm:$0xff]   ;;  %v11650_v30 = vld [vmem:[#allocation11 + $0x708] ss:$16 sps:$4 sm:$0xff]  }
 0x896   :  { %9275 = vmatprep.subr.bf16.mxu0 %v11601_v39  ;;  %9316 = vmatprep.subr.bf16.mxu1 %v11604_v62 }
 0x899   :  { %9276 = vmatpush2.bf16.msra.mxu0 %v11599_v15  ;;  %9317 = vmatpush2.bf16.msra.mxu1 %v11602_v2 }
 0x89a   :  { %9327 = vmatprep.subr.bf16.mxu0 %v11607_v19  ;;  %10657 = vmatprep.subr.bf16.mxu1 %v11653_v42  ;;  %v11669_v19 = vld [vmem:[#allocation13 + $0xf8] sm:$0xff]   ;;  %v15728_v42 = vld [vmem:[%s15770_s11] sm:$0xf] }
 0x89b   :  { %v9115_v12 = vpop.f32.mrf.mxu0 }
 0x89c   :  { %9278 = vmatmul.mubr.bf16.vlgmr.msra.gmra.mxu0 %v15684_v25  ;;  %9319 = vmatmul.mubr.bf16.vlgmr.msra.gmra.mxu1 %v15696_v51  ;;  %v15718_v23 = vadd.f32 %v9115_v12, %v9074_v27  ;;  %v11616_v51 = vld [vmem:[#allocation11 + $0x68c] ss:$16 sps:$4 sm:$0xff]   ;;  %v11638_v27 = vld [vmem:[#allocation11 + $0x788] ss:$16 sps:$4 sm:$0xff]  }
 0x89d   :  { %9328 = vmatpush1.bf16.msra.mxu0 %v11605_v53  ;;  %9359 = vmatprep.mubr.bf16.mxu0 %v15707_v55  ;;  %v9117_v28 = vpop.f32.mrf.mxu0  ;;  %v11659_v55 = vld [vmem:[#allocation13 + $0x60] sm:$0xff]   ;;  %v15733_v53 = vld [vmem:[%s15771_s12] sm:$0xf] }
 0x89e   :  { %v15721_v44 = vadd.f32 %v9117_v28, %v9076_v38  ;;  %9329 = vmatprep.subr.bf16.mxu0 %v11610_v8  ;;  %10658 = vmatpush3.bf16.msra.mxu1 %v11654_v59  ;;  %v11649_v38 = vld [vmem:[#allocation11 + $0x72c] ss:$16 sps:$4 sm:$0xff]   ;;  %v9377_v28 = vrot.slane %v15728_v42, %v15634_v24 }
 0x89f   :  { %v9119_v21 = vpop.f32.mrf.mxu0  ;;  %10659 = vmatprep.subr.bf16.mxu1 %v11655_v22 }
 0x8a1   :  { %9330 = vmatpush1.bf16.msra.mxu0 %v11608_v10  ;;  %v9120_v25 = vpop.f32.mrf.mxu0 }
 0x8a2   :  { %9331 = vmatprep.subr.bf16.mxu0 %v11613_v54  ;;  %10660 = vmatpush3.bf16.msra.mxu1 %v11656_v29 }
 0x8a3   :  { %10661 = vmatprep.subr.bf16.mxu1 %v11657_v43  ;;  %v9403_v43 = vrot.slane %v15733_v53, %v15634_v24  ;;  %v11674_v24 = vld [vmem:[#allocation13 + $0xa8] sm:$0xff]  }
 0x8a5   :  { %9332 = vmatpush1.bf16.msra.mxu0 %v11611_v11 }
 0x8a6   :  { %9333 = vmatprep.subr.bf16.mxu0 %v11616_v51  ;;  %10662 = vmatpush3.bf16.msra.mxu1 %v11658_v34 }
 0x8a7   :  { %10663 = vmatprep.subr.bf16.mxu1 %v11659_v55 }
 0x8a9   :  { %9334 = vmatpush1.bf16.msra.mxu0 %v11614_v58 }
 0x8aa   :  { %9335 = vmatprep.subr.bf16.mxu0 %v11619_v48  ;;  %10664 = vmatpush3.bf16.msra.mxu1 %v11660_v56 }
 0x8ab   :  { %10665 = vmatprep.subr.bf16.mxu1 %v11661_v36  ;;  %v11670_v36 = vld [vmem:[#allocation13 + $0xb8] sm:$0xff]  }
 0x8ad   :  { %9336 = vmatpush1.bf16.msra.mxu0 %v11617_v60 }
 0x8ae   :  { %9337 = vmatprep.subr.bf16.mxu0 %v11622_v63  ;;  %10666 = vmatpush3.bf16.msra.mxu1 %v11662_v17  ;;  %v11671_v63 = vld [vmem:[#allocation13 + $0xf0] sm:$0xff]  }
 0x8af   :  { %10667 = vmatprep.subr.bf16.mxu1 %v11663_v35  ;;  %v11672_v17 = vld [vmem:[#allocation13 + $0xb0] sm:$0xff]   ;;  %v11673_v35 = vld [vmem:[#allocation13 + $0xe8] sm:$0xff]  }
 0x8b1   :  { %9338 = vmatpush1.bf16.msra.mxu0 %v11620_v13  ;;  %v11675_v13 = vld [vmem:[#allocation13 + $0xe0] sm:$0xff]  }
 0x8b2   :  { %9339 = vmatprep.subr.bf16.mxu0 %v11625_v61  ;;  %10668 = vmatpush3.bf16.msra.mxu1 %v11664_v16  ;;  %v11676_v61 = vld [vmem:[#allocation13 + $0xa0] sm:$0xff]   ;;  %v11677_v16 = vld [vmem:[#allocation13 + $0xd8] sm:$0xff]  }
 0x8b3   :  { %10669 = vmatprep.subr.bf16.mxu1 %v11665_v49  ;;  %v11678_v49 = vld [vmem:[#allocation13 + $0x98] sm:$0xff]  }
 0x8b5   :  { %9340 = vmatpush1.bf16.msra.mxu0 %v11623_v7  ;;  %v11679_v7 = vld [vmem:[#allocation13 + $0xd0] sm:$0xff]  }
 0x8b6   :  { %9341 = vmatprep.subr.bf16.mxu0 %v11628_v5  ;;  %10670 = vmatpush3.bf16.msra.mxu1 %v11666_v37  ;;  %v11680_v5 = vld [vmem:[#allocation13 + $0x90] sm:$0xff]   ;;  %v11681_v37 = vld [vmem:[#allocation13 + $0xc8] sm:$0xff]  }
 0x8b7   :  { %10671 = vmatprep.subr.bf16.mxu1 %v11667_v45  ;;  %v11682_v45 = vld [vmem:[#allocation13 + $0x88] sm:$0xff]  }
 0x8b9   :  { %9342 = vmatpush1.bf16.msra.mxu0 %v11626_v33  ;;  %v11683_v33 = vld [vmem:[#allocation13 + $0xc0] sm:$0xff]  }
 0x8ba   :  { %9343 = vmatprep.subr.bf16.mxu0 %v11631_v57  ;;  %10672 = vmatpush3.bf16.msra.mxu1 %v11668_v47  ;;  %v11684_v57 = vld [vmem:[#allocation13 + $0x80] sm:$0xff]  }
 0x8bb   :  { %10679 = vmatprep.subr.bf16.mxu1 %v11669_v19 }
 0x8bd   :  { %9344 = vmatpush2.bf16.msra.mxu0 %v11629_v46 }
 0x8be   :  { %9345 = vmatprep.subr.bf16.mxu0 %v11634_v20 }
 0x8c1   :  { %9346 = vmatpush2.bf16.msra.mxu0 %v11632_v0 }
 0x8c2   :  { %9347 = vmatprep.subr.bf16.mxu0 %v11637_v26 }
 0x8c5   :  { %9348 = vmatpush2.bf16.msra.mxu0 %v11635_v52 }
 0x8c6   :  { %9349 = vmatprep.subr.bf16.mxu0 %v11640_v31 }
 0x8c9   :  { %9350 = vmatpush2.bf16.msra.mxu0 %v11638_v27 }
 0x8ca   :  { %9351 = vmatprep.subr.bf16.mxu0 %v11643_v3 }
 0x8cd   :  { %9352 = vmatpush2.bf16.msra.mxu0 %v11641_v40 }
 0x8ce   :  { %9353 = vmatprep.subr.bf16.mxu0 %v11646_v18 }
 0x8d1   :  { %9354 = vmatpush2.bf16.msra.mxu0 %v11644_v32  ;;  %v9381_v32 = vrot.slane %v15728_v42, %v15666_v6 }
 0x8d2   :  { %9355 = vmatprep.subr.bf16.mxu0 %v11649_v38 }
 0x8d5   :  { %9356 = vmatpush2.bf16.msra.mxu0 %v11647_v14 }
 0x8d6   :  { %9357 = vmatprep.subr.bf16.mxu0 %v11652_v4 }
 0x8d9   :  { %9358 = vmatpush2.bf16.msra.mxu0 %v11650_v30  ;;  %v9407_v30 = vrot.slane %v15733_v53, %v15666_v6 }
 0x8dc   :  { %9360 = vmatmul.mubr.bf16.vlgmr.msra.gmra.mxu0 %v15709_v9  ;;  %v9156_v39 = vpop.f32.mrf.mxu1  ;;  %v9373_v9 = vrot.slane %v15728_v42, %v15657_v50 }
 0x8dd   :  { %v9157_v62 = vadd.f32 %v9156_v39, %v15718_v23  ;;  %v9399_v23 = vrot.slane %v15733_v53, %v15657_v50  ;;  %v9385_v39 = vrot.slane %v15728_v42, %v15669_v1 }
 0x8de   :  { %v9158_v41 = vpop.f32.mrf.mxu1 }
 0x8df   :  { %v9159_v12 = vadd.f32 %v9158_v41, %v15721_v44 }
 0x8e0   :  { %v9160_v15 = vpop.f32.mrf.mxu1 }
 0x8e2   :  { %v9161_v2 = vpop.f32.mrf.mxu1 }
 0x8e3   :  { %v9411_v2 = vrot.slane %v15733_v53, %v15669_v1  ;;  %v10400_v1 = vld [vmem:[%s15773_s14] ss:$0 sm:$0xff] }
 0x91c   :  { %v9238_v8 = vpop.f32.mrf.mxu1  ;;  %v9197_v59 = vpop.f32.mrf.mxu0 }
 0x91d   :  { %v9198_v22 = vadd.f32 %v9197_v59, %v9157_v62 }
 0x91e   :  { %v9240_v10 = vpop.f32.mrf.mxu1  ;;  %v9199_v54 = vpop.f32.mrf.mxu0 }
 0x91f   :  { %v9390_v29 = vmul.f32 %v9373_v9, %v9198_v22  ;;  %v9200_v21 = vadd.f32 %v9199_v54, %v9159_v12 }
 0x920   :  { %v9242_v25 = vpop.f32.mrf.mxu1  ;;  %v9201_v11 = vpop.f32.mrf.mxu0 }
 0x921   :  { %v9416_v51 = vadd.f32 %v9399_v23, %v9390_v29  ;;  %v9391_v34 = vmul.f32 %v9377_v28, %v9200_v21 }
 0x922   :  { %v9243_v55 = vpop.f32.mrf.mxu1  ;;  %v9202_v44 = vpop.f32.mrf.mxu0 }
 0x923   :  { %v9417_v58 = vadd.f32 %v9403_v43, %v9391_v34  ;;  %v9420_v48 = vmax.f32 %v9416_v51, 0.0  ;;  %v15944_v43 = vlaneseq }
 0x925   :  { %v9421_v56 = vmax.f32 %v9417_v58, 0.0  ;;  %v9424_v60 = vpack.c.bf16 %v9420_v48, %v9420_v48  ;;  %v9772_v25 = vand.u32 127, %v15944_v43 }
 0x927   :  { %v9425_v50 = vpack.c.bf16 %v9421_v56, %v9421_v56  ;;  %vm9773_vm15 = vcmp.lt.s32.totalorder %v9772_v25, 65  ;;  %vm9788_vm1 = vcmp.eq.s32.totalorder %v9772_v25, 65 }
 0x929   :  { %9723 = vmatprep.mubr.bf16.mxu1 %v9425_v50 }
 0x92a   :  { %9724 = vmatmul.mubr.bf16.vlgmr.msra.gmra.mxu1 %v9424_v60 }
 0x92b   :  { %10680 = vmatpush3.bf16.msra.mxu1 %v11670_v36 }
 0x92c   :  { %10681 = vmatprep.subr.bf16.mxu1 %v11671_v63 }
 0x92f   :  { %10682 = vmatpush3.bf16.msra.mxu1 %v11672_v17 }
 0x930   :  { %10683 = vmatprep.subr.bf16.mxu1 %v11673_v35 }
 0x933   :  { %10684 = vmatpush3.bf16.msra.mxu1 %v11674_v24 }
 0x934   :  { %10685 = vmatprep.subr.bf16.mxu1 %v11675_v13 }
 0x937   :  { %10686 = vmatpush3.bf16.msra.mxu1 %v11676_v61 }
 0x938   :  { %10687 = vmatprep.subr.bf16.mxu1 %v11677_v16 }
 0x93b   :  { %10688 = vmatpush3.bf16.msra.mxu1 %v11678_v49 }
 0x93c   :  { %10689 = vmatprep.subr.bf16.mxu1 %v11679_v7 }
 0x93f   :  { %10690 = vmatpush3.bf16.msra.mxu1 %v11680_v5 }
 0x940   :  { %10691 = vmatprep.subr.bf16.mxu1 %v11681_v37 }
 0x943   :  { %10692 = vmatpush3.bf16.msra.mxu1 %v11682_v45 }
 0x944   :  { %10693 = vmatprep.subr.bf16.mxu1 %v11683_v33 }
 0x947   :  { %10694 = vmatpush3.bf16.msra.mxu1 %v11684_v57 }
 0x95c   :  { %v9279_v47 = vpop.f32.mrf.mxu0  ;;  %v9320_v46 = vpop.f32.mrf.mxu1 }
 0x95d   :  { %v9280_v20 = vadd.f32 %v9279_v47, %v9238_v8 }
 0x95e   :  { %v9281_v0 = vpop.f32.mrf.mxu0  ;;  %v9322_v26 = vpop.f32.mrf.mxu1 }
 0x95f   :  { %v9321_v52 = vadd.f32 %v9320_v46, %v9280_v20  ;;  %v9282_v18 = vadd.f32 %v9281_v0, %v9240_v10 }
 0x960   :  { %v9283_v31 = vpop.f32.mrf.mxu0  ;;  %v9324_v27 = vpop.f32.mrf.mxu1 }
 0x961   :  { %v9323_v14 = vadd.f32 %v9322_v26, %v9282_v18 }
 0x962   :  { %v9284_v3 = vpop.f32.mrf.mxu0  ;;  %v9325_v40 = vpop.f32.mrf.mxu1 }
 0x99c   :  { %v9361_v38 = vpop.f32.mrf.mxu0 }
 0x99d   :  { %v9362_v4 = vadd.f32 %v9361_v38, %v9321_v52 }
 0x99e   :  { %v9363_v62 = vpop.f32.mrf.mxu0 }
 0x99f   :  { %v9392_v41 = vmul.f32 %v9381_v32, %v9362_v4  ;;  %v9364_v15 = vadd.f32 %v9363_v62, %v9323_v14 }
 0x9a0   :  { %v9365_v19 = vpop.f32.mrf.mxu0 }
 0x9a1   :  { %v9418_v9 = vadd.f32 %v9407_v30, %v9392_v41  ;;  %v9393_v8 = vmul.f32 %v9385_v39, %v9364_v15 }
 0x9a2   :  { %v9366_v59 = vpop.f32.mrf.mxu0 }
 0x9a3   :  { %v9419_v12 = vadd.f32 %v9411_v2, %v9393_v8  ;;  %v9422_v22 = vmax.f32 %v9418_v9, 0.0 }
 0x9a5   :  { %v9423_v23 = vmax.f32 %v9419_v12, 0.0  ;;  %v9426_v10 = vpack.c.bf16 %v9422_v22, %v9422_v22 }
 0x9a7   :  { %v9427_v28 = vpack.c.bf16 %v9423_v23, %v9423_v23 }
 0x9a9   :  { %9763 = vmatprep.mubr.bf16.mxu1 %v9427_v28 }
 0x9aa   :  { %9764 = vmatmul.mubr.bf16.vlgmr.msra.gmra.mxu1 %v9426_v10 }
 0x9ea   :  { %v10673_v6 = vpop.f32.mrf.mxu1 }
 0x9ec   :  { %v10674_v54 = vpop.f32.mrf.mxu1 }
 0x9ed   :  { %v10675_v42 = vadd.f32 %v10674_v54, %v10673_v6 }
 0x9ee   :  { %v10676_v29 = vpop.f32.mrf.mxu1 }
 0x9ef   :  { %v9726_v51 = vadd.f32 %v10675_v42, %v10400_v1 }
 0x9f0   :  { %v10677_v21 = vpop.f32.mrf.mxu1 }
 0xa6a   :  { %v10695_v53 = vpop.f32.mrf.mxu1 }
 0xa6c   :  { %v10696_v11 = vpop.f32.mrf.mxu1 }
 0xa6d   :  { %v10697_v34 = vadd.f32 %v10696_v11, %v10695_v53 }
 0xa6e   :  { %v10698_v55 = vpop.f32.mrf.mxu1 }
 0xa6f   :  { %v9766_v44 = vadd.f32 %v10697_v34, %v9726_v51 }
 0xa70   :  { %v10699_v58 = vpop.f32.mrf.mxu1 }
 0xa71   :  { %v9774_v48 = vsel %vm9773_vm15, %v9766_v44, -1e+30 }
 0xa72   :  { %v9776_v56 = vsel %vm9775_vm0, %v9774_v48, -inf }
 0xa73   :  { %9777 = vmax.xlane.f32.xlu1 %v9776_v56 }
 0xafc   :  { %v9778_v50 = vpop.xlane.xlu1 %9777 }
 0xafd   :  { %v9779_v36 = vsub.f32 %v9774_v48, %v9778_v50 }
 0xaff   :  { %v9780_v60 = vmul.f32 1.442695, %v9779_v36 }
 0xb01   :  { %11685 = vpow2.f32 %v9780_v60 }
 0xb0e   :  { %v11686_v63 = vpop.eup %11685 }
 0xb0f   :  { %v9782_v17 = vsel %vm9773_vm15, %v11686_v63, 0.0 }
 0xb10   :  { %v9783_v35 = vsel %vm9775_vm0, %v9782_v17, 0.0 }
 0xb11   :  { %9784 = vadd.xlane.f32.xlu0 %v9783_v35 }
 0xb9a   :  { %v9785_v24 = vpop.xlane.xlu0 %9784 }
 0xb9b   :  { %11687 = vrcp.f32 %v9785_v24 }
 0xb9c   :  { %11689 = vtanh.f32 %v9766_v44 }
 0xba8   :  { %v11688_v13 = vpop.eup %11687 }
 0xba9   :  { %v9787_v61 = vmul.f32 %v11688_v13, %v9782_v17  ;;  %v11690_v16 = vpop.eup %11689 }
 0xbab   :  { %v9790_v49 = vsel %vm9788_vm1, %v11690_v16, %v9787_v61 }
 0xbac   :  { %9791 = vst [vmem:[%s15774_s15] sm:$0x3] %v9790_v49 }
 0xbad   :  { %9796 = vsyncpa [#allocation4], 1 }
 0xbae   :  { %9797 = vsyncpa [#allocation6], 1 }
 0xbaf   :  { %9798 = vsyncpa [#allocation9], 1 }
 0xbb0   :  { %9799 = vsyncpa [#allocation12], 1 }

</bundles_post_ra>
